<compile_context>
chip_gen: v6e
topology: v6e:2x2x1
jax: 0.10.0
libtpu: 0.0.40
codegen_flags: <defaults>
</compile_context>

<pallas_src>
import functools

import jax
import jax.numpy as jnp
import numpy as np
from jax.experimental import pallas as pl
from jax.experimental.pallas import tpu as pltpu

_EPS = 1e-5  # PyTorch BatchNorm2d default


def _out_hw(n, K, pad, stride):
    return (n + 2 * pad - K) // stride + 1


def _vmem_limit_bytes():
    """Generation-aware scoped-VMEM limit (~75% of physical, capped)."""
    cap = 64 << 20
    try:
        info = pltpu.get_tpu_info()
        cap = int(getattr(info, "vmem_capacity_bytes", 0)) or cap
    except Exception:  # no TPU info available; keep conservative default
        pass
    return int(min(0.75 * cap, 100 << 20))


def _pick_batch_tile(N, per_sample_bytes, budget_bytes):
    """Largest divisor of N whose per-step working set fits the budget."""
    bt = 1
    for b in range(1, N + 1):
        if N % b == 0 and b * per_sample_bytes <= budget_bytes:
            bt = b
    return bt


def _pick_row_tile(rows, lanes, block_budget_bytes):
    """Largest multiple-of-8 divisor of `rows` whose (tr, lanes) f32 block fits
    the per-block budget; falls back to the whole array (always legal)."""
    cap = max(8, block_budget_bytes // max(4 * lanes, 1))
    best = 0
    for t in range(8, rows + 1, 8):
        if rows % t == 0 and t <= cap:
            best = t
    return best if best > 0 else rows


# ----------------------------------------------------------------------------
# Pass 1 kernels: op + per-channel BN-statistics accumulation (grid over batch)
# ----------------------------------------------------------------------------
def _conv_kernel(x_ref, w_ref, y_ref, s1_ref, s2_ref, xp_ref, *, K, stride, pad):
    """Bt-sample fused pad + K*K accumulated MXU dots + BN-stat accumulation.

    x_ref : (Bt, H, W, Cin)      unpadded NHWC samples
    w_ref : (K*K, Cin, Cout)     weights, tap-major (kh, kw)
    y_ref : (Bt*Ho*Wo, Cout)     pre-BN conv output (flat rows)
    s1/s2 : (1, Cout)            accumulated sum / sum-of-squares (over grid)
    xp_ref: (Bt, Hp, Wp, Cin)    VMEM scratch, zero-padded samples (halo
                                 written once at n == 0, persists across steps)
    """
    n = pl.program_id(0)
    Bt, H, W, Cin = x_ref.shape
    Cout = w_ref.shape[-1]
    Ho = (H + 2 * pad - K) // stride + 1
    Wo = (W + 2 * pad - K) // stride + 1
    M = Bt * Ho * Wo

    @pl.when(n == 0)
    def _init():
        s1_ref[...] = jnp.zeros(s1_ref.shape, s1_ref.dtype)
        s2_ref[...] = jnp.zeros(s2_ref.shape, s2_ref.dtype)
        # Zero halo written once; only the interior is stored each step.
        xp_ref[...] = jnp.zeros(xp_ref.shape, xp_ref.dtype)

    xp_ref[:, pad:pad + H, pad:pad + W, :] = x_ref[...]

    acc = jnp.zeros((M, Cout), jnp.float32)
    if stride == 1:
        for kh in range(K):
            slab = xp_ref[:, kh:kh + Ho, :, :]            # (Bt, Ho, Wp, Cin)
            for kw in range(K):
                tap = jax.lax.slice(slab, (0, 0, kw, 0), (Bt, Ho, kw + Wo, Cin))
                acc += jnp.dot(tap.reshape(M, Cin), w_ref[kh * K + kw],
                               preferred_element_type=jnp.float32)
    else:
        xp = xp_ref[...]
        for kh in range(K):
            for kw in range(K):
                tap = jax.lax.slice(
                    xp, (0, kh, kw, 0),
                    (Bt, kh + stride * (Ho - 1) + 1,
                     kw + stride * (Wo - 1) + 1, Cin),
                    (1, stride, stride, 1))
                acc += jnp.dot(tap.reshape(M, Cin), w_ref[kh * K + kw],
                               preferred_element_type=jnp.float32)

    # Per-channel partial sums for training-mode BatchNorm batch statistics.
    # (E[y^2]-E[y]^2 in f32: fine at these magnitudes; shift if tolerances tighten.)
    s1_ref[...] += jnp.sum(acc, axis=0, keepdims=True)
    s2_ref[...] += jnp.sum(acc * acc, axis=0, keepdims=True)
    y_ref[...] = acc


def _pool_kernel(x_ref, y_ref, s1_ref, s2_ref, xp_ref, *, K, stride, pad, pool):
    """Bt-sample fused pad + {max,avg}pool + BN-stat accumulation."""
    n = pl.program_id(0)
    Bt, H, W, C = x_ref.shape
    Ho = (H + 2 * pad - K) // stride + 1
    Wo = (W + 2 * pad - K) // stride + 1
    pad_val = (-jnp.inf) if pool == "max" else 0.0

    @pl.when(n == 0)
    def _init():
        s1_ref[...] = jnp.zeros(s1_ref.shape, s1_ref.dtype)
        s2_ref[...] = jnp.zeros(s2_ref.shape, s2_ref.dtype)
        xp_ref[...] = jnp.full(xp_ref.shape, pad_val, xp_ref.dtype)

    xp_ref[:, pad:pad + H, pad:pad + W, :] = x_ref[...]

    def combine(a, t):
        if a is None:
            return t
        return jnp.maximum(a, t) if pool == "max" else a + t

    acc = None
    if stride == 1:
        for kh in range(K):
            slab = xp_ref[:, kh:kh + Ho, :, :]            # (Bt, Ho, Wp, C)
            for kw in range(K):
                tap = jax.lax.slice(slab, (0, 0, kw, 0), (Bt, Ho, kw + Wo, C))
                acc = combine(acc, tap)
    else:
        xp = xp_ref[...]
        for kh in range(K):
            for kw in range(K):
                tap = jax.lax.slice(
                    xp, (0, kh, kw, 0),
                    (Bt, kh + stride * (Ho - 1) + 1,
                     kw + stride * (Wo - 1) + 1, C),
                    (1, stride, stride, 1))
                acc = combine(acc, tap)
    if pool == "avg":
        acc = acc * (1.0 / (K * K))   # count_include_pad=True (PyTorch default)

    flat = acc.reshape(Bt * Ho * Wo, C)
    s1_ref[...] += jnp.sum(flat, axis=0, keepdims=True)
    s2_ref[...] += jnp.sum(flat * flat, axis=0, keepdims=True)
    y_ref[...] = flat


# ----------------------------------------------------------------------------
# Pass 2 kernel: folded BatchNorm affine + ReLU on a lane-dense slab
# ----------------------------------------------------------------------------
def _bn_relu_kernel(y_ref, scale_ref, shift_ref, o_ref):
    o_ref[...] = jnp.maximum(y_ref[...] * scale_ref[...] + shift_ref[...], 0.0)


def _apply_bn_relu(y_pre, s1, s2, gamma, beta, N, Ho, Wo, C, vmem_limit):
    """Fold biased batch stats into a per-channel affine (tiny (1,C) XLA math),
    then run a lane-dense, parallel-gridded normalize+ReLU kernel."""
    count = float(N * Ho * Wo)
    mean = s1 / count
    var = s2 / count - mean * mean
    scale = gamma * jax.lax.rsqrt(var + _EPS)          # (1, C)
    shift = beta - mean * scale                        # (1, C)
    scale_row = jnp.tile(scale, (1, Wo))               # (1, Wo*C), c fastest
    shift_row = jnp.tile(shift, (1, Wo))

    rows, lanes = N * Ho, Wo * C
    y2 = y_pre.reshape(rows, lanes)                    # free contiguous reshape
    tr = _pick_row_tile(rows, lanes, min(vmem_limit // 6, 8 << 20))

    out = pl.pallas_call(
        _bn_relu_kernel,
        out_shape=jax.ShapeDtypeStruct((rows, lanes), jnp.float32),
        grid=(rows // tr,),
        in_specs=[pl.BlockSpec((tr, lanes), lambda i: (i, 0)),
                  pl.BlockSpec((1, lanes), lambda i: (0, 0)),
                  pl.BlockSpec((1, lanes), lambda i: (0, 0))],
        out_specs=pl.BlockSpec((tr, lanes), lambda i: (i, 0)),
        input_output_aliases={0: 0},   # reuse y_pre's HBM buffer for the output
        compiler_params=pltpu.CompilerParams(
            dimension_semantics=("parallel",), vmem_limit_bytes=vmem_limit),
        cost_estimate=pl.CostEstimate(
            flops=3 * rows * lanes, transcendentals=0,
            bytes_accessed=4 * (2 * rows * lanes + 2 * lanes)),
    )(y2, scale_row, shift_row)
    return out.reshape(N, Ho, Wo, C)


# ----------------------------------------------------------------------------
# pallas_call wrappers (NHWC)
# ----------------------------------------------------------------------------
def _run_conv(x_nhwc, w_hwio, gamma, beta, K, pad, stride, vmem_limit):
    N, H, W, Cin = x_nhwc.shape
    Cout = w_hwio.shape[-1]
    Ho, Wo = _out_hw(H, K, pad, stride), _out_hw(W, K, pad, stride)
    Hp, Wp = H + 2 * pad, W + 2 * pad
    w_taps = w_hwio.reshape(K * K, Cin, Cout)          # tap-major (kh, kw)

    # Rough per-sample VMEM footprint (double-buffered I/O + scratch + slab + acc).
    per_sample = 4 * (2 * H * W * Cin + Hp * Wp * Cin + Ho * Wp * Cin
                      + 3 * Ho * Wo * Cout)
    Bt = _pick_batch_tile(N, per_sample, vmem_limit // 2)

    y_pre, s1, s2 = pl.pallas_call(
        functools.partial(_conv_kernel, K=K, stride=stride, pad=pad),
        out_shape=(jax.ShapeDtypeStruct((N * Ho * Wo, Cout), jnp.float32),
                   jax.ShapeDtypeStruct((1, Cout), jnp.float32),
                   jax.ShapeDtypeStruct((1, Cout), jnp.float32)),
        grid=(N // Bt,),
        in_specs=[pl.BlockSpec((Bt, H, W, Cin), lambda n: (n, 0, 0, 0)),
                  pl.BlockSpec((K * K, Cin, Cout), lambda n: (0, 0, 0))],
        out_specs=(pl.BlockSpec((Bt * Ho * Wo, Cout), lambda n: (n, 0)),
                   pl.BlockSpec((1, Cout), lambda n: (0, 0)),
                   pl.BlockSpec((1, Cout), lambda n: (0, 0))),
        scratch_shapes=[pltpu.VMEM((Bt, Hp, Wp, Cin), jnp.float32)],
        compiler_params=pltpu.CompilerParams(
            dimension_semantics=("arbitrary",),  # BN-stats reduction over batch
            vmem_limit_bytes=vmem_limit),
        cost_estimate=pl.CostEstimate(
            flops=2 * N * Ho * Wo * K * K * Cin * Cout, transcendentals=0,
            bytes_accessed=4 * (N * H * W * Cin + K * K * Cin * Cout
                                + N * Ho * Wo * Cout + 2 * Cout)),
    )(x_nhwc, w_taps)
    return _apply_bn_relu(y_pre, s1, s2, gamma, beta, N, Ho, Wo, Cout, vmem_limit)


def _run_pool(x_nhwc, gamma, beta, K, pad, stride, pool, vmem_limit):
    N, H, W, C = x_nhwc.shape
    Ho, Wo = _out_hw(H, K, pad, stride), _out_hw(W, K, pad, stride)
    Hp, Wp = H + 2 * pad, W + 2 * pad

    per_sample = 4 * (2 * H * W * C + Hp * Wp * C + Ho * Wp * C + 3 * Ho * Wo * C)
    Bt = _pick_batch_tile(N, per_sample, vmem_limit // 2)

    y_pre, s1, s2 = pl.pallas_call(
        functools.partial(_pool_kernel, K=K, stride=stride, pad=pad, pool=pool),
        out_shape=(jax.ShapeDtypeStruct((N * Ho * Wo, C), jnp.float32),
                   jax.ShapeDtypeStruct((1, C), jnp.float32),
                   jax.ShapeDtypeStruct((1, C), jnp.float32)),
        grid=(N // Bt,),
        in_specs=[pl.BlockSpec((Bt, H, W, C), lambda n: (n, 0, 0, 0))],
        out_specs=(pl.BlockSpec((Bt * Ho * Wo, C), lambda n: (n, 0)),
                   pl.BlockSpec((1, C), lambda n: (0, 0)),
                   pl.BlockSpec((1, C), lambda n: (0, 0))),
        scratch_shapes=[pltpu.VMEM((Bt, Hp, Wp, C), jnp.float32)],
        compiler_params=pltpu.CompilerParams(
            dimension_semantics=("arbitrary",),
            vmem_limit_bytes=vmem_limit),
        cost_estimate=pl.CostEstimate(
            flops=N * Ho * Wo * C * (K * K + 3), transcendentals=0,
            bytes_accessed=4 * (N * H * W * C + N * Ho * Wo * C + 2 * C)),
    )(x_nhwc)
    return _apply_bn_relu(y_pre, s1, s2, gamma, beta, N, Ho, Wo, C, vmem_limit)


# ----------------------------------------------------------------------------
# ProgressiveCell: parameters + forward
# ----------------------------------------------------------------------------
def init_progressive_cell_params(key, C_in, C_out):
    ks = jax.random.split(key, 6)

    def bn(k, C):
        kg, kb = jax.random.split(k)
        return (
            1.0 + 0.1 * jax.random.normal(kg, (1, C), jnp.float32),
            0.1 * jax.random.normal(kb, (1, C), jnp.float32),
        )

    # conv weights stored HWIO (PyTorch OIHW -> transpose(2,3,1,0))
    w3 = 0.1 * jax.random.normal(ks[0], (3, 3, C_in, C_out), jnp.float32)
    w5 = 0.1 * jax.random.normal(ks[1], (5, 5, C_in, C_out), jnp.float32)
    g3, b3 = bn(ks[2], C_out)
    g5, b5 = bn(ks[3], C_out)
    gm, bm = bn(ks[4], C_in)
    ga, ba = bn(ks[5], C_in)
    return {
        "conv3x3_w": w3, "conv3x3_g": g3, "conv3x3_b": b3,
        "conv5x5_w": w5, "conv5x5_g": g5, "conv5x5_b": b5,
        "maxpool_g": gm, "maxpool_b": bm,
        "avgpool_g": ga, "avgpool_b": ba,
    }


def progressive_cell_forward(x_nchw, params, op_name, *, stride):
    """x_nchw: (N, C_in, H, W) float32 (PyTorch layout). Returns NCHW output."""
    C_in = x_nchw.shape[1]
    C_out = params["conv3x3_w"].shape[-1]

    if op_name == "skip":
        # nn.Identity when stride==1 and C_in==C_out, otherwise zeros_like(x);
        # pure pass-through, no compute to put in a kernel.
        if stride == 1 and C_in == C_out:
            return x_nchw
        return jnp.zeros_like(x_nchw)

    vmem_limit = _vmem_limit_bytes()
    x = jnp.transpose(x_nchw, (0, 2, 3, 1))  # NCHW -> NHWC for the kernels
    if op_name == "conv3x3":
        y = _run_conv(x, params["conv3x3_w"], params["conv3x3_g"],
                      params["conv3x3_b"], K=3, pad=1, stride=stride,
                      vmem_limit=vmem_limit)
    elif op_name == "conv5x5":
        y = _run_conv(x, params["conv5x5_w"], params["conv5x5_g"],
                      params["conv5x5_b"], K=5, pad=2, stride=stride,
                      vmem_limit=vmem_limit)
    elif op_name == "maxpool3x3":
        y = _run_pool(x, params["maxpool_g"], params["maxpool_b"],
                      K=3, pad=1, stride=stride, pool="max",
                      vmem_limit=vmem_limit)
    elif op_name == "avgpool3x3":
        y = _run_pool(x, params["avgpool_g"], params["avgpool_b"],
                      K=3, pad=1, stride=stride, pool="avg",
                      vmem_limit=vmem_limit)
    else:
        raise ValueError(f"unknown op {op_name}")
    return jnp.transpose(y, (0, 3, 1, 2))  # NHWC -> NCHW


# ----------------------------------------------------------------------------
# Pure-JAX reference (for correctness checking)
# ----------------------------------------------------------------------------
def _bn_relu_ref(y_nchw, gamma, beta):
    mean = jnp.mean(y_nchw, axis=(0, 2, 3), keepdims=True)
    var = jnp.mean(jnp.square(y_nchw - mean), axis=(0, 2, 3), keepdims=True)
    yhat = (y_nchw - mean) / jnp.sqrt(var + _EPS)
    return jnp.maximum(
        yhat * gamma.reshape(1, -1, 1, 1) + beta.reshape(1, -1, 1, 1), 0.0)


def reference_forward(x_nchw, params, op_name, *, stride):
    C_in = x_nchw.shape[1]
    C_out = params["conv3x3_w"].shape[-1]
    if op_name == "skip":
        return x_nchw if (stride == 1 and C_in == C_out) else jnp.zeros_like(x_nchw)
    if op_name in ("conv3x3", "conv5x5"):
        K = 3 if op_name == "conv3x3" else 5
        pad = K // 2
        w_oihw = jnp.transpose(params[f"{op_name}_w"], (3, 2, 0, 1))
        y = jax.lax.conv_general_dilated(
            x_nchw, w_oihw, (stride, stride), [(pad, pad), (pad, pad)],
            dimension_numbers=("NCHW", "OIHW", "NCHW"),
            precision=jax.lax.Precision.HIGHEST)
        return _bn_relu_ref(y, params[f"{op_name}_g"], params[f"{op_name}_b"])
    if op_name == "maxpool3x3":
        y = jax.lax.reduce_window(x_nchw, -jnp.inf, jax.lax.max,
                                  (1, 1, 3, 3), (1, 1, stride, stride),
                                  [(0, 0), (0, 0), (1, 1), (1, 1)])
        return _bn_relu_ref(y, params["maxpool_g"], params["maxpool_b"])
    y = jax.lax.reduce_window(x_nchw, 0.0, jax.lax.add,
                              (1, 1, 3, 3), (1, 1, stride, stride),
                              [(0, 0), (0, 0), (1, 1), (1, 1)]) / 9.0
    return _bn_relu_ref(y, params["avgpool_g"], params["avgpool_b"])


# ----------------------------------------------------------------------------
if __name__ == "__main__":
    key = jax.random.PRNGKey(0)
    kx, kp = jax.random.split(key)

    N, C_in, H, W = 2, 8, 16, 16
    C_out, stride = 8, 1  # stride==1 & C_in==C_out so 'skip' is Identity

    x = jax.random.normal(kx, (N, C_in, H, W), jnp.float32)
    params = init_progressive_cell_params(kp, C_in, C_out)

    for op in ("conv3x3", "conv5x5", "maxpool3x3", "avgpool3x3", "skip"):
        out = progressive_cell_forward(x, params, op, stride=stride)
        out = jax.block_until_ready(out)
        ref = jax.block_until_ready(reference_forward(x, params, op, stride=stride))
        np.testing.assert_allclose(np.asarray(out), np.asarray(ref),
                                   rtol=1e-3, atol=1e-3)

    print("KERNEL_OK")
</pallas_src>

<mosaic_0001>
module attributes {stable_mosaic.version = 11 : i64} {
  func.func @_conv_kernel(%arg0: i32, %arg1: memref<2x16x16x8xf32, #tpu.memory_space<vmem>>, %arg2: memref<9x8x8xf32, #tpu.memory_space<vmem>>, %arg3: memref<512x8xf32, #tpu.memory_space<vmem>>, %arg4: memref<1x8xf32, #tpu.memory_space<vmem>>, %arg5: memref<1x8xf32, #tpu.memory_space<vmem>>, %arg6: memref<2x18x18x8xf32, #tpu.memory_space<vmem>>) attributes {dimension_semantics = [#tpu.dimension_semantics<arbitrary>], iteration_bounds = array<i64: 1>, scalar_prefetch = 0 : i64, scratch_operands = 1 : i64, tpu.core_type = #tpu.core_type<tc>, window_params = [{transform_indices = @transform_0, window_bounds = array<i64: 2, 16, 16, 8>}, {pipeline_mode = #tpu.pipeline_mode<synchronous>, transform_indices = @transform_1, window_bounds = array<i64: 9, 8, 8>}, {transform_indices = @transform_2, window_bounds = array<i64: 512, 8>}, {pipeline_mode = #tpu.pipeline_mode<synchronous>, transform_indices = @transform_3, window_bounds = array<i64: 1, 8>}, {pipeline_mode = #tpu.pipeline_mode<synchronous>, transform_indices = @transform_4, window_bounds = array<i64: 1, 8>}]} {
    %c0_i32 = arith.constant 0 : i32
    %0 = arith.cmpi eq, %arg0, %c0_i32 : i32
    %1 = arith.extui %0 : i1 to i32
    %c0_i32_0 = arith.constant 0 : i32
    %2 = arith.cmpi ne, %1, %c0_i32_0 : i32
    scf.if %2 {
      %cst_60 = arith.constant 0.000000e+00 : f32
      %75 = vector.broadcast %cst_60 : f32 to vector<1x8xf32>
      %c0_61 = arith.constant 0 : index
      %c0_62 = arith.constant 0 : index
      %76 = vector.load %arg4[%c0_61, %c0_62] : memref<1x8xf32, #tpu.memory_space<vmem>>, vector<1x8xf32>
      tpu.vector_store %arg4[%c0_61, %c0_62], %75 {strides = array<i32>} : memref<1x8xf32, #tpu.memory_space<vmem>>, vector<1x8xf32>,
      %cst_63 = arith.constant 0.000000e+00 : f32
      %77 = vector.broadcast %cst_63 : f32 to vector<1x8xf32>
      %c0_64 = arith.constant 0 : index
      %c0_65 = arith.constant 0 : index
      %78 = vector.load %arg5[%c0_64, %c0_65] : memref<1x8xf32, #tpu.memory_space<vmem>>, vector<1x8xf32>
      tpu.vector_store %arg5[%c0_64, %c0_65], %77 {strides = array<i32>} : memref<1x8xf32, #tpu.memory_space<vmem>>, vector<1x8xf32>,
      %cst_66 = arith.constant 0.000000e+00 : f32
      %79 = vector.broadcast %cst_66 : f32 to vector<2x18x18x8xf32>
      %c0_67 = arith.constant 0 : index
      %c0_68 = arith.constant 0 : index
      %c0_69 = arith.constant 0 : index
      %c0_70 = arith.constant 0 : index
      %80 = vector.load %arg6[%c0_67, %c0_68, %c0_69, %c0_70] : memref<2x18x18x8xf32, #tpu.memory_space<vmem>>, vector<2x18x18x8xf32>
      tpu.vector_store %arg6[%c0_67, %c0_68, %c0_69, %c0_70], %79 {strides = array<i32>} : memref<2x18x18x8xf32, #tpu.memory_space<vmem>>, vector<2x18x18x8xf32>,
    } else {
    }
    %c0 = arith.constant 0 : index
    %c0_1 = arith.constant 0 : index
    %c0_2 = arith.constant 0 : index
    %c0_3 = arith.constant 0 : index
    %3 = vector.load %arg1[%c0, %c0_1, %c0_2, %c0_3] : memref<2x16x16x8xf32, #tpu.memory_space<vmem>>, vector<2x16x16x8xf32>
    %c0_4 = arith.constant 0 : index
    %c1 = arith.constant 1 : index
    %c1_5 = arith.constant 1 : index
    %c0_6 = arith.constant 0 : index
    %4 = vector.load %arg6[%c0_4, %c1, %c1_5, %c0_6] : memref<2x18x18x8xf32, #tpu.memory_space<vmem>>, vector<2x16x16x8xf32>
    tpu.vector_store %arg6[%c0_4, %c1, %c1_5, %c0_6], %3 {strides = array<i32>} : memref<2x18x18x8xf32, #tpu.memory_space<vmem>>, vector<2x16x16x8xf32>,
    %cst = arith.constant 0.000000e+00 : f32
    %5 = vector.broadcast %cst : f32 to vector<512x8xf32>
    %c0_7 = arith.constant 0 : index
    %c0_8 = arith.constant 0 : index
    %c0_9 = arith.constant 0 : index
    %c0_10 = arith.constant 0 : index
    %6 = vector.load %arg6[%c0_7, %c0_8, %c0_9, %c0_10] : memref<2x18x18x8xf32, #tpu.memory_space<vmem>>, vector<2x16x18x8xf32>
    %7 = vector.extract_strided_slice %6 {offsets = [0, 0, 0, 0], sizes = [2, 16, 16, 8], strides = [1, 1, 1, 1]} : vector<2x16x18x8xf32> to vector<2x16x16x8xf32>
    %8 = vector.shape_cast %7 : vector<2x16x16x8xf32> to vector<512x8xf32>
    %c0_11 = arith.constant 0 : index
    %c0_12 = arith.constant 0 : index
    %c0_13 = arith.constant 0 : index
    %9 = vector.load %arg2[%c0_11, %c0_12, %c0_13] : memref<9x8x8xf32, #tpu.memory_space<vmem>>, vector<1x8x8xf32>
    %10 = vector.shape_cast %9 : vector<1x8x8xf32> to vector<8x8xf32>
    %cst_14 = arith.constant dense<0.000000e+00> : vector<512x8xf32>
    %11 = tpu.matmul %8, %10, %cst_14 {dimension_numbers = #tpu.dot_dimension_numbers<[1], [0], [0], [1], [0, 0, 1, 1], [], []>} : vector<512x8xf32>, vector<8x8xf32>, vector<512x8xf32> -> vector<512x8xf32>
    %12 = arith.addf %5, %11 : vector<512x8xf32>
    %13 = vector.extract_strided_slice %6 {offsets = [0, 0, 1, 0], sizes = [2, 16, 16, 8], strides = [1, 1, 1, 1]} : vector<2x16x18x8xf32> to vector<2x16x16x8xf32>
    %14 = vector.shape_cast %13 : vector<2x16x16x8xf32> to vector<512x8xf32>
    %c1_15 = arith.constant 1 : index
    %c0_16 = arith.constant 0 : index
    %c0_17 = arith.constant 0 : index
    %15 = vector.load %arg2[%c1_15, %c0_16, %c0_17] : memref<9x8x8xf32, #tpu.memory_space<vmem>>, vector<1x8x8xf32>
    %16 = vector.shape_cast %15 : vector<1x8x8xf32> to vector<8x8xf32>
    %cst_18 = arith.constant dense<0.000000e+00> : vector<512x8xf32>
    %17 = tpu.matmul %14, %16, %cst_18 {dimension_numbers = #tpu.dot_dimension_numbers<[1], [0], [0], [1], [0, 0, 1, 1], [], []>} : vector<512x8xf32>, vector<8x8xf32>, vector<512x8xf32> -> vector<512x8xf32>
    %18 = arith.addf %12, %17 : vector<512x8xf32>
    %19 = vector.extract_strided_slice %6 {offsets = [0, 0, 2, 0], sizes = [2, 16, 16, 8], strides = [1, 1, 1, 1]} : vector<2x16x18x8xf32> to vector<2x16x16x8xf32>
    %20 = vector.shape_cast %19 : vector<2x16x16x8xf32> to vector<512x8xf32>
    %c2 = arith.constant 2 : index
    %c0_19 = arith.constant 0 : index
    %c0_20 = arith.constant 0 : index
    %21 = vector.load %arg2[%c2, %c0_19, %c0_20] : memref<9x8x8xf32, #tpu.memory_space<vmem>>, vector<1x8x8xf32>
    %22 = vector.shape_cast %21 : vector<1x8x8xf32> to vector<8x8xf32>
    %cst_21 = arith.constant dense<0.000000e+00> : vector<512x8xf32>
    %23 = tpu.matmul %20, %22, %cst_21 {dimension_numbers = #tpu.dot_dimension_numbers<[1], [0], [0], [1], [0, 0, 1, 1], [], []>} : vector<512x8xf32>, vector<8x8xf32>, vector<512x8xf32> -> vector<512x8xf32>
    %24 = arith.addf %18, %23 : vector<512x8xf32>
    %c0_22 = arith.constant 0 : index
    %c1_23 = arith.constant 1 : index
    %c0_24 = arith.constant 0 : index
    %c0_25 = arith.constant 0 : index
    %25 = vector.load %arg6[%c0_22, %c1_23, %c0_24, %c0_25] : memref<2x18x18x8xf32, #tpu.memory_space<vmem>>, vector<2x16x18x8xf32>
    %26 = vector.extract_strided_slice %25 {offsets = [0, 0, 0, 0], sizes = [2, 16, 16, 8], strides = [1, 1, 1, 1]} : vector<2x16x18x8xf32> to vector<2x16x16x8xf32>
    %27 = vector.shape_cast %26 : vector<2x16x16x8xf32> to vector<512x8xf32>
    %c3 = arith.constant 3 : index
    %c0_26 = arith.constant 0 : index
    %c0_27 = arith.constant 0 : index
    %28 = vector.load %arg2[%c3, %c0_26, %c0_27] : memref<9x8x8xf32, #tpu.memory_space<vmem>>, vector<1x8x8xf32>
    %29 = vector.shape_cast %28 : vector<1x8x8xf32> to vector<8x8xf32>
    %cst_28 = arith.constant dense<0.000000e+00> : vector<512x8xf32>
    %30 = tpu.matmul %27, %29, %cst_28 {dimension_numbers = #tpu.dot_dimension_numbers<[1], [0], [0], [1], [0, 0, 1, 1], [], []>} : vector<512x8xf32>, vector<8x8xf32>, vector<512x8xf32> -> vector<512x8xf32>
    %31 = arith.addf %24, %30 : vector<512x8xf32>
    %32 = vector.extract_strided_slice %25 {offsets = [0, 0, 1, 0], sizes = [2, 16, 16, 8], strides = [1, 1, 1, 1]} : vector<2x16x18x8xf32> to vector<2x16x16x8xf32>
    %33 = vector.shape_cast %32 : vector<2x16x16x8xf32> to vector<512x8xf32>
    %c4 = arith.constant 4 : index
    %c0_29 = arith.constant 0 : index
    %c0_30 = arith.constant 0 : index
    %34 = vector.load %arg2[%c4, %c0_29, %c0_30] : memref<9x8x8xf32, #tpu.memory_space<vmem>>, vector<1x8x8xf32>
    %35 = vector.shape_cast %34 : vector<1x8x8xf32> to vector<8x8xf32>
    %cst_31 = arith.constant dense<0.000000e+00> : vector<512x8xf32>
    %36 = tpu.matmul %33, %35, %cst_31 {dimension_numbers = #tpu.dot_dimension_numbers<[1], [0], [0], [1], [0, 0, 1, 1], [], []>} : vector<512x8xf32>, vector<8x8xf32>, vector<512x8xf32> -> vector<512x8xf32>
    %37 = arith.addf %31, %36 : vector<512x8xf32>
    %38 = vector.extract_strided_slice %25 {offsets = [0, 0, 2, 0], sizes = [2, 16, 16, 8], strides = [1, 1, 1, 1]} : vector<2x16x18x8xf32> to vector<2x16x16x8xf32>
    %39 = vector.shape_cast %38 : vector<2x16x16x8xf32> to vector<512x8xf32>
    %c5 = arith.constant 5 : index
    %c0_32 = arith.constant 0 : index
    %c0_33 = arith.constant 0 : index
    %40 = vector.load %arg2[%c5, %c0_32, %c0_33] : memref<9x8x8xf32, #tpu.memory_space<vmem>>, vector<1x8x8xf32>
    %41 = vector.shape_cast %40 : vector<1x8x8xf32> to vector<8x8xf32>
    %cst_34 = arith.constant dense<0.000000e+00> : vector<512x8xf32>
    %42 = tpu.matmul %39, %41, %cst_34 {dimension_numbers = #tpu.dot_dimension_numbers<[1], [0], [0], [1], [0, 0, 1, 1], [], []>} : vector<512x8xf32>, vector<8x8xf32>, vector<512x8xf32> -> vector<512x8xf32>
    %43 = arith.addf %37, %42 : vector<512x8xf32>
    %c0_35 = arith.constant 0 : index
    %c2_36 = arith.constant 2 : index
    %c0_37 = arith.constant 0 : index
    %c0_38 = arith.constant 0 : index
    %44 = vector.load %arg6[%c0_35, %c2_36, %c0_37, %c0_38] : memref<2x18x18x8xf32, #tpu.memory_space<vmem>>, vector<2x16x18x8xf32>
    %45 = vector.extract_strided_slice %44 {offsets = [0, 0, 0, 0], sizes = [2, 16, 16, 8], strides = [1, 1, 1, 1]} : vector<2x16x18x8xf32> to vector<2x16x16x8xf32>
    %46 = vector.shape_cast %45 : vector<2x16x16x8xf32> to vector<512x8xf32>
    %c6 = arith.constant 6 : index
    %c0_39 = arith.constant 0 : index
    %c0_40 = arith.constant 0 : index
    %47 = vector.load %arg2[%c6, %c0_39, %c0_40] : memref<9x8x8xf32, #tpu.memory_space<vmem>>, vector<1x8x8xf32>
    %48 = vector.shape_cast %47 : vector<1x8x8xf32> to vector<8x8xf32>
    %cst_41 = arith.constant dense<0.000000e+00> : vector<512x8xf32>
    %49 = tpu.matmul %46, %48, %cst_41 {dimension_numbers = #tpu.dot_dimension_numbers<[1], [0], [0], [1], [0, 0, 1, 1], [], []>} : vector<512x8xf32>, vector<8x8xf32>, vector<512x8xf32> -> vector<512x8xf32>
    %50 = arith.addf %43, %49 : vector<512x8xf32>
    %51 = vector.extract_strided_slice %44 {offsets = [0, 0, 1, 0], sizes = [2, 16, 16, 8], strides = [1, 1, 1, 1]} : vector<2x16x18x8xf32> to vector<2x16x16x8xf32>
    %52 = vector.shape_cast %51 : vector<2x16x16x8xf32> to vector<512x8xf32>
    %c7 = arith.constant 7 : index
    %c0_42 = arith.constant 0 : index
    %c0_43 = arith.constant 0 : index
    %53 = vector.load %arg2[%c7, %c0_42, %c0_43] : memref<9x8x8xf32, #tpu.memory_space<vmem>>, vector<1x8x8xf32>
    %54 = vector.shape_cast %53 : vector<1x8x8xf32> to vector<8x8xf32>
    %cst_44 = arith.constant dense<0.000000e+00> : vector<512x8xf32>
    %55 = tpu.matmul %52, %54, %cst_44 {dimension_numbers = #tpu.dot_dimension_numbers<[1], [0], [0], [1], [0, 0, 1, 1], [], []>} : vector<512x8xf32>, vector<8x8xf32>, vector<512x8xf32> -> vector<512x8xf32>
    %56 = arith.addf %50, %55 : vector<512x8xf32>
    %57 = vector.extract_strided_slice %44 {offsets = [0, 0, 2, 0], sizes = [2, 16, 16, 8], strides = [1, 1, 1, 1]} : vector<2x16x18x8xf32> to vector<2x16x16x8xf32>
    %58 = vector.shape_cast %57 : vector<2x16x16x8xf32> to vector<512x8xf32>
    %c8 = arith.constant 8 : index
    %c0_45 = arith.constant 0 : index
    %c0_46 = arith.constant 0 : index
    %59 = vector.load %arg2[%c8, %c0_45, %c0_46] : memref<9x8x8xf32, #tpu.memory_space<vmem>>, vector<1x8x8xf32>
    %60 = vector.shape_cast %59 : vector<1x8x8xf32> to vector<8x8xf32>
    %cst_47 = arith.constant dense<0.000000e+00> : vector<512x8xf32>
    %61 = tpu.matmul %58, %60, %cst_47 {dimension_numbers = #tpu.dot_dimension_numbers<[1], [0], [0], [1], [0, 0, 1, 1], [], []>} : vector<512x8xf32>, vector<8x8xf32>, vector<512x8xf32> -> vector<512x8xf32>
    %62 = arith.addf %56, %61 : vector<512x8xf32>
    %c0_48 = arith.constant 0 : index
    %c0_49 = arith.constant 0 : index
    %63 = vector.load %arg4[%c0_48, %c0_49] : memref<1x8xf32, #tpu.memory_space<vmem>>, vector<1x8xf32>
    %cst_50 = arith.constant dense<0.000000e+00> : vector<8xf32>
    %64 = vector.multi_reduction <add>, %62, %cst_50 [0] : vector<512x8xf32> to vector<8xf32>
    %65 = vector.shape_cast %64 : vector<8xf32> to vector<1x8xf32>
    %66 = arith.addf %63, %65 : vector<1x8xf32>
    %c0_51 = arith.constant 0 : index
    %c0_52 = arith.constant 0 : index
    %67 = vector.load %arg4[%c0_51, %c0_52] : memref<1x8xf32, #tpu.memory_space<vmem>>, vector<1x8xf32>
    tpu.vector_store %arg4[%c0_51, %c0_52], %66 {strides = array<i32>} : memref<1x8xf32, #tpu.memory_space<vmem>>, vector<1x8xf32>,
    %c0_53 = arith.constant 0 : index
    %c0_54 = arith.constant 0 : index
    %68 = vector.load %arg5[%c0_53, %c0_54] : memref<1x8xf32, #tpu.memory_space<vmem>>, vector<1x8xf32>
    %69 = arith.mulf %62, %62 : vector<512x8xf32>
    %cst_55 = arith.constant dense<0.000000e+00> : vector<8xf32>
    %70 = vector.multi_reduction <add>, %69, %cst_55 [0] : vector<512x8xf32> to vector<8xf32>
    %71 = vector.shape_cast %70 : vector<8xf32> to vector<1x8xf32>
    %72 = arith.addf %68, %71 : vector<1x8xf32>
    %c0_56 = arith.constant 0 : index
    %c0_57 = arith.constant 0 : index
    %73 = vector.load %arg5[%c0_56, %c0_57] : memref<1x8xf32, #tpu.memory_space<vmem>>, vector<1x8xf32>
    tpu.vector_store %arg5[%c0_56, %c0_57], %72 {strides = array<i32>} : memref<1x8xf32, #tpu.memory_space<vmem>>, vector<1x8xf32>,
    %c0_58 = arith.constant 0 : index
    %c0_59 = arith.constant 0 : index
    %74 = vector.load %arg3[%c0_58, %c0_59] : memref<512x8xf32, #tpu.memory_space<vmem>>, vector<512x8xf32>
    tpu.vector_store %arg3[%c0_58, %c0_59], %62 {strides = array<i32>} : memref<512x8xf32, #tpu.memory_space<vmem>>, vector<512x8xf32>,
    return
  }
  func.func @transform_0(%arg0: i32) -> (i32, i32, i32, i32) {
    %c0_i32 = arith.constant 0 : i32
    %c0_i32_0 = arith.constant 0 : i32
    %c0_i32_1 = arith.constant 0 : i32
    %c0_i32_2 = arith.constant 0 : i32
    return %arg0, %c0_i32, %c0_i32_0, %c0_i32_1 : i32, i32, i32, i32
  }
  func.func @transform_1(%arg0: i32) -> (i32, i32, i32) {
    %c0_i32 = arith.constant 0 : i32
    %c0_i32_0 = arith.constant 0 : i32
    %c0_i32_1 = arith.constant 0 : i32
    %c0_i32_2 = arith.constant 0 : i32
    return %c0_i32, %c0_i32_0, %c0_i32_1 : i32, i32, i32
  }
  func.func @transform_2(%arg0: i32) -> (i32, i32) {
    %c0_i32 = arith.constant 0 : i32
    %c0_i32_0 = arith.constant 0 : i32
    return %arg0, %c0_i32 : i32, i32
  }
  func.func @transform_3(%arg0: i32) -> (i32, i32) {
    %c0_i32 = arith.constant 0 : i32
    %c0_i32_0 = arith.constant 0 : i32
    %c0_i32_1 = arith.constant 0 : i32
    return %c0_i32, %c0_i32_0 : i32, i32
  }
  func.func @transform_4(%arg0: i32) -> (i32, i32) {
    %c0_i32 = arith.constant 0 : i32
    %c0_i32_0 = arith.constant 0 : i32
    %c0_i32_1 = arith.constant 0 : i32
    return %c0_i32, %c0_i32_0 : i32, i32
  }
}

</mosaic_0001>

<bundles_post_ra>
// kernel: tpu_custom_call.1
= control target key start
LH: loop header
LB: loop body
LE: loop exit
PB: predicated region body
PF: predicated region fallthrough
CT: control target
= control target key end

     0   :  { %10 = vsyncpa [#allocation4], 0  ;;  %vm23_vm0 = vcmask 64512   ;;  %vm26_vm1 = vcmask 58368   ;;  %v12714_v2 = vmov 0.0   ;;  %vm456_vm2 = vcmask 1046528   ;;  %s12709_s0 = inlined_call_operand.vmem [shape: f32[2,16,16,8], index: 0, kind: input, shape index: {}]   ;;  %s12710_s1 = inlined_call_operand.vmem [shape: f32[9,8,8], index: 1, kind: input, shape index: {}]   ;;  %s12711_s2 = inlined_call_operand.vmem [shape: f32[512,8], index: 2, kind: output, shape index: {0}]   ;;  %s12712_s3 = inlined_call_operand.hbm [shape: f32[1,8], index: 3, kind: output, shape index: {1}]   ;;  %s12713_s4 = inlined_call_operand.hbm [shape: f32[1,8], index: 4, kind: output, shape index: {2}]  }
   0x1   :  { %v9627_v0 = vld [vmem:[%s12710_s1 + $0x8] sm:$0xff]  ;;  %v9632_v1 = vld [vmem:[%s12710_s1] sm:$0xff]  ;;  %24 = vst.msk [vmem:[#allocation2] sm:$0xff] %vm23_vm0, %v12714_v2  ;;  %25 = vst.msk [vmem:[#allocation2 + $0x8] sm:$0xff] %vm23_vm0, %v12714_v2 }
   0x2   :  { %9368 = vmatprep.subr.mxu1 %v9627_v0  ;;  %8486 = vmatprep.subr.mxu0 %v9627_v0  ;;  %28 = vst.msk [vmem:[#allocation2 + $0x18] sm:$0xff] %vm23_vm0, %v12714_v2  ;;  %29 = vst.msk [vmem:[#allocation2 + $0x20] sm:$0xff] %vm23_vm0, %v12714_v2  ;;  %v9855_v3 = vld [vmem:[%s12710_s1 + $0x10] sm:$0xff]  ;;  %v133_v4 = vld [vmem:[%s12709_s0] sm:$0xff] }
   0x3   :  { %31 = vst.msk [vmem:[#allocation2 + $0x30] sm:$0xff] %vm23_vm0, %v12714_v2  ;;  %32 = vst.msk [vmem:[#allocation2 + $0x38] sm:$0xff] %vm23_vm0, %v12714_v2  ;;  %v134_v5 = vld [vmem:[%s12709_s0 + $0x8] sm:$0xff]  ;;  %9369 = vmatpush3.msra.mxu1 %v9627_v0  ;;  %8487 = vmatpush3.msra.mxu0 %v9627_v0  ;;  %v165_v6 = vld [vmem:[%s12709_s0 + $0x100] sm:$0xff] }
   0x4   :  { %34 = vst.msk [vmem:[#allocation2 + $0x48] sm:$0xff] %vm23_vm0, %v12714_v2  ;;  %35 = vst.msk [vmem:[#allocation2 + $0x50] sm:$0xff] %vm23_vm0, %v12714_v2  ;;  %v166_v7 = vld [vmem:[%s12709_s0 + $0x108] sm:$0xff]  ;;  %v135_v8 = vld [vmem:[%s12709_s0 + $0x10] sm:$0xff]  ;;  %8584 = vmatprep.subr.mxu1 %v9632_v1  ;;  %8682 = vmatprep.subr.mxu0 %v9855_v3 }
   0x5   :  { %37 = vst.msk [vmem:[#allocation2 + $0x60] sm:$0xff] %vm23_vm0, %v12714_v2  ;;  %38 = vst.msk [vmem:[#allocation2 + $0x68] sm:$0xff] %vm23_vm0, %v12714_v2  ;;  %v136_v9 = vld [vmem:[%s12709_s0 + $0x18] sm:$0xff]  ;;  %v167_v10 = vld [vmem:[%s12709_s0 + $0x110] sm:$0xff] }
   0x6   :  { %40 = vst.msk [vmem:[#allocation2 + $0x78] sm:$0xff] %vm23_vm0, %v12714_v2  ;;  %41 = vst.msk [vmem:[#allocation2 + $0x80] sm:$0xff] %vm23_vm0, %v12714_v2  ;;  %v168_v11 = vld [vmem:[%s12709_s0 + $0x118] sm:$0xff]  ;;  %v137_v12 = vld [vmem:[%s12709_s0 + $0x20] sm:$0xff] }
   0x7   :  { %43 = vst.msk [vmem:[#allocation2 + $0x90] sm:$0xff] %vm23_vm0, %v12714_v2  ;;  %44 = vst.msk [vmem:[#allocation2 + $0x98] sm:$0xff] %vm23_vm0, %v12714_v2  ;;  %v138_v13 = vld [vmem:[%s12709_s0 + $0x28] sm:$0xff]  ;;  %v169_v14 = vld [vmem:[%s12709_s0 + $0x120] sm:$0xff] }
   0x8   :  { %46 = vst.msk [vmem:[#allocation2 + $0xa8] sm:$0xff] %vm23_vm0, %v12714_v2  ;;  %47 = vst.msk [vmem:[#allocation2 + $0xb0] sm:$0xff] %vm23_vm0, %v12714_v2  ;;  %v170_v15 = vld [vmem:[%s12709_s0 + $0x128] sm:$0xff]  ;;  %v139_v16 = vld [vmem:[%s12709_s0 + $0x30] sm:$0xff] }
   0x9   :  { %49 = vst.msk [vmem:[#allocation2 + $0xc0] sm:$0xff] %vm23_vm0, %v12714_v2  ;;  %50 = vst.msk [vmem:[#allocation2 + $0xc8] sm:$0xff] %vm23_vm0, %v12714_v2  ;;  %v140_v17 = vld [vmem:[%s12709_s0 + $0x38] sm:$0xff]  ;;  %v171_v18 = vld [vmem:[%s12709_s0 + $0x130] sm:$0xff] }
   0xa   :  { %52 = vst.msk [vmem:[#allocation2 + $0xd8] sm:$0xff] %vm23_vm0, %v12714_v2  ;;  %53 = vst.msk [vmem:[#allocation2 + $0xe0] sm:$0xff] %vm23_vm0, %v12714_v2  ;;  %v172_v19 = vld [vmem:[%s12709_s0 + $0x138] sm:$0xff]  ;;  %v141_v20 = vld [vmem:[%s12709_s0 + $0x40] sm:$0xff] }
   0xb   :  { %55 = vst.msk [vmem:[#allocation2 + $0xf0] sm:$0xff] %vm23_vm0, %v12714_v2  ;;  %56 = vst.msk [vmem:[#allocation2 + $0xf8] sm:$0xff] %vm23_vm0, %v12714_v2  ;;  %v142_v21 = vld [vmem:[%s12709_s0 + $0x48] sm:$0xff]  ;;  %v173_v22 = vld [vmem:[%s12709_s0 + $0x140] sm:$0xff] }
   0xc   :  { %58 = vst.msk [vmem:[#allocation2 + $0x108] sm:$0xff] %vm23_vm0, %v12714_v2  ;;  %59 = vst.msk [vmem:[#allocation2 + $0x110] sm:$0xff] %vm23_vm0, %v12714_v2  ;;  %v174_v23 = vld [vmem:[%s12709_s0 + $0x148] sm:$0xff]  ;;  %v9938_v24 = vld [vmem:[#allocation2] sm:$0xff] }
   0xd   :  { %61 = vst.msk [vmem:[#allocation2 + $0x120] sm:$0xff] %vm23_vm0, %v12714_v2  ;;  %62 = vst.msk [vmem:[#allocation2 + $0x128] sm:$0xff] %vm23_vm0, %v12714_v2  ;;  %v9940_v25 = vld [vmem:[#allocation2 + $0x8] sm:$0xff]  ;;  %v457_v27 = vrot.slane %v9938_v24, 1 }
   0xe   :  { %64 = vst.msk [vmem:[#allocation2 + $0x138] sm:$0xff] %vm23_vm0, %v12714_v2  ;;  %65 = vst.msk [vmem:[#allocation2 + $0x140] sm:$0xff] %vm23_vm0, %v12714_v2  ;;  %v458_v28 = vrot.slane %v9940_v25, 1 }
   0xf   :  { %67 = vst.msk [vmem:[#allocation2 + $0x150] sm:$0xff] %vm23_vm0, %v12714_v2  ;;  %68 = vst.msk [vmem:[#allocation2 + $0x158] sm:$0xff] %vm23_vm0, %v12714_v2 }
  0x10   :  { %70 = vst.msk [vmem:[#allocation2 + $0x168] sm:$0xff] %vm23_vm0, %v12714_v2  ;;  %71 = vst.msk [vmem:[#allocation2 + $0x170] sm:$0xff] %vm23_vm0, %v12714_v2  ;;  %v459_v36 = vsel %vm456_vm2, %v457_v27, %v458_v28 }
  0x11   :  { %73 = vst.msk [vmem:[#allocation2 + $0x180] sm:$0xff] %vm23_vm0, %v12714_v2  ;;  %74 = vst.msk [vmem:[#allocation2 + $0x188] sm:$0xff] %vm23_vm0, %v12714_v2  ;;  %8488 = vmatprep.mubr.msk.f32.mxu0 %vm23_vm0, %v459_v36 }
  0x12   :  { %76 = vst.msk [vmem:[#allocation2 + $0x198] sm:$0xff] %vm23_vm0, %v12714_v2  ;;  %77 = vst.msk [vmem:[#allocation2 + $0x1a0] sm:$0xff] %vm23_vm0, %v12714_v2 }
  0x13   :  { %79 = vst.msk [vmem:[#allocation2 + $0x1b0] sm:$0xff] %vm23_vm0, %v12714_v2  ;;  %80 = vst.msk [vmem:[#allocation2 + $0x1b8] sm:$0xff] %vm23_vm0, %v12714_v2 }
  0x14   :  { %82 = vst.msk [vmem:[#allocation2 + $0x1c8] sm:$0xff] %vm23_vm0, %v12714_v2  ;;  %83 = vst.msk [vmem:[#allocation2 + $0x1d0] sm:$0xff] %vm23_vm0, %v12714_v2 }
  0x15   :  { %85 = vst.msk [vmem:[#allocation2 + $0x1e0] sm:$0xff] %vm23_vm0, %v12714_v2  ;;  %86 = vst.msk [vmem:[#allocation2 + $0x1e8] sm:$0xff] %vm23_vm0, %v12714_v2 }
  0x16   :  { %88 = vst.msk [vmem:[#allocation2 + $0x1f8] sm:$0xff] %vm23_vm0, %v12714_v2  ;;  %89 = vst.msk [vmem:[#allocation2 + $0x200] sm:$0xff] %vm23_vm0, %v12714_v2 }
  0x17   :  { %91 = vst.msk [vmem:[#allocation2 + $0x210] sm:$0xff] %vm23_vm0, %v12714_v2  ;;  %92 = vst.msk [vmem:[#allocation2 + $0x218] sm:$0xff] %vm23_vm0, %v12714_v2 }
  0x18   :  { %94 = vst.msk [vmem:[#allocation2 + $0x228] sm:$0xff] %vm23_vm0, %v12714_v2  ;;  %95 = vst.msk [vmem:[#allocation2 + $0x230] sm:$0xff] %vm23_vm0, %v12714_v2 }
  0x19   :  { %97 = vst.msk [vmem:[#allocation2 + $0x240] sm:$0xff] %vm23_vm0, %v12714_v2  ;;  %98 = vst.msk [vmem:[#allocation2 + $0x248] sm:$0xff] %vm23_vm0, %v12714_v2 }
  0x1a   :  { %100 = vst.msk [vmem:[#allocation2 + $0x258] sm:$0xff] %vm23_vm0, %v12714_v2  ;;  %101 = vst.msk [vmem:[#allocation2 + $0x260] sm:$0xff] %vm23_vm0, %v12714_v2  ;;  %v311_v26 = vld [vmem:[#allocation2 + $0x1b0] sm:$0xff]  ;;  %v312_v29 = vld [vmem:[#allocation2 + $0x1b8] sm:$0xff] }
  0x1b   :  { %103 = vst.msk [vmem:[#allocation2 + $0x270] sm:$0xff] %vm23_vm0, %v12714_v2  ;;  %104 = vst.msk [vmem:[#allocation2 + $0x278] sm:$0xff] %vm23_vm0, %v12714_v2  ;;  %v537_v30 = vrot.slane %v311_v26, 1  ;;  %v538_v32 = vrot.slane %v312_v29, 1 }
  0x1c   :  { %106 = vst.msk [vmem:[#allocation2 + $0x288] sm:$0xff] %vm23_vm0, %v12714_v2  ;;  %107 = vst.msk [vmem:[#allocation2 + $0x290] sm:$0xff] %vm23_vm0, %v12714_v2 }
  0x1d   :  { %109 = vst.msk [vmem:[#allocation2 + $0x2a0] sm:$0xff] %vm23_vm0, %v12714_v2  ;;  %110 = vst.msk [vmem:[#allocation2 + $0x2a8] sm:$0xff] %vm23_vm0, %v12714_v2  ;;  %v539_v42 = vsel %vm456_vm2, %v537_v30, %v538_v32 }
  0x1e   :  { %112 = vst.msk [vmem:[#allocation2 + $0x2b8] sm:$0xff] %vm23_vm0, %v12714_v2  ;;  %113 = vst.msk [vmem:[#allocation2 + $0x2c0] sm:$0xff] %vm23_vm0, %v12714_v2  ;;  %8536 = vmatprep.mubr.msk.f32.mxu1 %vm23_vm0, %v539_v42 }
  0x1f   :  { %115 = vst.msk [vmem:[#allocation2 + $0x2d0] sm:$0xff] %vm23_vm0, %v12714_v2  ;;  %116 = vst.msk [vmem:[#allocation2 + $0x2d8] sm:$0xff] %vm23_vm0, %v12714_v2 }
  0x20   :  { %118 = vst.msk [vmem:[#allocation2 + $0x2e8] sm:$0xff] %vm23_vm0, %v12714_v2  ;;  %119 = vst.msk [vmem:[#allocation2 + $0x2f0] sm:$0xff] %vm23_vm0, %v12714_v2 }
  0x21   :  { %121 = vst.msk [vmem:[#allocation2 + $0x300] sm:$0xff] %vm23_vm0, %v12714_v2  ;;  %122 = vst.msk [vmem:[#allocation2 + $0x308] sm:$0xff] %vm23_vm0, %v12714_v2 }
  0x22   :  { %124 = vst.msk [vmem:[#allocation2 + $0x318] sm:$0xff] %vm23_vm0, %v12714_v2  ;;  %125 = vst.msk [vmem:[#allocation2 + $0x320] sm:$0xff] %vm23_vm0, %v12714_v2 }
  0x23   :  { %127 = vst.msk [vmem:[#allocation2 + $0x330] sm:$0xff] %vm23_vm0, %v12714_v2  ;;  %128 = vst.msk [vmem:[#allocation2 + $0x338] sm:$0xff] %vm23_vm0, %v12714_v2 }
  0x24   :  { %130 = vst.msk [vmem:[#allocation2 + $0x348] sm:$0xff] %vm23_vm0, %v12714_v2  ;;  %131 = vst.msk [vmem:[#allocation2 + $0x350] sm:$0xff] %vm23_vm0, %v12714_v2 }
  0x25   :  { %27 = vst.msk [vmem:[#allocation2 + $0x10] sm:$0x3] %vm26_vm1, %v12714_v2  ;;  %30 = vst.msk [vmem:[#allocation2 + $0x28] sm:$0x3] %vm26_vm1, %v12714_v2 }
  0x26   :  { %33 = vst.msk [vmem:[#allocation2 + $0x40] sm:$0x3] %vm26_vm1, %v12714_v2  ;;  %36 = vst.msk [vmem:[#allocation2 + $0x58] sm:$0x3] %vm26_vm1, %v12714_v2 }
  0x27   :  { %39 = vst.msk [vmem:[#allocation2 + $0x70] sm:$0x3] %vm26_vm1, %v12714_v2  ;;  %42 = vst.msk [vmem:[#allocation2 + $0x88] sm:$0x3] %vm26_vm1, %v12714_v2 }
  0x28   :  { %45 = vst.msk [vmem:[#allocation2 + $0xa0] sm:$0x3] %vm26_vm1, %v12714_v2  ;;  %48 = vst.msk [vmem:[#allocation2 + $0xb8] sm:$0x3] %vm26_vm1, %v12714_v2 }
  0x29   :  { %51 = vst.msk [vmem:[#allocation2 + $0xd0] sm:$0x3] %vm26_vm1, %v12714_v2  ;;  %54 = vst.msk [vmem:[#allocation2 + $0xe8] sm:$0x3] %vm26_vm1, %v12714_v2 }
  0x2a   :  { %57 = vst.msk [vmem:[#allocation2 + $0x100] sm:$0x3] %vm26_vm1, %v12714_v2  ;;  %60 = vst.msk [vmem:[#allocation2 + $0x118] sm:$0x3] %vm26_vm1, %v12714_v2 }
  0x2b   :  { %63 = vst.msk [vmem:[#allocation2 + $0x130] sm:$0x3] %vm26_vm1, %v12714_v2  ;;  %66 = vst.msk [vmem:[#allocation2 + $0x148] sm:$0x3] %vm26_vm1, %v12714_v2 }
  0x2c   :  { %69 = vst.msk [vmem:[#allocation2 + $0x160] sm:$0x3] %vm26_vm1, %v12714_v2  ;;  %72 = vst.msk [vmem:[#allocation2 + $0x178] sm:$0x3] %vm26_vm1, %v12714_v2  ;;  %v9947_v31 = vld [vmem:[#allocation2 + $0x10] sm:$0x3] }
  0x2d   :  { %75 = vst.msk [vmem:[#allocation2 + $0x190] sm:$0x3] %vm26_vm1, %v12714_v2  ;;  %78 = vst.msk [vmem:[#allocation2 + $0x1a8] sm:$0x3] %vm26_vm1, %v12714_v2  ;;  %v460_v33 = vrot.slane %v9947_v31, 1 }
  0x2e   :  { %81 = vst.msk [vmem:[#allocation2 + $0x1c0] sm:$0x3] %vm26_vm1, %v12714_v2  ;;  %84 = vst.msk [vmem:[#allocation2 + $0x1d8] sm:$0x3] %vm26_vm1, %v12714_v2 }
  0x2f   :  { %87 = vst.msk [vmem:[#allocation2 + $0x1f0] sm:$0x3] %vm26_vm1, %v12714_v2  ;;  %90 = vst.msk [vmem:[#allocation2 + $0x208] sm:$0x3] %vm26_vm1, %v12714_v2  ;;  %v461_v43 = vsel %vm456_vm2, %v458_v28, %v460_v33 }
  0x30   :  { %93 = vst.msk [vmem:[#allocation2 + $0x220] sm:$0x3] %vm26_vm1, %v12714_v2  ;;  %96 = vst.msk [vmem:[#allocation2 + $0x238] sm:$0x3] %vm26_vm1, %v12714_v2  ;;  %8489 = vmatmul.mubr.msk.f32.vlgmr.msra.gmra.mxu0 %vm23_vm0, %v461_v43  ;;  %v143_v43 = vld [vmem:[%s12709_s0 + $0x50] sm:$0xff] }
  0x31   :  { %99 = vst.msk [vmem:[#allocation2 + $0x250] sm:$0x3] %vm26_vm1, %v12714_v2  ;;  %102 = vst.msk [vmem:[#allocation2 + $0x268] sm:$0x3] %vm26_vm1, %v12714_v2  ;;  %8683 = vmatpush3.msra.mxu0 %v9855_v3 }
  0x32   :  { %105 = vst.msk [vmem:[#allocation2 + $0x280] sm:$0x3] %vm26_vm1, %v12714_v2  ;;  %108 = vst.msk [vmem:[#allocation2 + $0x298] sm:$0x3] %vm26_vm1, %v12714_v2 }
  0x33   :  { %111 = vst.msk [vmem:[#allocation2 + $0x2b0] sm:$0x3] %vm26_vm1, %v12714_v2  ;;  %114 = vst.msk [vmem:[#allocation2 + $0x2c8] sm:$0x3] %vm26_vm1, %v12714_v2 }
  0x34   :  { %117 = vst.msk [vmem:[#allocation2 + $0x2e0] sm:$0x3] %vm26_vm1, %v12714_v2  ;;  %120 = vst.msk [vmem:[#allocation2 + $0x2f8] sm:$0x3] %vm26_vm1, %v12714_v2 }
  0x35   :  { %123 = vst.msk [vmem:[#allocation2 + $0x310] sm:$0x3] %vm26_vm1, %v12714_v2  ;;  %126 = vst.msk [vmem:[#allocation2 + $0x328] sm:$0x3] %vm26_vm1, %v12714_v2  ;;  %v313_v34 = vld [vmem:[#allocation2 + $0x1c0] sm:$0x3] }
  0x36   :  { %129 = vst.msk [vmem:[#allocation2 + $0x340] sm:$0x3] %vm26_vm1, %v12714_v2  ;;  %132 = vst.msk [vmem:[#allocation2 + $0x358] sm:$0x3] %vm26_vm1, %v12714_v2  ;;  %v540_v37 = vrot.slane %v313_v34, 1 }
  0x37   :  { %199 = vst.msk [vmem:[#allocation2 + $0x19] sm:$0xff] %vm23_vm0, %v133_v4  ;;  %200 = vst.msk [vmem:[#allocation2 + $0x21] sm:$0xff] %vm23_vm0, %v134_v5 }
  0x38   :  { %231 = vst.msk [vmem:[#allocation2 + $0x1c9] sm:$0xff] %vm23_vm0, %v165_v6  ;;  %232 = vst.msk [vmem:[#allocation2 + $0x1d1] sm:$0xff] %vm23_vm0, %v166_v7  ;;  %v541_v48 = vsel %vm456_vm2, %v538_v32, %v540_v37 }
  0x39   :  { %201 = vst.msk [vmem:[#allocation2 + $0x31] sm:$0xff] %vm23_vm0, %v135_v8  ;;  %202 = vst.msk [vmem:[#allocation2 + $0x39] sm:$0xff] %vm23_vm0, %v136_v9  ;;  %8537 = vmatmul.mubr.msk.f32.vlgmr.msra.gmra.mxu1 %vm23_vm0, %v541_v48 }
  0x3a   :  { %233 = vst.msk [vmem:[#allocation2 + $0x1e1] sm:$0xff] %vm23_vm0, %v167_v10  ;;  %234 = vst.msk [vmem:[#allocation2 + $0x1e9] sm:$0xff] %vm23_vm0, %v168_v11  ;;  %8585 = vmatpush3.msra.mxu1 %v9632_v1 }
  0x3b   :  { %203 = vst.msk [vmem:[#allocation2 + $0x49] sm:$0xff] %vm23_vm0, %v137_v12  ;;  %204 = vst.msk [vmem:[#allocation2 + $0x51] sm:$0xff] %vm23_vm0, %v138_v13 }
  0x3c   :  { %235 = vst.msk [vmem:[#allocation2 + $0x1f9] sm:$0xff] %vm23_vm0, %v169_v14  ;;  %236 = vst.msk [vmem:[#allocation2 + $0x201] sm:$0xff] %vm23_vm0, %v170_v15 }
  0x3d   :  { %205 = vst.msk [vmem:[#allocation2 + $0x61] sm:$0xff] %vm23_vm0, %v139_v16  ;;  %206 = vst.msk [vmem:[#allocation2 + $0x69] sm:$0xff] %vm23_vm0, %v140_v17 }
  0x3e   :  { %237 = vst.msk [vmem:[#allocation2 + $0x211] sm:$0xff] %vm23_vm0, %v171_v18  ;;  %238 = vst.msk [vmem:[#allocation2 + $0x219] sm:$0xff] %vm23_vm0, %v172_v19  ;;  %v9950_v35 = vld [vmem:[#allocation2 + $0x18] sm:$0xff]  ;;  %v9953_v38 = vld [vmem:[#allocation2 + $0x20] sm:$0xff] }
  0x3f   :  { %207 = vst.msk [vmem:[#allocation2 + $0x79] sm:$0xff] %vm23_vm0, %v141_v20  ;;  %208 = vst.msk [vmem:[#allocation2 + $0x81] sm:$0xff] %vm23_vm0, %v142_v21  ;;  %v462_v39 = vrot.slane %v9950_v35, 1  ;;  %v314_v40 = vld [vmem:[#allocation2 + $0x1c8] sm:$0xff]  ;;  %v315_v41 = vld [vmem:[#allocation2 + $0x1d0] sm:$0xff]  ;;  %v463_v44 = vrot.slane %v9953_v38, 1 }
  0x40   :  { %239 = vst.msk [vmem:[#allocation2 + $0x229] sm:$0xff] %vm23_vm0, %v173_v22  ;;  %240 = vst.msk [vmem:[#allocation2 + $0x231] sm:$0xff] %vm23_vm0, %v174_v23  ;;  %v542_v45 = vrot.slane %v314_v40, 1  ;;  %v9960_v46 = vld [vmem:[#allocation2 + $0x28] sm:$0x3]  ;;  %v543_v49 = vrot.slane %v315_v41, 1 }
  0x41   :  { %v316_v47 = vld [vmem:[#allocation2 + $0x1d8] sm:$0x3]  ;;  %v465_v50 = vrot.slane %v9960_v46, 1  ;;  %v9966_v52 = vld [vmem:[#allocation2 + $0x30] sm:$0xff]  ;;  %v317_v54 = vld [vmem:[#allocation2 + $0x1e0] sm:$0xff]  ;;  %v464_v55 = vsel %vm456_vm2, %v462_v39, %v463_v44  ;;  %209 = vst.msk [vmem:[#allocation2 + $0x91] sm:$0xff] %vm23_vm0, %v143_v43 }
  0x42   :  { %v545_v51 = vrot.slane %v316_v47, 1  ;;  %v9968_v53 = vld [vmem:[#allocation2 + $0x38] sm:$0xff]  ;;  %v467_v56 = vrot.slane %v9966_v52, 1  ;;  %v318_v58 = vld [vmem:[#allocation2 + $0x1e8] sm:$0xff]  ;;  %v547_v59 = vrot.slane %v317_v54, 1  ;;  %8491 = vmatprep.mubr.msk.f32.mxu0 %vm23_vm0, %v464_v55  ;;  %v544_v61 = vsel %vm456_vm2, %v542_v45, %v543_v49  ;;  %v9984_v5 = vld [vmem:[#allocation2 + $0x50] sm:$0xff] }
  0x43   :  { %v468_v57 = vrot.slane %v9968_v53, 1  ;;  %v9975_v60 = vld [vmem:[#allocation2 + $0x40] sm:$0x3]  ;;  %v466_v62 = vsel %vm456_vm2, %v463_v44, %v465_v50  ;;  %v548_v0 = vrot.slane %v318_v58, 1  ;;  %v319_v3 = vld [vmem:[#allocation2 + $0x1f0] sm:$0x3]  ;;  %8539 = vmatprep.mubr.msk.f32.mxu1 %vm23_vm0, %v544_v61 }
  0x44   :  { %v546_v63 = vsel %vm456_vm2, %v543_v49, %v545_v51  ;;  %v9982_v4 = vld [vmem:[#allocation2 + $0x48] sm:$0xff]  ;;  %v470_v1 = vrot.slane %v9975_v60, 1  ;;  %v550_v7 = vrot.slane %v319_v3, 1  ;;  %v320_v9 = vld [vmem:[#allocation2 + $0x1f8] sm:$0xff]  ;;  %v321_v10 = vld [vmem:[#allocation2 + $0x200] sm:$0xff]  ;;  %8492 = vmatmul.mubr.msk.f32.gmra.mxu0 %vm23_vm0, %v466_v62  ;;  %v473_v13 = vrot.slane %v9984_v5, 1 }
  0x45   :  { %v469_v6 = vsel %vm456_vm2, %v467_v56, %v468_v57  ;;  %v472_v8 = vrot.slane %v9982_v4, 1  ;;  %v9990_v11 = vld [vmem:[#allocation2 + $0x60] sm:$0xff]  ;;  %v549_v12 = vsel %vm456_vm2, %v547_v59, %v548_v0  ;;  %v552_v14 = vrot.slane %v320_v9, 1  ;;  %v9995_v16 = vld [vmem:[#allocation2 + $0x58] sm:$0x3]  ;;  %v9997_v17 = vld [vmem:[#allocation2 + $0x68] sm:$0xff]  ;;  %8540 = vmatmul.mubr.msk.f32.gmra.mxu1 %vm23_vm0, %v546_v63 }
  0x46   :  { %v553_v15 = vrot.slane %v321_v10, 1  ;;  %8494 = vmatprep.mubr.msk.f32.mxu0 %vm23_vm0, %v469_v6  ;;  %v471_v18 = vsel %vm456_vm2, %v468_v57, %v470_v1  ;;  %v475_v19 = vrot.slane %v9995_v16, 1  ;;  %v322_v20 = vld [vmem:[#allocation2 + $0x208] sm:$0x3]  ;;  %v477_v21 = vrot.slane %v9990_v11, 1  ;;  %v323_v22 = vld [vmem:[#allocation2 + $0x210] sm:$0xff]  ;;  %8542 = vmatprep.mubr.msk.f32.mxu1 %vm23_vm0, %v549_v12 }
  0x47   :  { %v10004_v23 = vld [vmem:[#allocation2 + $0x218] sm:$0xff]  ;;  %v551_v26 = vsel %vm456_vm2, %v548_v0, %v550_v7  ;;  %v474_v27 = vsel %vm456_vm2, %v472_v8, %v473_v13  ;;  %v555_v28 = vrot.slane %v322_v20, 1  ;;  %v478_v29 = vrot.slane %v9997_v17, 1  ;;  %v10010_v30 = vld [vmem:[#allocation2 + $0x70] sm:$0x3]  ;;  %v10016_v39 = vld [vmem:[#allocation2 + $0x80] sm:$0xff] }
  0x48   :  { %v325_v32 = vld [vmem:[#allocation2 + $0x220] sm:$0x3]  ;;  %v554_v33 = vsel %vm456_vm2, %v552_v14, %v553_v15  ;;  %v557_v34 = vrot.slane %v323_v22, 1  ;;  %v558_v36 = vrot.slane %v10004_v23, 1  ;;  %v10014_v37 = vld [vmem:[#allocation2 + $0x78] sm:$0xff]  ;;  %v326_v40 = vld [vmem:[#allocation2 + $0x228] sm:$0xff]  ;;  %8495 = vmatmul.mubr.msk.f32.gmra.mxu0 %vm23_vm0, %v471_v18  ;;  %v476_v44 = vsel %vm456_vm2, %v473_v13, %v475_v19 }
  0x49   :  { %v10019_v41 = vld [vmem:[#allocation2 + $0x230] sm:$0xff]  ;;  %v10021_v42 = vld [vmem:[#allocation2 + $0x88] sm:$0x3]  ;;  %8543 = vmatmul.mubr.msk.f32.gmra.mxu1 %vm23_vm0, %v551_v26  ;;  %8497 = vmatprep.mubr.msk.f32.mxu0 %vm23_vm0, %v474_v27  ;;  %v556_v45 = vsel %vm456_vm2, %v553_v15, %v555_v28  ;;  %v480_v47 = vrot.slane %v10010_v30, 1  ;;  %v10031_v48 = vld [vmem:[#allocation2 + $0x238] sm:$0x3]  ;;  %v479_v51 = vsel %vm456_vm2, %v477_v21, %v478_v29 }
  0x4a   :  { %12775 = vst [vmem:[#allocation9_spill] sm:$0xff] %v10031_v48  ;;  %v144_v49 = vld [vmem:[%s12709_s0 + $0x58] sm:$0xff]  ;;  %v175_v50 = vld [vmem:[%s12709_s0 + $0x150] sm:$0xff]  ;;  %8545 = vmatprep.mubr.msk.f32.mxu1 %vm23_vm0, %v554_v33  ;;  %v560_v54 = vrot.slane %v325_v32, 1  ;;  %v482_v55 = vrot.slane %v10014_v37, 1  ;;  %v483_v56 = vrot.slane %v10016_v39, 1  ;;  %v559_v61 = vsel %vm456_vm2, %v557_v34, %v558_v36 }
  0x4b   :  { %210 = vst.msk [vmem:[#allocation2 + $0x99] sm:$0xff] %vm23_vm0, %v144_v49  ;;  %v176_v57 = vld [vmem:[%s12709_s0 + $0x158] sm:$0xff]  ;;  %241 = vst.msk [vmem:[#allocation2 + $0x241] sm:$0xff] %vm23_vm0, %v175_v50  ;;  %v145_v58 = vld [vmem:[%s12709_s0 + $0x60] sm:$0xff]  ;;  %v562_v62 = vrot.slane %v326_v40, 1  ;;  %v563_v63 = vrot.slane %v10019_v41, 1  ;;  %v481_v9 = vsel %vm456_vm2, %v478_v29, %v480_v47 }
  0x4c   :  { %v146_v59 = vld [vmem:[%s12709_s0 + $0x68] sm:$0xff]  ;;  %242 = vst.msk [vmem:[#allocation2 + $0x249] sm:$0xff] %vm23_vm0, %v176_v57  ;;  %211 = vst.msk [vmem:[#allocation2 + $0xa9] sm:$0xff] %vm23_vm0, %v145_v58  ;;  %v177_v0 = vld [vmem:[%s12709_s0 + $0x160] sm:$0xff]  ;;  %8498 = vmatmul.mubr.msk.f32.gmra.mxu0 %vm23_vm0, %v476_v44  ;;  %v485_v10 = vrot.slane %v10021_v42, 1  ;;  %v561_v15 = vsel %vm456_vm2, %v558_v36, %v560_v54  ;;  %v484_v18 = vsel %vm456_vm2, %v482_v55, %v483_v56  ;;  %v565_v19 = vrot.slane %v10031_v48, 1 }
  0x4d   :  { %212 = vst.msk [vmem:[#allocation2 + $0xb1] sm:$0xff] %vm23_vm0, %v146_v59  ;;  %v178_v3 = vld [vmem:[%s12709_s0 + $0x168] sm:$0xff]  ;;  %v147_v6 = vld [vmem:[%s12709_s0 + $0x70] sm:$0xff]  ;;  %243 = vst.msk [vmem:[#allocation2 + $0x259] sm:$0xff] %vm23_vm0, %v177_v0  ;;  %8546 = vmatmul.mubr.msk.f32.gmra.mxu1 %vm23_vm0, %v556_v45  ;;  %8500 = vmatprep.mubr.msk.f32.mxu0 %vm23_vm0, %v479_v51  ;;  %v564_v23 = vsel %vm456_vm2, %v562_v62, %v563_v63 }
  0x4e   :  { %244 = vst.msk [vmem:[#allocation2 + $0x261] sm:$0xff] %vm23_vm0, %v178_v3  ;;  %v148_v1 = vld [vmem:[%s12709_s0 + $0x78] sm:$0xff]  ;;  %213 = vst.msk [vmem:[#allocation2 + $0xc1] sm:$0xff] %vm23_vm0, %v147_v6  ;;  %v179_v7 = vld [vmem:[%s12709_s0 + $0x170] sm:$0xff]  ;;  %8548 = vmatprep.mubr.msk.f32.mxu1 %vm23_vm0, %v559_v61  ;;  %v486_v34 = vsel %vm456_vm2, %v483_v56, %v485_v10  ;;  %v566_v44 = vsel %vm456_vm2, %v563_v63, %v565_v19 }
  0x4f   :  { %v180_v8 = vld [vmem:[%s12709_s0 + $0x178] sm:$0xff]  ;;  %214 = vst.msk [vmem:[#allocation2 + $0xc9] sm:$0xff] %vm23_vm0, %v148_v1  ;;  %245 = vst.msk [vmem:[#allocation2 + $0x271] sm:$0xff] %vm23_vm0, %v179_v7  ;;  %v149_v12 = vld [vmem:[%s12709_s0 + $0x80] sm:$0xff] }
  0x50   :  { %246 = vst.msk [vmem:[#allocation2 + $0x279] sm:$0xff] %vm23_vm0, %v180_v8  ;;  %v150_v13 = vld [vmem:[%s12709_s0 + $0x88] sm:$0xff]  ;;  %v181_v14 = vld [vmem:[%s12709_s0 + $0x180] sm:$0xff]  ;;  %215 = vst.msk [vmem:[#allocation2 + $0xd9] sm:$0xff] %vm23_vm0, %v149_v12  ;;  %8501 = vmatmul.mubr.msk.f32.gmra.mxu0 %vm23_vm0, %v481_v9 }
  0x51   :  { %216 = vst.msk [vmem:[#allocation2 + $0xe1] sm:$0xff] %vm23_vm0, %v150_v13  ;;  %v182_v20 = vld [vmem:[%s12709_s0 + $0x188] sm:$0xff]  ;;  %247 = vst.msk [vmem:[#allocation2 + $0x289] sm:$0xff] %vm23_vm0, %v181_v14  ;;  %v151_v21 = vld [vmem:[%s12709_s0 + $0x90] sm:$0xff]  ;;  %8549 = vmatmul.mubr.msk.f32.gmra.mxu1 %vm23_vm0, %v561_v15  ;;  %8503 = vmatprep.mubr.msk.f32.mxu0 %vm23_vm0, %v484_v18 }
  0x52   :  { %v152_v22 = vld [vmem:[%s12709_s0 + $0x98] sm:$0xff]  ;;  %248 = vst.msk [vmem:[#allocation2 + $0x291] sm:$0xff] %vm23_vm0, %v182_v20  ;;  %217 = vst.msk [vmem:[#allocation2 + $0xf1] sm:$0xff] %vm23_vm0, %v151_v21  ;;  %v183_v26 = vld [vmem:[%s12709_s0 + $0x190] sm:$0xff]  ;;  %8551 = vmatprep.mubr.msk.f32.mxu1 %vm23_vm0, %v564_v23 }
  0x53   :  { %218 = vst.msk [vmem:[#allocation2 + $0xf9] sm:$0xff] %vm23_vm0, %v152_v22  ;;  %v184_v27 = vld [vmem:[%s12709_s0 + $0x198] sm:$0xff]  ;;  %v153_v28 = vld [vmem:[%s12709_s0 + $0xa0] sm:$0xff]  ;;  %v10128_v29 = vld [vmem:[#allocation2 + $0x90] sm:$0xff] }
  0x54   :  { %249 = vst.msk [vmem:[#allocation2 + $0x2a1] sm:$0xff] %vm23_vm0, %v183_v26  ;;  %250 = vst.msk [vmem:[#allocation2 + $0x2a9] sm:$0xff] %vm23_vm0, %v184_v27  ;;  %v154_v32 = vld [vmem:[%s12709_s0 + $0xa8] sm:$0xff]  ;;  %v185_v33 = vld [vmem:[%s12709_s0 + $0x1a0] sm:$0xff]  ;;  %v487_v40 = vrot.slane %v10128_v29, 1  ;;  %8504 = vmatmul.mubr.msk.f32.gmra.mxu0 %vm23_vm0, %v486_v34 }
  0x55   :  { %219 = vst.msk [vmem:[#allocation2 + $0x109] sm:$0xff] %vm23_vm0, %v153_v28  ;;  %v10142_v36 = vld [vmem:[#allocation2 + $0x98] sm:$0xff]  ;;  %v10145_v41 = vld [vmem:[#allocation2 + $0x240] sm:$0xff]  ;;  %220 = vst.msk [vmem:[#allocation2 + $0x111] sm:$0xff] %vm23_vm0, %v154_v32  ;;  %8552 = vmatmul.mubr.msk.f32.gmra.mxu1 %vm23_vm0, %v566_v44 }
  0x56   :  { %12776 = vst [vmem:[#allocation10_spill] sm:$0xff] %v10145_v41  ;;  %v10147_v43 = vld [vmem:[#allocation2 + $0xa0] sm:$0x3]  ;;  %251 = vst.msk [vmem:[#allocation2 + $0x2b9] sm:$0xff] %vm23_vm0, %v185_v33  ;;  %v488_v45 = vrot.slane %v10142_v36, 1  ;;  %v10154_v47 = vld [vmem:[#allocation2 + $0x248] sm:$0xff] }
  0x57   :  { %12777 = vst [vmem:[#allocation11_spill] sm:$0xff] %v10154_v47  ;;  %v567_v49 = vrot.slane %v10145_v41, 1  ;;  %v490_v50 = vrot.slane %v10147_v43, 1  ;;  %v10158_v51 = vld [vmem:[#allocation2 + $0x250] sm:$0x3]  ;;  %v568_v54 = vrot.slane %v10154_v47, 1 }
  0x58   :  { %12778 = vst [vmem:[#allocation12_spill] sm:$0xff] %v10158_v51  ;;  %v570_v55 = vrot.slane %v10158_v51, 1  ;;  %v10162_v56 = vld [vmem:[#allocation2 + $0xa8] sm:$0xff]  ;;  %v10164_v57 = vld [vmem:[#allocation2 + $0xb0] sm:$0xff]  ;;  %v10166_v58 = vld [vmem:[#allocation2 + $0x258] sm:$0xff]  ;;  %v489_v59 = vsel %vm456_vm2, %v487_v40, %v488_v45 }
  0x59   :  { %12779 = vst [vmem:[#allocation13_spill] sm:$0xff] %v10166_v58  ;;  %v491_v61 = vsel %vm456_vm2, %v488_v45, %v490_v50  ;;  %v492_v62 = vrot.slane %v10162_v56, 1  ;;  %v493_v63 = vrot.slane %v10164_v57, 1  ;;  %v10173_v0 = vld [vmem:[#allocation2 + $0x260] sm:$0xff]  ;;  %v10175_v3 = vld [vmem:[#allocation2 + $0xb8] sm:$0x3]  ;;  %8506 = vmatprep.mubr.msk.f32.mxu0 %vm23_vm0, %v489_v59  ;;  %v569_v1 = vsel %vm456_vm2, %v567_v49, %v568_v54 }
  0x5a   :  { %12780 = vst [vmem:[#allocation14_spill] sm:$0xff] %v10173_v0  ;;  %v10177_v6 = vld [vmem:[#allocation2 + $0xc0] sm:$0xff]  ;;  %v571_v7 = vsel %vm456_vm2, %v568_v54, %v570_v55  ;;  %v572_v8 = vrot.slane %v10166_v58, 1  ;;  %v573_v9 = vrot.slane %v10173_v0, 1  ;;  %v10185_v10 = vld [vmem:[#allocation2 + $0x268] sm:$0x3]  ;;  %8554 = vmatprep.mubr.msk.f32.mxu1 %vm23_vm0, %v569_v1  ;;  %8507 = vmatmul.mubr.msk.f32.gmra.mxu0 %vm23_vm0, %v491_v61 }
  0x5b   :  { %12781 = vst [vmem:[#allocation15_spill] sm:$0xff] %v10185_v10  ;;  %v10187_v12 = vld [vmem:[#allocation2 + $0xc8] sm:$0xff]  ;;  %v10189_v13 = vld [vmem:[#allocation2 + $0x270] sm:$0xff]  ;;  %v494_v14 = vsel %vm456_vm2, %v492_v62, %v493_v63  ;;  %v495_v15 = vrot.slane %v10175_v3, 1  ;;  %v575_v18 = vrot.slane %v10185_v10, 1  ;;  %v497_v19 = vrot.slane %v10177_v6, 1  ;;  %8555 = vmatmul.mubr.msk.f32.gmra.mxu1 %vm23_vm0, %v571_v7 }
  0x5c   :  { %12782 = vst [vmem:[#allocation16_spill] sm:$0xff] %v10189_v13  ;;  %v10196_v20 = vld [vmem:[#allocation2 + $0x278] sm:$0xff]  ;;  %v10198_v21 = vld [vmem:[#allocation2 + $0xd0] sm:$0x3]  ;;  %v574_v22 = vsel %vm456_vm2, %v572_v8, %v573_v9  ;;  %v498_v23 = vrot.slane %v10187_v12, 1  ;;  %v577_v26 = vrot.slane %v10189_v13, 1  ;;  %8509 = vmatprep.mubr.msk.f32.mxu0 %vm23_vm0, %v494_v14 }
  0x5d   :  { %12783 = vst [vmem:[#allocation17_spill] sm:$0xff] %v10196_v20  ;;  %v578_v27 = vrot.slane %v10196_v20, 1  ;;  %v10204_v28 = vld [vmem:[#allocation2 + $0x280] sm:$0x3]  ;;  %v10206_v32 = vld [vmem:[#allocation2 + $0xd8] sm:$0xff]  ;;  %v10211_v34 = vld [vmem:[#allocation2 + $0x288] sm:$0xff]  ;;  %v496_v44 = vsel %vm456_vm2, %v493_v63, %v495_v15  ;;  %8557 = vmatprep.mubr.msk.f32.mxu1 %vm23_vm0, %v574_v22  ;;  %v576_v50 = vsel %vm456_vm2, %v573_v9, %v575_v18 }
  0x5e   :  { %12784 = vst [vmem:[#allocation18_spill] sm:$0xff] %v10204_v28  ;;  %v10209_v33 = vld [vmem:[#allocation2 + $0xe0] sm:$0xff]  ;;  %12785 = vst [vmem:[#allocation19_spill] sm:$0xff] %v10211_v34  ;;  %v10213_v40 = vld [vmem:[#allocation2 + $0x290] sm:$0xff]  ;;  %v500_v45 = vrot.slane %v10198_v21, 1  ;;  %v580_v49 = vrot.slane %v10204_v28, 1  ;;  %v499_v54 = vsel %vm456_vm2, %v497_v19, %v498_v23  ;;  %8510 = vmatmul.mubr.msk.f32.gmra.mxu0 %vm23_vm0, %v496_v44 }
  0x5f   :  { %12786 = vst [vmem:[#allocation20_spill] sm:$0xff] %v10213_v40  ;;  %v502_v55 = vrot.slane %v10206_v32, 1  ;;  %v503_v59 = vrot.slane %v10209_v33, 1  ;;  %v10225_v61 = vld [vmem:[#allocation2 + $0xe8] sm:$0x3]  ;;  %v579_v63 = vsel %vm456_vm2, %v577_v26, %v578_v27  ;;  %v582_v1 = vrot.slane %v10211_v34, 1  ;;  %8558 = vmatmul.mubr.msk.f32.gmra.mxu1 %vm23_vm0, %v576_v50  ;;  %8512 = vmatprep.mubr.msk.f32.mxu0 %vm23_vm0, %v499_v54 }
  0x60   :  { %v10227_v62 = vld [vmem:[#allocation2 + $0x298] sm:$0x3]  ;;  %v583_v7 = vrot.slane %v10213_v40, 1  ;;  %v10232_v8 = vld [vmem:[#allocation2 + $0xf0] sm:$0xff]  ;;  %v10237_v9 = vld [vmem:[#allocation2 + $0x2a0] sm:$0xff]  ;;  %v501_v19 = vsel %vm456_vm2, %v498_v23, %v500_v45  ;;  %v505_v22 = vrot.slane %v10225_v61, 1  ;;  %8560 = vmatprep.mubr.msk.f32.mxu1 %vm23_vm0, %v579_v63  ;;  %v581_v50 = vsel %vm456_vm2, %v578_v27, %v580_v49 }
  0x61   :  { %12787 = vst [vmem:[#allocation21_spill] sm:$0xff] %v10227_v62  ;;  %v10234_v14 = vld [vmem:[#allocation2 + $0xf8] sm:$0xff]  ;;  %12788 = vst [vmem:[#allocation22_spill] sm:$0xff] %v10237_v9  ;;  %v10239_v15 = vld [vmem:[#allocation2 + $0x2a8] sm:$0xff]  ;;  %v585_v26 = vrot.slane %v10227_v62, 1  ;;  %v504_v54 = vsel %vm456_vm2, %v502_v55, %v503_v59  ;;  %v507_v23 = vrot.slane %v10232_v8, 1 }
  0x62   :  { %12789 = vst [vmem:[#allocation23_spill] sm:$0xff] %v10239_v15  ;;  %v10241_v18 = vld [vmem:[#allocation2 + $0x100] sm:$0x3]  ;;  %v10248_v2 = vld [vmem:[#allocation2 + $0x2b0] sm:$0x3]  ;;  %v10250_v40 = vld [vmem:[#allocation2 + $0x108] sm:$0xff]  ;;  %v584_v27 = vsel %vm456_vm2, %v582_v1, %v583_v7  ;;  %8513 = vmatmul.mubr.msk.f32.gmra.mxu0 %vm23_vm0, %v501_v19 }
  0x63   :  { %12790 = vst [vmem:[#allocation24_spill] sm:$0xff] %v10248_v2  ;;  %v186_v44 = vld [vmem:[%s12709_s0 + $0x1a8] sm:$0xff]  ;;  %v508_v45 = vrot.slane %v10234_v14, 1  ;;  %v10260_v34 = vld [vmem:[#allocation2 + $0x110] sm:$0xff]  ;;  %v156_v63 = vld [vmem:[%s12709_s0 + $0xb8] sm:$0xff]  ;;  %v587_v49 = vrot.slane %v10237_v9, 1  ;;  %8561 = vmatmul.mubr.msk.f32.gmra.mxu1 %vm23_vm0, %v581_v50  ;;  %8515 = vmatprep.mubr.msk.f32.mxu0 %vm23_vm0, %v504_v54 }
  0x64   :  { %252 = vst.msk [vmem:[#allocation2 + $0x2c1] sm:$0xff] %vm23_vm0, %v186_v44  ;;  %v155_v62 = vld [vmem:[%s12709_s0 + $0xb0] sm:$0xff]  ;;  %v588_v55 = vrot.slane %v10239_v15, 1  ;;  %v10272_v28 = vld [vmem:[#allocation2 + $0x2b8] sm:$0xff]  ;;  %222 = vst.msk [vmem:[#allocation2 + $0x129] sm:$0xff] %vm23_vm0, %v156_v63  ;;  %v510_v9 = vrot.slane %v10241_v18, 1  ;;  %8563 = vmatprep.mubr.msk.f32.mxu1 %vm23_vm0, %v584_v27 }
  0x65   :  { %12791 = vst [vmem:[#allocation25_spill] sm:$0xff] %v10272_v28  ;;  %221 = vst.msk [vmem:[#allocation2 + $0x121] sm:$0xff] %vm23_vm0, %v155_v62  ;;  %v187_v44 = vld [vmem:[%s12709_s0 + $0x1b0] sm:$0xff]  ;;  %v188_v20 = vld [vmem:[%s12709_s0 + $0x1b8] sm:$0xff]  ;;  %v513_v54 = vrot.slane %v10260_v34, 1 }
  0x66   :  { %v157_v1 = vld [vmem:[%s12709_s0 + $0xc0] sm:$0xff]  ;;  %v10286_v15 = vld [vmem:[#allocation2 + $0x118] sm:$0x3]  ;;  %253 = vst.msk [vmem:[#allocation2 + $0x2d1] sm:$0xff] %vm23_vm0, %v187_v44  ;;  %254 = vst.msk [vmem:[#allocation2 + $0x2d9] sm:$0xff] %vm23_vm0, %v188_v20  ;;  %v506_v20 = vsel %vm456_vm2, %v503_v59, %v505_v22  ;;  %v586_v44 = vsel %vm456_vm2, %v583_v7, %v585_v26  ;;  %v509_v7 = vsel %vm456_vm2, %v507_v23, %v508_v45  ;;  %v590_v22 = vrot.slane %v10248_v2, 1 }
  0x67   :  { %v158_v62 = vld [vmem:[%s12709_s0 + $0xc8] sm:$0xff]  ;;  %223 = vst.msk [vmem:[#allocation2 + $0x139] sm:$0xff] %vm23_vm0, %v157_v1  ;;  %v189_v63 = vld [vmem:[%s12709_s0 + $0x1c0] sm:$0xff]  ;;  %v159_v1 = vld [vmem:[%s12709_s0 + $0xd0] sm:$0xff]  ;;  %v512_v26 = vrot.slane %v10250_v40, 1  ;;  %8516 = vmatmul.mubr.msk.f32.gmra.mxu0 %vm23_vm0, %v506_v20 }
  0x68   :  { %v190_v19 = vld [vmem:[%s12709_s0 + $0x1c8] sm:$0xff]  ;;  %224 = vst.msk [vmem:[#allocation2 + $0x141] sm:$0xff] %vm23_vm0, %v158_v62  ;;  %255 = vst.msk [vmem:[#allocation2 + $0x2e9] sm:$0xff] %vm23_vm0, %v189_v63  ;;  %v160_v50 = vld [vmem:[%s12709_s0 + $0xd8] sm:$0xff]  ;;  %v589_v63 = vsel %vm456_vm2, %v587_v49, %v588_v55  ;;  %v592_v49 = vrot.slane %v10272_v28, 1 }
  0x69   :  { %256 = vst.msk [vmem:[#allocation2 + $0x2f1] sm:$0xff] %vm23_vm0, %v190_v19  ;;  %v191_v59 = vld [vmem:[%s12709_s0 + $0x1d0] sm:$0xff]  ;;  %225 = vst.msk [vmem:[#allocation2 + $0x151] sm:$0xff] %vm23_vm0, %v159_v1  ;;  %v192_v62 = vld [vmem:[%s12709_s0 + $0x1d8] sm:$0xff] }
  0x6a   :  { %226 = vst.msk [vmem:[#allocation2 + $0x159] sm:$0xff] %vm23_vm0, %v160_v50  ;;  %257 = vst.msk [vmem:[#allocation2 + $0x301] sm:$0xff] %vm23_vm0, %v191_v59  ;;  %v161_v23 = vld [vmem:[%s12709_s0 + $0xe0] sm:$0xff]  ;;  %v162_v27 = vld [vmem:[%s12709_s0 + $0xe8] sm:$0xff] }
  0x6b   :  { %258 = vst.msk [vmem:[#allocation2 + $0x309] sm:$0xff] %vm23_vm0, %v192_v62  ;;  %227 = vst.msk [vmem:[#allocation2 + $0x169] sm:$0xff] %vm23_vm0, %v161_v23  ;;  %v193_v19 = vld [vmem:[%s12709_s0 + $0x1e0] sm:$0xff]  ;;  %v194_v1 = vld [vmem:[%s12709_s0 + $0x1e8] sm:$0xff] }
  0x6c   :  { %228 = vst.msk [vmem:[#allocation2 + $0x171] sm:$0xff] %vm23_vm0, %v162_v27  ;;  %v10347_v50 = vld [vmem:[%s12710_s1 + $0x18] sm:$0xff]  ;;  %259 = vst.msk [vmem:[#allocation2 + $0x319] sm:$0xff] %vm23_vm0, %v193_v19  ;;  %v10357_v59 = vld [vmem:[%s12710_s1 + $0x20] sm:$0xff] }
  0x6d   :  { %260 = vst.msk [vmem:[#allocation2 + $0x321] sm:$0xff] %vm23_vm0, %v194_v1  ;;  %8780 = vmatprep.subr.mxu1 %v10347_v50 }
  0x6e   :  { %11 = vsyncpa [#allocation6], 0  ;;  %8564 = vmatmul.mubr.msk.f32.gmra.mxu1 %vm23_vm0, %v586_v44  ;;  %8518 = vmatprep.mubr.msk.f32.mxu0 %vm23_vm0, %v509_v7  ;;  %v511_v20 = vsel %vm456_vm2, %v508_v45, %v510_v9  ;;  %v10362_v62 = vld [vmem:[#allocation2 + $0x2c0] sm:$0xff]  ;;  %v515_v23 = vrot.slane %v10286_v15, 1  ;;  %v10365_v27 = vld [vmem:[#allocation2 + $0x2c8] sm:$0x3]  ;;  %v591_v19 = vsel %vm456_vm2, %v588_v55, %v590_v22  ;;  %v514_v1 = vsel %vm456_vm2, %v512_v26, %v513_v54 }
  0x6f   :  { %12792 = vst [vmem:[#allocation26_spill] sm:$0xff] %v10362_v62  ;;  %12793 = vst [vmem:[#allocation27_spill] sm:$0xff] %v10365_v27  ;;  %8566 = vmatprep.mubr.msk.f32.mxu1 %vm23_vm0, %v589_v63  ;;  %v593_v28 = vrot.slane %v10362_v62, 1  ;;  %v595_v44 = vrot.slane %v10365_v27, 1  ;;  %v10372_v2 = vld [vmem:[#allocation2 + $0x120] sm:$0xff]  ;;  %v10374_v7 = vld [vmem:[#allocation2 + $0x128] sm:$0xff]  ;;  %8878 = vmatprep.subr.mxu0 %v10357_v59 }
  0x70   :  { %12794 = vst [vmem:[#allocation28_spill] sm:$0xff] %v10374_v7  ;;  %v10376_v9 = vld [vmem:[#allocation2 + $0x130] sm:$0x3]  ;;  %v517_v45 = vrot.slane %v10372_v2, 1  ;;  %v518_v63 = vrot.slane %v10374_v7, 1  ;;  %v10383_v55 = vld [vmem:[#allocation2 + $0x2d8] sm:$0xff]  ;;  %8519 = vmatmul.mubr.msk.f32.gmra.mxu0 %vm23_vm0, %v511_v20  ;;  %v516_v51 = vsel %vm456_vm2, %v513_v54, %v515_v23 }
  0x71   :  { %12795 = vst [vmem:[#allocation29_spill] sm:$0xff] %v10376_v9  ;;  %v10381_v13 = vld [vmem:[#allocation2 + $0x2d0] sm:$0xff]  ;;  %12797 = vst [vmem:[#allocation31_spill] sm:$0xff] %v10383_v55  ;;  %v10385_v22 = vld [vmem:[#allocation2 + $0x138] sm:$0xff]  ;;  %v594_v26 = vsel %vm456_vm2, %v592_v49, %v593_v28  ;;  %v598_v62 = vrot.slane %v10383_v55, 1  ;;  %8521 = vmatprep.mubr.msk.f32.mxu0 %vm23_vm0, %v514_v1  ;;  %v520_v20 = vrot.slane %v10376_v9, 1  ;;  %v596_v55 = vsel %vm456_vm2, %v593_v28, %v595_v44 }
  0x72   :  { %12796 = vst [vmem:[#allocation30_spill] sm:$0xff] %v10381_v13  ;;  %12798 = vst [vmem:[#allocation32_spill] sm:$0xff] %v10385_v22  ;;  %v597_v27 = vrot.slane %v10381_v13, 1  ;;  %v10391_v10 = vld [vmem:[#allocation2 + $0x2e0] sm:$0x3]  ;;  %v10395_v58 = vld [vmem:[#allocation2 + $0x2e8] sm:$0xff]  ;;  %8567 = vmatmul.mubr.msk.f32.gmra.mxu1 %vm23_vm0, %v591_v19  ;;  %v519_v13 = vsel %vm456_vm2, %v517_v45, %v518_v63 }
  0x73   :  { %12799 = vst [vmem:[#allocation33_spill] sm:$0xff] %v10391_v10  ;;  %v10393_v0 = vld [vmem:[#allocation2 + $0x140] sm:$0xff]  ;;  %12801 = vst [vmem:[#allocation35_spill] sm:$0xff] %v10395_v58  ;;  %v600_v49 = vrot.slane %v10391_v10, 1  ;;  %v10402_v47 = vld [vmem:[#allocation2 + $0x2f0] sm:$0xff]  ;;  %8569 = vmatprep.mubr.msk.f32.mxu1 %vm23_vm0, %v594_v26  ;;  %v522_v41 = vrot.slane %v10385_v22, 1 }
  0x74   :  { %12800 = vst [vmem:[#allocation34_spill] sm:$0xff] %v10393_v0  ;;  %12802 = vst [vmem:[#allocation36_spill] sm:$0xff] %v10402_v47  ;;  %v523_v19 = vrot.slane %v10393_v0, 1  ;;  %v10409_v48 = vld [vmem:[#allocation2 + $0x148] sm:$0x3]  ;;  %v599_v54 = vsel %vm456_vm2, %v597_v27, %v598_v62  ;;  %v602_v23 = vrot.slane %v10395_v58, 1  ;;  %8522 = vmatmul.mubr.msk.f32.gmra.mxu0 %vm23_vm0, %v516_v51  ;;  %v521_v27 = vsel %vm456_vm2, %v518_v63, %v520_v20 }
  0x75   :  { %12803 = vst [vmem:[#allocation37_spill] sm:$0xff] %v10409_v48  ;;  %v10411_v1 = vld [vmem:[#allocation2 + $0x2f8] sm:$0x3]  ;;  %v603_v10 = vrot.slane %v10402_v47, 1  ;;  %v10416_v9 = vld [vmem:[#allocation2 + $0x150] sm:$0xff]  ;;  %v10421_v28 = vld [vmem:[#allocation2 + $0x300] sm:$0xff]  ;;  %8524 = vmatprep.mubr.msk.f32.mxu0 %vm23_vm0, %v519_v13  ;;  %v601_v58 = vsel %vm456_vm2, %v598_v62, %v600_v49 }
  0x76   :  { %12804 = vst [vmem:[#allocation38_spill] sm:$0xff] %v10411_v1  ;;  %12805 = vst [vmem:[#allocation39_spill] sm:$0xff] %v10416_v9  ;;  %v10418_v26 = vld [vmem:[#allocation2 + $0x158] sm:$0xff]  ;;  %v10423_v44 = vld [vmem:[#allocation2 + $0x308] sm:$0xff]  ;;  %8570 = vmatmul.mubr.msk.f32.gmra.mxu1 %vm23_vm0, %v596_v55  ;;  %v525_v45 = vrot.slane %v10409_v48, 1  ;;  %v605_v47 = vrot.slane %v10411_v1, 1  ;;  %v524_v51 = vsel %vm456_vm2, %v522_v41, %v523_v19 }
  0x77   :  { %12806 = vst [vmem:[#allocation40_spill] sm:$0xff] %v10418_v26  ;;  %12807 = vst [vmem:[#allocation41_spill] sm:$0xff] %v10421_v28  ;;  %8572 = vmatprep.mubr.msk.f32.mxu1 %vm23_vm0, %v599_v54  ;;  %v527_v0 = vrot.slane %v10416_v9, 1  ;;  %v528_v22 = vrot.slane %v10418_v26, 1  ;;  %v10435_v7 = vld [vmem:[#allocation2 + $0x160] sm:$0x3]  ;;  %v604_v13 = vsel %vm456_vm2, %v602_v23, %v603_v10 }
  0x78   :  { %12808 = vst [vmem:[#allocation42_spill] sm:$0xff] %v10423_v44  ;;  %v607_v63 = vrot.slane %v10421_v28, 1  ;;  %v608_v55 = vrot.slane %v10423_v44, 1  ;;  %v10440_v20 = vld [vmem:[#allocation2 + $0x310] sm:$0x3]  ;;  %v10442_v1 = vld [vmem:[#allocation2 + $0x168] sm:$0xff]  ;;  %8525 = vmatmul.mubr.msk.f32.gmra.mxu0 %vm23_vm0, %v521_v27  ;;  %v526_v49 = vsel %vm456_vm2, %v523_v19, %v525_v45  ;;  %v606_v23 = vsel %vm456_vm2, %v603_v10, %v605_v47 }
  0x79   :  { %v10444_v54 = vld [vmem:[#allocation2 + $0x170] sm:$0xff]  ;;  %v10447_v41 = vld [vmem:[#allocation2 + $0x318] sm:$0xff]  ;;  %v10449_v62 = vld [vmem:[#allocation2 + $0x320] sm:$0xff]  ;;  %8527 = vmatprep.mubr.msk.f32.mxu0 %vm23_vm0, %v524_v51  ;;  %v530_v44 = vrot.slane %v10435_v7, 1  ;;  %v529_v28 = vsel %vm456_vm2, %v527_v0, %v528_v22  ;;  %v610_v27 = vrot.slane %v10440_v20, 1  ;;  %v532_v26 = vrot.slane %v10442_v1, 1 }
  0x7a   :  { %12809 = vst [vmem:[#allocation43_spill] sm:$0xff] %v10449_v62  ;;  %8573 = vmatmul.mubr.msk.f32.gmra.mxu1 %vm23_vm0, %v601_v58  ;;  %v533_v9 = vrot.slane %v10444_v54, 1  ;;  %v10461_v48 = vld [vmem:[#allocation2 + $0x178] sm:$0x3]  ;;  %v609_v58 = vsel %vm456_vm2, %v607_v63, %v608_v55  ;;  %v612_v19 = vrot.slane %v10447_v41, 1  ;;  %v613_v47 = vrot.slane %v10449_v62, 1 }
  0x7b   :  { %8575 = vmatprep.mubr.msk.f32.mxu1 %vm23_vm0, %v604_v13  ;;  %v10466_v10 = vld [vmem:[#allocation2 + $0x328] sm:$0x3]  ;;  %v531_v0 = vsel %vm456_vm2, %v528_v22, %v530_v44  ;;  %v535_v45 = vrot.slane %v10461_v48, 1  ;;  %v1646_v51 = vrot.slane %v9938_v24, 2  ;;  %v611_v13 = vsel %vm456_vm2, %v608_v55, %v610_v27  ;;  %s9598_s24 = smov [#allocation5]  }
  0x7c   :  { %8528 = vmatmul.mubr.msk.f32.gmra.mxu0 %vm23_vm0, %v526_v49  ;;  %v534_v63 = vsel %vm456_vm2, %v532_v26, %v533_v9  ;;  %v615_v62 = vrot.slane %v10466_v10, 1  ;;  %v1647_v49 = vrot.slane %v9940_v25, 2  ;;  %vm1645_vm3 = vcmask 1045504   ;;  %s7303_s25 = sshll.u32 %s9598_s24, 4  ;;  %s7304_s25 = int_to_ptr.vmem [resolvable:$true] %s7303_s25 }
  0x7d   :  { %8530 = vmatprep.mubr.msk.f32.mxu0 %vm23_vm0, %v529_v28  ;;  %v1649_v22 = vrot.slane %v9947_v31, 2  ;;  %v536_v28 = vsel %vm456_vm2, %v533_v9, %v535_v45  ;;  %v1651_v55 = vrot.slane %v9950_v35, 2  ;;  %v1652_v27 = vrot.slane %v9953_v38, 2 }
  0x7e   :  { %8576 = vmatmul.mubr.msk.f32.gmra.mxu1 %vm23_vm0, %v606_v23  ;;  %v614_v23 = vsel %vm456_vm2, %v612_v19, %v613_v47  ;;  %v616_v26 = vsel %vm456_vm2, %v613_v47, %v615_v62  ;;  %v1648_v44 = vsel %vm1645_vm3, %v1646_v51, %v1647_v49  ;;  %v1654_v9 = vrot.slane %v9960_v46, 2  ;;  %v10504_v47 = vld [vmem:[%s12710_s1 + $0x28] sm:$0xff] }
  0x7f   :  { %8578 = vmatprep.mubr.msk.f32.mxu1 %vm23_vm0, %v609_v58  ;;  %v1650_v31 = vsel %vm1645_vm3, %v1647_v49, %v1649_v22  ;;  %v1656_v62 = vrot.slane %v9966_v52, 2  ;;  %v1657_v58 = vrot.slane %v9968_v53, 2  ;;  %v1653_v19 = vsel %vm1645_vm3, %v1651_v55, %v1652_v27 }
  0x80   :  { %8531 = vmatmul.mubr.msk.f32.gmra.mxu0 %vm23_vm0, %v531_v0  ;;  %v1659_v46 = vrot.slane %v9975_v60, 2  ;;  %v1661_v45 = vrot.slane %v9982_v4, 2  ;;  %v1662_v51 = vrot.slane %v9984_v5, 2  ;;  %v1664_v60 = vrot.slane %v9995_v16, 2 }
  0x81   :  { %8533 = vmatprep.mubr.msk.f32.mxu0 %vm23_vm0, %v534_v63  ;;  %v1658_v0 = vsel %vm1645_vm3, %v1656_v62, %v1657_v58  ;;  %v1669_v16 = vrot.slane %v10010_v30, 2  ;;  %v1671_v63 = vrot.slane %v10014_v37, 2  ;;  %v1672_v49 = vrot.slane %v10016_v39, 2 }
  0x82   :  { %8579 = vmatmul.mubr.msk.f32.gmra.mxu1 %vm23_vm0, %v611_v13  ;;  %v1667_v13 = vrot.slane %v9997_v17, 2  ;;  %v1674_v30 = vrot.slane %v10021_v42, 2  ;;  %v1677_v22 = vrot.slane %v10142_v36, 2  ;;  %v1679_v42 = vrot.slane %v10147_v43, 2 }
  0x83   :  { %8581 = vmatprep.mubr.msk.f32.mxu1 %vm23_vm0, %v614_v23  ;;  %v1676_v23 = vrot.slane %v10128_v29, 2  ;;  %v1684_v43 = vrot.slane %v10175_v3, 2  ;;  %v1687_v55 = vrot.slane %v10187_v12, 2  ;;  %v1689_v3 = vrot.slane %v10198_v21, 2 }
  0x84   :  { %8534 = vmatmul.mubr.msk.f32.gmra.mxu0 %vm23_vm0, %v536_v28  ;;  %v1681_v28 = vrot.slane %v10162_v56, 2  ;;  %v1694_v21 = vrot.slane %v10225_v61, 2  ;;  %v1697_v62 = vrot.slane %v10234_v14, 2  ;;  %v1699_v61 = vrot.slane %v10241_v18, 2 }
  0x85   :  { %8684 = vmatprep.mubr.msk.f32.mxu0 %vm23_vm0, %v1648_v44  ;;  %v1686_v44 = vrot.slane %v10177_v6, 2  ;;  %v1704_v18 = vrot.slane %v10286_v15, 2  ;;  %vm20_vm4 = vcmask 57344  }
  0x86   :  { %8582 = vmatmul.mubr.msk.f32.gmra.mxu1 %vm23_vm0, %v616_v26  ;;  %v1682_v26 = vrot.slane %v10164_v57, 2 }
  0x87   :  { %8586 = vmatprep.mubr.msk.f32.mxu1 %vm23_vm0, %v9938_v24  ;;  %v1655_v24 = vsel %vm1645_vm3, %v1652_v27, %v1654_v9  ;;  %v1691_v27 = vrot.slane %v10206_v32, 2  ;;  %v1696_v9 = vrot.slane %v10232_v8, 2 }
  0x88   :  { %8685 = vmatmul.mubr.msk.f32.vlgmr.msra.gmra.mxu0 %vm23_vm0, %v1650_v31  ;;  %v1692_v31 = vrot.slane %v10209_v33, 2 }
  0x89   :  { %8879 = vmatpush3.msra.mxu0 %v10357_v59  ;;  %8687 = vmatprep.mubr.msk.f32.mxu0 %vm23_vm0, %v1653_v19  ;;  %v1666_v59 = vrot.slane %v9990_v11, 2  ;;  %v1702_v19 = vrot.slane %v10260_v34, 2 }
  0x8a   :  { %8587 = vmatmul.mubr.msk.f32.vlgmr.msra.gmra.mxu1 %vm23_vm0, %v9940_v25  ;;  %v10520_v25 = vld [vmem:[%s12710_s1 + $0x30] sm:$0xff] }
  0x8b   :  { %8781 = vmatpush3.msra.mxu1 %v10347_v50  ;;  %8589 = vmatprep.mubr.msk.f32.mxu1 %vm23_vm0, %v9950_v35  ;;  %v1660_v35 = vsel %vm1645_vm3, %v1657_v58, %v1659_v46  ;;  %v1663_v50 = vsel %vm1645_vm3, %v1661_v45, %v1662_v51  ;;  %v1701_v58 = vrot.slane %v10250_v40, 2  ;;  %v12810_v46 = vld [vmem:[#allocation28_spill] sm:$0xff]  ;;  %v12811_v45 = vld [vmem:[#allocation29_spill] sm:$0xff] }
  0x8c   :  { %8976 = vmatprep.subr.mxu1 %v10504_v47  ;;  %8688 = vmatmul.mubr.msk.f32.gmra.mxu0 %vm23_vm0, %v1655_v24  ;;  %v1706_v24 = vrot.slane %v10372_v2, 2  ;;  %v1709_v15 = vrot.slane %v12811_v45, 2  ;;  %v9386_v45 = vld [vmem:[#allocation2 + $0x218] sm:$0xff] }
  0x8d   :  { %9074 = vmatprep.subr.mxu0 %v10520_v25  ;;  %8690 = vmatprep.mubr.msk.f32.mxu0 %vm23_vm0, %v1658_v0  ;;  %v1707_v0 = vrot.slane %v12810_v46, 2 }
  0x8e   :  { %8590 = vmatmul.mubr.msk.f32.gmra.mxu1 %vm23_vm0, %v9953_v38  ;;  %v1665_v38 = vsel %vm1645_vm3, %v1662_v51, %v1664_v60  ;;  %v12812_v51 = vld [vmem:[#allocation32_spill] sm:$0xff]  ;;  %v12813_v60 = vld [vmem:[#allocation34_spill] sm:$0xff] }
  0x8f   :  { %8592 = vmatprep.mubr.msk.f32.mxu1 %vm23_vm0, %v9966_v52  ;;  %v1668_v52 = vsel %vm1645_vm3, %v1666_v59, %v1667_v13  ;;  %v12814_v59 = vld [vmem:[#allocation37_spill] sm:$0xff] }
  0x90   :  { %8691 = vmatmul.mubr.msk.f32.gmra.mxu0 %vm23_vm0, %v1660_v35  ;;  %v1711_v35 = vrot.slane %v12812_v51, 2 }
  0x91   :  { %8693 = vmatprep.mubr.msk.f32.mxu0 %vm23_vm0, %v1663_v50  ;;  %v1712_v50 = vrot.slane %v12813_v60, 2 }
  0x92   :  { %8593 = vmatmul.mubr.msk.f32.gmra.mxu1 %vm23_vm0, %v9968_v53  ;;  %v1670_v53 = vsel %vm1645_vm3, %v1667_v13, %v1669_v16  ;;  %v1714_v13 = vrot.slane %v12814_v59, 2  ;;  %v9389_v59 = vld [vmem:[#allocation2 + $0x230] sm:$0xff] }
  0x93   :  { %8595 = vmatprep.mubr.msk.f32.mxu1 %vm23_vm0, %v9982_v4  ;;  %v1673_v4 = vsel %vm1645_vm3, %v1671_v63, %v1672_v49 }
  0x94   :  { %8694 = vmatmul.mubr.msk.f32.gmra.mxu0 %vm23_vm0, %v1665_v38  ;;  %v12815_v38 = vld [vmem:[#allocation39_spill] sm:$0xff] }
  0x95   :  { %8696 = vmatprep.mubr.msk.f32.mxu0 %vm23_vm0, %v1668_v52  ;;  %v1716_v16 = vrot.slane %v12815_v38, 2  ;;  %v12816_v52 = vld [vmem:[#allocation40_spill] sm:$0xff] }
  0x96   :  { %8596 = vmatmul.mubr.msk.f32.gmra.mxu1 %vm23_vm0, %v9984_v5  ;;  %v1675_v5 = vsel %vm1645_vm3, %v1672_v49, %v1674_v30  ;;  %v1717_v63 = vrot.slane %v12816_v52, 2  ;;  %v1715_v49 = vsel %vm1645_vm3, %v1712_v50, %v1714_v13  ;;  %v1752_v13 = vrot.slane %v9389_v59, 2 }
  0x97   :  { %8598 = vmatprep.mubr.msk.f32.mxu1 %vm23_vm0, %v9990_v11  ;;  %v1678_v11 = vsel %vm1645_vm3, %v1676_v23, %v1677_v22  ;;  %v1722_v23 = vrot.slane %v10444_v54, 2 }
  0x98   :  { %8697 = vmatmul.mubr.msk.f32.gmra.mxu0 %vm23_vm0, %v1670_v53  ;;  %v164_v53 = vld [vmem:[%s12709_s0 + $0xf8] sm:$0xff]  ;;  %v1718_v30 = vsel %vm1645_vm3, %v1716_v16, %v1717_v63 }
  0x99   :  { %8699 = vmatprep.mubr.msk.f32.mxu0 %vm23_vm0, %v1673_v4  ;;  %v1721_v4 = vrot.slane %v10442_v1, 2  ;;  %230 = vst.msk [vmem:[#allocation2 + $0x189] sm:$0xff] %vm23_vm0, %v164_v53 }
  0x9a   :  { %8599 = vmatmul.mubr.msk.f32.gmra.mxu1 %vm23_vm0, %v9997_v17  ;;  %v1680_v17 = vsel %vm1645_vm3, %v1677_v22, %v1679_v42  ;;  %v1724_v22 = vrot.slane %v10461_v48, 2  ;;  %v9373_v42 = vld [vmem:[#allocation2 + $0x1b0] sm:$0xff] }
  0x9b   :  { %8601 = vmatprep.mubr.msk.f32.mxu1 %vm23_vm0, %v10014_v37  ;;  %v1683_v37 = vsel %vm1645_vm3, %v1681_v28, %v1682_v26  ;;  %v9374_v28 = vld [vmem:[#allocation2 + $0x1b8] sm:$0xff] }
  0x9c   :  { %8700 = vmatmul.mubr.msk.f32.gmra.mxu0 %vm23_vm0, %v1675_v5  ;;  %v1723_v5 = vsel %vm1645_vm3, %v1721_v4, %v1722_v23 }
  0x9d   :  { %8702 = vmatprep.mubr.msk.f32.mxu0 %vm23_vm0, %v1678_v11  ;;  %v1726_v11 = vrot.slane %v9373_v42, 2 }
  0x9e   :  { %8602 = vmatmul.mubr.msk.f32.gmra.mxu1 %vm23_vm0, %v10016_v39  ;;  %v1685_v39 = vsel %vm1645_vm3, %v1682_v26, %v1684_v43  ;;  %v1727_v26 = vrot.slane %v9374_v28, 2  ;;  %v9375_v43 = vld [vmem:[#allocation2 + $0x1c0] sm:$0x3] }
  0x9f   :  { %8604 = vmatprep.mubr.msk.f32.mxu1 %vm23_vm0, %v10128_v29  ;;  %v1688_v29 = vsel %vm1645_vm3, %v1686_v44, %v1687_v55  ;;  %v1729_v48 = vrot.slane %v9375_v43, 2  ;;  %v9376_v44 = vld [vmem:[#allocation2 + $0x1c8] sm:$0xff]  ;;  %v12824_v43 = vld [vmem:[#allocation16_spill] sm:$0xff] }
  0xa0   :  { %8703 = vmatmul.mubr.msk.f32.gmra.mxu0 %vm23_vm0, %v1680_v17  ;;  %v1725_v17 = vsel %vm1645_vm3, %v1722_v23, %v1724_v22 }
  0xa1   :  { %8705 = vmatprep.mubr.msk.f32.mxu0 %vm23_vm0, %v1683_v37  ;;  %v1728_v37 = vsel %vm1645_vm3, %v1726_v11, %v1727_v26 }
  0xa2   :  { %8605 = vmatmul.mubr.msk.f32.gmra.mxu1 %vm23_vm0, %v10142_v36  ;;  %v1690_v36 = vsel %vm1645_vm3, %v1687_v55, %v1689_v3  ;;  %v1731_v55 = vrot.slane %v9376_v44, 2 }
  0xa3   :  { %8607 = vmatprep.mubr.msk.f32.mxu1 %vm23_vm0, %v10162_v56  ;;  %v1693_v56 = vsel %vm1645_vm3, %v1691_v27, %v1692_v31  ;;  %v9378_v27 = vld [vmem:[#allocation2 + $0x1d8] sm:$0x3] }
  0xa4   :  { %8706 = vmatmul.mubr.msk.f32.gmra.mxu0 %vm23_vm0, %v1685_v39  ;;  %v9377_v39 = vld [vmem:[#allocation2 + $0x1d0] sm:$0xff] }
  0xa5   :  { %8708 = vmatprep.mubr.msk.f32.mxu0 %vm23_vm0, %v1688_v29  ;;  %v1732_v3 = vrot.slane %v9377_v39, 2  ;;  %v1730_v29 = vsel %vm1645_vm3, %v1727_v26, %v1729_v48  ;;  %v1766_v48 = vrot.slane %v12824_v43, 2 }
  0xa6   :  { %8608 = vmatmul.mubr.msk.f32.gmra.mxu1 %vm23_vm0, %v10164_v57  ;;  %v1695_v57 = vsel %vm1645_vm3, %v1692_v31, %v1694_v21  ;;  %v1734_v31 = vrot.slane %v9378_v27, 2  ;;  %v12827_v27 = vld [vmem:[#allocation19_spill] sm:$0xff] }
  0xa7   :  { %8610 = vmatprep.mubr.msk.f32.mxu1 %vm23_vm0, %v10177_v6  ;;  %v1698_v6 = vsel %vm1645_vm3, %v1696_v9, %v1697_v62 }
  0xa8   :  { %8709 = vmatmul.mubr.msk.f32.gmra.mxu0 %vm23_vm0, %v1690_v36  ;;  %v9379_v36 = vld [vmem:[#allocation2 + $0x1e0] sm:$0xff] }
  0xa9   :  { %8711 = vmatprep.mubr.msk.f32.mxu0 %vm23_vm0, %v1693_v56  ;;  %v1736_v21 = vrot.slane %v9379_v36, 2  ;;  %v9380_v56 = vld [vmem:[#allocation2 + $0x1e8] sm:$0xff] }
  0xaa   :  { %8611 = vmatmul.mubr.msk.f32.gmra.mxu1 %vm23_vm0, %v10187_v12  ;;  %v1700_v12 = vsel %vm1645_vm3, %v1697_v62, %v1699_v61  ;;  %v1737_v9 = vrot.slane %v9380_v56, 2  ;;  %v9381_v62 = vld [vmem:[#allocation2 + $0x1f0] sm:$0x3] }
  0xab   :  { %8613 = vmatprep.mubr.msk.f32.mxu1 %vm23_vm0, %v10206_v32  ;;  %v1703_v32 = vsel %vm1645_vm3, %v1701_v58, %v1702_v19 }
  0xac   :  { %8712 = vmatmul.mubr.msk.f32.gmra.mxu0 %vm23_vm0, %v1695_v57  ;;  %v1739_v57 = vrot.slane %v9381_v62, 2  ;;  %v1738_v61 = vsel %vm1645_vm3, %v1736_v21, %v1737_v9  ;;  %v12830_v62 = vld [vmem:[#allocation22_spill] sm:$0xff] }
  0xad   :  { %8714 = vmatprep.mubr.msk.f32.mxu0 %vm23_vm0, %v1698_v6  ;;  %v9382_v6 = vld [vmem:[#allocation2 + $0x1f8] sm:$0xff] }
  0xae   :  { %8614 = vmatmul.mubr.msk.f32.gmra.mxu1 %vm23_vm0, %v10209_v33  ;;  %v1705_v33 = vsel %vm1645_vm3, %v1702_v19, %v1704_v18  ;;  %v1741_v58 = vrot.slane %v9382_v6, 2  ;;  %v9383_v19 = vld [vmem:[#allocation2 + $0x200] sm:$0xff]  ;;  %v1740_v18 = vsel %vm1645_vm3, %v1737_v9, %v1739_v57  ;;  %v1776_v57 = vrot.slane %v12830_v62, 2 }
  0xaf   :  { %8616 = vmatprep.mubr.msk.f32.mxu1 %vm23_vm0, %v10232_v8  ;;  %v1708_v8 = vsel %vm1645_vm3, %v1706_v24, %v1707_v0 }
  0xb0   :  { %8715 = vmatmul.mubr.msk.f32.gmra.mxu0 %vm23_vm0, %v1700_v12  ;;  %v1742_v12 = vrot.slane %v9383_v19, 2 }
  0xb1   :  { %8717 = vmatprep.mubr.msk.f32.mxu0 %vm23_vm0, %v1703_v32  ;;  %v9384_v32 = vld [vmem:[#allocation2 + $0x208] sm:$0x3] }
  0xb2   :  { %8617 = vmatmul.mubr.msk.f32.gmra.mxu1 %vm23_vm0, %v10234_v14  ;;  %v1710_v14 = vsel %vm1645_vm3, %v1707_v0, %v1709_v15  ;;  %v1744_v24 = vrot.slane %v9384_v32, 2  ;;  %v9385_v0 = vld [vmem:[#allocation2 + $0x210] sm:$0xff]  ;;  %v1747_v15 = vrot.slane %v9386_v45, 2  ;;  %v12833_v32 = vld [vmem:[#allocation25_spill] sm:$0xff] }
  0xb3   :  { %8619 = vmatprep.mubr.msk.f32.mxu1 %vm23_vm0, %v10250_v40  ;;  %v1713_v40 = vsel %vm1645_vm3, %v1711_v35, %v1712_v50  ;;  %v9388_v50 = vld [vmem:[#allocation2 + $0x228] sm:$0xff] }
  0xb4   :  { %8718 = vmatmul.mubr.msk.f32.gmra.mxu0 %vm23_vm0, %v1705_v33  ;;  %v1746_v33 = vrot.slane %v9385_v0, 2 }
  0xb5   :  { %8720 = vmatprep.mubr.msk.f32.mxu0 %vm23_vm0, %v1708_v8  ;;  %v1745_v8 = vsel %vm1645_vm3, %v1742_v12, %v1744_v24  ;;  %v1781_v24 = vrot.slane %v12833_v32, 2 }
  0xb6   :  { %8620 = vmatmul.mubr.msk.f32.gmra.mxu1 %vm23_vm0, %v10260_v34  ;;  %v163_v34 = vld [vmem:[%s12709_s0 + $0xf0] sm:$0xff] }
  0xb7   :  { %8622 = vmatprep.mubr.msk.f32.mxu1 %vm23_vm0, %v10372_v2  ;;  %v1719_v2 = vrot.slane %v10435_v7, 2  ;;  %229 = vst.msk [vmem:[#allocation2 + $0x181] sm:$0xff] %vm23_vm0, %v163_v34 }
  0xb8   :  { %8721 = vmatmul.mubr.msk.f32.gmra.mxu0 %vm23_vm0, %v1710_v14  ;;  %v1751_v14 = vrot.slane %v9388_v50, 2 }
  0xb9   :  { %8723 = vmatprep.mubr.msk.f32.mxu0 %vm23_vm0, %v1713_v40  ;;  %v1720_v7 = vsel %vm1645_vm3, %v1717_v63, %v1719_v2  ;;  %v12818_v63 = vld [vmem:[#allocation10_spill] sm:$0xff] }
  0xba   :  { %8623 = vmatmul.mubr.msk.f32.gmra.mxu1 %vm23_vm0, %v12810_v46  ;;  %v1743_v46 = vsel %vm1645_vm3, %v1741_v58, %v1742_v12  ;;  %v1756_v34 = vrot.slane %v12818_v63, 2 }
  0xbb   :  { %8625 = vmatprep.mubr.msk.f32.mxu1 %vm23_vm0, %v12812_v51  ;;  %v9387_v51 = vld [vmem:[#allocation2 + $0x220] sm:$0x3] }
  0xbc   :  { %8724 = vmatmul.mubr.msk.f32.gmra.mxu0 %vm23_vm0, %v1715_v49  ;;  %v1749_v35 = vrot.slane %v9387_v51, 2  ;;  %v12819_v49 = vld [vmem:[#allocation11_spill] sm:$0xff]  ;;  %v12836_v51 = vld [vmem:[#allocation30_spill] sm:$0xff] }
  0xbd   :  { %8726 = vmatprep.mubr.msk.f32.mxu0 %vm23_vm0, %v1718_v30  ;;  %v1757_v2 = vrot.slane %v12819_v49, 2  ;;  %v12820_v30 = vld [vmem:[#allocation12_spill] sm:$0xff] }
  0xbe   :  { %8626 = vmatmul.mubr.msk.f32.gmra.mxu1 %vm23_vm0, %v12813_v60  ;;  %v1748_v60 = vsel %vm1645_vm3, %v1746_v33, %v1747_v15  ;;  %v1750_v40 = vsel %vm1645_vm3, %v1747_v15, %v1749_v35  ;;  %v1759_v4 = vrot.slane %v12820_v30, 2  ;;  %v1786_v35 = vrot.slane %v12836_v51, 2  ;;  %v12842_v30 = vld [vmem:[#allocation41_spill] sm:$0xff] }
  0xbf   :  { %8628 = vmatprep.mubr.msk.f32.mxu1 %vm23_vm0, %v12815_v38  ;;  %v12817_v38 = vld [vmem:[#allocation9_spill] sm:$0xff]  ;;  %v1758_v23 = vsel %vm1645_vm3, %v1756_v34, %v1757_v2 }
  0xc0   :  { %8727 = vmatmul.mubr.msk.f32.gmra.mxu0 %vm23_vm0, %v1720_v7  ;;  %v1754_v16 = vrot.slane %v12817_v38, 2  ;;  %v12821_v7 = vld [vmem:[#allocation13_spill] sm:$0xff]  ;;  %v1760_v11 = vsel %vm1645_vm3, %v1757_v2, %v1759_v4  ;;  %v12839_v38 = vld [vmem:[#allocation35_spill] sm:$0xff]  ;;  %v1796_v4 = vrot.slane %v12842_v30, 2 }
  0xc1   :  { %8729 = vmatprep.mubr.msk.f32.mxu0 %vm23_vm0, %v1723_v5  ;;  %v1761_v22 = vrot.slane %v12821_v7, 2  ;;  %v12822_v5 = vld [vmem:[#allocation14_spill] sm:$0xff] }
  0xc2   :  { %8629 = vmatmul.mubr.msk.f32.gmra.mxu1 %vm23_vm0, %v12816_v52  ;;  %v1753_v52 = vsel %vm1645_vm3, %v1751_v14, %v1752_v13  ;;  %v1755_v53 = vsel %vm1645_vm3, %v1752_v13, %v1754_v16  ;;  %v1791_v16 = vrot.slane %v12839_v38, 2 }
  0xc3   :  { %8631 = vmatprep.mubr.msk.f32.mxu1 %vm23_vm0, %v10442_v1  ;;  %v1733_v1 = vsel %vm1645_vm3, %v1731_v55, %v1732_v3 }
  0xc4   :  { %8730 = vmatmul.mubr.msk.f32.gmra.mxu0 %vm23_vm0, %v1725_v17 }
  0xc5   :  { %8732 = vmatprep.mubr.msk.f32.mxu0 %vm23_vm0, %v1728_v37  ;;  %v12825_v37 = vld [vmem:[#allocation17_spill] sm:$0xff] }
  0xc6   :  { %8632 = vmatmul.mubr.msk.f32.gmra.mxu1 %vm23_vm0, %v10444_v54  ;;  %v1735_v54 = vsel %vm1645_vm3, %v1732_v3, %v1734_v31  ;;  %v1771_v31 = vrot.slane %v12827_v27, 2 }
  0xc7   :  { %8634 = vmatprep.mubr.msk.f32.mxu1 %vm23_vm0, %v9373_v42  ;;  %v1762_v42 = vrot.slane %v12822_v5, 2 }
  0xc8   :  { %8733 = vmatmul.mubr.msk.f32.gmra.mxu0 %vm23_vm0, %v1730_v29 }
  0xc9   :  { %8735 = vmatprep.mubr.msk.f32.mxu0 %vm23_vm0, %v1733_v1  ;;  %v1763_v17 = vsel %vm1645_vm3, %v1761_v22, %v1762_v42  ;;  %v12828_v1 = vld [vmem:[#allocation20_spill] sm:$0xff]  ;;  %v195_v22 = vld [vmem:[%s12709_s0 + $0x1f0] sm:$0xff] }
  0xca   :  { %8635 = vmatmul.mubr.msk.f32.gmra.mxu1 %vm23_vm0, %v9374_v28  ;;  %v12823_v28 = vld [vmem:[#allocation15_spill] sm:$0xff]  ;;  %261 = vst.msk [vmem:[#allocation2 + $0x331] sm:$0xff] %vm23_vm0, %v195_v22 }
  0xcb   :  { %8637 = vmatprep.mubr.msk.f32.mxu1 %vm23_vm0, %v9376_v44  ;;  %v1764_v26 = vrot.slane %v12823_v28, 2  ;;  %v1767_v44 = vrot.slane %v12825_v37, 2 }
  0xcc   :  { %8736 = vmatmul.mubr.msk.f32.gmra.mxu0 %vm23_vm0, %v1735_v54 }
  0xcd   :  { %8738 = vmatprep.mubr.msk.f32.mxu0 %vm23_vm0, %v1738_v61  ;;  %v1765_v55 = vsel %vm1645_vm3, %v1762_v42, %v1764_v26  ;;  %v1768_v29 = vsel %vm1645_vm3, %v1766_v48, %v1767_v44  ;;  %v12831_v61 = vld [vmem:[#allocation23_spill] sm:$0xff]  ;;  %v1799_v42 = vrot.slane %v10440_v20, 2  ;;  %v1801_v26 = vrot.slane %v10447_v41, 2 }
  0xce   :  { %8638 = vmatmul.mubr.msk.f32.gmra.mxu1 %vm23_vm0, %v9377_v39  ;;  %v12826_v39 = vld [vmem:[#allocation18_spill] sm:$0xff]  ;;  %v2385_v48 = vld [vmem:[#allocation2 + $0x18] sm:$0xff] }
  0xcf   :  { %8640 = vmatprep.mubr.msk.f32.mxu1 %vm23_vm0, %v9379_v36  ;;  %v1769_v3 = vrot.slane %v12826_v39, 2  ;;  %v1772_v36 = vrot.slane %v12828_v1, 2  ;;  %v3156_v39 = vrot.slane %v2385_v48, 1 }
  0xd0   :  { %8739 = vmatmul.mubr.msk.f32.gmra.mxu0 %vm23_vm0, %v1740_v18 }
  0xd1   :  { %8741 = vmatprep.mubr.msk.f32.mxu0 %vm23_vm0, %v1743_v46  ;;  %v1770_v21 = vsel %vm1645_vm3, %v1767_v44, %v1769_v3  ;;  %v1773_v54 = vsel %vm1645_vm3, %v1771_v31, %v1772_v36  ;;  %v12834_v46 = vld [vmem:[#allocation26_spill] sm:$0xff]  ;;  %v1804_v44 = vrot.slane %v10466_v10, 2  ;;  %v2389_v10 = vld [vmem:[#allocation2 + $0x38] sm:$0xff] }
  0xd2   :  { %8641 = vmatmul.mubr.msk.f32.gmra.mxu1 %vm23_vm0, %v9380_v56  ;;  %v12829_v56 = vld [vmem:[#allocation21_spill] sm:$0xff] }
  0xd3   :  { %8643 = vmatprep.mubr.msk.f32.mxu1 %vm23_vm0, %v9382_v6  ;;  %v1774_v9 = vrot.slane %v12829_v56, 2  ;;  %v1777_v6 = vrot.slane %v12831_v61, 2  ;;  %v2391_v56 = vld [vmem:[#allocation2 + $0x48] sm:$0xff] }
  0xd4   :  { %8742 = vmatmul.mubr.msk.f32.gmra.mxu0 %vm23_vm0, %v1745_v8 }
  0xd5   :  { %8744 = vmatprep.mubr.msk.f32.mxu0 %vm23_vm0, %v1748_v60  ;;  %v1775_v58 = vsel %vm1645_vm3, %v1772_v36, %v1774_v9  ;;  %v1778_v18 = vsel %vm1645_vm3, %v1776_v57, %v1777_v6  ;;  %v12837_v60 = vld [vmem:[#allocation31_spill] sm:$0xff] }
  0xd6   :  { %8644 = vmatmul.mubr.msk.f32.gmra.mxu1 %vm23_vm0, %v9383_v19  ;;  %v12832_v19 = vld [vmem:[#allocation24_spill] sm:$0xff]  ;;  %v2392_v9 = vld [vmem:[#allocation2 + $0x50] sm:$0xff] }
  0xd7   :  { %8646 = vmatprep.mubr.msk.f32.mxu1 %vm23_vm0, %v9385_v0  ;;  %v1779_v12 = vrot.slane %v12832_v19, 2  ;;  %v1782_v0 = vrot.slane %v12834_v46, 2  ;;  %v2394_v19 = vld [vmem:[#allocation2 + $0x60] sm:$0xff] }
  0xd8   :  { %8745 = vmatmul.mubr.msk.f32.gmra.mxu0 %vm23_vm0, %v1750_v40 }
  0xd9   :  { %8747 = vmatprep.mubr.msk.f32.mxu0 %vm23_vm0, %v1753_v52  ;;  %v1780_v33 = vsel %vm1645_vm3, %v1777_v6, %v1779_v12  ;;  %v1783_v8 = vsel %vm1645_vm3, %v1781_v24, %v1782_v0  ;;  %v12840_v52 = vld [vmem:[#allocation36_spill] sm:$0xff]  ;;  %v3167_v6 = vrot.slane %v2392_v9, 1  ;;  %v2395_v12 = vld [vmem:[#allocation2 + $0x68] sm:$0xff] }
  0xda   :  { %8647 = vmatmul.mubr.msk.f32.gmra.mxu1 %vm23_vm0, %v9386_v45  ;;  %v12835_v45 = vld [vmem:[#allocation27_spill] sm:$0xff] }
  0xdb   :  { %8649 = vmatprep.mubr.msk.f32.mxu1 %vm23_vm0, %v9388_v50  ;;  %v1784_v15 = vrot.slane %v12835_v45, 2  ;;  %v1787_v50 = vrot.slane %v12837_v60, 2 }
  0xdc   :  { %8748 = vmatmul.mubr.msk.f32.gmra.mxu0 %vm23_vm0, %v1755_v53 }
  0xdd   :  { %8750 = vmatprep.mubr.msk.f32.mxu0 %vm23_vm0, %v1758_v23  ;;  %v1785_v14 = vsel %vm1645_vm3, %v1782_v0, %v1784_v15  ;;  %v1788_v40 = vsel %vm1645_vm3, %v1786_v35, %v1787_v50  ;;  %v12843_v23 = vld [vmem:[#allocation42_spill] sm:$0xff]  ;;  %v3171_v15 = vrot.slane %v2394_v19, 1  ;;  %v7771_v35 = vld [vmem:[%s12710_s1 + $0x38] sm:$0xff] }
  0xde   :  { %8650 = vmatmul.mubr.msk.f32.gmra.mxu1 %vm23_vm0, %v9389_v59  ;;  %v12838_v59 = vld [vmem:[#allocation33_spill] sm:$0xff] }
  0xdf   :  { %8652 = vmatprep.mubr.msk.f32.mxu1 %vm23_vm0, %v12818_v63  ;;  %v1789_v13 = vrot.slane %v12838_v59, 2  ;;  %v1792_v63 = vrot.slane %v12840_v52, 2 }
  0xe0   :  { %8751 = vmatmul.mubr.msk.f32.gmra.mxu0 %vm23_vm0, %v1760_v11  ;;  %v196_v11 = vld [vmem:[%s12709_s0 + $0x1f8] sm:$0xff] }
  0xe1   :  { %8753 = vmatprep.mubr.msk.f32.mxu0 %vm23_vm0, %v1763_v17  ;;  %v1790_v34 = vsel %vm1645_vm3, %v1787_v50, %v1789_v13  ;;  %v1793_v53 = vsel %vm1645_vm3, %v1791_v16, %v1792_v63  ;;  %v12844_v17 = vld [vmem:[#allocation43_spill] sm:$0xff]  ;;  %262 = vst.msk [vmem:[#allocation2 + $0x339] sm:$0xff] %vm23_vm0, %v196_v11  ;;  %v2398_v50 = vld [vmem:[#allocation2 + $0x80] sm:$0xff] }
  0xe2   :  { %8653 = vmatmul.mubr.msk.f32.gmra.mxu1 %vm23_vm0, %v12819_v49  ;;  %v12841_v49 = vld [vmem:[#allocation38_spill] sm:$0xff] }
  0xe3   :  { %8655 = vmatprep.mubr.msk.f32.mxu1 %vm23_vm0, %v12821_v7  ;;  %v1794_v2 = vrot.slane %v12841_v49, 2  ;;  %v1797_v7 = vrot.slane %v12843_v23, 2 }
  0xe4   :  { %8754 = vmatmul.mubr.msk.f32.gmra.mxu0 %vm23_vm0, %v1765_v55 }
  0xe5   :  { %8756 = vmatprep.mubr.msk.f32.mxu0 %vm23_vm0, %v1768_v29  ;;  %v1798_v28 = vsel %vm1645_vm3, %v1796_v4, %v1797_v7  ;;  %v1800_v20 = vsel %vm1645_vm3, %v1797_v7, %v1799_v42  ;;  %v2387_v29 = vld [vmem:[#allocation2 + $0x28] sm:$0x3] }
  0xe6   :  { %8656 = vmatmul.mubr.msk.f32.gmra.mxu1 %vm23_vm0, %v12822_v5  ;;  %v1795_v5 = vsel %vm1645_vm3, %v1792_v63, %v1794_v2  ;;  %v3159_v31 = vrot.slane %v2387_v29, 1  ;;  %v3177_v63 = vrot.slane %v2398_v50, 1  ;;  %v2400_v2 = vld [vmem:[#allocation2 + $0x90] sm:$0xff] }
  0xe7   :  { %8658 = vmatprep.mubr.msk.f32.mxu1 %vm23_vm0, %v12824_v43  ;;  %v1802_v43 = vrot.slane %v12844_v17, 2  ;;  %v3181_v42 = vrot.slane %v2400_v2, 1 }
  0xe8   :  { %8757 = vmatmul.mubr.msk.f32.gmra.mxu0 %vm23_vm0, %v1770_v21  ;;  %v2390_v21 = vld [vmem:[#allocation2 + $0x40] sm:$0x3] }
  0xe9   :  { %8759 = vmatprep.mubr.msk.f32.mxu0 %vm23_vm0, %v1773_v54  ;;  %v1803_v55 = vsel %vm1645_vm3, %v1801_v26, %v1802_v43 }
  0xea   :  { %8659 = vmatmul.mubr.msk.f32.gmra.mxu1 %vm23_vm0, %v12825_v37  ;;  %v2386_v37 = vld [vmem:[#allocation2 + $0x20] sm:$0xff] }
  0xeb   :  { %8661 = vmatprep.mubr.msk.f32.mxu1 %vm23_vm0, %v12827_v27  ;;  %v3157_v3 = vrot.slane %v2386_v37, 1  ;;  %v1805_v27 = vsel %vm1645_vm3, %v1802_v43, %v1804_v44  ;;  %v2404_v43 = vld [vmem:[#allocation2 + $0xb0] sm:$0xff] }
  0xec   :  { %8760 = vmatmul.mubr.msk.f32.gmra.mxu0 %vm23_vm0, %v1775_v58  ;;  %v2393_v58 = vld [vmem:[#allocation2 + $0x58] sm:$0x3]  ;;  %v3187_v29 = vrot.slane %v2404_v43, 1 }
  0xed   :  { %8762 = vmatprep.mubr.msk.f32.mxu0 %vm23_vm0, %v1778_v18  ;;  %v3158_v36 = vsel %vm456_vm2, %v3156_v39, %v3157_v3  ;;  %v3160_v57 = vsel %vm456_vm2, %v3157_v3, %v3159_v31  ;;  %v3169_v0 = vrot.slane %v2393_v58, 1  ;;  %v2409_v58 = vld [vmem:[#allocation2 + $0xd8] sm:$0xff] }
  0xee   :  { %8662 = vmatmul.mubr.msk.f32.gmra.mxu1 %vm23_vm0, %v12828_v1  ;;  %v2388_v1 = vld [vmem:[#allocation2 + $0x30] sm:$0xff] }
  0xef   :  { %8664 = vmatprep.mubr.msk.f32.mxu1 %vm23_vm0, %v12830_v62  ;;  %v3161_v54 = vrot.slane %v2388_v1, 1  ;;  %v3162_v62 = vrot.slane %v2389_v10, 1  ;;  %v3170_v13 = vsel %vm456_vm2, %v3167_v6, %v3169_v0 }
  0xf0   :  { %8763 = vmatmul.mubr.msk.f32.gmra.mxu0 %vm23_vm0, %v1780_v33  ;;  %v10843_v18 = vpop.f32.mrf.mxu0 }
  0xf1   :  { %8765 = vmatprep.mubr.msk.f32.mxu0 %vm23_vm0, %v1783_v8  ;;  %v3172_v8 = vrot.slane %v2395_v12, 1 }
  0xf2   :  { %8665 = vmatmul.mubr.msk.f32.gmra.mxu1 %vm23_vm0, %v12831_v61  ;;  %v3164_v61 = vrot.slane %v2390_v21, 1  ;;  %v10853_v33 = vpop.f32.mrf.mxu0 }
  0xf3   :  { %8667 = vmatprep.mubr.msk.f32.mxu1 %vm23_vm0, %v12833_v32  ;;  %v3163_v32 = vsel %vm456_vm2, %v3161_v54, %v3162_v62  ;;  %v3173_v16 = vsel %vm456_vm2, %v3171_v15, %v3172_v8 }
  0xf4   :  { %8766 = vmatmul.mubr.msk.f32.gmra.mxu0 %vm23_vm0, %v1785_v14  ;;  %v7836_v14 = vld [vmem:[%s12710_s1 + $0x40] sm:$0xff] }
  0xf5   :  { %8768 = vmatprep.mubr.msk.f32.mxu0 %vm23_vm0, %v1788_v40 }
  0xf6   :  { %8668 = vmatmul.mubr.msk.f32.gmra.mxu1 %vm23_vm0, %v12834_v46  ;;  %v3165_v46 = vsel %vm456_vm2, %v3162_v62, %v3164_v61 }
  0xf7   :  { %8670 = vmatprep.mubr.msk.f32.mxu1 %vm23_vm0, %v12836_v51  ;;  %v2396_v51 = vld [vmem:[#allocation2 + $0x70] sm:$0x3] }
  0xf8   :  { %8769 = vmatmul.mubr.msk.f32.gmra.mxu0 %vm23_vm0, %v1790_v34  ;;  %v3174_v40 = vrot.slane %v2396_v51, 1  ;;  %v2399_v34 = vld [vmem:[#allocation2 + $0x88] sm:$0x3] }
  0xf9   :  { %8771 = vmatprep.mubr.msk.f32.mxu0 %vm23_vm0, %v1793_v53  ;;  %v10847_v24 = vpop.f32.mrf.mxu1  ;;  %v2401_v53 = vld [vmem:[#allocation2 + $0x98] sm:$0xff]  ;;  %v3179_v7 = vrot.slane %v2399_v34, 1 }
  0xfa   :  { %8671 = vmatmul.mubr.msk.f32.gmra.mxu1 %vm23_vm0, %v12837_v60  ;;  %v3182_v11 = vrot.slane %v2401_v53, 1 }
  0xfb   :  { %8673 = vmatprep.mubr.msk.f32.mxu1 %vm23_vm0, %v12839_v38  ;;  %v10860_v60 = vpop.f32.mrf.mxu1 }
  0xfc   :  { %8772 = vmatmul.mubr.msk.f32.gmra.mxu0 %vm23_vm0, %v1795_v5  ;;  %v3183_v39 = vsel %vm456_vm2, %v3181_v42, %v3182_v11  ;;  %v2416_v42 = vld [vmem:[#allocation2 + $0x110] sm:$0xff] }
  0xfd   :  { %8774 = vmatprep.mubr.msk.f32.mxu0 %vm23_vm0, %v1798_v28  ;;  %v2402_v28 = vld [vmem:[#allocation2 + $0xa0] sm:$0x3] }
  0xfe   :  { %8674 = vmatmul.mubr.msk.f32.gmra.mxu1 %vm23_vm0, %v12840_v52  ;;  %v3184_v44 = vrot.slane %v2402_v28, 1 }
  0xff   :  { %8676 = vmatprep.mubr.msk.f32.mxu1 %vm23_vm0, %v12842_v30 }
 0x100   :  { %8775 = vmatmul.mubr.msk.f32.gmra.mxu0 %vm23_vm0, %v1800_v20  ;;  %v3180_v20 = vsel %vm456_vm2, %v3177_v63, %v3179_v7 }
 0x101   :  { %8777 = vmatprep.mubr.msk.f32.mxu0 %vm23_vm0, %v1803_v55 }
 0x102   :  { %8677 = vmatmul.mubr.msk.f32.gmra.mxu1 %vm23_vm0, %v12843_v23  ;;  %v3175_v23 = vsel %vm456_vm2, %v3172_v8, %v3174_v40  ;;  %v3196_v8 = vrot.slane %v2409_v58, 1 }
 0x103   :  { %8679 = vmatprep.mubr.msk.f32.mxu1 %vm23_vm0, %v10447_v41  ;;  %v3166_v41 = vrot.slane %v2391_v56, 1 }
 0x104   :  { %8778 = vmatmul.mubr.msk.f32.gmra.mxu0 %vm23_vm0, %v1805_v27  ;;  %v2405_v27 = vld [vmem:[#allocation2 + $0xb8] sm:$0x3] }
 0x105   :  { %8880 = vmatprep.mubr.msk.f32.mxu0 %vm23_vm0, %v3158_v36  ;;  %v3168_v45 = vsel %vm456_vm2, %v3166_v41, %v3167_v6  ;;  %v10869_v59 = vpop.f32.mrf.mxu1  ;;  %v2408_v41 = vld [vmem:[#allocation2 + $0xd0] sm:$0x3] }
 0x106   :  { %8680 = vmatmul.mubr.msk.f32.gmra.mxu1 %vm23_vm0, %v12844_v17  ;;  %v2403_v17 = vld [vmem:[#allocation2 + $0xa8] sm:$0xff]  ;;  %v3194_v0 = vrot.slane %v2408_v41, 1 }
 0x107   :  { %8782 = vmatprep.mubr.msk.f32.mxu1 %vm23_vm0, %v2385_v48  ;;  %v10878_v49 = vpop.f32.mrf.mxu1  ;;  %v3186_v3 = vrot.slane %v2403_v17, 1 }
 0x108   :  { %8881 = vmatmul.mubr.msk.f32.vlgmr.msra.gmra.mxu0 %vm23_vm0, %v3160_v57 }
 0x109   :  { %9075 = vmatpush3.msra.mxu0 %v10520_v25  ;;  %8883 = vmatprep.mubr.msk.f32.mxu0 %vm23_vm0, %v3163_v32  ;;  %v2397_v25 = vld [vmem:[#allocation2 + $0x78] sm:$0xff]  ;;  %v10883_v4 = vpop.f32.mrf.mxu1  ;;  %v3188_v62 = vsel %vm456_vm2, %v3186_v3, %v3187_v29  ;;  %v3207_v3 = vrot.slane %v2416_v42, 1 }
 0x10a   :  { %8783 = vmatmul.mubr.msk.f32.vlgmr.msra.gmra.mxu1 %vm23_vm0, %v2386_v37  ;;  %v3176_v52 = vrot.slane %v2397_v25, 1  ;;  %9270 = vmatprep.subr.mxu0 %v7836_v14  ;;  %v2413_v14 = vld [vmem:[#allocation2 + $0xf8] sm:$0xff] }
 0x10b   :  { %8977 = vmatpush3.msra.mxu1 %v10504_v47  ;;  %8785 = vmatprep.mubr.msk.f32.mxu1 %vm23_vm0, %v2388_v1  ;;  %v10863_v47 = vpop.f32.mrf.mxu0  ;;  %v10892_v26 = vpop.f32.mrf.mxu1  ;;  %v2406_v1 = vld [vmem:[#allocation2 + $0xc0] sm:$0xff] }
 0x10c   :  { %9172 = vmatprep.subr.mxu1 %v7771_v35  ;;  %8884 = vmatmul.mubr.msk.f32.gmra.mxu0 %vm23_vm0, %v3165_v46  ;;  %v3178_v5 = vsel %vm456_vm2, %v3176_v52, %v3177_v63  ;;  %v3191_v57 = vrot.slane %v2406_v1, 1  ;;  %v2411_v35 = vld [vmem:[#allocation2 + $0xe8] sm:$0x3] }
 0x10d   :  { %8886 = vmatprep.mubr.msk.f32.mxu0 %vm23_vm0, %v3168_v45  ;;  %v10874_v38 = vpop.f32.mrf.mxu0  ;;  %v10897_v37 = vpop.f32.mrf.mxu1  ;;  %v3199_v52 = vrot.slane %v2411_v35, 1 }
 0x10e   :  { %8786 = vmatmul.mubr.msk.f32.gmra.mxu1 %vm23_vm0, %v2389_v10  ;;  %12845 = vst [vmem:[#allocation28_spill] sm:$0xff] %v10897_v37  ;;  %v2407_v10 = vld [vmem:[#allocation2 + $0xc8] sm:$0xff] }
 0x10f   :  { %8788 = vmatprep.mubr.msk.f32.mxu1 %vm23_vm0, %v2391_v56  ;;  %v10880_v30 = vpop.f32.mrf.mxu0  ;;  %v10906_v31 = vpop.f32.mrf.mxu1  ;;  %v3185_v56 = vsel %vm456_vm2, %v3182_v11, %v3184_v44  ;;  %v3192_v61 = vrot.slane %v2407_v10, 1 }
 0x110   :  { %8887 = vmatmul.mubr.msk.f32.gmra.mxu0 %vm23_vm0, %v3170_v13  ;;  %12846 = vst [vmem:[#allocation29_spill] sm:$0xff] %v10906_v31  ;;  %v11086_v31 = vld [vmem:[#allocation2 + $0x230] sm:$0xff] }
 0x111   :  { %8889 = vmatprep.mubr.msk.f32.mxu0 %vm23_vm0, %v3173_v16  ;;  %v10888_v22 = vpop.f32.mrf.mxu0  ;;  %v10911_v21 = vpop.f32.mrf.mxu1  ;;  %v3193_v15 = vsel %vm456_vm2, %v3191_v57, %v3192_v61  ;;  %v3195_v16 = vsel %vm456_vm2, %v3192_v61, %v3194_v0  ;;  %v2420_v0 = vld [vmem:[#allocation2 + $0x130] sm:$0x3] }
 0x112   :  { %8789 = vmatmul.mubr.msk.f32.gmra.mxu1 %vm23_vm0, %v2392_v9  ;;  %12847 = vst [vmem:[#allocation32_spill] sm:$0xff] %v10911_v21  ;;  %v3189_v9 = vrot.slane %v2405_v27, 1  ;;  %v2444_v21 = vld [vmem:[#allocation2 + $0x220] sm:$0x3] }
 0x113   :  { %8791 = vmatprep.mubr.msk.f32.mxu1 %vm23_vm0, %v2394_v19  ;;  %v10894_v48 = vpop.f32.mrf.mxu0  ;;  %v10920_v6 = vpop.f32.mrf.mxu1  ;;  %v2410_v19 = vld [vmem:[#allocation2 + $0xe0] sm:$0xff] }
 0x114   :  { %8890 = vmatmul.mubr.msk.f32.gmra.mxu0 %vm23_vm0, %v3175_v23  ;;  %12848 = vst [vmem:[#allocation34_spill] sm:$0xff] %v10920_v6  ;;  %v3190_v46 = vsel %vm456_vm2, %v3187_v29, %v3189_v9  ;;  %v3197_v51 = vrot.slane %v2410_v19, 1  ;;  %v2414_v23 = vld [vmem:[#allocation2 + $0x100] sm:$0x3]  ;;  %v2417_v29 = vld [vmem:[#allocation2 + $0x118] sm:$0x3] }
 0x115   :  { %8892 = vmatprep.mubr.msk.f32.mxu0 %vm23_vm0, %v3178_v5  ;;  %v10902_v55 = vpop.f32.mrf.mxu0  ;;  %v10925_v32 = vpop.f32.mrf.mxu1  ;;  %v2415_v5 = vld [vmem:[#allocation2 + $0x108] sm:$0xff]  ;;  %v3209_v57 = vrot.slane %v2417_v29, 1 }
 0x116   :  { %8792 = vmatmul.mubr.msk.f32.gmra.mxu1 %vm23_vm0, %v2395_v12  ;;  %12849 = vst [vmem:[#allocation37_spill] sm:$0xff] %v10925_v32  ;;  %v3198_v34 = vsel %vm456_vm2, %v3196_v8, %v3197_v51  ;;  %v2421_v8 = vld [vmem:[#allocation2 + $0x138] sm:$0xff] }
 0x117   :  { %8794 = vmatprep.mubr.msk.f32.mxu1 %vm23_vm0, %v2397_v25  ;;  %v10908_v36 = vpop.f32.mrf.mxu0  ;;  %v10934_v25 = vpop.f32.mrf.mxu1 }
 0x118   :  { %8893 = vmatmul.mubr.msk.f32.gmra.mxu0 %vm23_vm0, %v3180_v20  ;;  %12850 = vst [vmem:[#allocation39_spill] sm:$0xff] %v10934_v25 }
 0x119   :  { %8895 = vmatprep.mubr.msk.f32.mxu0 %vm23_vm0, %v3183_v39  ;;  %v10916_v54 = vpop.f32.mrf.mxu0  ;;  %v3206_v39 = vrot.slane %v2415_v5, 1 }
 0x11a   :  { %8795 = vmatmul.mubr.msk.f32.gmra.mxu1 %vm23_vm0, %v2398_v50  ;;  %v2412_v50 = vld [vmem:[#allocation2 + $0xf0] sm:$0xff] }
 0x11b   :  { %8797 = vmatprep.mubr.msk.f32.mxu1 %vm23_vm0, %v2400_v2  ;;  %v10922_v12 = vpop.f32.mrf.mxu0  ;;  %v10939_v40 = vpop.f32.mrf.mxu1  ;;  %v3201_v2 = vrot.slane %v2412_v50, 1  ;;  %v3208_v41 = vsel %vm456_vm2, %v3206_v39, %v3207_v3 }
 0x11c   :  { %8896 = vmatmul.mubr.msk.f32.gmra.mxu0 %vm23_vm0, %v3185_v56  ;;  %12851 = vst [vmem:[#allocation40_spill] sm:$0xff] %v10939_v40  ;;  %v2419_v56 = vld [vmem:[#allocation2 + $0x128] sm:$0xff] }
 0x11d   :  { %8898 = vmatprep.mubr.msk.f32.mxu0 %vm23_vm0, %v3188_v62  ;;  %v10930_v45 = vpop.f32.mrf.mxu0  ;;  %v10948_v7 = vpop.f32.mrf.mxu1 }
 0x11e   :  { %8798 = vmatmul.mubr.msk.f32.gmra.mxu1 %vm23_vm0, %v2401_v53  ;;  %v3202_v53 = vrot.slane %v2413_v14, 1  ;;  %12852 = vst [vmem:[#allocation9_spill] sm:$0xff] %v10948_v7 }
 0x11f   :  { %8800 = vmatprep.mubr.msk.f32.mxu1 %vm23_vm0, %v2403_v17  ;;  %v10936_v13 = vpop.f32.mrf.mxu0  ;;  %v10953_v28 = vpop.f32.mrf.mxu1  ;;  %v3200_v17 = vsel %vm456_vm2, %v3197_v51, %v3199_v52  ;;  %v2422_v51 = vld [vmem:[#allocation2 + $0x140] sm:$0xff] }
 0x120   :  { %8899 = vmatmul.mubr.msk.f32.gmra.mxu0 %vm23_vm0, %v3190_v46  ;;  %12853 = vst [vmem:[#allocation10_spill] sm:$0xff] %v10953_v28  ;;  %v3203_v44 = vsel %vm456_vm2, %v3201_v2, %v3202_v53  ;;  %v3212_v46 = vrot.slane %v2419_v56, 1  ;;  %v3216_v2 = vrot.slane %v2421_v8, 1 }
 0x121   :  { %8901 = vmatprep.mubr.msk.f32.mxu0 %vm23_vm0, %v3193_v15  ;;  %v10944_v63 = vpop.f32.mrf.mxu0  ;;  %v10962_v27 = vpop.f32.mrf.mxu1 }
 0x122   :  { %8801 = vmatmul.mubr.msk.f32.gmra.mxu1 %vm23_vm0, %v2404_v43  ;;  %v3204_v43 = vrot.slane %v2414_v23, 1  ;;  %12854 = vst [vmem:[#allocation11_spill] sm:$0xff] %v10962_v27  ;;  %v2423_v23 = vld [vmem:[#allocation2 + $0x148] sm:$0x3] }
 0x123   :  { %8803 = vmatprep.mubr.msk.f32.mxu1 %vm23_vm0, %v2406_v1  ;;  %v10950_v11 = vpop.f32.mrf.mxu0  ;;  %v2418_v1 = vld [vmem:[#allocation2 + $0x120] sm:$0xff] }
 0x124   :  { %8902 = vmatmul.mubr.msk.f32.gmra.mxu0 %vm23_vm0, %v3195_v16  ;;  %v3205_v62 = vsel %vm456_vm2, %v3202_v53, %v3204_v43  ;;  %v3214_v16 = vrot.slane %v2420_v0, 1  ;;  %v3217_v53 = vrot.slane %v2422_v51, 1  ;;  %v2424_v43 = vld [vmem:[#allocation2 + $0x150] sm:$0xff] }
 0x125   :  { %8904 = vmatprep.mubr.msk.f32.mxu0 %vm23_vm0, %v3198_v34  ;;  %v10958_v20 = vpop.f32.mrf.mxu0 }
 0x126   :  { %8804 = vmatmul.mubr.msk.f32.gmra.mxu1 %vm23_vm0, %v2407_v10  ;;  %v10967_v10 = vpop.f32.mrf.mxu1 }
 0x127   :  { %8806 = vmatprep.mubr.msk.f32.mxu1 %vm23_vm0, %v2409_v58  ;;  %v10964_v9 = vpop.f32.mrf.mxu0  ;;  %12855 = vst [vmem:[#allocation12_spill] sm:$0xff] %v10967_v10  ;;  %v3211_v58 = vrot.slane %v2418_v1, 1 }
 0x128   :  { %8905 = vmatmul.mubr.msk.f32.gmra.mxu0 %vm23_vm0, %v3200_v17  ;;  %v10976_v15 = vpop.f32.mrf.mxu1 }
 0x129   :  { %8907 = vmatprep.mubr.msk.f32.mxu0 %vm23_vm0, %v3203_v44  ;;  %v10972_v61 = vpop.f32.mrf.mxu0  ;;  %12856 = vst [vmem:[#allocation13_spill] sm:$0xff] %v10976_v15  ;;  %v3213_v34 = vsel %vm456_vm2, %v3211_v58, %v3212_v46  ;;  %v2425_v44 = vld [vmem:[#allocation2 + $0x158] sm:$0xff]  ;;  %v2426_v58 = vld [vmem:[#allocation2 + $0x160] sm:$0x3] }
 0x12a   :  { %8807 = vmatmul.mubr.msk.f32.gmra.mxu1 %vm23_vm0, %v2410_v19 }
 0x12b   :  { %8809 = vmatprep.mubr.msk.f32.mxu1 %vm23_vm0, %v2412_v50  ;;  %v10978_v35 = vpop.f32.mrf.mxu0  ;;  %v3210_v50 = vsel %vm456_vm2, %v3207_v3, %v3209_v57  ;;  %v3219_v3 = vrot.slane %v2423_v23, 1  ;;  %v3221_v57 = vrot.slane %v2424_v43, 1 }
 0x12c   :  { %8908 = vmatmul.mubr.msk.f32.gmra.mxu0 %vm23_vm0, %v3205_v62  ;;  %v3218_v62 = vsel %vm456_vm2, %v3216_v2, %v3217_v53 }
 0x12d   :  { %8910 = vmatprep.mubr.msk.f32.mxu0 %vm23_vm0, %v3208_v41  ;;  %v10986_v52 = vpop.f32.mrf.mxu0  ;;  %v3222_v41 = vrot.slane %v2425_v44, 1 }
 0x12e   :  { %v10981_v19 = vpop.f32.mrf.mxu1  ;;  %8810 = vmatmul.mubr.msk.f32.gmra.mxu1 %vm23_vm0, %v2413_v14 }
 0x12f   :  { %12857 = vst [vmem:[#allocation14_spill] sm:$0xff] %v10981_v19  ;;  %8812 = vmatprep.mubr.msk.f32.mxu1 %vm23_vm0, %v2415_v5  ;;  %v3215_v5 = vsel %vm456_vm2, %v3212_v46, %v3214_v16  ;;  %v3224_v46 = vrot.slane %v2426_v58, 1 }
 0x130   :  { %v10990_v17 = vpop.f32.mrf.mxu1  ;;  %v10992_v39 = vpop.f32.mrf.mxu0  ;;  %8911 = vmatmul.mubr.msk.f32.gmra.mxu0 %vm23_vm0, %v3210_v50  ;;  %v2427_v50 = vld [vmem:[#allocation2 + $0x168] sm:$0xff] }
 0x131   :  { %12858 = vst [vmem:[#allocation15_spill] sm:$0xff] %v10990_v17  ;;  %8913 = vmatprep.mubr.msk.f32.mxu0 %vm23_vm0, %v3213_v34  ;;  %v3223_v34 = vsel %vm456_vm2, %v3221_v57, %v3222_v41  ;;  %v3226_v2 = vrot.slane %v2427_v50, 1 }
 0x132   :  { %v10995_v14 = vpop.f32.mrf.mxu1  ;;  %8813 = vmatmul.mubr.msk.f32.gmra.mxu1 %vm23_vm0, %v2416_v42  ;;  %v11000_v29 = vpop.f32.mrf.mxu0 }
 0x133   :  { %12859 = vst [vmem:[#allocation16_spill] sm:$0xff] %v10995_v14  ;;  %8815 = vmatprep.mubr.msk.f32.mxu1 %vm23_vm0, %v2418_v1  ;;  %v2428_v14 = vld [vmem:[#allocation2 + $0x170] sm:$0xff]  ;;  %v3220_v1 = vsel %vm456_vm2, %v3217_v53, %v3219_v3 }
 0x134   :  { %v11004_v0 = vpop.f32.mrf.mxu1  ;;  %v11006_v17 = vpop.f32.mrf.mxu0  ;;  %8914 = vmatmul.mubr.msk.f32.gmra.mxu0 %vm23_vm0, %v3215_v5  ;;  %v3227_v23 = vrot.slane %v2428_v14, 1  ;;  %v2430_v5 = vld [vmem:[#allocation2 + $0x180] sm:$0xff] }
 0x135   :  { %12860 = vst [vmem:[#allocation17_spill] sm:$0xff] %v11004_v0  ;;  %8916 = vmatprep.mubr.msk.f32.mxu0 %vm23_vm0, %v3218_v62  ;;  %v2429_v0 = vld [vmem:[#allocation2 + $0x178] sm:$0x3]  ;;  %v3231_v57 = vrot.slane %v2430_v5, 1 }
 0x136   :  { %v11009_v42 = vpop.f32.mrf.mxu1  ;;  %8816 = vmatmul.mubr.msk.f32.gmra.mxu1 %vm23_vm0, %v2419_v56  ;;  %v11014_v16 = vpop.f32.mrf.mxu0  ;;  %v3229_v53 = vrot.slane %v2429_v0, 1  ;;  %v3228_v62 = vsel %vm456_vm2, %v3226_v2, %v3227_v23 }
 0x137   :  { %12861 = vst [vmem:[#allocation18_spill] sm:$0xff] %v11009_v42  ;;  %8818 = vmatprep.mubr.msk.f32.mxu1 %vm23_vm0, %v2421_v8  ;;  %v2431_v42 = vld [vmem:[#allocation2 + $0x188] sm:$0xff]  ;;  %v3225_v8 = vsel %vm456_vm2, %v3222_v41, %v3224_v46 }
 0x138   :  { %v11018_v19 = vpop.f32.mrf.mxu1  ;;  %v11020_v15 = vpop.f32.mrf.mxu0  ;;  %8917 = vmatmul.mubr.msk.f32.gmra.mxu0 %vm23_vm0, %v3220_v1  ;;  %v3232_v58 = vrot.slane %v2431_v42, 1  ;;  %v2433_v1 = vld [vmem:[#allocation2 + $0x1c8] sm:$0xff] }
 0x139   :  { %12862 = vst [vmem:[#allocation19_spill] sm:$0xff] %v11018_v19  ;;  %8919 = vmatprep.mubr.msk.f32.mxu0 %vm23_vm0, %v3223_v34  ;;  %v2432_v19 = vld [vmem:[#allocation2 + $0x190] sm:$0x3]  ;;  %v3236_v34 = vrot.slane %v2433_v1, 1 }
 0x13a   :  { %v11023_v56 = vpop.f32.mrf.mxu1  ;;  %8819 = vmatmul.mubr.msk.f32.gmra.mxu1 %vm23_vm0, %v2422_v51  ;;  %v11028_v3 = vpop.f32.mrf.mxu0  ;;  %v3234_v41 = vrot.slane %v2432_v19, 1  ;;  %v3233_v46 = vsel %vm456_vm2, %v3231_v57, %v3232_v58 }
 0x13b   :  { %12863 = vst [vmem:[#allocation20_spill] sm:$0xff] %v11023_v56  ;;  %8821 = vmatprep.mubr.msk.f32.mxu1 %vm23_vm0, %v2424_v43  ;;  %v2434_v56 = vld [vmem:[#allocation2 + $0x1d0] sm:$0xff]  ;;  %v3230_v43 = vsel %vm456_vm2, %v3227_v23, %v3229_v53 }
 0x13c   :  { %v11032_v10 = vpop.f32.mrf.mxu1  ;;  %v11034_v27 = vpop.f32.mrf.mxu0  ;;  %8920 = vmatmul.mubr.msk.f32.gmra.mxu0 %vm23_vm0, %v3225_v8  ;;  %v3237_v2 = vrot.slane %v2434_v56, 1  ;;  %v2436_v8 = vld [vmem:[#allocation2 + $0x1e0] sm:$0xff]  ;;  %v3235_v19 = vsel %vm456_vm2, %v3232_v58, %v3234_v41 }
 0x13d   :  { %12864 = vst [vmem:[#allocation21_spill] sm:$0xff] %v11032_v10  ;;  %8922 = vmatprep.mubr.msk.f32.mxu0 %vm23_vm0, %v3228_v62  ;;  %v2435_v10 = vld [vmem:[#allocation2 + $0x1d8] sm:$0x3]  ;;  %v3241_v62 = vrot.slane %v2436_v8, 1 }
 0x13e   :  { %v11037_v51 = vpop.f32.mrf.mxu1  ;;  %8822 = vmatmul.mubr.msk.f32.gmra.mxu1 %vm23_vm0, %v2425_v44  ;;  %v11042_v0 = vpop.f32.mrf.mxu0  ;;  %v3238_v53 = vsel %vm456_vm2, %v3236_v34, %v3237_v2 }
 0x13f   :  { %12865 = vst [vmem:[#allocation22_spill] sm:$0xff] %v11037_v51  ;;  %8824 = vmatprep.mubr.msk.f32.mxu1 %vm23_vm0, %v2427_v50  ;;  %v2437_v51 = vld [vmem:[#allocation2 + $0x1e8] sm:$0xff]  ;;  %v3239_v50 = vrot.slane %v2435_v10, 1 }
 0x140   :  { %v11046_v28 = vpop.f32.mrf.mxu1  ;;  %v11048_v7 = vpop.f32.mrf.mxu0  ;;  %8923 = vmatmul.mubr.msk.f32.gmra.mxu0 %vm23_vm0, %v3230_v43  ;;  %v3242_v57 = vrot.slane %v2437_v51, 1  ;;  %v2439_v43 = vld [vmem:[#allocation2 + $0x1f8] sm:$0xff] }
 0x141   :  { %12866 = vst [vmem:[#allocation23_spill] sm:$0xff] %v11046_v28  ;;  %8925 = vmatprep.mubr.msk.f32.mxu0 %vm23_vm0, %v3233_v46  ;;  %v2438_v28 = vld [vmem:[#allocation2 + $0x1f0] sm:$0x3]  ;;  %v3240_v10 = vsel %vm456_vm2, %v3237_v2, %v3239_v50  ;;  %v3246_v46 = vrot.slane %v2439_v43, 1 }
 0x142   :  { %v11051_v44 = vpop.f32.mrf.mxu1  ;;  %8825 = vmatmul.mubr.msk.f32.gmra.mxu1 %vm23_vm0, %v2428_v14  ;;  %v11056_v23 = vpop.f32.mrf.mxu0  ;;  %v3243_v41 = vsel %vm456_vm2, %v3241_v62, %v3242_v57 }
 0x143   :  { %12867 = vst [vmem:[#allocation24_spill] sm:$0xff] %v11051_v44  ;;  %8827 = vmatprep.mubr.msk.f32.mxu1 %vm23_vm0, %v2430_v5  ;;  %v2440_v44 = vld [vmem:[#allocation2 + $0x200] sm:$0xff]  ;;  %v3244_v5 = vrot.slane %v2438_v28, 1 }
 0x144   :  { %v11060_v40 = vpop.f32.mrf.mxu1  ;;  %v11062_v25 = vpop.f32.mrf.mxu0  ;;  %8926 = vmatmul.mubr.msk.f32.gmra.mxu0 %vm23_vm0, %v3235_v19  ;;  %v3247_v34 = vrot.slane %v2440_v44, 1  ;;  %v2442_v19 = vld [vmem:[#allocation2 + $0x210] sm:$0xff] }
 0x145   :  { %12868 = vst [vmem:[#allocation25_spill] sm:$0xff] %v11060_v40  ;;  %8928 = vmatprep.mubr.msk.f32.mxu0 %vm23_vm0, %v3238_v53  ;;  %v2441_v40 = vld [vmem:[#allocation2 + $0x208] sm:$0x3]  ;;  %v3245_v28 = vsel %vm456_vm2, %v3242_v57, %v3244_v5  ;;  %v3254_v5 = vrot.slane %v2444_v21, 1 }
 0x146   :  { %v11065_v14 = vpop.f32.mrf.mxu1  ;;  %8828 = vmatmul.mubr.msk.f32.gmra.mxu1 %vm23_vm0, %v2431_v42  ;;  %v11070_v58 = vpop.f32.mrf.mxu0  ;;  %v3248_v62 = vsel %vm456_vm2, %v3246_v46, %v3247_v34  ;;  %v3257_v46 = vrot.slane %v11086_v31, 1 }
 0x147   :  { %12869 = vst [vmem:[#allocation26_spill] sm:$0xff] %v11065_v14  ;;  %8830 = vmatprep.mubr.msk.f32.mxu1 %vm23_vm0, %v2433_v1  ;;  %v11076_v14 = vld [vmem:[#allocation2 + $0x218] sm:$0xff]  ;;  %v3249_v1 = vrot.slane %v2441_v40, 1 }
 0x148   :  { %v11074_v32 = vpop.f32.mrf.mxu1  ;;  %v8686_v42 = vpop.f32.mrf.mxu0  ;;  %8929 = vmatmul.mubr.msk.f32.gmra.mxu0 %vm23_vm0, %v3240_v10  ;;  %v3252_v6 = vrot.slane %v11076_v14, 1  ;;  %v2445_v10 = vld [vmem:[#allocation2 + $0x228] sm:$0xff] }
 0x149   :  { %12870 = vst [vmem:[#allocation27_spill] sm:$0xff] %v11074_v32  ;;  %8931 = vmatprep.mubr.msk.f32.mxu0 %vm23_vm0, %v3243_v41  ;;  %v3251_v32 = vrot.slane %v2442_v19, 1  ;;  %v3256_v41 = vrot.slane %v2445_v10, 1 }
 0x14a   :  { %v8588_v53 = vpop.f32.mrf.mxu1  ;;  %8831 = vmatmul.mubr.msk.f32.gmra.mxu1 %vm23_vm0, %v2434_v56  ;;  %v2002_v50 = vpop.f32.mrf.mxu0 }
 0x14b   :  { %v1332_v2 = vadd.f32 %v8588_v53, %v10843_v18  ;;  %8833 = vmatprep.mubr.msk.f32.mxu1 %vm23_vm0, %v2436_v8  ;;  %v3250_v8 = vsel %vm456_vm2, %v3247_v34, %v3249_v1 }
 0x14c   :  { %v1326_v56 = vpop.f32.mrf.mxu1  ;;  %v8689_v40 = vpop.f32.mrf.mxu0  ;;  %8932 = vmatmul.mubr.msk.f32.gmra.mxu0 %vm23_vm0, %v3245_v28  ;;  %v2447_v28 = vld [vmem:[#allocation2 + $0x238] sm:$0x3] }
 0x14d   :  { %v11088_v37 = vadd.f32 %v8686_v42, %v1332_v2  ;;  %v1327_v57 = vadd.f32 %v1326_v56, %v10853_v33  ;;  %8934 = vmatprep.mubr.msk.f32.mxu0 %vm23_vm0, %v3248_v62  ;;  %v3253_v33 = vsel %vm456_vm2, %v3251_v32, %v3252_v6  ;;  %v3258_v32 = vsel %vm456_vm2, %v3256_v41, %v3257_v46 }
 0x14e   :  { %v8591_v18 = vpop.f32.mrf.mxu1  ;;  %8834 = vmatmul.mubr.msk.f32.gmra.mxu1 %vm23_vm0, %v2437_v51  ;;  %v2012_v2 = vpop.f32.mrf.mxu0  ;;  %v2448_v51 = vld [vmem:[#allocation2 + $0x240] sm:$0xff] }
 0x14f   :  { %12871 = vst [vmem:[#allocation30_spill] sm:$0xff] %v11088_v37  ;;  %v11096_v53 = vadd.f32 %v2002_v50, %v1327_v57  ;;  %v1342_v42 = vadd.f32 %v8591_v18, %v10863_v47  ;;  %8836 = vmatprep.mubr.msk.f32.mxu1 %vm23_vm0, %v2439_v43  ;;  %v11101_v37 = vld [vmem:[#allocation2 + $0x248] sm:$0xff]  ;;  %v3255_v47 = vsel %vm456_vm2, %v3252_v6, %v3254_v5  ;;  %v3259_v43 = vrot.slane %v2447_v28, 1 }
 0x150   :  { %v1336_v56 = vpop.f32.mrf.mxu1  ;;  %v8692_v34 = vpop.f32.mrf.mxu0  ;;  %8935 = vmatmul.mubr.msk.f32.gmra.mxu0 %vm23_vm0, %v3250_v8  ;;  %v3262_v18 = vrot.slane %v11101_v37, 1  ;;  %v2450_v8 = vld [vmem:[#allocation2 + $0x250] sm:$0x3] }
 0x151   :  { %v11103_v62 = vadd.f32 %v8689_v40, %v1342_v42  ;;  %v1337_v21 = vadd.f32 %v1336_v56, %v10874_v38  ;;  %8937 = vmatprep.mubr.msk.f32.mxu0 %vm23_vm0, %v3253_v33  ;;  %v3261_v38 = vrot.slane %v2448_v51, 1  ;;  %v2451_v42 = vld [vmem:[#allocation2 + $0x258] sm:$0xff] }
 0x152   :  { %v8594_v1 = vpop.f32.mrf.mxu1  ;;  %8837 = vmatmul.mubr.msk.f32.gmra.mxu1 %vm23_vm0, %v2440_v44  ;;  %v2022_v40 = vpop.f32.mrf.mxu0  ;;  %v11116_v44 = vld [vmem:[#allocation2 + $0x260] sm:$0xff] }
 0x153   :  { %v11111_v50 = vadd.f32 %v2012_v2, %v1337_v21  ;;  %v1352_v57 = vadd.f32 %v8594_v1, %v10880_v30  ;;  %8839 = vmatprep.mubr.msk.f32.mxu1 %vm23_vm0, %v2442_v19  ;;  %v3260_v30 = vsel %vm456_vm2, %v3257_v46, %v3259_v43  ;;  %v3264_v19 = vrot.slane %v2450_v8, 1 }
 0x154   :  { %v1346_v33 = vpop.f32.mrf.mxu1  ;;  %v8695_v5 = vpop.f32.mrf.mxu0  ;;  %8938 = vmatmul.mubr.msk.f32.gmra.mxu0 %vm23_vm0, %v3255_v47  ;;  %v3266_v2 = vrot.slane %v2451_v42, 1  ;;  %v3267_v28 = vrot.slane %v11116_v44, 1  ;;  %v3263_v1 = vsel %vm456_vm2, %v3261_v38, %v3262_v18  ;;  %v2453_v47 = vld [vmem:[#allocation2 + $0x268] sm:$0x3] }
 0x155   :  { %v11118_v56 = vadd.f32 %v8692_v34, %v1352_v57  ;;  %v1347_v6 = vadd.f32 %v1346_v33, %v10888_v22  ;;  %8940 = vmatprep.mubr.msk.f32.mxu0 %vm23_vm0, %v3258_v32  ;;  %v11132_v33 = vld [vmem:[#allocation2 + $0x278] sm:$0xff]  ;;  %v3269_v38 = vrot.slane %v2453_v47, 1 }
 0x156   :  { %v8597_v41 = vpop.f32.mrf.mxu1  ;;  %8840 = vmatmul.mubr.msk.f32.gmra.mxu1 %vm23_vm0, %v11076_v14  ;;  %v2032_v22 = vpop.f32.mrf.mxu0  ;;  %v2454_v14 = vld [vmem:[#allocation2 + $0x270] sm:$0xff] }
 0x157   :  { %v11127_v21 = vadd.f32 %v2022_v40, %v1347_v6  ;;  %v1362_v34 = vadd.f32 %v8597_v41, %v10894_v48  ;;  %8842 = vmatprep.mubr.msk.f32.mxu1 %vm23_vm0, %v2445_v10  ;;  %v3265_v48 = vsel %vm456_vm2, %v3262_v18, %v3264_v19  ;;  %v3268_v10 = vsel %vm456_vm2, %v3266_v2, %v3267_v28 }
 0x158   :  { %v1356_v57 = vpop.f32.mrf.mxu1  ;;  %v8698_v43 = vpop.f32.mrf.mxu0  ;;  %8941 = vmatmul.mubr.msk.f32.gmra.mxu0 %vm23_vm0, %v3260_v30  ;;  %v3272_v41 = vrot.slane %v11132_v33, 1  ;;  %v2456_v30 = vld [vmem:[#allocation2 + $0x280] sm:$0x3] }
 0x159   :  { %v11134_v32 = vadd.f32 %v8695_v5, %v1362_v34  ;;  %v1357_v46 = vadd.f32 %v1356_v57, %v10902_v55  ;;  %8943 = vmatprep.mubr.msk.f32.mxu0 %vm23_vm0, %v3263_v1  ;;  %v3271_v55 = vrot.slane %v2454_v14, 1  ;;  %v2457_v34 = vld [vmem:[#allocation2 + $0x288] sm:$0xff] }
 0x15a   :  { %v8600_v40 = vpop.f32.mrf.mxu1  ;;  %8843 = vmatmul.mubr.msk.f32.gmra.mxu1 %vm23_vm0, %v11086_v31  ;;  %v2042_v5 = vpop.f32.mrf.mxu0  ;;  %v11148_v31 = vld [vmem:[#allocation2 + $0x290] sm:$0xff] }
 0x15b   :  { %v11143_v8 = vadd.f32 %v2032_v22, %v1357_v46  ;;  %v1372_v6 = vadd.f32 %v8600_v40, %v10908_v36  ;;  %8845 = vmatprep.mubr.msk.f32.mxu1 %vm23_vm0, %v2448_v51  ;;  %v3270_v36 = vsel %vm456_vm2, %v3267_v28, %v3269_v38  ;;  %v3274_v51 = vrot.slane %v2456_v30, 1 }
 0x15c   :  { %v1366_v1 = vpop.f32.mrf.mxu1  ;;  %v8701_v19 = vpop.f32.mrf.mxu0  ;;  %8944 = vmatmul.mubr.msk.f32.gmra.mxu0 %vm23_vm0, %v3265_v48  ;;  %v3276_v22 = vrot.slane %v2457_v34, 1  ;;  %v3277_v47 = vrot.slane %v11148_v31, 1  ;;  %v3273_v40 = vsel %vm456_vm2, %v3271_v55, %v3272_v41  ;;  %v2459_v48 = vld [vmem:[#allocation2 + $0x298] sm:$0x3] }
 0x15d   :  { %v11150_v57 = vadd.f32 %v8698_v43, %v1372_v6  ;;  %v1367_v18 = vadd.f32 %v1366_v1, %v10916_v54  ;;  %8946 = vmatprep.mubr.msk.f32.mxu0 %vm23_vm0, %v3268_v10  ;;  %v11164_v1 = vld [vmem:[#allocation2 + $0x2a8] sm:$0xff]  ;;  %v3279_v55 = vrot.slane %v2459_v48, 1 }
 0x15e   :  { %v8603_v2 = vpop.f32.mrf.mxu1  ;;  %8846 = vmatmul.mubr.msk.f32.gmra.mxu1 %vm23_vm0, %v11101_v37  ;;  %v2052_v54 = vpop.f32.mrf.mxu0  ;;  %v2460_v37 = vld [vmem:[#allocation2 + $0x2a0] sm:$0xff] }
 0x15f   :  { %v11159_v46 = vadd.f32 %v2042_v5, %v1367_v18  ;;  %v1382_v43 = vadd.f32 %v8603_v2, %v10922_v12  ;;  %8848 = vmatprep.mubr.msk.f32.mxu1 %vm23_vm0, %v2451_v42  ;;  %v3275_v12 = vsel %vm456_vm2, %v3272_v41, %v3274_v51  ;;  %v3278_v42 = vsel %vm456_vm2, %v3276_v22, %v3277_v47 }
 0x160   :  { %v1376_v6 = vpop.f32.mrf.mxu1  ;;  %v8704_v38 = vpop.f32.mrf.mxu0  ;;  %8947 = vmatmul.mubr.msk.f32.gmra.mxu0 %vm23_vm0, %v3270_v36  ;;  %v3282_v2 = vrot.slane %v11164_v1, 1  ;;  %v2462_v36 = vld [vmem:[#allocation2 + $0x2b0] sm:$0x3] }
 0x161   :  { %v11166_v10 = vadd.f32 %v8701_v19, %v1382_v43  ;;  %v1377_v28 = vadd.f32 %v1376_v6, %v10930_v45  ;;  %8949 = vmatprep.mubr.msk.f32.mxu0 %vm23_vm0, %v3273_v40  ;;  %v3281_v45 = vrot.slane %v2460_v37, 1  ;;  %v2463_v43 = vld [vmem:[#allocation2 + $0x2b8] sm:$0xff] }
 0x162   :  { %v8606_v5 = vpop.f32.mrf.mxu1  ;;  %8849 = vmatmul.mubr.msk.f32.gmra.mxu1 %vm23_vm0, %v11116_v44  ;;  %v2062_v19 = vpop.f32.mrf.mxu0  ;;  %v11180_v44 = vld [vmem:[#allocation2 + $0x2c0] sm:$0xff] }
 0x163   :  { %v11175_v30 = vadd.f32 %v2052_v54, %v1377_v28  ;;  %v1392_v18 = vadd.f32 %v8606_v5, %v10936_v13  ;;  %8851 = vmatprep.mubr.msk.f32.mxu1 %vm23_vm0, %v2454_v14  ;;  %v3280_v13 = vsel %vm456_vm2, %v3277_v47, %v3279_v55  ;;  %v3284_v14 = vrot.slane %v2462_v36, 1 }
 0x164   :  { %v1386_v40 = vpop.f32.mrf.mxu1  ;;  %v8707_v51 = vpop.f32.mrf.mxu0  ;;  %8950 = vmatmul.mubr.msk.f32.gmra.mxu0 %vm23_vm0, %v3275_v12  ;;  %v3286_v54 = vrot.slane %v2463_v43, 1  ;;  %v3287_v48 = vrot.slane %v11180_v44, 1  ;;  %v3283_v5 = vsel %vm456_vm2, %v3281_v45, %v3282_v2  ;;  %v2465_v12 = vld [vmem:[#allocation2 + $0x2c8] sm:$0x3] }
 0x165   :  { %v11182_v6 = vadd.f32 %v8704_v38, %v1392_v18  ;;  %v1387_v41 = vadd.f32 %v1386_v40, %v10944_v63  ;;  %8952 = vmatprep.mubr.msk.f32.mxu0 %vm23_vm0, %v3278_v42  ;;  %v11196_v40 = vld [vmem:[#allocation2 + $0x2d8] sm:$0xff]  ;;  %v3289_v45 = vrot.slane %v2465_v12, 1 }
 0x166   :  { %v8609_v22 = vpop.f32.mrf.mxu1  ;;  %8852 = vmatmul.mubr.msk.f32.gmra.mxu1 %vm23_vm0, %v11132_v33  ;;  %v2072_v63 = vpop.f32.mrf.mxu0  ;;  %v2466_v33 = vld [vmem:[#allocation2 + $0x2d0] sm:$0xff] }
 0x167   :  { %v11191_v28 = vadd.f32 %v2062_v19, %v1387_v41  ;;  %v1402_v38 = vadd.f32 %v8609_v22, %v10950_v11  ;;  %8854 = vmatprep.mubr.msk.f32.mxu1 %vm23_vm0, %v2457_v34  ;;  %v3285_v11 = vsel %vm456_vm2, %v3282_v2, %v3284_v14  ;;  %v3288_v34 = vsel %vm456_vm2, %v3286_v54, %v3287_v48 }
 0x168   :  { %v1396_v18 = vpop.f32.mrf.mxu1  ;;  %v8710_v55 = vpop.f32.mrf.mxu0  ;;  %8953 = vmatmul.mubr.msk.f32.gmra.mxu0 %vm23_vm0, %v3280_v13  ;;  %v3292_v22 = vrot.slane %v11196_v40, 1  ;;  %v2468_v13 = vld [vmem:[#allocation2 + $0x2e0] sm:$0x3] }
 0x169   :  { %v11198_v42 = vadd.f32 %v8707_v51, %v1402_v38  ;;  %v1397_v47 = vadd.f32 %v1396_v18, %v10958_v20  ;;  %8955 = vmatprep.mubr.msk.f32.mxu0 %vm23_vm0, %v3283_v5  ;;  %v3291_v20 = vrot.slane %v2466_v33, 1  ;;  %v2469_v38 = vld [vmem:[#allocation2 + $0x2e8] sm:$0xff] }
 0x16a   :  { %v8612_v19 = vpop.f32.mrf.mxu1  ;;  %8855 = vmatmul.mubr.msk.f32.gmra.mxu1 %vm23_vm0, %v11148_v31  ;;  %v2082_v51 = vpop.f32.mrf.mxu0  ;;  %v11212_v31 = vld [vmem:[#allocation2 + $0x2f0] sm:$0xff] }
 0x16b   :  { %v11207_v36 = vadd.f32 %v2072_v63, %v1397_v47  ;;  %v1412_v41 = vadd.f32 %v8612_v19, %v10964_v9  ;;  %8857 = vmatprep.mubr.msk.f32.mxu1 %vm23_vm0, %v2460_v37  ;;  %v3290_v9 = vsel %vm456_vm2, %v3287_v48, %v3289_v45  ;;  %v3294_v37 = vrot.slane %v2468_v13, 1 }
 0x16c   :  { %v1406_v5 = vpop.f32.mrf.mxu1  ;;  %v8713_v14 = vpop.f32.mrf.mxu0  ;;  %8956 = vmatmul.mubr.msk.f32.gmra.mxu0 %vm23_vm0, %v3285_v11  ;;  %v3296_v63 = vrot.slane %v2469_v38, 1  ;;  %v3297_v12 = vrot.slane %v11212_v31, 1  ;;  %v3293_v19 = vsel %vm456_vm2, %v3291_v20, %v3292_v22  ;;  %v2471_v11 = vld [vmem:[#allocation2 + $0x2f8] sm:$0x3] }
 0x16d   :  { %v11214_v18 = vadd.f32 %v8710_v55, %v1412_v41  ;;  %v1407_v2 = vadd.f32 %v1406_v5, %v10972_v61  ;;  %8958 = vmatprep.mubr.msk.f32.mxu0 %vm23_vm0, %v3288_v34  ;;  %v11228_v5 = vld [vmem:[#allocation2 + $0x308] sm:$0xff]  ;;  %v3299_v20 = vrot.slane %v2471_v11, 1 }
 0x16e   :  { %v8615_v54 = vpop.f32.mrf.mxu1  ;;  %8858 = vmatmul.mubr.msk.f32.gmra.mxu1 %vm23_vm0, %v11164_v1  ;;  %v2092_v61 = vpop.f32.mrf.mxu0  ;;  %v2472_v1 = vld [vmem:[#allocation2 + $0x300] sm:$0xff] }
 0x16f   :  { %v11223_v47 = vadd.f32 %v2082_v51, %v1407_v2  ;;  %v1422_v55 = vadd.f32 %v8615_v54, %v10978_v35  ;;  %8860 = vmatprep.mubr.msk.f32.mxu1 %vm23_vm0, %v2463_v43  ;;  %v3295_v35 = vsel %vm456_vm2, %v3292_v22, %v3294_v37  ;;  %v3298_v43 = vsel %vm456_vm2, %v3296_v63, %v3297_v12 }
 0x170   :  { %v1416_v41 = vpop.f32.mrf.mxu1  ;;  %v8716_v45 = vpop.f32.mrf.mxu0  ;;  %8959 = vmatmul.mubr.msk.f32.gmra.mxu0 %vm23_vm0, %v3290_v9  ;;  %v3302_v54 = vrot.slane %v11228_v5, 1  ;;  %v2474_v9 = vld [vmem:[#allocation2 + $0x310] sm:$0x3] }
 0x171   :  { %v11230_v34 = vadd.f32 %v8713_v14, %v1422_v55  ;;  %v1417_v48 = vadd.f32 %v1416_v41, %v10986_v52  ;;  %8961 = vmatprep.mubr.msk.f32.mxu0 %vm23_vm0, %v3293_v19  ;;  %v3301_v52 = vrot.slane %v2472_v1, 1  ;;  %v2475_v55 = vld [vmem:[#allocation2 + $0x318] sm:$0xff] }
 0x172   :  { %v8618_v51 = vpop.f32.mrf.mxu1  ;;  %8861 = vmatmul.mubr.msk.f32.gmra.mxu1 %vm23_vm0, %v11180_v44  ;;  %v2102_v14 = vpop.f32.mrf.mxu0  ;;  %v11244_v44 = vld [vmem:[#allocation2 + $0x320] sm:$0xff] }
 0x173   :  { %v11239_v13 = vadd.f32 %v2092_v61, %v1417_v48  ;;  %v1432_v2 = vadd.f32 %v8618_v51, %v10992_v39  ;;  %8863 = vmatprep.mubr.msk.f32.mxu1 %vm23_vm0, %v2466_v33  ;;  %v3300_v39 = vsel %vm456_vm2, %v3297_v12, %v3299_v20  ;;  %v3304_v33 = vrot.slane %v2474_v9, 1 }
 0x174   :  { %v1426_v19 = vpop.f32.mrf.mxu1  ;;  %v8719_v37 = vpop.f32.mrf.mxu0  ;;  %8962 = vmatmul.mubr.msk.f32.gmra.mxu0 %vm23_vm0, %v3295_v35  ;;  %v3306_v61 = vrot.slane %v2475_v55, 1  ;;  %v3307_v11 = vrot.slane %v11244_v44, 1  ;;  %v3303_v51 = vsel %vm456_vm2, %v3301_v52, %v3302_v54  ;;  %v2477_v35 = vld [vmem:[#allocation2 + $0x328] sm:$0x3] }
 0x175   :  { %v11246_v41 = vadd.f32 %v8716_v45, %v1432_v2  ;;  %v1427_v22 = vadd.f32 %v1426_v19, %v11000_v29  ;;  %8964 = vmatprep.mubr.msk.f32.mxu0 %vm23_vm0, %v3298_v43  ;;  %v11260_v19 = vld [vmem:[#allocation2 + $0x338] sm:$0xff]  ;;  %v3309_v52 = vrot.slane %v2477_v35, 1 }
 0x176   :  { %v8621_v63 = vpop.f32.mrf.mxu1  ;;  %8864 = vmatmul.mubr.msk.f32.gmra.mxu1 %vm23_vm0, %v11196_v40  ;;  %v2112_v29 = vpop.f32.mrf.mxu0  ;;  %v2478_v40 = vld [vmem:[#allocation2 + $0x330] sm:$0xff] }
 0x177   :  { %v11255_v48 = vadd.f32 %v2102_v14, %v1427_v22  ;;  %v1442_v45 = vadd.f32 %v8621_v63, %v11006_v17  ;;  %8866 = vmatprep.mubr.msk.f32.mxu1 %vm23_vm0, %v2469_v38  ;;  %v3305_v17 = vsel %vm456_vm2, %v3302_v54, %v3304_v33  ;;  %v3308_v38 = vsel %vm456_vm2, %v3306_v61, %v3307_v11 }
 0x178   :  { %v1436_v2 = vpop.f32.mrf.mxu1  ;;  %v8722_v20 = vpop.f32.mrf.mxu0  ;;  %8965 = vmatmul.mubr.msk.f32.gmra.mxu0 %vm23_vm0, %v3300_v39  ;;  %v3312_v63 = vrot.slane %v11260_v19, 1  ;;  %v2480_v39 = vld [vmem:[#allocation2 + $0x340] sm:$0x3] }
 0x179   :  { %v11262_v43 = vadd.f32 %v8719_v37, %v1442_v45  ;;  %v1437_v12 = vadd.f32 %v1436_v2, %v11014_v16  ;;  %8967 = vmatprep.mubr.msk.f32.mxu0 %vm23_vm0, %v3303_v51  ;;  %v3311_v16 = vrot.slane %v2478_v40, 1  ;;  %v9390_v2 = vld [vmem:[#allocation2 + $0x18] sm:$0xff] }
 0x17a   :  { %v8624_v14 = vpop.f32.mrf.mxu1  ;;  %8867 = vmatmul.mubr.msk.f32.gmra.mxu1 %vm23_vm0, %v11212_v31  ;;  %v2122_v37 = vpop.f32.mrf.mxu0 }
 0x17b   :  { %v11271_v9 = vadd.f32 %v2112_v29, %v1437_v12  ;;  %v1452_v22 = vadd.f32 %v8624_v14, %v11020_v15  ;;  %8869 = vmatprep.mubr.msk.f32.mxu1 %vm23_vm0, %v2472_v1  ;;  %v3310_v15 = vsel %vm456_vm2, %v3307_v11, %v3309_v52  ;;  %v3314_v1 = vrot.slane %v2480_v39, 1  ;;  %v9391_v14 = vld [vmem:[#allocation2 + $0x20] sm:$0xff] }
 0x17c   :  { %v1446_v45 = vpop.f32.mrf.mxu1  ;;  %v8725_v54 = vpop.f32.mrf.mxu0  ;;  %8968 = vmatmul.mubr.msk.f32.gmra.mxu0 %vm23_vm0, %v3305_v17  ;;  %v3895_v12 = vrot.slane %v9390_v2, 2  ;;  %v3896_v17 = vrot.slane %v9391_v14, 2  ;;  %v9396_v14 = vld [vmem:[#allocation2 + $0x48] sm:$0xff] }
 0x17d   :  { %v11276_v31 = vadd.f32 %v8722_v20, %v1452_v22  ;;  %v1447_v51 = vadd.f32 %v1446_v45, %v11028_v3  ;;  %8970 = vmatprep.mubr.msk.f32.mxu0 %vm23_vm0, %v3308_v38  ;;  %v3313_v3 = vsel %vm456_vm2, %v3311_v16, %v3312_v63  ;;  %v9393_v45 = vld [vmem:[#allocation2 + $0x30] sm:$0xff] }
 0x17e   :  { %v8627_v33 = vpop.f32.mrf.mxu1  ;;  %8870 = vmatmul.mubr.msk.f32.gmra.mxu1 %vm23_vm0, %v11228_v5  ;;  %v2132_v35 = vpop.f32.mrf.mxu0 }
 0x17f   :  { %v11284_v61 = vadd.f32 %v2122_v37, %v1447_v51  ;;  %v1462_v29 = vadd.f32 %v8627_v33, %v11034_v27  ;;  %8872 = vmatprep.mubr.msk.f32.mxu1 %vm23_vm0, %v2475_v55  ;;  %v3315_v27 = vsel %vm456_vm2, %v3312_v63, %v3314_v1  ;;  %v9392_v55 = vld [vmem:[#allocation2 + $0x28] sm:$0x3]  ;;  %v3900_v51 = vrot.slane %v9393_v45, 2  ;;  %v9399_v45 = vld [vmem:[#allocation2 + $0x58] sm:$0x3] }
 0x180   :  { %v1456_v20 = vpop.f32.mrf.mxu1  ;;  %v8728_v11 = vpop.f32.mrf.mxu0  ;;  %8971 = vmatmul.mubr.msk.f32.gmra.mxu0 %vm23_vm0, %v3310_v15  ;;  %v3898_v22 = vrot.slane %v9392_v55, 2  ;;  %v3897_v33 = vsel %vm1645_vm3, %v3895_v12, %v3896_v17 }
 0x181   :  { %v11289_v5 = vadd.f32 %v8725_v54, %v1462_v29  ;;  %v1457_v38 = vadd.f32 %v1456_v20, %v11042_v0  ;;  %8973 = vmatprep.mubr.msk.f32.mxu0 %vm23_vm0, %v3313_v3  ;;  %v4635_v0 = vld [vmem:[#allocation2 + $0x30] sm:$0xff] }
 0x182   :  { %v8630_v52 = vpop.f32.mrf.mxu1  ;;  %8873 = vmatmul.mubr.msk.f32.gmra.mxu1 %vm23_vm0, %v11244_v44  ;;  %v2142_v39 = vpop.f32.mrf.mxu0  ;;  %v9394_v44 = vld [vmem:[#allocation2 + $0x38] sm:$0xff] }
 0x183   :  { %v11297_v37 = vadd.f32 %v2132_v35, %v1457_v38  ;;  %v1472_v16 = vadd.f32 %v8630_v52, %v11048_v7  ;;  %8875 = vmatprep.mubr.msk.f32.mxu1 %vm23_vm0, %v2478_v40  ;;  %v3901_v15 = vrot.slane %v9394_v44, 2  ;;  %v4636_v7 = vld [vmem:[#allocation2 + $0x38] sm:$0xff]  ;;  %v9395_v40 = vld [vmem:[#allocation2 + $0x40] sm:$0x3]  ;;  %v3905_v38 = vrot.slane %v9396_v14, 2 }
 0x184   :  { %v1466_v54 = vpop.f32.mrf.mxu1  ;;  %v8731_v1 = vpop.f32.mrf.mxu0  ;;  %8974 = vmatmul.mubr.msk.f32.gmra.mxu0 %vm23_vm0, %v3315_v27  ;;  %v3903_v3 = vrot.slane %v9395_v40, 2 }
 0x185   :  { %v11302_v29 = vadd.f32 %v8728_v11, %v1472_v16  ;;  %v1467_v63 = vadd.f32 %v1466_v54, %v11056_v23  ;;  %9076 = vmatprep.mubr.msk.f32.mxu0 %vm23_vm0, %v4635_v0  ;;  %v3899_v23 = vsel %vm1645_vm3, %v3896_v17, %v3898_v22  ;;  %v3902_v52 = vsel %vm1645_vm3, %v3900_v51, %v3901_v15  ;;  %v9398_v17 = vld [vmem:[%s12710_s1 + $0x40] sm:$0xff]  ;;  %v4639_v22 = vld [vmem:[#allocation2 + $0x50] sm:$0xff] }
 0x186   :  { %v8633_v35 = vpop.f32.mrf.mxu1  ;;  %8876 = vmatmul.mubr.msk.f32.gmra.mxu1 %vm23_vm0, %v11260_v19  ;;  %v2152_v20 = vpop.f32.mrf.mxu0  ;;  %v9397_v19 = vld [vmem:[#allocation2 + $0x50] sm:$0xff]  ;;  %v3908_v51 = vrot.slane %v9399_v45, 2 }
 0x187   :  { %v11309_v2 = vadd.f32 %v2142_v39, %v1467_v63  ;;  %v1482_v12 = vadd.f32 %v8633_v35, %v11062_v25  ;;  %8978 = vmatprep.mubr.msk.f32.mxu1 %vm23_vm0, %v3897_v33  ;;  %v3906_v27 = vrot.slane %v9397_v19, 2  ;;  %v4638_v25 = vld [vmem:[#allocation2 + $0x48] sm:$0xff]  ;;  %v3904_v63 = vsel %vm1645_vm3, %v3901_v15, %v3903_v3  ;;  %v9401_v35 = vld [vmem:[#allocation2 + $0x60] sm:$0xff]  ;;  %v9403_v3 = vld [vmem:[#allocation2 + $0x70] sm:$0x3] }
 0x188   :  { %v1476_v11 = vpop.f32.mrf.mxu1  ;;  %v8734_v39 = vpop.f32.mrf.mxu0  ;;  %9077 = vmatmul.mubr.msk.f32.vlgmr.msra.gmra.mxu0 %vm23_vm0, %v4636_v7  ;;  %v3910_v7 = vrot.slane %v9401_v35, 2  ;;  %v4642_v15 = vld [vmem:[#allocation2 + $0x68] sm:$0xff]  ;;  %v3913_v19 = vrot.slane %v9403_v3, 2  ;;  %v9408_v3 = vld [vmem:[#allocation2 + $0x98] sm:$0xff] }
 0x189   :  { %v11315_v55 = vadd.f32 %v8731_v1, %v1482_v12  ;;  %v1477_v16 = vadd.f32 %v1476_v11, %v11070_v58  ;;  %9271 = vmatpush3.msra.mxu0 %v9398_v17  ;;  %v9400_v58 = vld [vmem:[%s12710_s1 + $0x38] sm:$0xff]  ;;  %v4641_v1 = vld [vmem:[#allocation2 + $0x60] sm:$0xff]  ;;  %9079 = vmatprep.mubr.msk.f32.mxu0 %vm23_vm0, %v4638_v25  ;;  %v3907_v12 = vsel %vm1645_vm3, %v3905_v38, %v3906_v27 }
 0x18a   :  { %v8636_v0 = vpop.f32.mrf.mxu1  ;;  %8979 = vmatmul.mubr.msk.f32.vlgmr.msra.gmra.mxu1 %vm23_vm0, %v3899_v23  ;;  %v2162_v44 = vpop.f32.mrf.mxu0 }
 0x18b   :  { %v11323_v54 = vadd.f32 %v2152_v20, %v1477_v16  ;;  %v1492_v33 = vadd.f32 %v8636_v0, %v10847_v24  ;;  %9173 = vmatpush3.msra.mxu1 %v9400_v58  ;;  %8981 = vmatprep.mubr.msk.f32.mxu1 %vm23_vm0, %v3902_v52  ;;  %v9402_v20 = vld [vmem:[#allocation2 + $0x68] sm:$0xff]  ;;  %v9404_v0 = vld [vmem:[#allocation2 + $0x78] sm:$0xff] }
 0x18c   :  { %v1486_v40 = vpop.f32.mrf.mxu1  ;;  %v3911_v24 = vrot.slane %v9402_v20, 2  ;;  %v8737_v11 = vpop.f32.mrf.mxu0  ;;  %9080 = vmatmul.mubr.msk.f32.gmra.mxu0 %vm23_vm0, %v4639_v22  ;;  %v3915_v17 = vrot.slane %v9404_v0, 2  ;;  %v4647_v20 = vld [vmem:[#allocation2 + $0x90] sm:$0xff] }
 0x18d   :  { %v11333_v23 = vadd.f32 %v8734_v39, %v1492_v33  ;;  %v1487_v14 = vadd.f32 %v1486_v40, %v10860_v60  ;;  %9082 = vmatprep.mubr.msk.f32.mxu0 %vm23_vm0, %v4641_v1  ;;  %v3909_v60 = vsel %vm1645_vm3, %v3906_v27, %v3908_v51  ;;  %v4644_v39 = vld [vmem:[#allocation2 + $0x78] sm:$0xff]  ;;  %v9405_v33 = vld [vmem:[#allocation2 + $0x80] sm:$0xff]  ;;  %v9406_v51 = vld [vmem:[#allocation2 + $0x88] sm:$0x3] }
 0x18e   :  { %v8639_v52 = vpop.f32.mrf.mxu1  ;;  %8982 = vmatmul.mubr.msk.f32.gmra.mxu1 %vm23_vm0, %v3904_v63  ;;  %v2172_v25 = vpop.f32.mrf.mxu0  ;;  %v3912_v45 = vsel %vm1645_vm3, %v3910_v7, %v3911_v24  ;;  %v3916_v58 = vrot.slane %v9405_v33, 2  ;;  %v4645_v27 = vld [vmem:[#allocation2 + $0x80] sm:$0xff]  ;;  %v3918_v35 = vrot.slane %v9406_v51, 2 }
 0x18f   :  { %v11339_v16 = vadd.f32 %v2162_v44, %v1487_v14  ;;  %v1502_v38 = vadd.f32 %v8639_v52, %v10869_v59  ;;  %8984 = vmatprep.mubr.msk.f32.mxu1 %vm23_vm0, %v3907_v12  ;;  %v9407_v14 = vld [vmem:[#allocation2 + $0x90] sm:$0xff] }
 0x190   :  { %v1496_v22 = vpop.f32.mrf.mxu1  ;;  %v8740_v1 = vpop.f32.mrf.mxu0  ;;  %9083 = vmatmul.mubr.msk.f32.gmra.mxu0 %vm23_vm0, %v4642_v15  ;;  %v3917_v15 = vsel %vm1645_vm3, %v3915_v17, %v3916_v58  ;;  %v12872_v17 = vld [vmem:[#allocation28_spill] sm:$0xff] }
 0x191   :  { %v11345_v63 = vadd.f32 %v8737_v11, %v1502_v38  ;;  %v1497_v44 = vadd.f32 %v1496_v22, %v10878_v49  ;;  %9085 = vmatprep.mubr.msk.f32.mxu0 %vm23_vm0, %v4644_v39  ;;  %v3914_v49 = vsel %vm1645_vm3, %v3911_v24, %v3913_v19  ;;  %v3920_v11 = vrot.slane %v9407_v14, 2  ;;  %v4648_v24 = vld [vmem:[#allocation2 + $0x98] sm:$0xff]  ;;  %v9409_v19 = vld [vmem:[#allocation2 + $0xa0] sm:$0x3]  ;;  %v12873_v14 = vld [vmem:[#allocation29_spill] sm:$0xff] }
 0x192   :  { %v8642_v59 = vpop.f32.mrf.mxu1  ;;  %8985 = vmatmul.mubr.msk.f32.gmra.mxu1 %vm23_vm0, %v3909_v60  ;;  %v2182_v12 = vpop.f32.mrf.mxu0  ;;  %v3921_v38 = vrot.slane %v9408_v3, 2  ;;  %v3923_v0 = vrot.slane %v9409_v19, 2 }
 0x193   :  { %v11351_v40 = vadd.f32 %v2172_v25, %v1497_v44  ;;  %v1512_v7 = vadd.f32 %v8642_v59, %v10883_v4  ;;  %8987 = vmatprep.mubr.msk.f32.mxu1 %vm23_vm0, %v3912_v45  ;;  %v4650_v44 = vld [vmem:[#allocation2 + $0xa8] sm:$0xff] }
 0x194   :  { %v1506_v52 = vpop.f32.mrf.mxu1  ;;  %v8743_v39 = vpop.f32.mrf.mxu0  ;;  %9086 = vmatmul.mubr.msk.f32.gmra.mxu0 %vm23_vm0, %v4645_v27  ;;  %v3922_v51 = vsel %vm1645_vm3, %v3920_v11, %v3921_v38  ;;  %v12874_v11 = vld [vmem:[#allocation32_spill] sm:$0xff] }
 0x195   :  { %v11357_v60 = vadd.f32 %v8740_v1, %v1512_v7  ;;  %v1507_v25 = vadd.f32 %v1506_v52, %v10892_v26  ;;  %9088 = vmatprep.mubr.msk.f32.mxu0 %vm23_vm0, %v4647_v20  ;;  %v3919_v26 = vsel %vm1645_vm3, %v3916_v58, %v3918_v35  ;;  %v9410_v1 = vld [vmem:[#allocation2 + $0xa8] sm:$0xff]  ;;  %v9411_v7 = vld [vmem:[#allocation2 + $0xb0] sm:$0xff]  ;;  %v9412_v35 = vld [vmem:[#allocation2 + $0xb8] sm:$0x3] }
 0x196   :  { %v8645_v4 = vpop.f32.mrf.mxu1  ;;  %8988 = vmatmul.mubr.msk.f32.gmra.mxu1 %vm23_vm0, %v3914_v49  ;;  %v2192_v33 = vpop.f32.mrf.mxu0  ;;  %v3925_v59 = vrot.slane %v9410_v1, 2  ;;  %v3926_v49 = vrot.slane %v9411_v7, 2  ;;  %v4651_v58 = vld [vmem:[#allocation2 + $0xb0] sm:$0xff] }
 0x197   :  { %v11363_v22 = vadd.f32 %v2182_v12, %v1507_v25  ;;  %v1522_v45 = vadd.f32 %v8645_v4, %v12872_v17  ;;  %8990 = vmatprep.mubr.msk.f32.mxu1 %vm23_vm0, %v3917_v15  ;;  %v3928_v15 = vrot.slane %v9412_v35, 2  ;;  %v4653_v17 = vld [vmem:[#allocation2 + $0xc0] sm:$0xff] }
 0x198   :  { %v1516_v27 = vpop.f32.mrf.mxu1  ;;  %v8746_v52 = vpop.f32.mrf.mxu0  ;;  %9089 = vmatmul.mubr.msk.f32.gmra.mxu0 %vm23_vm0, %v4648_v24 }
 0x199   :  { %v11369_v20 = vadd.f32 %v8743_v39, %v1522_v45  ;;  %v1517_v12 = vadd.f32 %v1516_v27, %v12873_v14  ;;  %9091 = vmatprep.mubr.msk.f32.mxu0 %vm23_vm0, %v4650_v44  ;;  %v3924_v39 = vsel %vm1645_vm3, %v3921_v38, %v3923_v0  ;;  %v9413_v45 = vld [vmem:[#allocation2 + $0xc0] sm:$0xff]  ;;  %v9414_v27 = vld [vmem:[#allocation2 + $0xc8] sm:$0xff]  ;;  %v9415_v0 = vld [vmem:[#allocation2 + $0xd0] sm:$0x3] }
 0x19a   :  { %v8648_v3 = vpop.f32.mrf.mxu1  ;;  %8991 = vmatmul.mubr.msk.f32.gmra.mxu1 %vm23_vm0, %v3919_v26  ;;  %v2202_v19 = vpop.f32.mrf.mxu0  ;;  %v3930_v24 = vrot.slane %v9413_v45, 2  ;;  %v3927_v26 = vsel %vm1645_vm3, %v3925_v59, %v3926_v49  ;;  %v3931_v44 = vrot.slane %v9414_v27, 2  ;;  %v12876_v14 = vld [vmem:[#allocation34_spill] sm:$0xff]  ;;  %v12878_v59 = vld [vmem:[#allocation37_spill] sm:$0xff] }
 0x19b   :  { %v11375_v25 = vadd.f32 %v2192_v33, %v1517_v12  ;;  %v1532_v4 = vadd.f32 %v8648_v3, %v12874_v11  ;;  %8993 = vmatprep.mubr.msk.f32.mxu1 %vm23_vm0, %v3922_v51  ;;  %v4654_v38 = vld [vmem:[#allocation2 + $0xc8] sm:$0xff]  ;;  %v3933_v51 = vrot.slane %v9415_v0, 2  ;;  %v12880_v0 = vld [vmem:[#allocation39_spill] sm:$0xff] }
 0x19c   :  { %v1526_v1 = vpop.f32.mrf.mxu1  ;;  %v8749_v12 = vpop.f32.mrf.mxu0  ;;  %9092 = vmatmul.mubr.msk.f32.gmra.mxu0 %vm23_vm0, %v4651_v58 }
 0x19d   :  { %v11381_v7 = vadd.f32 %v8746_v52, %v1532_v4  ;;  %v1527_v33 = vadd.f32 %v1526_v1, %v12876_v14  ;;  %9094 = vmatprep.mubr.msk.f32.mxu0 %vm23_vm0, %v4653_v17  ;;  %v3929_v52 = vsel %vm1645_vm3, %v3926_v49, %v3928_v15  ;;  %v4656_v4 = vld [vmem:[#allocation2 + $0xd8] sm:$0xff]  ;;  %v9417_v14 = vld [vmem:[#allocation2 + $0xe0] sm:$0xff] }
 0x19e   :  { %v8651_v3 = vpop.f32.mrf.mxu1  ;;  %8994 = vmatmul.mubr.msk.f32.gmra.mxu1 %vm23_vm0, %v3924_v39  ;;  %v2212_v45 = vpop.f32.mrf.mxu0  ;;  %v9416_v1 = vld [vmem:[#allocation2 + $0xd8] sm:$0xff]  ;;  %v3932_v39 = vsel %vm1645_vm3, %v3930_v24, %v3931_v44  ;;  %v3936_v17 = vrot.slane %v9417_v14, 2  ;;  %v4657_v49 = vld [vmem:[#allocation2 + $0xe0] sm:$0xff]  ;;  %v9419_v14 = vld [vmem:[#allocation2 + $0xf0] sm:$0xff] }
 0x19f   :  { %12875 = vst [vmem:[#allocation31_spill] sm:$0xff] %v11381_v7  ;;  %v11387_v35 = vadd.f32 %v2202_v19, %v1527_v33  ;;  %v1542_v11 = vadd.f32 %v8651_v3, %v12878_v59  ;;  %8996 = vmatprep.mubr.msk.f32.mxu1 %vm23_vm0, %v3927_v26  ;;  %v3935_v58 = vrot.slane %v9416_v1, 2  ;;  %v12882_v26 = vld [vmem:[#allocation40_spill] sm:$0xff]  ;;  %v9418_v1 = vld [vmem:[#allocation2 + $0xe8] sm:$0x3] }
 0x1a0   :  { %v1536_v27 = vpop.f32.mrf.mxu1  ;;  %v8752_v33 = vpop.f32.mrf.mxu0  ;;  %9095 = vmatmul.mubr.msk.f32.gmra.mxu0 %vm23_vm0, %v4654_v38  ;;  %v3940_v38 = vrot.slane %v9419_v14, 2 }
 0x1a1   :  { %12877 = vst [vmem:[#allocation33_spill] sm:$0xff] %v11387_v35  ;;  %v11393_v7 = vadd.f32 %v8749_v12, %v1542_v11  ;;  %v1537_v19 = vadd.f32 %v1536_v27, %v12880_v0  ;;  %9097 = vmatprep.mubr.msk.f32.mxu0 %vm23_vm0, %v4656_v4  ;;  %v3934_v12 = vsel %vm1645_vm3, %v3931_v44, %v3933_v51  ;;  %v4659_v11 = vld [vmem:[#allocation2 + $0xf0] sm:$0xff]  ;;  %v3938_v27 = vrot.slane %v9418_v1, 2  ;;  %v4660_v44 = vld [vmem:[#allocation2 + $0xf8] sm:$0xff] }
 0x1a2   :  { %v8654_v3 = vpop.f32.mrf.mxu1  ;;  %8997 = vmatmul.mubr.msk.f32.gmra.mxu1 %vm23_vm0, %v3929_v52  ;;  %v2222_v24 = vpop.f32.mrf.mxu0  ;;  %v3937_v52 = vsel %vm1645_vm3, %v3935_v58, %v3936_v17 }
 0x1a3   :  { %12879 = vst [vmem:[#allocation35_spill] sm:$0xff] %v11393_v7  ;;  %v11399_v15 = vadd.f32 %v2212_v45, %v1537_v19  ;;  %v1552_v59 = vadd.f32 %v8654_v3, %v12882_v26  ;;  %8999 = vmatprep.mubr.msk.f32.mxu1 %vm23_vm0, %v3932_v39  ;;  %v9420_v7 = vld [vmem:[#allocation2 + $0xf8] sm:$0xff]  ;;  %v12884_v45 = vld [vmem:[#allocation9_spill] sm:$0xff]  ;;  %v12886_v26 = vld [vmem:[#allocation10_spill] sm:$0xff] }
 0x1a4   :  { %v1546_v0 = vpop.f32.mrf.mxu1  ;;  %v3941_v4 = vrot.slane %v9420_v7, 2  ;;  %v8755_v3 = vpop.f32.mrf.mxu0  ;;  %9098 = vmatmul.mubr.msk.f32.gmra.mxu0 %vm23_vm0, %v4657_v49  ;;  %v3939_v7 = vsel %vm1645_vm3, %v3936_v17, %v3938_v27  ;;  %v4663_v17 = vld [vmem:[#allocation2 + $0x110] sm:$0xff] }
 0x1a5   :  { %12881 = vst [vmem:[#allocation36_spill] sm:$0xff] %v11399_v15  ;;  %v11405_v35 = vadd.f32 %v8752_v33, %v1552_v59  ;;  %v1547_v19 = vadd.f32 %v1546_v0, %v12884_v45  ;;  %9100 = vmatprep.mubr.msk.f32.mxu0 %vm23_vm0, %v4659_v11  ;;  %v4662_v33 = vld [vmem:[#allocation2 + $0x108] sm:$0xff]  ;;  %v9421_v59 = vld [vmem:[#allocation2 + $0x100] sm:$0x3] }
 0x1a6   :  { %v8657_v39 = vpop.f32.mrf.mxu1  ;;  %9000 = vmatmul.mubr.msk.f32.gmra.mxu1 %vm23_vm0, %v3934_v12  ;;  %v2232_v58 = vpop.f32.mrf.mxu0  ;;  %v3943_v14 = vrot.slane %v9421_v59, 2  ;;  %v9422_v0 = vld [vmem:[#allocation2 + $0x108] sm:$0xff]  ;;  %v3942_v12 = vsel %vm1645_vm3, %v3940_v38, %v3941_v4 }
 0x1a7   :  { %12883 = vst [vmem:[#allocation38_spill] sm:$0xff] %v11405_v35  ;;  %v11411_v51 = vadd.f32 %v2222_v24, %v1547_v19  ;;  %v1562_v1 = vadd.f32 %v8657_v39, %v12886_v26  ;;  %9002 = vmatprep.mubr.msk.f32.mxu1 %vm23_vm0, %v3937_v52  ;;  %v3945_v49 = vrot.slane %v9422_v0, 2  ;;  %v9423_v35 = vld [vmem:[#allocation2 + $0x110] sm:$0xff]  ;;  %v12890_v26 = vld [vmem:[#allocation12_spill] sm:$0xff] }
 0x1a8   :  { %v1556_v45 = vpop.f32.mrf.mxu1  ;;  %v3946_v11 = vrot.slane %v9423_v35, 2  ;;  %v12888_v24 = vld [vmem:[#allocation11_spill] sm:$0xff]  ;;  %v8758_v39 = vpop.f32.mrf.mxu0  ;;  %9101 = vmatmul.mubr.msk.f32.gmra.mxu0 %vm23_vm0, %v4660_v44  ;;  %v3944_v35 = vsel %vm1645_vm3, %v3941_v4, %v3943_v14  ;;  %v4666_v4 = vld [vmem:[#allocation2 + $0x128] sm:$0xff] }
 0x1a9   :  { %12885 = vst [vmem:[#allocation41_spill] sm:$0xff] %v11411_v51  ;;  %v11417_v15 = vadd.f32 %v8755_v3, %v1562_v1  ;;  %v1557_v19 = vadd.f32 %v1556_v45, %v12888_v24  ;;  %9103 = vmatprep.mubr.msk.f32.mxu0 %vm23_vm0, %v4662_v33  ;;  %v4665_v3 = vld [vmem:[#allocation2 + $0x120] sm:$0xff]  ;;  %v9424_v1 = vld [vmem:[#allocation2 + $0x118] sm:$0x3] }
 0x1aa   :  { %v8660_v52 = vpop.f32.mrf.mxu1  ;;  %9003 = vmatmul.mubr.msk.f32.gmra.mxu1 %vm23_vm0, %v3939_v7  ;;  %v2242_v38 = vpop.f32.mrf.mxu0  ;;  %v3948_v0 = vrot.slane %v9424_v1, 2  ;;  %v9425_v45 = vld [vmem:[#allocation2 + $0x120] sm:$0xff]  ;;  %v3947_v7 = vsel %vm1645_vm3, %v3945_v49, %v3946_v11 }
 0x1ab   :  { %12887 = vst [vmem:[#allocation42_spill] sm:$0xff] %v11417_v15  ;;  %v11423_v27 = vadd.f32 %v2232_v58, %v1557_v19  ;;  %v1572_v59 = vadd.f32 %v8660_v52, %v12890_v26  ;;  %9005 = vmatprep.mubr.msk.f32.mxu1 %vm23_vm0, %v3942_v12  ;;  %v3950_v44 = vrot.slane %v9425_v45, 2  ;;  %v9426_v15 = vld [vmem:[#allocation2 + $0x128] sm:$0xff] }
 0x1ac   :  { %v1566_v24 = vpop.f32.mrf.mxu1  ;;  %v3951_v33 = vrot.slane %v9426_v15, 2  ;;  %v12892_v58 = vld [vmem:[#allocation13_spill] sm:$0xff]  ;;  %v8761_v52 = vpop.f32.mrf.mxu0  ;;  %9104 = vmatmul.mubr.msk.f32.gmra.mxu0 %vm23_vm0, %v4663_v17  ;;  %v12894_v26 = vld [vmem:[#allocation14_spill] sm:$0xff]  ;;  %v3949_v15 = vsel %vm1645_vm3, %v3946_v11, %v3948_v0 }
 0x1ad   :  { %12889 = vst [vmem:[#allocation43_spill] sm:$0xff] %v11423_v27  ;;  %v11429_v51 = vadd.f32 %v8758_v39, %v1572_v59  ;;  %v1567_v19 = vadd.f32 %v1566_v24, %v12892_v58  ;;  %9106 = vmatprep.mubr.msk.f32.mxu0 %vm23_vm0, %v4665_v3  ;;  %v4668_v39 = vld [vmem:[#allocation2 + $0x138] sm:$0xff]  ;;  %v9427_v59 = vld [vmem:[#allocation2 + $0x130] sm:$0x3]  ;;  %v4669_v11 = vld [vmem:[#allocation2 + $0x140] sm:$0xff] }
 0x1ae   :  { %v8663_v12 = vpop.f32.mrf.mxu1  ;;  %9006 = vmatmul.mubr.msk.f32.gmra.mxu1 %vm23_vm0, %v3944_v35  ;;  %v2252_v49 = vpop.f32.mrf.mxu0  ;;  %v3953_v45 = vrot.slane %v9427_v59, 2  ;;  %v9428_v24 = vld [vmem:[#allocation2 + $0x138] sm:$0xff]  ;;  %v3952_v35 = vsel %vm1645_vm3, %v3950_v44, %v3951_v33 }
 0x1af   :  { %12891 = vst [vmem:[#allocation28_spill] sm:$0xff] %v11429_v51  ;;  %v11435_v14 = vadd.f32 %v2242_v38, %v1567_v19  ;;  %v1582_v1 = vadd.f32 %v8663_v12, %v12894_v26  ;;  %9008 = vmatprep.mubr.msk.f32.mxu1 %vm23_vm0, %v3947_v7  ;;  %v3955_v17 = vrot.slane %v9428_v24, 2  ;;  %v9429_v51 = vld [vmem:[#allocation2 + $0x140] sm:$0xff]  ;;  %v12896_v38 = vld [vmem:[#allocation15_spill] sm:$0xff] }
 0x1b0   :  { %v1576_v58 = vpop.f32.mrf.mxu1  ;;  %v3956_v3 = vrot.slane %v9429_v51, 2  ;;  %v8764_v12 = vpop.f32.mrf.mxu0  ;;  %9107 = vmatmul.mubr.msk.f32.gmra.mxu0 %vm23_vm0, %v4666_v4  ;;  %v12898_v26 = vld [vmem:[#allocation16_spill] sm:$0xff]  ;;  %v3954_v51 = vsel %vm1645_vm3, %v3951_v33, %v3953_v45 }
 0x1b1   :  { %12893 = vst [vmem:[#allocation29_spill] sm:$0xff] %v11435_v14  ;;  %v11441_v27 = vadd.f32 %v8761_v52, %v1582_v1  ;;  %v1577_v19 = vadd.f32 %v1576_v58, %v12896_v38  ;;  %9109 = vmatprep.mubr.msk.f32.mxu0 %vm23_vm0, %v4668_v39  ;;  %v4671_v52 = vld [vmem:[#allocation2 + $0x150] sm:$0xff]  ;;  %v9430_v1 = vld [vmem:[#allocation2 + $0x148] sm:$0x3]  ;;  %v4672_v33 = vld [vmem:[#allocation2 + $0x158] sm:$0xff] }
 0x1b2   :  { %v8666_v7 = vpop.f32.mrf.mxu1  ;;  %9009 = vmatmul.mubr.msk.f32.gmra.mxu1 %vm23_vm0, %v3949_v15  ;;  %v2262_v44 = vpop.f32.mrf.mxu0  ;;  %v3958_v24 = vrot.slane %v9430_v1, 2  ;;  %v9431_v58 = vld [vmem:[#allocation2 + $0x150] sm:$0xff]  ;;  %v3957_v15 = vsel %vm1645_vm3, %v3955_v17, %v3956_v3 }
 0x1b3   :  { %12895 = vst [vmem:[#allocation32_spill] sm:$0xff] %v11441_v27  ;;  %v11447_v0 = vadd.f32 %v2252_v49, %v1577_v19  ;;  %v1592_v59 = vadd.f32 %v8666_v7, %v12898_v26  ;;  %9011 = vmatprep.mubr.msk.f32.mxu1 %vm23_vm0, %v3952_v35  ;;  %v3960_v4 = vrot.slane %v9431_v58, 2  ;;  %v9432_v27 = vld [vmem:[#allocation2 + $0x158] sm:$0xff]  ;;  %v12900_v49 = vld [vmem:[#allocation17_spill] sm:$0xff]  ;;  %v12902_v26 = vld [vmem:[#allocation18_spill] sm:$0xff] }
 0x1b4   :  { %v1586_v38 = vpop.f32.mrf.mxu1  ;;  %v3961_v39 = vrot.slane %v9432_v27, 2  ;;  %v8767_v7 = vpop.f32.mrf.mxu0  ;;  %9110 = vmatmul.mubr.msk.f32.gmra.mxu0 %vm23_vm0, %v4669_v11  ;;  %v3959_v27 = vsel %vm1645_vm3, %v3956_v3, %v3958_v24  ;;  %v4675_v3 = vld [vmem:[#allocation2 + $0x170] sm:$0xff] }
 0x1b5   :  { %12897 = vst [vmem:[#allocation34_spill] sm:$0xff] %v11447_v0  ;;  %v11453_v14 = vadd.f32 %v8764_v12, %v1592_v59  ;;  %v1587_v19 = vadd.f32 %v1586_v38, %v12900_v49  ;;  %9112 = vmatprep.mubr.msk.f32.mxu0 %vm23_vm0, %v4671_v52  ;;  %v4674_v12 = vld [vmem:[#allocation2 + $0x168] sm:$0xff]  ;;  %v9433_v59 = vld [vmem:[#allocation2 + $0x160] sm:$0x3] }
 0x1b6   :  { %v8669_v35 = vpop.f32.mrf.mxu1  ;;  %9012 = vmatmul.mubr.msk.f32.gmra.mxu1 %vm23_vm0, %v3954_v51  ;;  %v2272_v17 = vpop.f32.mrf.mxu0  ;;  %v3963_v58 = vrot.slane %v9433_v59, 2  ;;  %v9434_v38 = vld [vmem:[#allocation2 + $0x168] sm:$0xff]  ;;  %v3962_v51 = vsel %vm1645_vm3, %v3960_v4, %v3961_v39 }
 0x1b7   :  { %12899 = vst [vmem:[#allocation37_spill] sm:$0xff] %v11453_v14  ;;  %v11459_v45 = vadd.f32 %v2262_v44, %v1587_v19  ;;  %v1602_v1 = vadd.f32 %v8669_v35, %v12902_v26  ;;  %9014 = vmatprep.mubr.msk.f32.mxu1 %vm23_vm0, %v3957_v15  ;;  %v3965_v11 = vrot.slane %v9434_v38, 2  ;;  %v9435_v14 = vld [vmem:[#allocation2 + $0x170] sm:$0xff]  ;;  %v12906_v26 = vld [vmem:[#allocation20_spill] sm:$0xff] }
 0x1b8   :  { %v1596_v49 = vpop.f32.mrf.mxu1  ;;  %v3966_v52 = vrot.slane %v9435_v14, 2  ;;  %v12904_v44 = vld [vmem:[#allocation19_spill] sm:$0xff]  ;;  %v8770_v35 = vpop.f32.mrf.mxu0  ;;  %9113 = vmatmul.mubr.msk.f32.gmra.mxu0 %vm23_vm0, %v4672_v33  ;;  %v3964_v14 = vsel %vm1645_vm3, %v3961_v39, %v3963_v58  ;;  %v4678_v39 = vld [vmem:[#allocation2 + $0x188] sm:$0xff] }
 0x1b9   :  { %12901 = vst [vmem:[#allocation39_spill] sm:$0xff] %v11459_v45  ;;  %v11465_v0 = vadd.f32 %v8767_v7, %v1602_v1  ;;  %v1597_v19 = vadd.f32 %v1596_v49, %v12904_v44  ;;  %9115 = vmatprep.mubr.msk.f32.mxu0 %vm23_vm0, %v4674_v12  ;;  %v4677_v7 = vld [vmem:[#allocation2 + $0x180] sm:$0xff]  ;;  %v9436_v1 = vld [vmem:[#allocation2 + $0x178] sm:$0x3] }
 0x1ba   :  { %v8672_v15 = vpop.f32.mrf.mxu1  ;;  %9015 = vmatmul.mubr.msk.f32.gmra.mxu1 %vm23_vm0, %v3959_v27  ;;  %v2282_v4 = vpop.f32.mrf.mxu0  ;;  %v3968_v38 = vrot.slane %v9436_v1, 2  ;;  %v9437_v49 = vld [vmem:[#allocation2 + $0x180] sm:$0xff]  ;;  %v3967_v27 = vsel %vm1645_vm3, %v3965_v11, %v3966_v52 }
 0x1bb   :  { %12903 = vst [vmem:[#allocation40_spill] sm:$0xff] %v11465_v0  ;;  %v11471_v24 = vadd.f32 %v2272_v17, %v1597_v19  ;;  %v1612_v59 = vadd.f32 %v8672_v15, %v12906_v26  ;;  %9017 = vmatprep.mubr.msk.f32.mxu1 %vm23_vm0, %v3962_v51  ;;  %v3970_v33 = vrot.slane %v9437_v49, 2  ;;  %v9438_v0 = vld [vmem:[#allocation2 + $0x188] sm:$0xff] }
 0x1bc   :  { %v1606_v44 = vpop.f32.mrf.mxu1  ;;  %v3971_v12 = vrot.slane %v9438_v0, 2  ;;  %v12908_v17 = vld [vmem:[#allocation21_spill] sm:$0xff]  ;;  %v8773_v15 = vpop.f32.mrf.mxu0  ;;  %9116 = vmatmul.mubr.msk.f32.gmra.mxu0 %vm23_vm0, %v4675_v3  ;;  %v12910_v26 = vld [vmem:[#allocation22_spill] sm:$0xff]  ;;  %v3969_v0 = vsel %vm1645_vm3, %v3966_v52, %v3968_v38 }
 0x1bd   :  { %12905 = vst [vmem:[#allocation9_spill] sm:$0xff] %v11471_v24  ;;  %v11477_v45 = vadd.f32 %v8770_v35, %v1612_v59  ;;  %v1607_v19 = vadd.f32 %v1606_v44, %v12908_v17  ;;  %9118 = vmatprep.mubr.msk.f32.mxu0 %vm23_vm0, %v4677_v7  ;;  %v4680_v35 = vld [vmem:[#allocation2 + $0x198] sm:$0xff]  ;;  %v9439_v59 = vld [vmem:[#allocation2 + $0x190] sm:$0x3]  ;;  %v9440_v44 = vld [vmem:[#allocation2 + $0x1c8] sm:$0xff] }
 0x1be   :  { %v8675_v51 = vpop.f32.mrf.mxu1  ;;  %9018 = vmatmul.mubr.msk.f32.gmra.mxu1 %vm23_vm0, %v3964_v14  ;;  %v2292_v11 = vpop.f32.mrf.mxu0  ;;  %v3973_v49 = vrot.slane %v9439_v59, 2  ;;  %v3975_v3 = vrot.slane %v9440_v44, 2  ;;  %v3972_v14 = vsel %vm1645_vm3, %v3970_v33, %v3971_v12  ;;  %v4681_v52 = vld [vmem:[#allocation2 + $0x1a0] sm:$0xff] }
 0x1bf   :  { %12907 = vst [vmem:[#allocation10_spill] sm:$0xff] %v11477_v45  ;;  %v11483_v58 = vadd.f32 %v2282_v4, %v1607_v19  ;;  %v1622_v1 = vadd.f32 %v8675_v51, %v12910_v26  ;;  %9020 = vmatprep.mubr.msk.f32.mxu1 %vm23_vm0, %v3967_v27  ;;  %v9441_v45 = vld [vmem:[#allocation2 + $0x1d0] sm:$0xff]  ;;  %v12914_v26 = vld [vmem:[#allocation24_spill] sm:$0xff] }
 0x1c0   :  { %v1616_v17 = vpop.f32.mrf.mxu1  ;;  %v3976_v7 = vrot.slane %v9441_v45, 2  ;;  %v12912_v4 = vld [vmem:[#allocation23_spill] sm:$0xff]  ;;  %v8776_v51 = vpop.f32.mrf.mxu0  ;;  %9119 = vmatmul.mubr.msk.f32.gmra.mxu0 %vm23_vm0, %v4678_v39  ;;  %v3974_v45 = vsel %vm1645_vm3, %v3971_v12, %v3973_v49  ;;  %v4684_v12 = vld [vmem:[#allocation2 + $0x1e8] sm:$0xff] }
 0x1c1   :  { %12909 = vst [vmem:[#allocation11_spill] sm:$0xff] %v11483_v58  ;;  %v11489_v24 = vadd.f32 %v8773_v15, %v1622_v1  ;;  %v1617_v19 = vadd.f32 %v1616_v17, %v12912_v4  ;;  %9121 = vmatprep.mubr.msk.f32.mxu0 %vm23_vm0, %v4680_v35  ;;  %v4683_v15 = vld [vmem:[#allocation2 + $0x1e0] sm:$0xff]  ;;  %v9442_v1 = vld [vmem:[#allocation2 + $0x1d8] sm:$0x3] }
 0x1c2   :  { %v8678_v27 = vpop.f32.mrf.mxu1  ;;  %9021 = vmatmul.mubr.msk.f32.gmra.mxu1 %vm23_vm0, %v3969_v0  ;;  %v2302_v33 = vpop.f32.mrf.mxu0  ;;  %v3978_v44 = vrot.slane %v9442_v1, 2  ;;  %v9443_v17 = vld [vmem:[#allocation2 + $0x1e0] sm:$0xff]  ;;  %v3977_v0 = vsel %vm1645_vm3, %v3975_v3, %v3976_v7 }
 0x1c3   :  { %12911 = vst [vmem:[#allocation12_spill] sm:$0xff] %v11489_v24  ;;  %v11495_v38 = vadd.f32 %v2292_v11, %v1617_v19  ;;  %v1632_v59 = vadd.f32 %v8678_v27, %v12914_v26  ;;  %9023 = vmatprep.mubr.msk.f32.mxu1 %vm23_vm0, %v3972_v14  ;;  %v3980_v39 = vrot.slane %v9443_v17, 2  ;;  %v9444_v24 = vld [vmem:[#allocation2 + $0x1e8] sm:$0xff] }
 0x1c4   :  { %v1626_v4 = vpop.f32.mrf.mxu1  ;;  %v3981_v35 = vrot.slane %v9444_v24, 2  ;;  %v12916_v11 = vld [vmem:[#allocation25_spill] sm:$0xff]  ;;  %v8779_v27 = vpop.f32.mrf.mxu0  ;;  %9122 = vmatmul.mubr.msk.f32.gmra.mxu0 %vm23_vm0, %v4681_v52  ;;  %v12918_v26 = vld [vmem:[#allocation26_spill] sm:$0xff]  ;;  %v3979_v24 = vsel %vm1645_vm3, %v3976_v7, %v3978_v44 }
 0x1c5   :  { %12913 = vst [vmem:[#allocation13_spill] sm:$0xff] %v11495_v38  ;;  %v11501_v58 = vadd.f32 %v8776_v51, %v1632_v59  ;;  %v1627_v19 = vadd.f32 %v1626_v4, %v12916_v11  ;;  %9124 = vmatprep.mubr.msk.f32.mxu0 %vm23_vm0, %v4683_v15  ;;  %v4686_v51 = vld [vmem:[#allocation2 + $0x1f8] sm:$0xff]  ;;  %v9445_v59 = vld [vmem:[#allocation2 + $0x1f0] sm:$0x3]  ;;  %v4687_v7 = vld [vmem:[#allocation2 + $0x200] sm:$0xff] }
 0x1c6   :  { %v8681_v14 = vpop.f32.mrf.mxu1  ;;  %9024 = vmatmul.mubr.msk.f32.gmra.mxu1 %vm23_vm0, %v3974_v45  ;;  %v2312_v3 = vpop.f32.mrf.mxu0  ;;  %v3983_v17 = vrot.slane %v9445_v59, 2  ;;  %v9446_v4 = vld [vmem:[#allocation2 + $0x1f8] sm:$0xff]  ;;  %v3982_v45 = vsel %vm1645_vm3, %v3980_v39, %v3981_v35 }
 0x1c7   :  { %12915 = vst [vmem:[#allocation14_spill] sm:$0xff] %v11501_v58  ;;  %v11507_v49 = vadd.f32 %v2302_v33, %v1627_v19  ;;  %v1642_v1 = vadd.f32 %v8681_v14, %v12918_v26  ;;  %9026 = vmatprep.mubr.msk.f32.mxu1 %vm23_vm0, %v3977_v0  ;;  %v3985_v52 = vrot.slane %v9446_v4, 2  ;;  %v9447_v58 = vld [vmem:[#allocation2 + $0x200] sm:$0xff]  ;;  %v12920_v33 = vld [vmem:[#allocation27_spill] sm:$0xff]  ;;  %v12921_v26 = vld [vmem:[#allocation30_spill] sm:$0xff] }
 0x1c8   :  { %v1636_v11 = vpop.f32.mrf.mxu1  ;;  %v3986_v15 = vrot.slane %v9447_v58, 2  ;;  %v8882_v14 = vpop.f32.mrf.mxu0  ;;  %9125 = vmatmul.mubr.msk.f32.gmra.mxu0 %vm23_vm0, %v4684_v12  ;;  %v3984_v58 = vsel %vm1645_vm3, %v3981_v35, %v3983_v17  ;;  %v4690_v35 = vld [vmem:[#allocation2 + $0x218] sm:$0xff] }
 0x1c9   :  { %12917 = vst [vmem:[#allocation15_spill] sm:$0xff] %v11507_v49  ;;  %v11513_v38 = vadd.f32 %v8779_v27, %v1642_v1  ;;  %v1637_v19 = vadd.f32 %v1636_v11, %v12920_v33  ;;  %9127 = vmatprep.mubr.msk.f32.mxu0 %vm23_vm0, %v4686_v51  ;;  %v4689_v27 = vld [vmem:[#allocation2 + $0x210] sm:$0xff]  ;;  %v9448_v1 = vld [vmem:[#allocation2 + $0x208] sm:$0x3] }
 0x1ca   :  { %v8784_v0 = vpop.f32.mrf.mxu1  ;;  %9027 = vmatmul.mubr.msk.f32.gmra.mxu1 %vm23_vm0, %v3979_v24  ;;  %v3512_v39 = vpop.f32.mrf.mxu0  ;;  %v3988_v4 = vrot.slane %v9448_v1, 2  ;;  %v9449_v11 = vld [vmem:[#allocation2 + $0x210] sm:$0xff]  ;;  %v3987_v24 = vsel %vm1645_vm3, %v3985_v52, %v3986_v15 }
 0x1cb   :  { %12919 = vst [vmem:[#allocation16_spill] sm:$0xff] %v11513_v38  ;;  %v11519_v44 = vadd.f32 %v2312_v3, %v1637_v19  ;;  %v3061_v59 = vadd.f32 %v8784_v0, %v12921_v26  ;;  %9029 = vmatprep.mubr.msk.f32.mxu1 %vm23_vm0, %v3982_v45  ;;  %v3990_v12 = vrot.slane %v9449_v11, 2  ;;  %v9450_v38 = vld [vmem:[#allocation2 + $0x218] sm:$0xff]  ;;  %v9453_v11 = vld [vmem:[#allocation2 + $0x230] sm:$0xff] }
 0x1cc   :  { %v2741_v33 = vpop.f32.mrf.mxu1  ;;  %v3991_v51 = vrot.slane %v9450_v38, 2  ;;  %v8885_v19 = vpop.f32.mrf.mxu0  ;;  %9128 = vmatmul.mubr.msk.f32.gmra.mxu0 %vm23_vm0, %v4687_v7  ;;  %v3989_v38 = vsel %vm1645_vm3, %v3986_v15, %v3988_v4  ;;  %v4693_v15 = vld [vmem:[#allocation2 + $0x230] sm:$0xff] }
 0x1cd   :  { %v11525_v49 = vadd.f32 %v8882_v14, %v3061_v59  ;;  %v3060_v3 = vadd.f32 %v2741_v33, %v11096_v53  ;;  %9130 = vmatprep.mubr.msk.f32.mxu0 %vm23_vm0, %v4689_v27  ;;  %v4692_v14 = vld [vmem:[#allocation2 + $0x228] sm:$0xff]  ;;  %v9451_v53 = vld [vmem:[#allocation2 + $0x220] sm:$0x3]  ;;  %v3996_v27 = vrot.slane %v9453_v11, 2 }
 0x1ce   :  { %v8787_v45 = vpop.f32.mrf.mxu1  ;;  %9030 = vmatmul.mubr.msk.f32.gmra.mxu1 %vm23_vm0, %v3984_v58  ;;  %v3522_v52 = vpop.f32.mrf.mxu0  ;;  %v3993_v26 = vrot.slane %v9451_v53, 2  ;;  %v9452_v59 = vld [vmem:[#allocation2 + $0x228] sm:$0xff]  ;;  %v3992_v58 = vsel %vm1645_vm3, %v3990_v12, %v3991_v51  ;;  %v9455_v53 = vld [vmem:[#allocation2 + $0x240] sm:$0xff] }
 0x1cf   :  { %v11531_v17 = vadd.f32 %v3512_v39, %v3060_v3  ;;  %v3063_v0 = vadd.f32 %v8787_v45, %v11103_v62  ;;  %9032 = vmatprep.mubr.msk.f32.mxu1 %vm23_vm0, %v3987_v24  ;;  %v3995_v7 = vrot.slane %v9452_v59, 2  ;;  %v4695_v45 = vld [vmem:[#allocation2 + $0x240] sm:$0xff] }
 0x1d0   :  { %v2751_v1 = vpop.f32.mrf.mxu1  ;;  %v8888_v62 = vpop.f32.mrf.mxu0  ;;  %9131 = vmatmul.mubr.msk.f32.gmra.mxu0 %vm23_vm0, %v4690_v35  ;;  %v4000_v35 = vrot.slane %v9455_v53, 2 }
 0x1d1   :  { %v11537_v33 = vadd.f32 %v8885_v19, %v3063_v0  ;;  %v3062_v39 = vadd.f32 %v2751_v1, %v11111_v50  ;;  %9133 = vmatprep.mubr.msk.f32.mxu0 %vm23_vm0, %v4692_v14  ;;  %v3994_v19 = vsel %vm1645_vm3, %v3991_v51, %v3993_v26  ;;  %v9454_v50 = vld [vmem:[#allocation2 + $0x238] sm:$0x3]  ;;  %v9456_v1 = vld [vmem:[#allocation2 + $0x248] sm:$0xff] }
 0x1d2   :  { %v8790_v24 = vpop.f32.mrf.mxu1  ;;  %9033 = vmatmul.mubr.msk.f32.gmra.mxu1 %vm23_vm0, %v3989_v38  ;;  %v3532_v12 = vpop.f32.mrf.mxu0  ;;  %v3998_v0 = vrot.slane %v9454_v50, 2  ;;  %v3997_v38 = vsel %vm1645_vm3, %v3995_v7, %v3996_v27  ;;  %v4001_v14 = vrot.slane %v9456_v1, 2  ;;  %v4696_v51 = vld [vmem:[#allocation2 + $0x248] sm:$0xff]  ;;  %v9458_v50 = vld [vmem:[#allocation2 + $0x258] sm:$0xff] }
 0x1d3   :  { %v11543_v4 = vadd.f32 %v3522_v52, %v3062_v39  ;;  %v3065_v3 = vadd.f32 %v8790_v24, %v11118_v56  ;;  %9035 = vmatprep.mubr.msk.f32.mxu1 %vm23_vm0, %v3992_v58  ;;  %v4698_v24 = vld [vmem:[#allocation2 + $0x258] sm:$0xff] }
 0x1d4   :  { %v2761_v59 = vpop.f32.mrf.mxu1  ;;  %v8891_v56 = vpop.f32.mrf.mxu0  ;;  %9134 = vmatmul.mubr.msk.f32.gmra.mxu0 %vm23_vm0, %v4693_v15  ;;  %v4005_v15 = vrot.slane %v9458_v50, 2 }
 0x1d5   :  { %v11549_v11 = vadd.f32 %v8888_v62, %v3065_v3  ;;  %v3064_v52 = vadd.f32 %v2761_v59, %v11127_v21  ;;  %9136 = vmatprep.mubr.msk.f32.mxu0 %vm23_vm0, %v4695_v45  ;;  %v3999_v62 = vsel %vm1645_vm3, %v3996_v27, %v3998_v0  ;;  %v9457_v21 = vld [vmem:[#allocation2 + $0x250] sm:$0x3]  ;;  %v9459_v59 = vld [vmem:[#allocation2 + $0x260] sm:$0xff] }
 0x1d6   :  { %v8793_v58 = vpop.f32.mrf.mxu1  ;;  %9036 = vmatmul.mubr.msk.f32.gmra.mxu1 %vm23_vm0, %v3994_v19  ;;  %v3542_v7 = vpop.f32.mrf.mxu0  ;;  %v4003_v3 = vrot.slane %v9457_v21, 2  ;;  %v4002_v19 = vsel %vm1645_vm3, %v4000_v35, %v4001_v14  ;;  %v4006_v45 = vrot.slane %v9459_v59, 2  ;;  %v4699_v27 = vld [vmem:[#allocation2 + $0x260] sm:$0xff]  ;;  %v9461_v21 = vld [vmem:[#allocation2 + $0x270] sm:$0xff] }
 0x1d7   :  { %v11555_v26 = vadd.f32 %v3532_v12, %v3064_v52  ;;  %v3067_v39 = vadd.f32 %v8793_v58, %v11134_v32  ;;  %9038 = vmatprep.mubr.msk.f32.mxu1 %vm23_vm0, %v3997_v38  ;;  %v4701_v58 = vld [vmem:[#allocation2 + $0x270] sm:$0xff] }
 0x1d8   :  { %v2771_v53 = vpop.f32.mrf.mxu1  ;;  %v8894_v32 = vpop.f32.mrf.mxu0  ;;  %9137 = vmatmul.mubr.msk.f32.gmra.mxu0 %vm23_vm0, %v4696_v51  ;;  %v4010_v51 = vrot.slane %v9461_v21, 2 }
 0x1d9   :  { %v11561_v1 = vadd.f32 %v8891_v56, %v3067_v39  ;;  %v3066_v12 = vadd.f32 %v2771_v53, %v11143_v8  ;;  %9139 = vmatprep.mubr.msk.f32.mxu0 %vm23_vm0, %v4698_v24  ;;  %v4004_v56 = vsel %vm1645_vm3, %v4001_v14, %v4003_v3  ;;  %v9460_v8 = vld [vmem:[#allocation2 + $0x268] sm:$0x3]  ;;  %v9462_v53 = vld [vmem:[#allocation2 + $0x278] sm:$0xff] }
 0x1da   :  { %v8796_v38 = vpop.f32.mrf.mxu1  ;;  %9039 = vmatmul.mubr.msk.f32.gmra.mxu1 %vm23_vm0, %v3999_v62  ;;  %v3552_v35 = vpop.f32.mrf.mxu0  ;;  %v4008_v39 = vrot.slane %v9460_v8, 2  ;;  %v4007_v62 = vsel %vm1645_vm3, %v4005_v15, %v4006_v45  ;;  %v4011_v24 = vrot.slane %v9462_v53, 2  ;;  %v4702_v14 = vld [vmem:[#allocation2 + $0x278] sm:$0xff]  ;;  %v9464_v8 = vld [vmem:[#allocation2 + $0x288] sm:$0xff] }
 0x1db   :  { %v11567_v0 = vadd.f32 %v3542_v7, %v3066_v12  ;;  %v3069_v52 = vadd.f32 %v8796_v38, %v11150_v57  ;;  %9041 = vmatprep.mubr.msk.f32.mxu1 %vm23_vm0, %v4002_v19  ;;  %v4704_v38 = vld [vmem:[#allocation2 + $0x288] sm:$0xff] }
 0x1dc   :  { %v2781_v50 = vpop.f32.mrf.mxu1  ;;  %v8897_v57 = vpop.f32.mrf.mxu0  ;;  %9140 = vmatmul.mubr.msk.f32.gmra.mxu0 %vm23_vm0, %v4699_v27  ;;  %v4015_v27 = vrot.slane %v9464_v8, 2 }
 0x1dd   :  { %v11573_v59 = vadd.f32 %v8894_v32, %v3069_v52  ;;  %v3068_v7 = vadd.f32 %v2781_v50, %v11159_v46  ;;  %9142 = vmatprep.mubr.msk.f32.mxu0 %vm23_vm0, %v4701_v58  ;;  %v4009_v32 = vsel %vm1645_vm3, %v4006_v45, %v4008_v39  ;;  %v9463_v46 = vld [vmem:[#allocation2 + $0x280] sm:$0x3]  ;;  %v9465_v50 = vld [vmem:[#allocation2 + $0x290] sm:$0xff] }
 0x1de   :  { %v8799_v19 = vpop.f32.mrf.mxu1  ;;  %9042 = vmatmul.mubr.msk.f32.gmra.mxu1 %vm23_vm0, %v4004_v56  ;;  %v3562_v15 = vpop.f32.mrf.mxu0  ;;  %v4013_v52 = vrot.slane %v9463_v46, 2  ;;  %v4012_v56 = vsel %vm1645_vm3, %v4010_v51, %v4011_v24  ;;  %v4016_v58 = vrot.slane %v9465_v50, 2  ;;  %v4705_v45 = vld [vmem:[#allocation2 + $0x290] sm:$0xff]  ;;  %v9467_v46 = vld [vmem:[#allocation2 + $0x2a0] sm:$0xff] }
 0x1df   :  { %v11579_v3 = vadd.f32 %v3552_v35, %v3068_v7  ;;  %v3071_v12 = vadd.f32 %v8799_v19, %v11166_v10  ;;  %9044 = vmatprep.mubr.msk.f32.mxu1 %vm23_vm0, %v4007_v62  ;;  %v4707_v19 = vld [vmem:[#allocation2 + $0x2a0] sm:$0xff] }
 0x1e0   :  { %v2791_v21 = vpop.f32.mrf.mxu1  ;;  %v8900_v10 = vpop.f32.mrf.mxu0  ;;  %9143 = vmatmul.mubr.msk.f32.gmra.mxu0 %vm23_vm0, %v4702_v14  ;;  %v4020_v14 = vrot.slane %v9467_v46, 2 }
 0x1e1   :  { %v11585_v53 = vadd.f32 %v8897_v57, %v3071_v12  ;;  %v3070_v35 = vadd.f32 %v2791_v21, %v11175_v30  ;;  %9145 = vmatprep.mubr.msk.f32.mxu0 %vm23_vm0, %v4704_v38  ;;  %v4014_v57 = vsel %vm1645_vm3, %v4011_v24, %v4013_v52  ;;  %v9466_v30 = vld [vmem:[#allocation2 + $0x298] sm:$0x3]  ;;  %v9468_v21 = vld [vmem:[#allocation2 + $0x2a8] sm:$0xff] }
 0x1e2   :  { %v8802_v62 = vpop.f32.mrf.mxu1  ;;  %9045 = vmatmul.mubr.msk.f32.gmra.mxu1 %vm23_vm0, %v4009_v32  ;;  %v3572_v51 = vpop.f32.mrf.mxu0  ;;  %v4018_v12 = vrot.slane %v9466_v30, 2  ;;  %v4017_v32 = vsel %vm1645_vm3, %v4015_v27, %v4016_v58  ;;  %v4021_v38 = vrot.slane %v9468_v21, 2  ;;  %v4708_v24 = vld [vmem:[#allocation2 + $0x2a8] sm:$0xff]  ;;  %v9470_v30 = vld [vmem:[#allocation2 + $0x2b8] sm:$0xff] }
 0x1e3   :  { %v11591_v39 = vadd.f32 %v3562_v15, %v3070_v35  ;;  %v3073_v7 = vadd.f32 %v8802_v62, %v11182_v6  ;;  %9047 = vmatprep.mubr.msk.f32.mxu1 %vm23_vm0, %v4012_v56  ;;  %v4710_v62 = vld [vmem:[#allocation2 + $0x2b8] sm:$0xff] }
 0x1e4   :  { %v2801_v8 = vpop.f32.mrf.mxu1  ;;  %v8903_v6 = vpop.f32.mrf.mxu0  ;;  %9146 = vmatmul.mubr.msk.f32.gmra.mxu0 %vm23_vm0, %v4705_v45  ;;  %v4025_v45 = vrot.slane %v9470_v30, 2 }
 0x1e5   :  { %v11597_v50 = vadd.f32 %v8900_v10, %v3073_v7  ;;  %v3072_v15 = vadd.f32 %v2801_v8, %v11191_v28  ;;  %9148 = vmatprep.mubr.msk.f32.mxu0 %vm23_vm0, %v4707_v19  ;;  %v4019_v10 = vsel %vm1645_vm3, %v4016_v58, %v4018_v12  ;;  %v9469_v28 = vld [vmem:[#allocation2 + $0x2b0] sm:$0x3]  ;;  %v9471_v8 = vld [vmem:[#allocation2 + $0x2c0] sm:$0xff] }
 0x1e6   :  { %v8805_v56 = vpop.f32.mrf.mxu1  ;;  %9048 = vmatmul.mubr.msk.f32.gmra.mxu1 %vm23_vm0, %v4014_v57  ;;  %v3582_v27 = vpop.f32.mrf.mxu0  ;;  %v4023_v7 = vrot.slane %v9469_v28, 2  ;;  %v4022_v57 = vsel %vm1645_vm3, %v4020_v14, %v4021_v38  ;;  %v4026_v19 = vrot.slane %v9471_v8, 2  ;;  %v4711_v58 = vld [vmem:[#allocation2 + $0x2c0] sm:$0xff]  ;;  %v9473_v28 = vld [vmem:[#allocation2 + $0x2d0] sm:$0xff] }
 0x1e7   :  { %v11603_v52 = vadd.f32 %v3572_v51, %v3072_v15  ;;  %v3075_v35 = vadd.f32 %v8805_v56, %v11198_v42  ;;  %9050 = vmatprep.mubr.msk.f32.mxu1 %vm23_vm0, %v4017_v32  ;;  %v4713_v56 = vld [vmem:[#allocation2 + $0x2d0] sm:$0xff] }
 0x1e8   :  { %v2811_v46 = vpop.f32.mrf.mxu1  ;;  %v8906_v42 = vpop.f32.mrf.mxu0  ;;  %9149 = vmatmul.mubr.msk.f32.gmra.mxu0 %vm23_vm0, %v4708_v24  ;;  %v4030_v24 = vrot.slane %v9473_v28, 2 }
 0x1e9   :  { %v11609_v21 = vadd.f32 %v8903_v6, %v3075_v35  ;;  %v3074_v51 = vadd.f32 %v2811_v46, %v11207_v36  ;;  %9151 = vmatprep.mubr.msk.f32.mxu0 %vm23_vm0, %v4710_v62  ;;  %v4024_v6 = vsel %vm1645_vm3, %v4021_v38, %v4023_v7  ;;  %v9472_v36 = vld [vmem:[#allocation2 + $0x2c8] sm:$0x3]  ;;  %v9474_v46 = vld [vmem:[#allocation2 + $0x2d8] sm:$0xff] }
 0x1ea   :  { %v8808_v32 = vpop.f32.mrf.mxu1  ;;  %9051 = vmatmul.mubr.msk.f32.gmra.mxu1 %vm23_vm0, %v4019_v10  ;;  %v3592_v14 = vpop.f32.mrf.mxu0  ;;  %v4028_v35 = vrot.slane %v9472_v36, 2  ;;  %v4027_v10 = vsel %vm1645_vm3, %v4025_v45, %v4026_v19  ;;  %v4031_v62 = vrot.slane %v9474_v46, 2  ;;  %v4714_v38 = vld [vmem:[#allocation2 + $0x2d8] sm:$0xff]  ;;  %v9476_v36 = vld [vmem:[#allocation2 + $0x2e8] sm:$0xff] }
 0x1eb   :  { %v11615_v12 = vadd.f32 %v3582_v27, %v3074_v51  ;;  %v3077_v15 = vadd.f32 %v8808_v32, %v11214_v18  ;;  %9053 = vmatprep.mubr.msk.f32.mxu1 %vm23_vm0, %v4022_v57  ;;  %v4716_v32 = vld [vmem:[#allocation2 + $0x2e8] sm:$0xff] }
 0x1ec   :  { %v2821_v30 = vpop.f32.mrf.mxu1  ;;  %v8909_v18 = vpop.f32.mrf.mxu0  ;;  %9152 = vmatmul.mubr.msk.f32.gmra.mxu0 %vm23_vm0, %v4711_v58  ;;  %v4035_v58 = vrot.slane %v9476_v36, 2 }
 0x1ed   :  { %v11621_v8 = vadd.f32 %v8906_v42, %v3077_v15  ;;  %v3076_v27 = vadd.f32 %v2821_v30, %v11223_v47  ;;  %9154 = vmatprep.mubr.msk.f32.mxu0 %vm23_vm0, %v4713_v56  ;;  %v4029_v42 = vsel %vm1645_vm3, %v4026_v19, %v4028_v35  ;;  %v9475_v47 = vld [vmem:[#allocation2 + $0x2e0] sm:$0x3]  ;;  %v9477_v30 = vld [vmem:[#allocation2 + $0x2f0] sm:$0xff] }
 0x1ee   :  { %v8811_v57 = vpop.f32.mrf.mxu1  ;;  %9054 = vmatmul.mubr.msk.f32.gmra.mxu1 %vm23_vm0, %v4024_v6  ;;  %v3602_v45 = vpop.f32.mrf.mxu0  ;;  %v4033_v15 = vrot.slane %v9475_v47, 2  ;;  %v4032_v6 = vsel %vm1645_vm3, %v4030_v24, %v4031_v62  ;;  %v4036_v56 = vrot.slane %v9477_v30, 2  ;;  %v4717_v19 = vld [vmem:[#allocation2 + $0x2f0] sm:$0xff]  ;;  %v9479_v47 = vld [vmem:[#allocation2 + $0x300] sm:$0xff] }
 0x1ef   :  { %v11627_v7 = vadd.f32 %v3592_v14, %v3076_v27  ;;  %v3079_v51 = vadd.f32 %v8811_v57, %v11230_v34  ;;  %9056 = vmatprep.mubr.msk.f32.mxu1 %vm23_vm0, %v4027_v10  ;;  %v4719_v57 = vld [vmem:[#allocation2 + $0x300] sm:$0xff] }
 0x1f0   :  { %v2831_v28 = vpop.f32.mrf.mxu1  ;;  %v8912_v34 = vpop.f32.mrf.mxu0  ;;  %9155 = vmatmul.mubr.msk.f32.gmra.mxu0 %vm23_vm0, %v4714_v38  ;;  %v4040_v38 = vrot.slane %v9479_v47, 2 }
 0x1f1   :  { %v11633_v46 = vadd.f32 %v8909_v18, %v3079_v51  ;;  %v3078_v14 = vadd.f32 %v2831_v28, %v11239_v13  ;;  %9157 = vmatprep.mubr.msk.f32.mxu0 %vm23_vm0, %v4716_v32  ;;  %v4034_v18 = vsel %vm1645_vm3, %v4031_v62, %v4033_v15  ;;  %v9478_v13 = vld [vmem:[#allocation2 + $0x2f8] sm:$0x3]  ;;  %v9480_v28 = vld [vmem:[#allocation2 + $0x308] sm:$0xff] }
 0x1f2   :  { %v8814_v10 = vpop.f32.mrf.mxu1  ;;  %9057 = vmatmul.mubr.msk.f32.gmra.mxu1 %vm23_vm0, %v4029_v42  ;;  %v3612_v24 = vpop.f32.mrf.mxu0  ;;  %v4038_v51 = vrot.slane %v9478_v13, 2  ;;  %v4037_v42 = vsel %vm1645_vm3, %v4035_v58, %v4036_v56  ;;  %v4041_v32 = vrot.slane %v9480_v28, 2  ;;  %v4720_v62 = vld [vmem:[#allocation2 + $0x308] sm:$0xff]  ;;  %v9482_v13 = vld [vmem:[#allocation2 + $0x318] sm:$0xff] }
 0x1f3   :  { %v11639_v35 = vadd.f32 %v3602_v45, %v3078_v14  ;;  %v3081_v27 = vadd.f32 %v8814_v10, %v11246_v41  ;;  %9059 = vmatprep.mubr.msk.f32.mxu1 %vm23_vm0, %v4032_v6  ;;  %v4722_v10 = vld [vmem:[#allocation2 + $0x318] sm:$0xff] }
 0x1f4   :  { %v2841_v36 = vpop.f32.mrf.mxu1  ;;  %v8915_v41 = vpop.f32.mrf.mxu0  ;;  %9158 = vmatmul.mubr.msk.f32.gmra.mxu0 %vm23_vm0, %v4717_v19  ;;  %v4045_v19 = vrot.slane %v9482_v13, 2 }
 0x1f5   :  { %v11645_v30 = vadd.f32 %v8912_v34, %v3081_v27  ;;  %v3080_v45 = vadd.f32 %v2841_v36, %v11255_v48  ;;  %9160 = vmatprep.mubr.msk.f32.mxu0 %vm23_vm0, %v4719_v57  ;;  %v4039_v34 = vsel %vm1645_vm3, %v4036_v56, %v4038_v51  ;;  %v9481_v48 = vld [vmem:[#allocation2 + $0x310] sm:$0x3]  ;;  %v9483_v36 = vld [vmem:[#allocation2 + $0x320] sm:$0xff] }
 0x1f6   :  { %v8817_v6 = vpop.f32.mrf.mxu1  ;;  %9060 = vmatmul.mubr.msk.f32.gmra.mxu1 %vm23_vm0, %v4034_v18  ;;  %v3622_v58 = vpop.f32.mrf.mxu0  ;;  %v4043_v27 = vrot.slane %v9481_v48, 2  ;;  %v4042_v18 = vsel %vm1645_vm3, %v4040_v38, %v4041_v32  ;;  %v4046_v57 = vrot.slane %v9483_v36, 2  ;;  %v4723_v56 = vld [vmem:[#allocation2 + $0x320] sm:$0xff]  ;;  %v9485_v48 = vld [vmem:[#allocation2 + $0x330] sm:$0xff] }
 0x1f7   :  { %v11651_v15 = vadd.f32 %v3612_v24, %v3080_v45  ;;  %v3083_v14 = vadd.f32 %v8817_v6, %v11262_v43  ;;  %9062 = vmatprep.mubr.msk.f32.mxu1 %vm23_vm0, %v4037_v42  ;;  %v4725_v6 = vld [vmem:[#allocation2 + $0x330] sm:$0xff] }
 0x1f8   :  { %v2851_v47 = vpop.f32.mrf.mxu1  ;;  %v8918_v43 = vpop.f32.mrf.mxu0  ;;  %9161 = vmatmul.mubr.msk.f32.gmra.mxu0 %vm23_vm0, %v4720_v62  ;;  %v4050_v62 = vrot.slane %v9485_v48, 2  ;;  %v9489_v48 = vld [vmem:[#allocation2 + $0x38] sm:$0xff] }
 0x1f9   :  { %v11657_v28 = vadd.f32 %v8915_v41, %v3083_v14  ;;  %v3082_v24 = vadd.f32 %v2851_v47, %v11271_v9  ;;  %9163 = vmatprep.mubr.msk.f32.mxu0 %vm23_vm0, %v4722_v10  ;;  %v4044_v41 = vsel %vm1645_vm3, %v4041_v32, %v4043_v27  ;;  %v9484_v9 = vld [vmem:[#allocation2 + $0x328] sm:$0x3]  ;;  %v9486_v47 = vld [vmem:[#allocation2 + $0x338] sm:$0xff] }
 0x1fa   :  { %v8820_v42 = vpop.f32.mrf.mxu1  ;;  %9063 = vmatmul.mubr.msk.f32.gmra.mxu1 %vm23_vm0, %v4039_v34  ;;  %v3632_v38 = vpop.f32.mrf.mxu0  ;;  %v4048_v14 = vrot.slane %v9484_v9, 2  ;;  %v4047_v34 = vsel %vm1645_vm3, %v4045_v19, %v4046_v57  ;;  %v4051_v10 = vrot.slane %v9486_v47, 2  ;;  %v4726_v27 = vld [vmem:[#allocation2 + $0x338] sm:$0xff]  ;;  %v4637_v47 = vld [vmem:[#allocation2 + $0x40] sm:$0x3] }
 0x1fb   :  { %12922 = vst [vmem:[#allocation17_spill] sm:$0xff] %v11657_v28  ;;  %v11663_v51 = vadd.f32 %v3622_v58, %v3082_v24  ;;  %v3085_v45 = vadd.f32 %v8820_v42, %v11276_v31  ;;  %9065 = vmatprep.mubr.msk.f32.mxu1 %vm23_vm0, %v4042_v18  ;;  %v9487_v18 = vld [vmem:[#allocation2 + $0x30] sm:$0xff]  ;;  %v9488_v42 = vld [vmem:[#allocation2 + $0x340] sm:$0x3] }
 0x1fc   :  { %v2861_v13 = vpop.f32.mrf.mxu1  ;;  %v8921_v31 = vpop.f32.mrf.mxu0  ;;  %9164 = vmatmul.mubr.msk.f32.gmra.mxu0 %vm23_vm0, %v4723_v56  ;;  %v6145_v24 = vrot.slane %v9487_v18, 2  ;;  %v4053_v9 = vrot.slane %v9488_v42, 2  ;;  %v4728_v56 = vld [vmem:[#allocation2 + $0x348] sm:$0xff] }
 0x1fd   :  { %12923 = vst [vmem:[#allocation18_spill] sm:$0xff] %v11663_v51  ;;  %v11669_v36 = vadd.f32 %v8918_v43, %v3085_v45  ;;  %v3084_v58 = vadd.f32 %v2861_v13, %v11284_v61  ;;  %9166 = vmatprep.mubr.msk.f32.mxu0 %vm23_vm0, %v4725_v6  ;;  %v4049_v61 = vsel %vm1645_vm3, %v4046_v57, %v4048_v14  ;;  %v6146_v13 = vrot.slane %v9489_v48, 2  ;;  %v4729_v14 = vld [vmem:[#allocation2 + $0x350] sm:$0xff] }
 0x1fe   :  { %v8823_v32 = vpop.f32.mrf.mxu1  ;;  %9066 = vmatmul.mubr.msk.f32.gmra.mxu1 %vm23_vm0, %v4044_v41  ;;  %v3642_v45 = vpop.f32.mrf.mxu0  ;;  %v4052_v6 = vsel %vm1645_vm3, %v4050_v62, %v4051_v10  ;;  %v5407_v51 = vrot.slane %v9489_v48, 1  ;;  %v4054_v57 = vsel %vm1645_vm3, %v4051_v10, %v4053_v9  ;;  %v6148_v62 = vrot.slane %v4637_v47, 2  ;;  %v9492_v9 = vld [vmem:[#allocation2 + $0x60] sm:$0xff] }
 0x1ff   :  { %12924 = vst [vmem:[#allocation19_spill] sm:$0xff] %v11669_v36  ;;  %v11675_v19 = vadd.f32 %v3632_v38, %v3084_v58  ;;  %v3087_v43 = vadd.f32 %v8823_v32, %v11289_v5  ;;  %9068 = vmatprep.mubr.msk.f32.mxu1 %vm23_vm0, %v4047_v34  ;;  %v5406_v36 = vrot.slane %v9487_v18, 1  ;;  %v9490_v5 = vld [vmem:[#allocation2 + $0x48] sm:$0xff]  ;;  %v5409_v18 = vrot.slane %v4637_v47, 1 }
 0x200   :  { %v2871_v41 = vpop.f32.mrf.mxu1  ;;  %v8924_v58 = vpop.f32.mrf.mxu0  ;;  %9167 = vmatmul.mubr.msk.f32.gmra.mxu0 %vm23_vm0, %v4726_v27  ;;  %v6150_v34 = vrot.slane %v9490_v5, 2  ;;  %v6147_v27 = vsel %vm1645_vm3, %v6145_v24, %v6146_v13 }
 0x201   :  { %12925 = vst [vmem:[#allocation20_spill] sm:$0xff] %v11675_v19  ;;  %v11681_v28 = vadd.f32 %v8921_v31, %v3087_v43  ;;  %v3086_v38 = vadd.f32 %v2871_v41, %v11297_v37  ;;  %9169 = vmatprep.mubr.msk.f32.mxu0 %vm23_vm0, %v4728_v56  ;;  %v9491_v43 = vld [vmem:[#allocation2 + $0x50] sm:$0xff]  ;;  %v4640_v41 = vld [vmem:[#allocation2 + $0x58] sm:$0x3]  ;;  %v5408_v56 = vsel %vm456_vm2, %v5406_v36, %v5407_v51  ;;  %v6155_v19 = vrot.slane %v9492_v9, 2 }
 0x202   :  { %v8826_v32 = vpop.f32.mrf.mxu1  ;;  %9069 = vmatmul.mubr.msk.f32.gmra.mxu1 %vm23_vm0, %v4049_v61  ;;  %v3652_v37 = vpop.f32.mrf.mxu0  ;;  %v6151_v48 = vrot.slane %v9491_v43, 2  ;;  %v5411_v61 = vrot.slane %v9490_v5, 1  ;;  %v5412_v10 = vrot.slane %v9491_v43, 1  ;;  %v5410_v24 = vsel %vm456_vm2, %v5407_v51, %v5409_v18 }
 0x203   :  { %12926 = vst [vmem:[#allocation21_spill] sm:$0xff] %v11681_v28  ;;  %v11688_v42 = vadd.f32 %v3642_v45, %v3086_v38  ;;  %v3089_v31 = vadd.f32 %v8826_v32, %v11302_v29  ;;  %9071 = vmatprep.mubr.msk.f32.mxu1 %vm23_vm0, %v4052_v6  ;;  %v6149_v38 = vsel %vm1645_vm3, %v6146_v13, %v6148_v62  ;;  %v5414_v36 = vrot.slane %v4640_v41, 1  ;;  %v9494_v13 = vld [vmem:[#allocation2 + $0x78] sm:$0xff] }
 0x204   :  { %v2881_v28 = vpop.f32.mrf.mxu1  ;;  %v8927_v29 = vpop.f32.mrf.mxu0  ;;  %9170 = vmatmul.mubr.msk.f32.gmra.mxu0 %vm23_vm0, %v4729_v14  ;;  %v6153_v5 = vrot.slane %v4640_v41, 2  ;;  %v5416_v43 = vrot.slane %v9492_v9, 1  ;;  %v5413_v51 = vsel %vm456_vm2, %v5411_v61, %v5412_v10  ;;  %v6160_v62 = vrot.slane %v9494_v13, 2 }
 0x205   :  { %v11694_v47 = vadd.f32 %v8924_v58, %v3089_v31  ;;  %v3088_v45 = vadd.f32 %v2881_v28, %v11309_v2  ;;  %9272 = vmatprep.mubr.msk.f32.mxu0 %vm23_vm0, %v6147_v27  ;;  %v6152_v2 = vsel %vm1645_vm3, %v6150_v34, %v6151_v48  ;;  %v9493_v28 = vld [vmem:[#allocation2 + $0x68] sm:$0xff]  ;;  %v5415_v34 = vsel %vm456_vm2, %v5412_v10, %v5414_v36 }
 0x206   :  { %v8829_v6 = vpop.f32.mrf.mxu1  ;;  %9072 = vmatmul.mubr.msk.f32.gmra.mxu1 %vm23_vm0, %v4054_v57  ;;  %v3662_v31 = vpop.f32.mrf.mxu0  ;;  %v6156_v14 = vrot.slane %v9493_v28, 2  ;;  %v4643_v57 = vld [vmem:[#allocation2 + $0x70] sm:$0x3]  ;;  %v5417_v18 = vrot.slane %v9493_v28, 1  ;;  %v6154_v9 = vsel %vm1645_vm3, %v6151_v48, %v6153_v5 }
 0x207   :  { %v11702_v32 = vadd.f32 %v3652_v37, %v3088_v45  ;;  %v3091_v58 = vadd.f32 %v8829_v6, %v11315_v55  ;;  %9174 = vmatprep.mubr.msk.f32.mxu1 %vm23_vm0, %v5408_v56  ;;  %v5419_v61 = vrot.slane %v4643_v57, 1  ;;  %v6158_v45 = vrot.slane %v4643_v57, 2  ;;  %v9496_v48 = vld [vmem:[#allocation2 + $0x90] sm:$0xff] }
 0x208   :  { %v2891_v27 = vpop.f32.mrf.mxu1  ;;  %v8930_v55 = vpop.f32.mrf.mxu0  ;;  %9273 = vmatmul.mubr.msk.f32.vlgmr.msra.gmra.mxu0 %vm23_vm0, %v6149_v38  ;;  %v9495_v38 = vld [vmem:[#allocation2 + $0x80] sm:$0xff]  ;;  %v5418_v10 = vsel %vm456_vm2, %v5416_v43, %v5417_v18  ;;  %v6165_v5 = vrot.slane %v9496_v48, 2 }
 0x209   :  { %v11708_v41 = vadd.f32 %v8927_v29, %v3091_v58  ;;  %v3090_v37 = vadd.f32 %v2891_v27, %v11323_v54  ;;  %9275 = vmatprep.mubr.msk.f32.mxu0 %vm23_vm0, %v6152_v2  ;;  %v6157_v54 = vsel %vm1645_vm3, %v6155_v19, %v6156_v14  ;;  %v6161_v28 = vrot.slane %v9495_v38, 2 }
 0x20a   :  { %v8832_v56 = vpop.f32.mrf.mxu1  ;;  %9175 = vmatmul.mubr.msk.f32.vlgmr.msra.gmra.mxu1 %vm23_vm0, %v5410_v24  ;;  %v3672_v58 = vpop.f32.mrf.mxu0  ;;  %v4646_v24 = vld [vmem:[#allocation2 + $0x88] sm:$0x3]  ;;  %v5421_v27 = vrot.slane %v9494_v13, 1  ;;  %v5422_v36 = vrot.slane %v9495_v38, 1  ;;  %v5420_v19 = vsel %vm456_vm2, %v5417_v18, %v5419_v61  ;;  %v6159_v13 = vsel %vm1645_vm3, %v6156_v14, %v6158_v45 }
 0x20b   :  { %v11716_v6 = vadd.f32 %v3662_v31, %v3090_v37  ;;  %v3093_v29 = vadd.f32 %v8832_v56, %v11333_v23  ;;  %9177 = vmatprep.mubr.msk.f32.mxu1 %vm23_vm0, %v5413_v51  ;;  %v5424_v43 = vrot.slane %v4646_v24, 1  ;;  %v6163_v37 = vrot.slane %v4646_v24, 2  ;;  %v9498_v14 = vld [vmem:[#allocation2 + $0xa8] sm:$0xff] }
 0x20c   :  { %v2901_v2 = vpop.f32.mrf.mxu1  ;;  %v8933_v23 = vpop.f32.mrf.mxu0  ;;  %9276 = vmatmul.mubr.msk.f32.gmra.mxu0 %vm23_vm0, %v6154_v9  ;;  %v9497_v9 = vld [vmem:[#allocation2 + $0x98] sm:$0xff]  ;;  %v5423_v18 = vsel %vm456_vm2, %v5421_v27, %v5422_v36  ;;  %v6170_v45 = vrot.slane %v9498_v14, 2 }
 0x20d   :  { %v11722_v57 = vadd.f32 %v8930_v55, %v3093_v29  ;;  %v3092_v31 = vadd.f32 %v2901_v2, %v11339_v16  ;;  %9278 = vmatprep.mubr.msk.f32.mxu0 %vm23_vm0, %v6157_v54  ;;  %v6162_v16 = vsel %vm1645_vm3, %v6160_v62, %v6161_v28  ;;  %v6166_v38 = vrot.slane %v9497_v9, 2 }
 0x20e   :  { %v8835_v51 = vpop.f32.mrf.mxu1  ;;  %9178 = vmatmul.mubr.msk.f32.gmra.mxu1 %vm23_vm0, %v5415_v34  ;;  %v3682_v29 = vpop.f32.mrf.mxu0  ;;  %v4649_v34 = vld [vmem:[#allocation2 + $0xa0] sm:$0x3]  ;;  %v5426_v2 = vrot.slane %v9496_v48, 1  ;;  %v5427_v61 = vrot.slane %v9497_v9, 1  ;;  %v5425_v62 = vsel %vm456_vm2, %v5422_v36, %v5424_v43  ;;  %v6164_v48 = vsel %vm1645_vm3, %v6161_v28, %v6163_v37 }
 0x20f   :  { %v11730_v56 = vadd.f32 %v3672_v58, %v3092_v31  ;;  %v3095_v55 = vadd.f32 %v8835_v51, %v11345_v63  ;;  %9180 = vmatprep.mubr.msk.f32.mxu1 %vm23_vm0, %v5418_v10  ;;  %v5429_v27 = vrot.slane %v4649_v34, 1  ;;  %v6168_v31 = vrot.slane %v4649_v34, 2  ;;  %v9500_v28 = vld [vmem:[#allocation2 + $0xc0] sm:$0xff] }
 0x210   :  { %v2911_v54 = vpop.f32.mrf.mxu1  ;;  %v8936_v63 = vpop.f32.mrf.mxu0  ;;  %9279 = vmatmul.mubr.msk.f32.gmra.mxu0 %vm23_vm0, %v6159_v13  ;;  %v9499_v13 = vld [vmem:[#allocation2 + $0xb0] sm:$0xff]  ;;  %v5428_v36 = vsel %vm456_vm2, %v5426_v2, %v5427_v61  ;;  %v6175_v37 = vrot.slane %v9500_v28, 2 }
 0x211   :  { %v11736_v24 = vadd.f32 %v8933_v23, %v3095_v55  ;;  %v3094_v58 = vadd.f32 %v2911_v54, %v11351_v40  ;;  %9281 = vmatprep.mubr.msk.f32.mxu0 %vm23_vm0, %v6162_v16  ;;  %v6167_v40 = vsel %vm1645_vm3, %v6165_v5, %v6166_v38  ;;  %v6171_v9 = vrot.slane %v9499_v13, 2 }
 0x212   :  { %v8838_v10 = vpop.f32.mrf.mxu1  ;;  %9181 = vmatmul.mubr.msk.f32.gmra.mxu1 %vm23_vm0, %v5420_v19  ;;  %v3692_v55 = vpop.f32.mrf.mxu0  ;;  %v4652_v19 = vld [vmem:[#allocation2 + $0xb8] sm:$0x3]  ;;  %v5431_v54 = vrot.slane %v9498_v14, 1  ;;  %v5432_v43 = vrot.slane %v9499_v13, 1  ;;  %v5430_v5 = vsel %vm456_vm2, %v5427_v61, %v5429_v27  ;;  %v6169_v14 = vsel %vm1645_vm3, %v6166_v38, %v6168_v31 }
 0x213   :  { %v11744_v51 = vadd.f32 %v3682_v29, %v3094_v58  ;;  %v3097_v23 = vadd.f32 %v8838_v10, %v11357_v60  ;;  %9183 = vmatprep.mubr.msk.f32.mxu1 %vm23_vm0, %v5423_v18  ;;  %v5434_v2 = vrot.slane %v4652_v19, 1  ;;  %v6173_v58 = vrot.slane %v4652_v19, 2  ;;  %v9502_v38 = vld [vmem:[#allocation2 + $0xd8] sm:$0xff] }
 0x214   :  { %v2921_v16 = vpop.f32.mrf.mxu1  ;;  %v8939_v60 = vpop.f32.mrf.mxu0  ;;  %9282 = vmatmul.mubr.msk.f32.gmra.mxu0 %vm23_vm0, %v6164_v48  ;;  %v9501_v48 = vld [vmem:[#allocation2 + $0xc8] sm:$0xff]  ;;  %v5433_v61 = vsel %vm456_vm2, %v5431_v54, %v5432_v43  ;;  %v6180_v31 = vrot.slane %v9502_v38, 2 }
 0x215   :  { %v11750_v34 = vadd.f32 %v8936_v63, %v3097_v23  ;;  %v3096_v29 = vadd.f32 %v2921_v16, %v11363_v22  ;;  %9284 = vmatprep.mubr.msk.f32.mxu0 %vm23_vm0, %v6167_v40  ;;  %v6172_v22 = vsel %vm1645_vm3, %v6170_v45, %v6171_v9  ;;  %v6176_v13 = vrot.slane %v9501_v48, 2 }
 0x216   :  { %v8841_v18 = vpop.f32.mrf.mxu1  ;;  %9184 = vmatmul.mubr.msk.f32.gmra.mxu1 %vm23_vm0, %v5425_v62  ;;  %v3702_v23 = vpop.f32.mrf.mxu0  ;;  %v4655_v62 = vld [vmem:[#allocation2 + $0xd0] sm:$0x3]  ;;  %v5436_v16 = vrot.slane %v9500_v28, 1  ;;  %v5437_v27 = vrot.slane %v9501_v48, 1  ;;  %v5435_v45 = vsel %vm456_vm2, %v5432_v43, %v5434_v2  ;;  %v6174_v28 = vsel %vm1645_vm3, %v6171_v9, %v6173_v58 }
 0x217   :  { %v11758_v10 = vadd.f32 %v3692_v55, %v3096_v29  ;;  %v3099_v63 = vadd.f32 %v8841_v18, %v11369_v20  ;;  %9186 = vmatprep.mubr.msk.f32.mxu1 %vm23_vm0, %v5428_v36  ;;  %v5439_v54 = vrot.slane %v4655_v62, 1  ;;  %v6178_v29 = vrot.slane %v4655_v62, 2  ;;  %v9504_v9 = vld [vmem:[#allocation2 + $0xf0] sm:$0xff] }
 0x218   :  { %v2931_v40 = vpop.f32.mrf.mxu1  ;;  %v8942_v20 = vpop.f32.mrf.mxu0  ;;  %9285 = vmatmul.mubr.msk.f32.gmra.mxu0 %vm23_vm0, %v6169_v14  ;;  %v9503_v14 = vld [vmem:[#allocation2 + $0xe0] sm:$0xff]  ;;  %v5438_v43 = vsel %vm456_vm2, %v5436_v16, %v5437_v27  ;;  %v6185_v58 = vrot.slane %v9504_v9, 2 }
 0x219   :  { %v11764_v19 = vadd.f32 %v8939_v60, %v3099_v63  ;;  %v3098_v55 = vadd.f32 %v2931_v40, %v11375_v25  ;;  %9287 = vmatprep.mubr.msk.f32.mxu0 %vm23_vm0, %v6172_v22  ;;  %v12929_v60 = vld [vmem:[#allocation31_spill] sm:$0xff]  ;;  %v6177_v25 = vsel %vm1645_vm3, %v6175_v37, %v6176_v13  ;;  %v6181_v40 = vrot.slane %v9503_v14, 2 }
 0x21a   :  { %v8844_v36 = vpop.f32.mrf.mxu1  ;;  %9187 = vmatmul.mubr.msk.f32.gmra.mxu1 %vm23_vm0, %v5430_v5  ;;  %v3712_v48 = vpop.f32.mrf.mxu0  ;;  %v4658_v5 = vld [vmem:[#allocation2 + $0xe8] sm:$0x3]  ;;  %v5442_v2 = vrot.slane %v9503_v14, 1  ;;  %v5440_v37 = vsel %vm456_vm2, %v5437_v27, %v5439_v54 }
 0x21b   :  { %12927 = vst [vmem:[#allocation22_spill] sm:$0xff] %v11764_v19  ;;  %v11772_v18 = vadd.f32 %v3702_v23, %v3098_v55  ;;  %v3101_v63 = vadd.f32 %v8844_v36, %v12929_v60  ;;  %9189 = vmatprep.mubr.msk.f32.mxu1 %vm23_vm0, %v5433_v61  ;;  %v5441_v19 = vrot.slane %v9502_v38, 1  ;;  %v12931_v23 = vld [vmem:[#allocation33_spill] sm:$0xff]  ;;  %v6179_v38 = vsel %vm1645_vm3, %v6176_v13, %v6178_v29 }
 0x21c   :  { %v2941_v22 = vpop.f32.mrf.mxu1  ;;  %v8945_v36 = vpop.f32.mrf.mxu0  ;;  %9288 = vmatmul.mubr.msk.f32.gmra.mxu0 %vm23_vm0, %v6174_v28  ;;  %v5444_v16 = vrot.slane %v4658_v5, 1  ;;  %v6183_v60 = vrot.slane %v4658_v5, 2  ;;  %v6182_v28 = vsel %vm1645_vm3, %v6180_v31, %v6181_v40  ;;  %v9506_v13 = vld [vmem:[#allocation2 + $0x108] sm:$0xff] }
 0x21d   :  { %12928 = vst [vmem:[#allocation23_spill] sm:$0xff] %v11772_v18  ;;  %v11778_v62 = vadd.f32 %v8942_v20, %v3101_v63  ;;  %v3100_v55 = vadd.f32 %v2941_v22, %v12931_v23  ;;  %9290 = vmatprep.mubr.msk.f32.mxu0 %vm23_vm0, %v6177_v25  ;;  %v12933_v20 = vld [vmem:[#allocation35_spill] sm:$0xff]  ;;  %v5446_v18 = vrot.slane %v9504_v9, 1  ;;  %v5443_v27 = vsel %vm456_vm2, %v5441_v19, %v5442_v2 }
 0x21e   :  { %v8847_v61 = vpop.f32.mrf.mxu1  ;;  %9190 = vmatmul.mubr.msk.f32.gmra.mxu1 %vm23_vm0, %v5435_v45  ;;  %v9505_v22 = vld [vmem:[#allocation2 + $0xf8] sm:$0xff]  ;;  %v4661_v45 = vld [vmem:[#allocation2 + $0x100] sm:$0x3]  ;;  %v6190_v29 = vrot.slane %v9506_v13, 2  ;;  %v5445_v31 = vsel %vm456_vm2, %v5442_v2, %v5444_v16  ;;  %v6184_v9 = vsel %vm1645_vm3, %v6181_v40, %v6183_v60 }
 0x21f   :  { %12930 = vst [vmem:[#allocation24_spill] sm:$0xff] %v11778_v62  ;;  %v11786_v14 = vadd.f32 %v3712_v48, %v3100_v55  ;;  %v3103_v63 = vadd.f32 %v8847_v61, %v12933_v20  ;;  %v3722_v62 = vpop.f32.mrf.mxu0  ;;  %9192 = vmatprep.mubr.msk.f32.mxu1 %vm23_vm0, %v5438_v43  ;;  %v6186_v23 = vrot.slane %v9505_v22, 2  ;;  %v5447_v54 = vrot.slane %v9505_v22, 1  ;;  %v12935_v48 = vld [vmem:[#allocation36_spill] sm:$0xff] }
 0x220   :  { %v2951_v25 = vpop.f32.mrf.mxu1  ;;  %9291 = vmatmul.mubr.msk.f32.gmra.mxu0 %vm23_vm0, %v6179_v38  ;;  %v5449_v19 = vrot.slane %v4661_v45, 1  ;;  %v6188_v20 = vrot.slane %v4661_v45, 2  ;;  %v9508_v40 = vld [vmem:[#allocation2 + $0x120] sm:$0xff] }
 0x221   :  { %12932 = vst [vmem:[#allocation25_spill] sm:$0xff] %v11786_v14  ;;  %v11792_v5 = vadd.f32 %v8945_v36, %v3103_v63  ;;  %v3102_v55 = vadd.f32 %v2951_v25, %v12935_v48  ;;  %v8948_v61 = vpop.f32.mrf.mxu0  ;;  %9293 = vmatprep.mubr.msk.f32.mxu0 %vm23_vm0, %v6182_v28  ;;  %v12937_v36 = vld [vmem:[#allocation38_spill] sm:$0xff]  ;;  %v6187_v38 = vsel %vm1645_vm3, %v6185_v58, %v6186_v23  ;;  %v5451_v14 = vrot.slane %v9506_v13, 1 }
 0x222   :  { %v8850_v43 = vpop.f32.mrf.mxu1  ;;  %9193 = vmatmul.mubr.msk.f32.gmra.mxu1 %vm23_vm0, %v5440_v37  ;;  %v9507_v25 = vld [vmem:[#allocation2 + $0x110] sm:$0xff]  ;;  %v4664_v37 = vld [vmem:[#allocation2 + $0x118] sm:$0x3]  ;;  %v5448_v2 = vsel %vm456_vm2, %v5446_v18, %v5447_v54  ;;  %v6195_v60 = vrot.slane %v9508_v40, 2  ;;  %v5450_v58 = vsel %vm456_vm2, %v5447_v54, %v5449_v19  ;;  %v6189_v13 = vsel %vm1645_vm3, %v6186_v23, %v6188_v20 }
 0x223   :  { %12934 = vst [vmem:[#allocation26_spill] sm:$0xff] %v11792_v5  ;;  %v11800_v22 = vadd.f32 %v3722_v62, %v3102_v55  ;;  %v3105_v63 = vadd.f32 %v8850_v43, %v12937_v36  ;;  %v3732_v5 = vpop.f32.mrf.mxu0  ;;  %9195 = vmatprep.mubr.msk.f32.mxu1 %vm23_vm0, %v5443_v27  ;;  %v6191_v48 = vrot.slane %v9507_v25, 2  ;;  %v5452_v16 = vrot.slane %v9507_v25, 1  ;;  %v12939_v62 = vld [vmem:[#allocation41_spill] sm:$0xff]  ;;  %v9510_v23 = vld [vmem:[#allocation2 + $0x138] sm:$0xff] }
 0x224   :  { %v2961_v28 = vpop.f32.mrf.mxu1  ;;  %9294 = vmatmul.mubr.msk.f32.gmra.mxu0 %vm23_vm0, %v6184_v9  ;;  %v5454_v18 = vrot.slane %v4664_v37, 1  ;;  %v6193_v36 = vrot.slane %v4664_v37, 2  ;;  %v6200_v20 = vrot.slane %v9510_v23, 2 }
 0x225   :  { %12936 = vst [vmem:[#allocation27_spill] sm:$0xff] %v11800_v22  ;;  %v11806_v45 = vadd.f32 %v8948_v61, %v3105_v63  ;;  %v3104_v55 = vadd.f32 %v2961_v28, %v12939_v62  ;;  %v8951_v43 = vpop.f32.mrf.mxu0  ;;  %9296 = vmatprep.mubr.msk.f32.mxu0 %vm23_vm0, %v6187_v38  ;;  %v12941_v61 = vld [vmem:[#allocation42_spill] sm:$0xff]  ;;  %v6192_v9 = vsel %vm1645_vm3, %v6190_v29, %v6191_v48  ;;  %v5456_v22 = vrot.slane %v9508_v40, 1 }
 0x226   :  { %v8853_v27 = vpop.f32.mrf.mxu1  ;;  %9196 = vmatmul.mubr.msk.f32.gmra.mxu1 %vm23_vm0, %v5445_v31  ;;  %v9509_v28 = vld [vmem:[#allocation2 + $0x128] sm:$0xff]  ;;  %v4667_v31 = vld [vmem:[#allocation2 + $0x130] sm:$0x3]  ;;  %v5453_v54 = vsel %vm456_vm2, %v5451_v14, %v5452_v16  ;;  %v5455_v29 = vsel %vm456_vm2, %v5452_v16, %v5454_v18  ;;  %v6194_v40 = vsel %vm1645_vm3, %v6191_v48, %v6193_v36 }
 0x227   :  { %12938 = vst [vmem:[#allocation30_spill] sm:$0xff] %v11806_v45  ;;  %v11814_v25 = vadd.f32 %v3732_v5, %v3104_v55  ;;  %v3107_v63 = vadd.f32 %v8853_v27, %v12941_v61  ;;  %v3742_v45 = vpop.f32.mrf.mxu0  ;;  %9198 = vmatprep.mubr.msk.f32.mxu1 %vm23_vm0, %v5448_v2  ;;  %v6196_v62 = vrot.slane %v9509_v28, 2  ;;  %v5457_v19 = vrot.slane %v9509_v28, 1  ;;  %v12943_v5 = vld [vmem:[#allocation43_spill] sm:$0xff] }
 0x228   :  { %v2971_v38 = vpop.f32.mrf.mxu1  ;;  %9297 = vmatmul.mubr.msk.f32.gmra.mxu0 %vm23_vm0, %v6189_v13  ;;  %v5459_v14 = vrot.slane %v4667_v31, 1  ;;  %v6198_v61 = vrot.slane %v4667_v31, 2  ;;  %v9512_v48 = vld [vmem:[#allocation2 + $0x150] sm:$0xff] }
 0x229   :  { %12940 = vst [vmem:[#allocation31_spill] sm:$0xff] %v11814_v25  ;;  %v11820_v37 = vadd.f32 %v8951_v43, %v3107_v63  ;;  %v3106_v55 = vadd.f32 %v2971_v38, %v12943_v5  ;;  %v8954_v27 = vpop.f32.mrf.mxu0  ;;  %9299 = vmatprep.mubr.msk.f32.mxu0 %vm23_vm0, %v6192_v9  ;;  %v12945_v43 = vld [vmem:[#allocation28_spill] sm:$0xff]  ;;  %v6197_v13 = vsel %vm1645_vm3, %v6195_v60, %v6196_v62  ;;  %v5461_v25 = vrot.slane %v9510_v23, 1 }
 0x22a   :  { %v8856_v2 = vpop.f32.mrf.mxu1  ;;  %9199 = vmatmul.mubr.msk.f32.gmra.mxu1 %vm23_vm0, %v5450_v58  ;;  %v9511_v38 = vld [vmem:[#allocation2 + $0x140] sm:$0xff]  ;;  %v4670_v58 = vld [vmem:[#allocation2 + $0x148] sm:$0x3]  ;;  %v5458_v16 = vsel %vm456_vm2, %v5456_v22, %v5457_v19  ;;  %v6205_v36 = vrot.slane %v9512_v48, 2  ;;  %v5460_v60 = vsel %vm456_vm2, %v5457_v19, %v5459_v14  ;;  %v6199_v23 = vsel %vm1645_vm3, %v6196_v62, %v6198_v61 }
 0x22b   :  { %12942 = vst [vmem:[#allocation33_spill] sm:$0xff] %v11820_v37  ;;  %v11828_v28 = vadd.f32 %v3742_v45, %v3106_v55  ;;  %v3109_v63 = vadd.f32 %v8856_v2, %v12945_v43  ;;  %v3752_v37 = vpop.f32.mrf.mxu0  ;;  %9201 = vmatprep.mubr.msk.f32.mxu1 %vm23_vm0, %v5453_v54  ;;  %v6201_v5 = vrot.slane %v9511_v38, 2  ;;  %v5462_v18 = vrot.slane %v9511_v38, 1  ;;  %v12947_v45 = vld [vmem:[#allocation29_spill] sm:$0xff] }
 0x22c   :  { %v2981_v9 = vpop.f32.mrf.mxu1  ;;  %9300 = vmatmul.mubr.msk.f32.gmra.mxu0 %vm23_vm0, %v6194_v40  ;;  %v5464_v22 = vrot.slane %v4670_v58, 1  ;;  %v6203_v43 = vrot.slane %v4670_v58, 2  ;;  %v9514_v62 = vld [vmem:[#allocation2 + $0x168] sm:$0xff] }
 0x22d   :  { %12944 = vst [vmem:[#allocation35_spill] sm:$0xff] %v11828_v28  ;;  %v11834_v31 = vadd.f32 %v8954_v27, %v3109_v63  ;;  %v3108_v55 = vadd.f32 %v2981_v9, %v12947_v45  ;;  %v8957_v2 = vpop.f32.mrf.mxu0  ;;  %9302 = vmatprep.mubr.msk.f32.mxu0 %vm23_vm0, %v6197_v13  ;;  %v12949_v27 = vld [vmem:[#allocation32_spill] sm:$0xff]  ;;  %v6202_v40 = vsel %vm1645_vm3, %v6200_v20, %v6201_v5  ;;  %v5466_v28 = vrot.slane %v9512_v48, 1 }
 0x22e   :  { %v8859_v54 = vpop.f32.mrf.mxu1  ;;  %9202 = vmatmul.mubr.msk.f32.gmra.mxu1 %vm23_vm0, %v5455_v29  ;;  %v9513_v9 = vld [vmem:[#allocation2 + $0x158] sm:$0xff]  ;;  %v4673_v29 = vld [vmem:[#allocation2 + $0x160] sm:$0x3]  ;;  %v5463_v19 = vsel %vm456_vm2, %v5461_v25, %v5462_v18  ;;  %v6210_v61 = vrot.slane %v9514_v62, 2  ;;  %v5465_v20 = vsel %vm456_vm2, %v5462_v18, %v5464_v22  ;;  %v6204_v48 = vsel %vm1645_vm3, %v6201_v5, %v6203_v43 }
 0x22f   :  { %12946 = vst [vmem:[#allocation36_spill] sm:$0xff] %v11834_v31  ;;  %v11842_v38 = vadd.f32 %v3752_v37, %v3108_v55  ;;  %v3111_v63 = vadd.f32 %v8859_v54, %v12949_v27  ;;  %v3762_v31 = vpop.f32.mrf.mxu0  ;;  %9204 = vmatprep.mubr.msk.f32.mxu1 %vm23_vm0, %v5458_v16  ;;  %v6206_v45 = vrot.slane %v9513_v9, 2  ;;  %v5467_v14 = vrot.slane %v9513_v9, 1  ;;  %v12951_v37 = vld [vmem:[#allocation34_spill] sm:$0xff]  ;;  %v9516_v5 = vld [vmem:[#allocation2 + $0x180] sm:$0xff] }
 0x230   :  { %v2991_v13 = vpop.f32.mrf.mxu1  ;;  %9303 = vmatmul.mubr.msk.f32.gmra.mxu0 %vm23_vm0, %v6199_v23  ;;  %v5469_v25 = vrot.slane %v4673_v29, 1  ;;  %v6208_v27 = vrot.slane %v4673_v29, 2  ;;  %v6215_v43 = vrot.slane %v9516_v5, 2 }
 0x231   :  { %12948 = vst [vmem:[#allocation38_spill] sm:$0xff] %v11842_v38  ;;  %v11848_v58 = vadd.f32 %v8957_v2, %v3111_v63  ;;  %v3110_v55 = vadd.f32 %v2991_v13, %v12951_v37  ;;  %v8960_v54 = vpop.f32.mrf.mxu0  ;;  %9305 = vmatprep.mubr.msk.f32.mxu0 %vm23_vm0, %v6202_v40  ;;  %v12953_v2 = vld [vmem:[#allocation37_spill] sm:$0xff]  ;;  %v6207_v23 = vsel %vm1645_vm3, %v6205_v36, %v6206_v45  ;;  %v9515_v13 = vld [vmem:[#allocation2 + $0x170] sm:$0xff]  ;;  %v5471_v38 = vrot.slane %v9514_v62, 1 }
 0x232   :  { %v8862_v16 = vpop.f32.mrf.mxu1  ;;  %9205 = vmatmul.mubr.msk.f32.gmra.mxu1 %vm23_vm0, %v5460_v60  ;;  %v6211_v37 = vrot.slane %v9515_v13, 2  ;;  %v4676_v60 = vld [vmem:[#allocation2 + $0x178] sm:$0x3]  ;;  %v5468_v18 = vsel %vm456_vm2, %v5466_v28, %v5467_v14  ;;  %v5472_v22 = vrot.slane %v9515_v13, 1  ;;  %v5470_v36 = vsel %vm456_vm2, %v5467_v14, %v5469_v25 }
 0x233   :  { %12950 = vst [vmem:[#allocation41_spill] sm:$0xff] %v11848_v58  ;;  %v11856_v9 = vadd.f32 %v3762_v31, %v3110_v55  ;;  %v3113_v63 = vadd.f32 %v8862_v16, %v12953_v2  ;;  %v3772_v58 = vpop.f32.mrf.mxu0  ;;  %9207 = vmatprep.mubr.msk.f32.mxu1 %vm23_vm0, %v5463_v19  ;;  %v12955_v31 = vld [vmem:[#allocation39_spill] sm:$0xff]  ;;  %v6209_v62 = vsel %vm1645_vm3, %v6206_v45, %v6208_v27  ;;  %v5474_v28 = vrot.slane %v4676_v60, 1 }
 0x234   :  { %v3001_v40 = vpop.f32.mrf.mxu1  ;;  %9306 = vmatmul.mubr.msk.f32.gmra.mxu0 %vm23_vm0, %v6204_v48  ;;  %v6213_v2 = vrot.slane %v4676_v60, 2  ;;  %v6212_v48 = vsel %vm1645_vm3, %v6210_v61, %v6211_v37  ;;  %v5473_v14 = vsel %vm456_vm2, %v5471_v38, %v5472_v22  ;;  %v9518_v45 = vld [vmem:[#allocation2 + $0x198] sm:$0xff] }
 0x235   :  { %12952 = vst [vmem:[#allocation42_spill] sm:$0xff] %v11856_v9  ;;  %v11862_v29 = vadd.f32 %v8960_v54, %v3113_v63  ;;  %v3112_v55 = vadd.f32 %v3001_v40, %v12955_v31  ;;  %v8963_v16 = vpop.f32.mrf.mxu0  ;;  %9308 = vmatprep.mubr.msk.f32.mxu0 %vm23_vm0, %v6207_v23  ;;  %v12957_v54 = vld [vmem:[#allocation40_spill] sm:$0xff]  ;;  %v9517_v40 = vld [vmem:[#allocation2 + $0x188] sm:$0xff]  ;;  %v5476_v9 = vrot.slane %v9516_v5, 1  ;;  %v6220_v27 = vrot.slane %v9518_v45, 2 }
 0x236   :  { %v8865_v19 = vpop.f32.mrf.mxu1  ;;  %9208 = vmatmul.mubr.msk.f32.gmra.mxu1 %vm23_vm0, %v5465_v20  ;;  %v6216_v31 = vrot.slane %v9517_v40, 2  ;;  %v4679_v20 = vld [vmem:[#allocation2 + $0x190] sm:$0x3]  ;;  %v5477_v25 = vrot.slane %v9517_v40, 1  ;;  %v5475_v61 = vsel %vm456_vm2, %v5472_v22, %v5474_v28  ;;  %v6214_v5 = vsel %vm1645_vm3, %v6211_v37, %v6213_v2  ;;  %v9520_v37 = vld [vmem:[#allocation2 + $0x1e0] sm:$0xff] }
 0x237   :  { %12954 = vst [vmem:[#allocation43_spill] sm:$0xff] %v11862_v29  ;;  %v11870_v13 = vadd.f32 %v3772_v58, %v3112_v55  ;;  %v3115_v63 = vadd.f32 %v8865_v19, %v12957_v54  ;;  %v3782_v29 = vpop.f32.mrf.mxu0  ;;  %9210 = vmatprep.mubr.msk.f32.mxu1 %vm23_vm0, %v5468_v18  ;;  %v12959_v58 = vld [vmem:[#allocation9_spill] sm:$0xff]  ;;  %v5479_v38 = vrot.slane %v4679_v20, 1  ;;  %v6218_v54 = vrot.slane %v4679_v20, 2 }
 0x238   :  { %v3011_v23 = vpop.f32.mrf.mxu1  ;;  %9309 = vmatmul.mubr.msk.f32.gmra.mxu0 %vm23_vm0, %v6209_v62  ;;  %v6217_v62 = vsel %vm1645_vm3, %v6215_v43, %v6216_v31  ;;  %v5478_v22 = vsel %vm456_vm2, %v5476_v9, %v5477_v25  ;;  %v6225_v2 = vrot.slane %v9520_v37, 2 }
 0x239   :  { %12956 = vst [vmem:[#allocation28_spill] sm:$0xff] %v11870_v13  ;;  %v11876_v60 = vadd.f32 %v8963_v16, %v3115_v63  ;;  %v3114_v55 = vadd.f32 %v3011_v23, %v12959_v58  ;;  %v8966_v19 = vpop.f32.mrf.mxu0  ;;  %9311 = vmatprep.mubr.msk.f32.mxu0 %vm23_vm0, %v6212_v48  ;;  %v12961_v16 = vld [vmem:[#allocation10_spill] sm:$0xff]  ;;  %v9519_v23 = vld [vmem:[#allocation2 + $0x1a0] sm:$0xff]  ;;  %v5481_v13 = vrot.slane %v9518_v45, 1  ;;  %v5480_v43 = vsel %vm456_vm2, %v5477_v25, %v5479_v38 }
 0x23a   :  { %v8868_v18 = vpop.f32.mrf.mxu1  ;;  %9211 = vmatmul.mubr.msk.f32.gmra.mxu1 %vm23_vm0, %v5470_v36  ;;  %v6221_v58 = vrot.slane %v9519_v23, 2  ;;  %v4682_v36 = vld [vmem:[#allocation2 + $0x1a8] sm:$0x3]  ;;  %v5482_v28 = vrot.slane %v9519_v23, 1  ;;  %v6219_v45 = vsel %vm1645_vm3, %v6216_v31, %v6218_v54  ;;  %v9522_v31 = vld [vmem:[#allocation2 + $0x1f8] sm:$0xff] }
 0x23b   :  { %12958 = vst [vmem:[#allocation29_spill] sm:$0xff] %v11876_v60  ;;  %v11884_v40 = vadd.f32 %v3782_v29, %v3114_v55  ;;  %v3117_v63 = vadd.f32 %v8868_v18, %v12961_v16  ;;  %v3792_v60 = vpop.f32.mrf.mxu0  ;;  %9213 = vmatprep.mubr.msk.f32.mxu1 %vm23_vm0, %v5473_v14  ;;  %v12963_v29 = vld [vmem:[#allocation11_spill] sm:$0xff]  ;;  %v5484_v9 = vrot.slane %v4682_v36, 1  ;;  %v6223_v16 = vrot.slane %v4682_v36, 2 }
 0x23c   :  { %v3021_v48 = vpop.f32.mrf.mxu1  ;;  %9312 = vmatmul.mubr.msk.f32.gmra.mxu0 %vm23_vm0, %v6214_v5  ;;  %v6222_v5 = vsel %vm1645_vm3, %v6220_v27, %v6221_v58  ;;  %v5483_v25 = vsel %vm456_vm2, %v5481_v13, %v5482_v28  ;;  %v6230_v54 = vrot.slane %v9522_v31, 2 }
 0x23d   :  { %12960 = vst [vmem:[#allocation32_spill] sm:$0xff] %v11884_v40  ;;  %v11890_v20 = vadd.f32 %v8966_v19, %v3117_v63  ;;  %v3116_v55 = vadd.f32 %v3021_v48, %v12963_v29  ;;  %v8969_v18 = vpop.f32.mrf.mxu0  ;;  %9314 = vmatprep.mubr.msk.f32.mxu0 %vm23_vm0, %v6217_v62  ;;  %v12965_v19 = vld [vmem:[#allocation12_spill] sm:$0xff]  ;;  %v9521_v48 = vld [vmem:[#allocation2 + $0x1e8] sm:$0xff]  ;;  %v5486_v40 = vrot.slane %v9520_v37, 1  ;;  %v5485_v27 = vsel %vm456_vm2, %v5482_v28, %v5484_v9 }
 0x23e   :  { %v8871_v14 = vpop.f32.mrf.mxu1  ;;  %9214 = vmatmul.mubr.msk.f32.gmra.mxu1 %vm23_vm0, %v5475_v61  ;;  %v6226_v29 = vrot.slane %v9521_v48, 2  ;;  %v4685_v61 = vld [vmem:[#allocation2 + $0x1f0] sm:$0x3]  ;;  %v5487_v38 = vrot.slane %v9521_v48, 1  ;;  %v6224_v37 = vsel %vm1645_vm3, %v6221_v58, %v6223_v16 }
 0x23f   :  { %12962 = vst [vmem:[#allocation34_spill] sm:$0xff] %v11890_v20  ;;  %v11898_v23 = vadd.f32 %v3792_v60, %v3116_v55  ;;  %v3119_v63 = vadd.f32 %v8871_v14, %v12965_v19  ;;  %v3802_v20 = vpop.f32.mrf.mxu0  ;;  %9216 = vmatprep.mubr.msk.f32.mxu1 %vm23_vm0, %v5478_v22  ;;  %v12967_v60 = vld [vmem:[#allocation13_spill] sm:$0xff]  ;;  %v5489_v13 = vrot.slane %v4685_v61, 1  ;;  %v6228_v19 = vrot.slane %v4685_v61, 2  ;;  %v9524_v58 = vld [vmem:[#allocation2 + $0x210] sm:$0xff] }
 0x240   :  { %v3031_v62 = vpop.f32.mrf.mxu1  ;;  %9315 = vmatmul.mubr.msk.f32.gmra.mxu0 %vm23_vm0, %v6219_v45  ;;  %v6227_v45 = vsel %vm1645_vm3, %v6225_v2, %v6226_v29  ;;  %v5488_v28 = vsel %vm456_vm2, %v5486_v40, %v5487_v38  ;;  %v6235_v16 = vrot.slane %v9524_v58, 2 }
 0x241   :  { %12964 = vst [vmem:[#allocation37_spill] sm:$0xff] %v11898_v23  ;;  %v11904_v36 = vadd.f32 %v8969_v18, %v3119_v63  ;;  %v3118_v55 = vadd.f32 %v3031_v62, %v12967_v60  ;;  %v8972_v14 = vpop.f32.mrf.mxu0  ;;  %9317 = vmatprep.mubr.msk.f32.mxu0 %vm23_vm0, %v6222_v5  ;;  %v12969_v18 = vld [vmem:[#allocation14_spill] sm:$0xff]  ;;  %v9523_v62 = vld [vmem:[#allocation2 + $0x200] sm:$0xff]  ;;  %v5491_v23 = vrot.slane %v9522_v31, 1  ;;  %v5490_v2 = vsel %vm456_vm2, %v5487_v38, %v5489_v13 }
 0x242   :  { %v8874_v22 = vpop.f32.mrf.mxu1  ;;  %9217 = vmatmul.mubr.msk.f32.gmra.mxu1 %vm23_vm0, %v5480_v43  ;;  %v6231_v60 = vrot.slane %v9523_v62, 2  ;;  %v4688_v43 = vld [vmem:[#allocation2 + $0x208] sm:$0x3]  ;;  %v5492_v9 = vrot.slane %v9523_v62, 1  ;;  %v6229_v31 = vsel %vm1645_vm3, %v6226_v29, %v6228_v19 }
 0x243   :  { %12966 = vst [vmem:[#allocation39_spill] sm:$0xff] %v11904_v36  ;;  %v11912_v48 = vadd.f32 %v3802_v20, %v3118_v55  ;;  %v3121_v63 = vadd.f32 %v8874_v22, %v12969_v18  ;;  %v3812_v36 = vpop.f32.mrf.mxu0  ;;  %9219 = vmatprep.mubr.msk.f32.mxu1 %vm23_vm0, %v5483_v25  ;;  %v12971_v20 = vld [vmem:[#allocation15_spill] sm:$0xff]  ;;  %v5494_v40 = vrot.slane %v4688_v43, 1  ;;  %v6233_v18 = vrot.slane %v4688_v43, 2  ;;  %v9526_v29 = vld [vmem:[#allocation2 + $0x228] sm:$0xff] }
 0x244   :  { %v3041_v5 = vpop.f32.mrf.mxu1  ;;  %9318 = vmatmul.mubr.msk.f32.gmra.mxu0 %vm23_vm0, %v6224_v37  ;;  %v6232_v37 = vsel %vm1645_vm3, %v6230_v54, %v6231_v60  ;;  %v5493_v38 = vsel %vm456_vm2, %v5491_v23, %v5492_v9  ;;  %v6240_v19 = vrot.slane %v9526_v29, 2 }
 0x245   :  { %12968 = vst [vmem:[#allocation40_spill] sm:$0xff] %v11912_v48  ;;  %v11918_v61 = vadd.f32 %v8972_v14, %v3121_v63  ;;  %v3120_v55 = vadd.f32 %v3041_v5, %v12971_v20  ;;  %v8975_v22 = vpop.f32.mrf.mxu0  ;;  %9320 = vmatprep.mubr.msk.f32.mxu0 %vm23_vm0, %v6227_v45  ;;  %v12972_v14 = vld [vmem:[#allocation16_spill] sm:$0xff]  ;;  %v5496_v48 = vrot.slane %v9524_v58, 1  ;;  %v5495_v54 = vsel %vm456_vm2, %v5492_v9, %v5494_v40 }
 0x246   :  { %v8877_v25 = vpop.f32.mrf.mxu1  ;;  %9220 = vmatmul.mubr.msk.f32.gmra.mxu1 %vm23_vm0, %v5485_v27  ;;  %v9525_v5 = vld [vmem:[#allocation2 + $0x218] sm:$0xff]  ;;  %v4691_v27 = vld [vmem:[#allocation2 + $0x220] sm:$0x3]  ;;  %v6234_v58 = vsel %vm1645_vm3, %v6231_v60, %v6233_v18 }
 0x247   :  { %12970 = vst [vmem:[#allocation9_spill] sm:$0xff] %v11918_v61  ;;  %v11926_v62 = vadd.f32 %v3812_v36, %v3120_v55  ;;  %v3123_v63 = vadd.f32 %v8877_v25, %v12972_v14  ;;  %v3822_v61 = vpop.f32.mrf.mxu0  ;;  %9222 = vmatprep.mubr.msk.f32.mxu1 %vm23_vm0, %v5488_v28  ;;  %v6236_v20 = vrot.slane %v9525_v5, 2  ;;  %v5497_v13 = vrot.slane %v9525_v5, 1  ;;  %v9528_v60 = vld [vmem:[#allocation2 + $0x240] sm:$0xff] }
 0x248   :  { %v3051_v45 = vpop.f32.mrf.mxu1  ;;  %9321 = vmatmul.mubr.msk.f32.gmra.mxu0 %vm23_vm0, %v6229_v31  ;;  %v5499_v23 = vrot.slane %v4691_v27, 1  ;;  %v6238_v25 = vrot.slane %v4691_v27, 2  ;;  %v9527_v31 = vld [vmem:[#allocation2 + $0x230] sm:$0xff]  ;;  %v6245_v18 = vrot.slane %v9528_v60, 2 }
 0x249   :  { %v11932_v43 = vadd.f32 %v8975_v22, %v3123_v63  ;;  %v3122_v36 = vadd.f32 %v3051_v45, %v11519_v44  ;;  %v9078_v55 = vpop.f32.mrf.mxu0  ;;  %9323 = vmatprep.mubr.msk.f32.mxu0 %vm23_vm0, %v6232_v37  ;;  %v6237_v44 = vsel %vm1645_vm3, %v6235_v16, %v6236_v20  ;;  %v6241_v5 = vrot.slane %v9527_v31, 2 }
 0x24a   :  { %v8980_v28 = vpop.f32.mrf.mxu1  ;;  %9223 = vmatmul.mubr.msk.f32.gmra.mxu1 %vm23_vm0, %v5490_v2  ;;  %v4694_v2 = vld [vmem:[#allocation2 + $0x238] sm:$0x3]  ;;  %v5501_v45 = vrot.slane %v9526_v29, 1  ;;  %v5498_v9 = vsel %vm456_vm2, %v5496_v48, %v5497_v13  ;;  %v5502_v40 = vrot.slane %v9527_v31, 1  ;;  %v5500_v16 = vsel %vm456_vm2, %v5497_v13, %v5499_v23 }
 0x24b   :  { %v11940_v14 = vadd.f32 %v3822_v61, %v3122_v36  ;;  %v4571_v22 = vadd.f32 %v8980_v28, %v11525_v49  ;;  %v4991_v63 = vpop.f32.mrf.mxu0  ;;  %9225 = vmatprep.mubr.msk.f32.mxu1 %vm23_vm0, %v5493_v38  ;;  %v6239_v29 = vsel %vm1645_vm3, %v6236_v20, %v6238_v25  ;;  %v5504_v48 = vrot.slane %v4694_v2, 1  ;;  %v9530_v20 = vld [vmem:[#allocation2 + $0x258] sm:$0xff] }
 0x24c   :  { %v4251_v37 = vpop.f32.mrf.mxu1  ;;  %9324 = vmatmul.mubr.msk.f32.gmra.mxu0 %vm23_vm0, %v6234_v58  ;;  %v6243_v36 = vrot.slane %v4694_v2, 2  ;;  %v9529_v58 = vld [vmem:[#allocation2 + $0x248] sm:$0xff]  ;;  %v5503_v13 = vsel %vm456_vm2, %v5501_v45, %v5502_v40  ;;  %v6250_v25 = vrot.slane %v9530_v20, 2 }
 0x24d   :  { %v11946_v27 = vadd.f32 %v9078_v55, %v4571_v22  ;;  %v4570_v61 = vadd.f32 %v4251_v37, %v11531_v17  ;;  %v9081_v49 = vpop.f32.mrf.mxu0  ;;  %9326 = vmatprep.mubr.msk.f32.mxu0 %vm23_vm0, %v6237_v44  ;;  %v6242_v17 = vsel %vm1645_vm3, %v6240_v19, %v6241_v5  ;;  %v6246_v31 = vrot.slane %v9529_v58, 2 }
 0x24e   :  { %v8983_v38 = vpop.f32.mrf.mxu1  ;;  %9226 = vmatmul.mubr.msk.f32.gmra.mxu1 %vm23_vm0, %v5495_v54  ;;  %v4697_v54 = vld [vmem:[#allocation2 + $0x250] sm:$0x3]  ;;  %v5506_v37 = vrot.slane %v9528_v60, 1  ;;  %v5507_v23 = vrot.slane %v9529_v58, 1  ;;  %v5505_v19 = vsel %vm456_vm2, %v5502_v40, %v5504_v48  ;;  %v6244_v60 = vsel %vm1645_vm3, %v6241_v5, %v6243_v36 }
 0x24f   :  { %v11954_v28 = vadd.f32 %v4991_v63, %v4570_v61  ;;  %v4573_v55 = vadd.f32 %v8983_v38, %v11537_v33  ;;  %v5001_v22 = vpop.f32.mrf.mxu0  ;;  %9228 = vmatprep.mubr.msk.f32.mxu1 %vm23_vm0, %v5498_v9  ;;  %v5509_v45 = vrot.slane %v4697_v54, 1  ;;  %v6248_v61 = vrot.slane %v4697_v54, 2  ;;  %v9532_v5 = vld [vmem:[#allocation2 + $0x270] sm:$0xff] }
 0x250   :  { %v4261_v44 = vpop.f32.mrf.mxu1  ;;  %9327 = vmatmul.mubr.msk.f32.gmra.mxu0 %vm23_vm0, %v6239_v29  ;;  %v9531_v29 = vld [vmem:[#allocation2 + $0x260] sm:$0xff]  ;;  %v5508_v40 = vsel %vm456_vm2, %v5506_v37, %v5507_v23  ;;  %v6255_v36 = vrot.slane %v9532_v5, 2 }
 0x251   :  { %v11960_v2 = vadd.f32 %v9081_v49, %v4573_v55  ;;  %v4572_v63 = vadd.f32 %v4261_v44, %v11543_v4  ;;  %v9084_v33 = vpop.f32.mrf.mxu0  ;;  %9329 = vmatprep.mubr.msk.f32.mxu0 %vm23_vm0, %v6242_v17  ;;  %v6247_v4 = vsel %vm1645_vm3, %v6245_v18, %v6246_v31  ;;  %v6251_v58 = vrot.slane %v9531_v29, 2 }
 0x252   :  { %v8986_v9 = vpop.f32.mrf.mxu1  ;;  %9229 = vmatmul.mubr.msk.f32.gmra.mxu1 %vm23_vm0, %v5500_v16  ;;  %v4700_v16 = vld [vmem:[#allocation2 + $0x268] sm:$0x3]  ;;  %v5511_v44 = vrot.slane %v9530_v20, 1  ;;  %v5512_v48 = vrot.slane %v9531_v29, 1  ;;  %v5510_v18 = vsel %vm456_vm2, %v5507_v23, %v5509_v45  ;;  %v6249_v20 = vsel %vm1645_vm3, %v6246_v31, %v6248_v61 }
 0x253   :  { %v11968_v38 = vadd.f32 %v5001_v22, %v4572_v63  ;;  %v4575_v49 = vadd.f32 %v8986_v9, %v11549_v11  ;;  %v5011_v55 = vpop.f32.mrf.mxu0  ;;  %9231 = vmatprep.mubr.msk.f32.mxu1 %vm23_vm0, %v5503_v13  ;;  %v5514_v37 = vrot.slane %v4700_v16, 1  ;;  %v6253_v63 = vrot.slane %v4700_v16, 2  ;;  %v9534_v31 = vld [vmem:[#allocation2 + $0x288] sm:$0xff] }
 0x254   :  { %v4271_v17 = vpop.f32.mrf.mxu1  ;;  %9330 = vmatmul.mubr.msk.f32.gmra.mxu0 %vm23_vm0, %v6244_v60  ;;  %v9533_v60 = vld [vmem:[#allocation2 + $0x278] sm:$0xff]  ;;  %v5513_v23 = vsel %vm456_vm2, %v5511_v44, %v5512_v48  ;;  %v6260_v61 = vrot.slane %v9534_v31, 2 }
 0x255   :  { %v11974_v54 = vadd.f32 %v9084_v33, %v4575_v49  ;;  %v4574_v22 = vadd.f32 %v4271_v17, %v11555_v26  ;;  %v9087_v11 = vpop.f32.mrf.mxu0  ;;  %9332 = vmatprep.mubr.msk.f32.mxu0 %vm23_vm0, %v6247_v4  ;;  %v6252_v26 = vsel %vm1645_vm3, %v6250_v25, %v6251_v58  ;;  %v6256_v29 = vrot.slane %v9533_v60, 2 }
 0x256   :  { %v8989_v13 = vpop.f32.mrf.mxu1  ;;  %9232 = vmatmul.mubr.msk.f32.gmra.mxu1 %vm23_vm0, %v5505_v19  ;;  %v4703_v19 = vld [vmem:[#allocation2 + $0x280] sm:$0x3]  ;;  %v5516_v17 = vrot.slane %v9532_v5, 1  ;;  %v5517_v45 = vrot.slane %v9533_v60, 1  ;;  %v5515_v25 = vsel %vm456_vm2, %v5512_v48, %v5514_v37  ;;  %v6254_v5 = vsel %vm1645_vm3, %v6251_v58, %v6253_v63 }
 0x257   :  { %v11982_v9 = vadd.f32 %v5011_v55, %v4574_v22  ;;  %v4577_v33 = vadd.f32 %v8989_v13, %v11561_v1  ;;  %v5021_v49 = vpop.f32.mrf.mxu0  ;;  %9234 = vmatprep.mubr.msk.f32.mxu1 %vm23_vm0, %v5508_v40  ;;  %v5519_v44 = vrot.slane %v4703_v19, 1  ;;  %v6258_v22 = vrot.slane %v4703_v19, 2  ;;  %v9536_v58 = vld [vmem:[#allocation2 + $0x2a0] sm:$0xff] }
 0x258   :  { %v4281_v4 = vpop.f32.mrf.mxu1  ;;  %9333 = vmatmul.mubr.msk.f32.gmra.mxu0 %vm23_vm0, %v6249_v20  ;;  %v9535_v20 = vld [vmem:[#allocation2 + $0x290] sm:$0xff]  ;;  %v5518_v48 = vsel %vm456_vm2, %v5516_v17, %v5517_v45  ;;  %v6265_v63 = vrot.slane %v9536_v58, 2 }
 0x259   :  { %v11988_v16 = vadd.f32 %v9087_v11, %v4577_v33  ;;  %v4576_v55 = vadd.f32 %v4281_v4, %v11567_v0  ;;  %v9090_v1 = vpop.f32.mrf.mxu0  ;;  %9335 = vmatprep.mubr.msk.f32.mxu0 %vm23_vm0, %v6252_v26  ;;  %v6257_v0 = vsel %vm1645_vm3, %v6255_v36, %v6256_v29  ;;  %v6261_v60 = vrot.slane %v9535_v20, 2 }
 0x25a   :  { %v8992_v40 = vpop.f32.mrf.mxu1  ;;  %9235 = vmatmul.mubr.msk.f32.gmra.mxu1 %vm23_vm0, %v5510_v18  ;;  %v4706_v18 = vld [vmem:[#allocation2 + $0x298] sm:$0x3]  ;;  %v5521_v4 = vrot.slane %v9534_v31, 1  ;;  %v5522_v37 = vrot.slane %v9535_v20, 1  ;;  %v5520_v36 = vsel %vm456_vm2, %v5517_v45, %v5519_v44  ;;  %v6259_v31 = vsel %vm1645_vm3, %v6256_v29, %v6258_v22 }
 0x25b   :  { %v11996_v13 = vadd.f32 %v5021_v49, %v4576_v55  ;;  %v4579_v11 = vadd.f32 %v8992_v40, %v11573_v59  ;;  %v5031_v33 = vpop.f32.mrf.mxu0  ;;  %9237 = vmatprep.mubr.msk.f32.mxu1 %vm23_vm0, %v5513_v23  ;;  %v5524_v17 = vrot.slane %v4706_v18, 1  ;;  %v6263_v55 = vrot.slane %v4706_v18, 2  ;;  %v9538_v29 = vld [vmem:[#allocation2 + $0x2b8] sm:$0xff] }
 0x25c   :  { %v4291_v26 = vpop.f32.mrf.mxu1  ;;  %9336 = vmatmul.mubr.msk.f32.gmra.mxu0 %vm23_vm0, %v6254_v5  ;;  %v9537_v5 = vld [vmem:[#allocation2 + $0x2a8] sm:$0xff]  ;;  %v5523_v45 = vsel %vm456_vm2, %v5521_v4, %v5522_v37  ;;  %v6270_v22 = vrot.slane %v9538_v29, 2 }
 0x25d   :  { %v12002_v19 = vadd.f32 %v9090_v1, %v4579_v11  ;;  %v4578_v49 = vadd.f32 %v4291_v26, %v11579_v3  ;;  %v9093_v59 = vpop.f32.mrf.mxu0  ;;  %9338 = vmatprep.mubr.msk.f32.mxu0 %vm23_vm0, %v6257_v0  ;;  %v6262_v3 = vsel %vm1645_vm3, %v6260_v61, %v6261_v60  ;;  %v6266_v20 = vrot.slane %v9537_v5, 2 }
 0x25e   :  { %v8995_v23 = vpop.f32.mrf.mxu1  ;;  %9238 = vmatmul.mubr.msk.f32.gmra.mxu1 %vm23_vm0, %v5515_v25  ;;  %v4709_v25 = vld [vmem:[#allocation2 + $0x2b0] sm:$0x3]  ;;  %v5526_v26 = vrot.slane %v9536_v58, 1  ;;  %v5527_v44 = vrot.slane %v9537_v5, 1  ;;  %v5525_v61 = vsel %vm456_vm2, %v5522_v37, %v5524_v17  ;;  %v6264_v58 = vsel %vm1645_vm3, %v6261_v60, %v6263_v55 }
 0x25f   :  { %v12010_v40 = vadd.f32 %v5031_v33, %v4578_v49  ;;  %v4581_v1 = vadd.f32 %v8995_v23, %v11585_v53  ;;  %v5041_v11 = vpop.f32.mrf.mxu0  ;;  %9240 = vmatprep.mubr.msk.f32.mxu1 %vm23_vm0, %v5518_v48  ;;  %v5529_v4 = vrot.slane %v4709_v25, 1  ;;  %v6268_v49 = vrot.slane %v4709_v25, 2  ;;  %v9540_v60 = vld [vmem:[#allocation2 + $0x2d0] sm:$0xff] }
 0x260   :  { %v4301_v0 = vpop.f32.mrf.mxu1  ;;  %9339 = vmatmul.mubr.msk.f32.gmra.mxu0 %vm23_vm0, %v6259_v31  ;;  %v9539_v31 = vld [vmem:[#allocation2 + $0x2c0] sm:$0xff]  ;;  %v5528_v37 = vsel %vm456_vm2, %v5526_v26, %v5527_v44  ;;  %v6275_v55 = vrot.slane %v9540_v60, 2 }
 0x261   :  { %v12016_v18 = vadd.f32 %v9093_v59, %v4581_v1  ;;  %v4580_v33 = vadd.f32 %v4301_v0, %v11591_v39  ;;  %v9096_v53 = vpop.f32.mrf.mxu0  ;;  %9341 = vmatprep.mubr.msk.f32.mxu0 %vm23_vm0, %v6262_v3  ;;  %v6267_v39 = vsel %vm1645_vm3, %v6265_v63, %v6266_v20  ;;  %v6271_v5 = vrot.slane %v9539_v31, 2 }
 0x262   :  { %v8998_v48 = vpop.f32.mrf.mxu1  ;;  %9241 = vmatmul.mubr.msk.f32.gmra.mxu1 %vm23_vm0, %v5520_v36  ;;  %v4712_v36 = vld [vmem:[#allocation2 + $0x2c8] sm:$0x3]  ;;  %v5531_v0 = vrot.slane %v9538_v29, 1  ;;  %v5532_v17 = vrot.slane %v9539_v31, 1  ;;  %v5530_v63 = vsel %vm456_vm2, %v5527_v44, %v5529_v4  ;;  %v6269_v29 = vsel %vm1645_vm3, %v6266_v20, %v6268_v49 }
 0x263   :  { %v12024_v23 = vadd.f32 %v5041_v11, %v4580_v33  ;;  %v4583_v59 = vadd.f32 %v8998_v48, %v11597_v50  ;;  %v5051_v1 = vpop.f32.mrf.mxu0  ;;  %9243 = vmatprep.mubr.msk.f32.mxu1 %vm23_vm0, %v5523_v45  ;;  %v5534_v26 = vrot.slane %v4712_v36, 1  ;;  %v6273_v33 = vrot.slane %v4712_v36, 2  ;;  %v9542_v20 = vld [vmem:[#allocation2 + $0x2e8] sm:$0xff] }
 0x264   :  { %v4311_v3 = vpop.f32.mrf.mxu1  ;;  %9342 = vmatmul.mubr.msk.f32.gmra.mxu0 %vm23_vm0, %v6264_v58  ;;  %v9541_v58 = vld [vmem:[#allocation2 + $0x2d8] sm:$0xff]  ;;  %v5533_v44 = vsel %vm456_vm2, %v5531_v0, %v5532_v17  ;;  %v6280_v49 = vrot.slane %v9542_v20, 2 }
 0x265   :  { %v12030_v25 = vadd.f32 %v9096_v53, %v4583_v59  ;;  %v4582_v11 = vadd.f32 %v4311_v3, %v11603_v52  ;;  %v9099_v50 = vpop.f32.mrf.mxu0  ;;  %9344 = vmatprep.mubr.msk.f32.mxu0 %vm23_vm0, %v6267_v39  ;;  %v6272_v52 = vsel %vm1645_vm3, %v6270_v22, %v6271_v5  ;;  %v6276_v31 = vrot.slane %v9541_v58, 2 }
 0x266   :  { %v9001_v45 = vpop.f32.mrf.mxu1  ;;  %9244 = vmatmul.mubr.msk.f32.gmra.mxu1 %vm23_vm0, %v5525_v61  ;;  %v4715_v61 = vld [vmem:[#allocation2 + $0x2e0] sm:$0x3]  ;;  %v5536_v3 = vrot.slane %v9540_v60, 1  ;;  %v5537_v4 = vrot.slane %v9541_v58, 1  ;;  %v5535_v22 = vsel %vm456_vm2, %v5532_v17, %v5534_v26  ;;  %v6274_v60 = vsel %vm1645_vm3, %v6271_v5, %v6273_v33 }
 0x267   :  { %v12038_v48 = vadd.f32 %v5051_v1, %v4582_v11  ;;  %v4585_v53 = vadd.f32 %v9001_v45, %v11609_v21  ;;  %v5061_v59 = vpop.f32.mrf.mxu0  ;;  %9246 = vmatprep.mubr.msk.f32.mxu1 %vm23_vm0, %v5528_v37  ;;  %v5539_v0 = vrot.slane %v4715_v61, 1  ;;  %v6278_v11 = vrot.slane %v4715_v61, 2  ;;  %v9544_v5 = vld [vmem:[#allocation2 + $0x300] sm:$0xff] }
 0x268   :  { %v4321_v39 = vpop.f32.mrf.mxu1  ;;  %9345 = vmatmul.mubr.msk.f32.gmra.mxu0 %vm23_vm0, %v6269_v29  ;;  %v9543_v29 = vld [vmem:[#allocation2 + $0x2f0] sm:$0xff]  ;;  %v5538_v17 = vsel %vm456_vm2, %v5536_v3, %v5537_v4  ;;  %v6285_v33 = vrot.slane %v9544_v5, 2 }
 0x269   :  { %v12044_v36 = vadd.f32 %v9099_v50, %v4585_v53  ;;  %v4584_v1 = vadd.f32 %v4321_v39, %v11615_v12  ;;  %v9102_v21 = vpop.f32.mrf.mxu0  ;;  %9347 = vmatprep.mubr.msk.f32.mxu0 %vm23_vm0, %v6272_v52  ;;  %v6277_v12 = vsel %vm1645_vm3, %v6275_v55, %v6276_v31  ;;  %v6281_v58 = vrot.slane %v9543_v29, 2 }
 0x26a   :  { %v9004_v37 = vpop.f32.mrf.mxu1  ;;  %9247 = vmatmul.mubr.msk.f32.gmra.mxu1 %vm23_vm0, %v5530_v63  ;;  %v4718_v63 = vld [vmem:[#allocation2 + $0x2f8] sm:$0x3]  ;;  %v5541_v39 = vrot.slane %v9542_v20, 1  ;;  %v5542_v26 = vrot.slane %v9543_v29, 1  ;;  %v5540_v55 = vsel %vm456_vm2, %v5537_v4, %v5539_v0  ;;  %v6279_v20 = vsel %vm1645_vm3, %v6276_v31, %v6278_v11 }
 0x26b   :  { %v12052_v45 = vadd.f32 %v5061_v59, %v4584_v1  ;;  %v4587_v50 = vadd.f32 %v9004_v37, %v11621_v8  ;;  %v5071_v53 = vpop.f32.mrf.mxu0  ;;  %9249 = vmatprep.mubr.msk.f32.mxu1 %vm23_vm0, %v5533_v44  ;;  %v5544_v3 = vrot.slane %v4718_v63, 1  ;;  %v6283_v1 = vrot.slane %v4718_v63, 2  ;;  %v9546_v31 = vld [vmem:[#allocation2 + $0x318] sm:$0xff] }
 0x26c   :  { %v4331_v52 = vpop.f32.mrf.mxu1  ;;  %9348 = vmatmul.mubr.msk.f32.gmra.mxu0 %vm23_vm0, %v6274_v60  ;;  %v9545_v60 = vld [vmem:[#allocation2 + $0x308] sm:$0xff]  ;;  %v5543_v4 = vsel %vm456_vm2, %v5541_v39, %v5542_v26  ;;  %v6290_v11 = vrot.slane %v9546_v31, 2 }
 0x26d   :  { %v12058_v61 = vadd.f32 %v9102_v21, %v4587_v50  ;;  %v4586_v59 = vadd.f32 %v4331_v52, %v11627_v7  ;;  %v9105_v8 = vpop.f32.mrf.mxu0  ;;  %9350 = vmatprep.mubr.msk.f32.mxu0 %vm23_vm0, %v6277_v12  ;;  %v6282_v7 = vsel %vm1645_vm3, %v6280_v49, %v6281_v58  ;;  %v6286_v29 = vrot.slane %v9545_v60, 2 }
 0x26e   :  { %v9007_v44 = vpop.f32.mrf.mxu1  ;;  %9250 = vmatmul.mubr.msk.f32.gmra.mxu1 %vm23_vm0, %v5535_v22  ;;  %v4721_v22 = vld [vmem:[#allocation2 + $0x310] sm:$0x3]  ;;  %v5546_v52 = vrot.slane %v9544_v5, 1  ;;  %v5547_v0 = vrot.slane %v9545_v60, 1  ;;  %v5545_v49 = vsel %vm456_vm2, %v5542_v26, %v5544_v3  ;;  %v6284_v5 = vsel %vm1645_vm3, %v6281_v58, %v6283_v1 }
 0x26f   :  { %v12066_v37 = vadd.f32 %v5071_v53, %v4586_v59  ;;  %v4589_v21 = vadd.f32 %v9007_v44, %v11633_v46  ;;  %v5081_v50 = vpop.f32.mrf.mxu0  ;;  %9252 = vmatprep.mubr.msk.f32.mxu1 %vm23_vm0, %v5538_v17  ;;  %v5549_v39 = vrot.slane %v4721_v22, 1  ;;  %v6288_v59 = vrot.slane %v4721_v22, 2  ;;  %v9548_v58 = vld [vmem:[#allocation2 + $0x330] sm:$0xff] }
 0x270   :  { %v4341_v12 = vpop.f32.mrf.mxu1  ;;  %9351 = vmatmul.mubr.msk.f32.gmra.mxu0 %vm23_vm0, %v6279_v20  ;;  %v9547_v20 = vld [vmem:[#allocation2 + $0x320] sm:$0xff]  ;;  %v5548_v26 = vsel %vm456_vm2, %v5546_v52, %v5547_v0  ;;  %v6295_v1 = vrot.slane %v9548_v58, 2 }
 0x271   :  { %v12072_v63 = vadd.f32 %v9105_v8, %v4589_v21  ;;  %v4588_v53 = vadd.f32 %v4341_v12, %v11639_v35  ;;  %v9108_v46 = vpop.f32.mrf.mxu0  ;;  %9353 = vmatprep.mubr.msk.f32.mxu0 %vm23_vm0, %v6282_v7  ;;  %v6287_v35 = vsel %vm1645_vm3, %v6285_v33, %v6286_v29  ;;  %v6291_v60 = vrot.slane %v9547_v20, 2 }
 0x272   :  { %v9010_v17 = vpop.f32.mrf.mxu1  ;;  %9253 = vmatmul.mubr.msk.f32.gmra.mxu1 %vm23_vm0, %v5540_v55  ;;  %v4724_v55 = vld [vmem:[#allocation2 + $0x328] sm:$0x3]  ;;  %v5551_v12 = vrot.slane %v9546_v31, 1  ;;  %v5552_v3 = vrot.slane %v9547_v20, 1  ;;  %v5550_v33 = vsel %vm456_vm2, %v5547_v0, %v5549_v39  ;;  %v6289_v31 = vsel %vm1645_vm3, %v6286_v29, %v6288_v59 }
 0x273   :  { %v12080_v44 = vadd.f32 %v5081_v50, %v4588_v53  ;;  %v4591_v8 = vadd.f32 %v9010_v17, %v11645_v30  ;;  %v5091_v21 = vpop.f32.mrf.mxu0  ;;  %9255 = vmatprep.mubr.msk.f32.mxu1 %vm23_vm0, %v5543_v4  ;;  %v5554_v52 = vrot.slane %v4724_v55, 1  ;;  %v6293_v53 = vrot.slane %v4724_v55, 2  ;;  %v9550_v29 = vld [vmem:[#allocation2 + $0x348] sm:$0xff] }
 0x274   :  { %v4351_v7 = vpop.f32.mrf.mxu1  ;;  %9354 = vmatmul.mubr.msk.f32.gmra.mxu0 %vm23_vm0, %v6284_v5  ;;  %v9549_v5 = vld [vmem:[#allocation2 + $0x338] sm:$0xff]  ;;  %v5553_v0 = vsel %vm456_vm2, %v5551_v12, %v5552_v3  ;;  %v6300_v59 = vrot.slane %v9550_v29, 2 }
 0x275   :  { %v12086_v22 = vadd.f32 %v9108_v46, %v4591_v8  ;;  %v4590_v50 = vadd.f32 %v4351_v7, %v11651_v15  ;;  %v9111_v30 = vpop.f32.mrf.mxu0  ;;  %9356 = vmatprep.mubr.msk.f32.mxu0 %vm23_vm0, %v6287_v35  ;;  %v12975_v46 = vld [vmem:[#allocation17_spill] sm:$0xff]  ;;  %v6292_v15 = vsel %vm1645_vm3, %v6290_v11, %v6291_v60  ;;  %v6296_v7 = vrot.slane %v9549_v5, 2 }
 0x276   :  { %v9013_v4 = vpop.f32.mrf.mxu1  ;;  %9256 = vmatmul.mubr.msk.f32.gmra.mxu1 %vm23_vm0, %v5545_v49  ;;  %v4727_v49 = vld [vmem:[#allocation2 + $0x340] sm:$0x3]  ;;  %v5557_v39 = vrot.slane %v9549_v5, 1  ;;  %v5555_v11 = vsel %vm456_vm2, %v5552_v3, %v5554_v52 }
 0x277   :  { %12973 = vst [vmem:[#allocation10_spill] sm:$0xff] %v12086_v22  ;;  %v12094_v17 = vadd.f32 %v5091_v21, %v4590_v50  ;;  %v4593_v8 = vadd.f32 %v9013_v4, %v12975_v46  ;;  %v5101_v20 = vpop.f32.mrf.mxu0  ;;  %9258 = vmatprep.mubr.msk.f32.mxu1 %vm23_vm0, %v5548_v26  ;;  %v5556_v22 = vrot.slane %v9548_v58, 1  ;;  %v12977_v21 = vld [vmem:[#allocation18_spill] sm:$0xff]  ;;  %v6294_v58 = vsel %vm1645_vm3, %v6291_v60, %v6293_v53  ;;  %v12979_v53 = vld [vmem:[#allocation20_spill] sm:$0xff] }
 0x278   :  { %v4361_v35 = vpop.f32.mrf.mxu1  ;;  %9357 = vmatmul.mubr.msk.f32.gmra.mxu0 %vm23_vm0, %v6289_v31  ;;  %v5559_v12 = vrot.slane %v4727_v49, 1  ;;  %v6298_v46 = vrot.slane %v4727_v49, 2  ;;  %v6297_v31 = vsel %vm1645_vm3, %v6295_v1, %v6296_v7 }
 0x279   :  { %12974 = vst [vmem:[#allocation11_spill] sm:$0xff] %v12094_v17  ;;  %v12100_v55 = vadd.f32 %v9111_v30, %v4593_v8  ;;  %v4592_v50 = vadd.f32 %v4361_v35, %v12977_v21  ;;  %v9114_v4 = vpop.f32.mrf.mxu0  ;;  %9359 = vmatprep.mubr.msk.f32.mxu0 %vm23_vm0, %v6292_v15  ;;  %v12978_v30 = vld [vmem:[#allocation19_spill] sm:$0xff]  ;;  %v5561_v17 = vrot.slane %v9550_v29, 1  ;;  %v5558_v3 = vsel %vm456_vm2, %v5556_v22, %v5557_v39  ;;  %v12980_v22 = vld [vmem:[#allocation21_spill] sm:$0xff] }
 0x27a   :  { %v9016_v26 = vpop.f32.mrf.mxu1  ;;  %9259 = vmatmul.mubr.msk.f32.gmra.mxu1 %vm23_vm0, %v5550_v33  ;;  %v9551_v35 = vld [vmem:[#allocation2 + $0x350] sm:$0xff]  ;;  %v4730_v33 = vld [vmem:[#allocation2 + $0x358] sm:$0x3]  ;;  %v5560_v1 = vsel %vm456_vm2, %v5557_v39, %v5559_v12 }
 0x27b   :  { %12976 = vst [vmem:[#allocation12_spill] sm:$0xff] %v12100_v55  ;;  %v12108_v5 = vadd.f32 %v5101_v20, %v4592_v50  ;;  %v4595_v8 = vadd.f32 %v9016_v26, %v12978_v30  ;;  %v5111_v55 = vpop.f32.mrf.mxu0  ;;  %9261 = vmatprep.mubr.msk.f32.mxu1 %vm23_vm0, %v5553_v0  ;;  %v6301_v21 = vrot.slane %v9551_v35, 2  ;;  %v5562_v52 = vrot.slane %v9551_v35, 1 }
 0x27c   :  { %v4371_v15 = vpop.f32.mrf.mxu1  ;;  %9360 = vmatmul.mubr.msk.f32.gmra.mxu0 %vm23_vm0, %v6294_v58  ;;  %v6299_v0 = vsel %vm1645_vm3, %v6296_v7, %v6298_v46  ;;  %v6303_v29 = vrot.slane %v4730_v33, 2  ;;  %v5564_v58 = vrot.slane %v4730_v33, 1 }
 0x27d   :  { %v12114_v60 = vadd.f32 %v9114_v4, %v4595_v8  ;;  %v4594_v20 = vadd.f32 %v4371_v15, %v12979_v53  ;;  %v9117_v49 = vpop.f32.mrf.mxu0  ;;  %9362 = vmatprep.mubr.msk.f32.mxu0 %vm23_vm0, %v6297_v31  ;;  %v6302_v8 = vsel %vm1645_vm3, %v6300_v59, %v6301_v21 }
 0x27e   :  { %v9019_v50 = vpop.f32.mrf.mxu1  ;;  %9262 = vmatmul.mubr.msk.f32.gmra.mxu1 %vm23_vm0, %v5555_v11  ;;  %v5563_v11 = vsel %vm456_vm2, %v5561_v17, %v5562_v52  ;;  %v5565_v17 = vsel %vm456_vm2, %v5562_v52, %v5564_v58 }
 0x27f   :  { %v12122_v26 = vadd.f32 %v5111_v55, %v4594_v20  ;;  %v4597_v4 = vadd.f32 %v9019_v50, %v12980_v22  ;;  %v5121_v30 = vpop.f32.mrf.mxu0  ;;  %9264 = vmatprep.mubr.msk.f32.mxu1 %vm23_vm0, %v5558_v3  ;;  %v6304_v55 = vsel %vm1645_vm3, %v6301_v21, %v6303_v29 }
 0x280   :  { %v4381_v35 = vpop.f32.mrf.mxu1  ;;  %9363 = vmatmul.mubr.msk.f32.gmra.mxu0 %vm23_vm0, %v6299_v0 }
 0x281   :  { %v12128_v15 = vadd.f32 %v9117_v49, %v4597_v4  ;;  %v4596_v39 = vadd.f32 %v4381_v35, %v11688_v42  ;;  %v9120_v12 = vpop.f32.mrf.mxu0  ;;  %9365 = vmatprep.mubr.msk.f32.mxu0 %vm23_vm0, %v6302_v8 }
 0x282   :  { %v9022_v7 = vpop.f32.mrf.mxu1  ;;  %9265 = vmatmul.mubr.msk.f32.gmra.mxu1 %vm23_vm0, %v5560_v1 }
 0x283   :  { %v12135_v46 = vadd.f32 %v5121_v30, %v4596_v39  ;;  %v4599_v59 = vadd.f32 %v9022_v7, %v11694_v47  ;;  %v5131_v31 = vpop.f32.mrf.mxu0  ;;  %9267 = vmatprep.mubr.msk.f32.mxu1 %vm23_vm0, %v5563_v11 }
 0x284   :  { %v4391_v42 = vpop.f32.mrf.mxu1  ;;  %9366 = vmatmul.mubr.msk.f32.gmra.mxu0 %vm23_vm0, %v6304_v55 }
 0x285   :  { %v12140_v33 = vadd.f32 %v9120_v12, %v4599_v59  ;;  %v4598_v3 = vadd.f32 %v4391_v42, %v11702_v32  ;;  %v9123_v53 = vpop.f32.mrf.mxu0 }
 0x286   :  { %v9025_v20 = vpop.f32.mrf.mxu1  ;;  %9268 = vmatmul.mubr.msk.f32.gmra.mxu1 %vm23_vm0, %v5565_v17 }
 0x287   :  { %v12145_v21 = vadd.f32 %v5131_v31, %v4598_v3  ;;  %v4601_v47 = vadd.f32 %v9025_v20, %v11708_v41  ;;  %v5141_v49 = vpop.f32.mrf.mxu0 }
 0x288   :  { %v4401_v50 = vpop.f32.mrf.mxu1 }
 0x289   :  { %v12148_v1 = vadd.f32 %v9123_v53, %v4601_v47  ;;  %v4600_v52 = vadd.f32 %v4401_v50, %v11716_v6  ;;  %v9126_v0 = vpop.f32.mrf.mxu0 }
 0x28a   :  { %v9028_v29 = vpop.f32.mrf.mxu1 }
 0x28b   :  { %v12151_v22 = vadd.f32 %v5141_v49, %v4600_v52  ;;  %v4603_v32 = vadd.f32 %v9028_v29, %v11722_v57  ;;  %v5151_v4 = vpop.f32.mrf.mxu0  ;;  %v12981_v49 = vld [vmem:[#allocation22_spill] sm:$0xff]  ;;  %v12982_v29 = vld [vmem:[#allocation23_spill] sm:$0xff] }
 0x28c   :  { %v4411_v30 = vpop.f32.mrf.mxu1 }
 0x28d   :  { %v12154_v8 = vadd.f32 %v9126_v0, %v4603_v32  ;;  %v4602_v58 = vadd.f32 %v4411_v30, %v11730_v56  ;;  %v9129_v35 = vpop.f32.mrf.mxu0 }
 0x28e   :  { %v9031_v41 = vpop.f32.mrf.mxu1 }
 0x28f   :  { %v12157_v11 = vadd.f32 %v5151_v4, %v4602_v58  ;;  %v4605_v39 = vadd.f32 %v9031_v41, %v11736_v24  ;;  %v5161_v12 = vpop.f32.mrf.mxu0  ;;  %v12983_v58 = vld [vmem:[#allocation24_spill] sm:$0xff] }
 0x290   :  { %v4421_v6 = vpop.f32.mrf.mxu1 }
 0x291   :  { %v12160_v7 = vadd.f32 %v9129_v35, %v4605_v39  ;;  %v4604_v55 = vadd.f32 %v4421_v6, %v11744_v51  ;;  %v9132_v59 = vpop.f32.mrf.mxu0 }
 0x292   :  { %v9034_v57 = vpop.f32.mrf.mxu1 }
 0x293   :  { %v12163_v31 = vadd.f32 %v5161_v12, %v4604_v55  ;;  %v4607_v17 = vadd.f32 %v9034_v57, %v11750_v34  ;;  %v5171_v42 = vpop.f32.mrf.mxu0  ;;  %v12984_v12 = vld [vmem:[#allocation25_spill] sm:$0xff] }
 0x294   :  { %v4431_v56 = vpop.f32.mrf.mxu1 }
 0x295   :  { %v12166_v3 = vadd.f32 %v9132_v59, %v4607_v17  ;;  %v4606_v53 = vadd.f32 %v4431_v56, %v11758_v10  ;;  %v9135_v20 = vpop.f32.mrf.mxu0  ;;  %v12985_v17 = vld [vmem:[#allocation26_spill] sm:$0xff] }
 0x296   :  { %v9037_v24 = vpop.f32.mrf.mxu1 }
 0x297   :  { %v12169_v47 = vadd.f32 %v5171_v42, %v4606_v53  ;;  %v4609_v50 = vadd.f32 %v9037_v24, %v12981_v49  ;;  %v5181_v52 = vpop.f32.mrf.mxu0  ;;  %v12986_v24 = vld [vmem:[#allocation27_spill] sm:$0xff] }
 0x298   :  { %v4441_v51 = vpop.f32.mrf.mxu1 }
 0x299   :  { %v12172_v0 = vadd.f32 %v9135_v20, %v4609_v50  ;;  %v4608_v32 = vadd.f32 %v4441_v51, %v12982_v29  ;;  %v9138_v4 = vpop.f32.mrf.mxu0  ;;  %v12987_v29 = vld [vmem:[#allocation30_spill] sm:$0xff] }
 0x29a   :  { %v9040_v34 = vpop.f32.mrf.mxu1 }
 0x29b   :  { %v12175_v30 = vadd.f32 %v5181_v52, %v4608_v32  ;;  %v4611_v35 = vadd.f32 %v9040_v34, %v12983_v58  ;;  %v5191_v41 = vpop.f32.mrf.mxu0 }
 0x29c   :  { %v4451_v10 = vpop.f32.mrf.mxu1 }
 0x29d   :  { %v12178_v39 = vadd.f32 %v9138_v4, %v4611_v35  ;;  %v4610_v6 = vadd.f32 %v4451_v10, %v12984_v12  ;;  %v9141_v55 = vpop.f32.mrf.mxu0  ;;  %v12989_v35 = vld [vmem:[#allocation31_spill] sm:$0xff] }
 0x29e   :  { %v9043_v59 = vpop.f32.mrf.mxu1 }
 0x29f   :  { %v12181_v57 = vadd.f32 %v5191_v41, %v4610_v6  ;;  %v4613_v42 = vadd.f32 %v9043_v59, %v12985_v17  ;;  %v5201_v56 = vpop.f32.mrf.mxu0 }
 0x2a0   :  { %v4461_v53 = vpop.f32.mrf.mxu1 }
 0x2a1   :  { %v12184_v20 = vadd.f32 %v9141_v55, %v4613_v42  ;;  %v4612_v49 = vadd.f32 %v4461_v53, %v12986_v24  ;;  %v9144_v50 = vpop.f32.mrf.mxu0  ;;  %v12991_v55 = vld [vmem:[#allocation33_spill] sm:$0xff] }
 0x2a2   :  { %v9046_v52 = vpop.f32.mrf.mxu1 }
 0x2a3   :  { %v12187_v51 = vadd.f32 %v5201_v56, %v4612_v49  ;;  %v4615_v32 = vadd.f32 %v9046_v52, %v12987_v29  ;;  %v5211_v4 = vpop.f32.mrf.mxu0  ;;  %v12993_v56 = vld [vmem:[#allocation35_spill] sm:$0xff] }
 0x2a4   :  { %v4471_v34 = vpop.f32.mrf.mxu1 }
 0x2a5   :  { %v12190_v58 = vadd.f32 %v9144_v50, %v4615_v32  ;;  %v4614_v41 = vadd.f32 %v4471_v34, %v12989_v35  ;;  %v9147_v10 = vpop.f32.mrf.mxu0  ;;  %v12995_v50 = vld [vmem:[#allocation36_spill] sm:$0xff] }
 0x2a6   :  { %v9049_v12 = vpop.f32.mrf.mxu1 }
 0x2a7   :  { %12988 = vst [vmem:[#allocation13_spill] sm:$0xff] %v12190_v58  ;;  %v12193_v6 = vadd.f32 %v5211_v4, %v4614_v41  ;;  %v4617_v59 = vadd.f32 %v9049_v12, %v12991_v55  ;;  %v5221_v17 = vpop.f32.mrf.mxu0  ;;  %v12997_v4 = vld [vmem:[#allocation38_spill] sm:$0xff] }
 0x2a8   :  { %v4481_v42 = vpop.f32.mrf.mxu1 }
 0x2a9   :  { %12990 = vst [vmem:[#allocation14_spill] sm:$0xff] %v12193_v6  ;;  %v12196_v53 = vadd.f32 %v9147_v10, %v4617_v59  ;;  %v4616_v24 = vadd.f32 %v4481_v42, %v12993_v56  ;;  %v9150_v49 = vpop.f32.mrf.mxu0  ;;  %v12999_v10 = vld [vmem:[#allocation41_spill] sm:$0xff] }
 0x2aa   :  { %v9052_v52 = vpop.f32.mrf.mxu1 }
 0x2ab   :  { %12992 = vst [vmem:[#allocation15_spill] sm:$0xff] %v12196_v53  ;;  %v12199_v29 = vadd.f32 %v5221_v17, %v4616_v24  ;;  %v4619_v32 = vadd.f32 %v9052_v52, %v12995_v50  ;;  %v5231_v58 = vpop.f32.mrf.mxu0  ;;  %v13001_v17 = vld [vmem:[#allocation42_spill] sm:$0xff] }
 0x2ac   :  { %v4491_v34 = vpop.f32.mrf.mxu1 }
 0x2ad   :  { %12994 = vst [vmem:[#allocation16_spill] sm:$0xff] %v12199_v29  ;;  %v12202_v35 = vadd.f32 %v9150_v49, %v4619_v32  ;;  %v4618_v41 = vadd.f32 %v4491_v34, %v12997_v4  ;;  %v9153_v6 = vpop.f32.mrf.mxu0  ;;  %v13003_v49 = vld [vmem:[#allocation43_spill] sm:$0xff] }
 0x2ae   :  { %v9055_v12 = vpop.f32.mrf.mxu1 }
 0x2af   :  { %12996 = vst [vmem:[#allocation17_spill] sm:$0xff] %v12202_v35  ;;  %v12205_v55 = vadd.f32 %v5231_v58, %v4618_v41  ;;  %v4621_v59 = vadd.f32 %v9055_v12, %v12999_v10  ;;  %v5241_v53 = vpop.f32.mrf.mxu0  ;;  %v13005_v58 = vld [vmem:[#allocation28_spill] sm:$0xff] }
 0x2b0   :  { %v4501_v42 = vpop.f32.mrf.mxu1 }
 0x2b1   :  { %12998 = vst [vmem:[#allocation18_spill] sm:$0xff] %v12205_v55  ;;  %v12208_v56 = vadd.f32 %v9153_v6, %v4621_v59  ;;  %v4620_v24 = vadd.f32 %v4501_v42, %v13001_v17  ;;  %v9156_v29 = vpop.f32.mrf.mxu0  ;;  %v13007_v6 = vld [vmem:[#allocation29_spill] sm:$0xff] }
 0x2b2   :  { %v9058_v52 = vpop.f32.mrf.mxu1 }
 0x2b3   :  { %13000 = vst [vmem:[#allocation19_spill] sm:$0xff] %v12208_v56  ;;  %v12211_v50 = vadd.f32 %v5241_v53, %v4620_v24  ;;  %v4623_v32 = vadd.f32 %v9058_v52, %v13003_v49  ;;  %v5251_v35 = vpop.f32.mrf.mxu0  ;;  %v13009_v53 = vld [vmem:[#allocation32_spill] sm:$0xff] }
 0x2b4   :  { %v4511_v34 = vpop.f32.mrf.mxu1 }
 0x2b5   :  { %13002 = vst [vmem:[#allocation20_spill] sm:$0xff] %v12211_v50  ;;  %v12214_v4 = vadd.f32 %v9156_v29, %v4623_v32  ;;  %v4622_v41 = vadd.f32 %v4511_v34, %v13005_v58  ;;  %v9159_v55 = vpop.f32.mrf.mxu0  ;;  %v13011_v29 = vld [vmem:[#allocation34_spill] sm:$0xff] }
 0x2b6   :  { %v9061_v12 = vpop.f32.mrf.mxu1 }
 0x2b7   :  { %13004 = vst [vmem:[#allocation21_spill] sm:$0xff] %v12214_v4  ;;  %v12217_v10 = vadd.f32 %v5251_v35, %v4622_v41  ;;  %v4625_v59 = vadd.f32 %v9061_v12, %v13007_v6  ;;  %v5261_v56 = vpop.f32.mrf.mxu0  ;;  %v13013_v35 = vld [vmem:[#allocation37_spill] sm:$0xff] }
 0x2b8   :  { %v4521_v42 = vpop.f32.mrf.mxu1 }
 0x2b9   :  { %13006 = vst [vmem:[#allocation22_spill] sm:$0xff] %v12217_v10  ;;  %v12220_v17 = vadd.f32 %v9159_v55, %v4625_v59  ;;  %v4624_v24 = vadd.f32 %v4521_v42, %v13009_v53  ;;  %v9162_v50 = vpop.f32.mrf.mxu0  ;;  %v13014_v55 = vld [vmem:[#allocation39_spill] sm:$0xff] }
 0x2ba   :  { %v9064_v52 = vpop.f32.mrf.mxu1 }
 0x2bb   :  { %13008 = vst [vmem:[#allocation23_spill] sm:$0xff] %v12220_v17  ;;  %v12223_v49 = vadd.f32 %v5261_v56, %v4624_v24  ;;  %v4627_v32 = vadd.f32 %v9064_v52, %v13011_v29  ;;  %v5271_v4 = vpop.f32.mrf.mxu0  ;;  %v13015_v56 = vld [vmem:[#allocation40_spill] sm:$0xff] }
 0x2bc   :  { %v4531_v34 = vpop.f32.mrf.mxu1 }
 0x2bd   :  { %13010 = vst [vmem:[#allocation24_spill] sm:$0xff] %v12223_v49  ;;  %v12226_v58 = vadd.f32 %v9162_v50, %v4627_v32  ;;  %v4626_v41 = vadd.f32 %v4531_v34, %v13013_v35  ;;  %v9165_v10 = vpop.f32.mrf.mxu0  ;;  %v13016_v50 = vld [vmem:[#allocation9_spill] sm:$0xff] }
 0x2be   :  { %v9067_v12 = vpop.f32.mrf.mxu1 }
 0x2bf   :  { %13012 = vst [vmem:[#allocation25_spill] sm:$0xff] %v12226_v58  ;;  %v12229_v6 = vadd.f32 %v5271_v4, %v4626_v41  ;;  %v4629_v59 = vadd.f32 %v9067_v12, %v13014_v55  ;;  %v5281_v17 = vpop.f32.mrf.mxu0 }
 0x2c0   :  { %v4541_v42 = vpop.f32.mrf.mxu1 }
 0x2c1   :  { %v12232_v53 = vadd.f32 %v9165_v10, %v4629_v59  ;;  %v4628_v24 = vadd.f32 %v4541_v42, %v13015_v56  ;;  %v9168_v49 = vpop.f32.mrf.mxu0 }
 0x2c2   :  { %v9070_v52 = vpop.f32.mrf.mxu1 }
 0x2c3   :  { %v12235_v29 = vadd.f32 %v5281_v17, %v4628_v24  ;;  %v4631_v32 = vadd.f32 %v9070_v52, %v13016_v50  ;;  %v5291_v58 = vpop.f32.mrf.mxu0 }
 0x2c4   :  { %v4551_v34 = vpop.f32.mrf.mxu1 }
 0x2c5   :  { %v12238_v35 = vadd.f32 %v9168_v49, %v4631_v32  ;;  %v4630_v4 = vadd.f32 %v4551_v34, %v11926_v62  ;;  %v9171_v41 = vpop.f32.mrf.mxu0 }
 0x2c6   :  { %v9073_v12 = vpop.f32.mrf.mxu1 }
 0x2c7   :  { %v12241_v55 = vadd.f32 %v5291_v58, %v4630_v4  ;;  %v4633_v10 = vadd.f32 %v9073_v12, %v11932_v43  ;;  %v5301_v59 = vpop.f32.mrf.mxu0 }
 0x2c8   :  { %v4561_v42 = vpop.f32.mrf.mxu1 }
 0x2c9   :  { %13017 = vst [vmem:[#allocation26_spill] sm:$0xff] %v12241_v55  ;;  %v12244_v56 = vadd.f32 %v9171_v41, %v4633_v10  ;;  %v4632_v17 = vadd.f32 %v4561_v42, %v11940_v14  ;;  %v9274_v24 = vpop.f32.mrf.mxu0 }
 0x2ca   :  { %v9176_v52 = vpop.f32.mrf.mxu1 }
 0x2cb   :  { %v12247_v50 = vadd.f32 %v5301_v59, %v4632_v17  ;;  %v6082_v49 = vadd.f32 %v9176_v52, %v11946_v27  ;;  %v6501_v32 = vpop.f32.mrf.mxu0 }
 0x2cc   :  { %v5762_v62 = vpop.f32.mrf.mxu1 }
 0x2cd   :  { %v6821_v34 = vadd.f32 %v9274_v24, %v6082_v49  ;;  %v6081_v58 = vadd.f32 %v5762_v62, %v11954_v28  ;;  %v9277_v4 = vpop.f32.mrf.mxu0 }
 0x2ce   :  { %v9179_v55 = vpop.f32.mrf.mxu1 }
 0x2cf   :  { %v7023_v43 = vmul.f32 %v6821_v34, %v6821_v34  ;;  %7222 = vst.msk [vmem:[%s12711_s2 + $0x8] sm:$0xff] %vm23_vm0, %v6821_v34  ;;  %v6820_v14 = vadd.f32 %v6501_v32, %v6081_v58  ;;  %v6084_v41 = vadd.f32 %v9179_v55, %v11960_v2  ;;  %v6511_v12 = vpop.f32.mrf.mxu0  ;;  %v6886_v27 = vsel %vm23_vm0, %v6821_v34, 0.0 }
 0x2d0   :  { %v5772_v10 = vpop.f32.mrf.mxu1 }
 0x2d1   :  { %v6885_v59 = vsel %vm23_vm0, %v6820_v14, 0.0  ;;  %v7022_v42 = vmul.f32 %v6820_v14, %v6820_v14  ;;  %7221 = vst.msk [vmem:[%s12711_s2] sm:$0xff] %vm23_vm0, %v6820_v14  ;;  %v6823_v28 = vadd.f32 %v9277_v4, %v6084_v41  ;;  %v9280_v17 = vpop.f32.mrf.mxu0  ;;  %v6083_v52 = vadd.f32 %v5772_v10, %v11968_v38 }
 0x2d2   :  { %v6887_v24 = vadd.f32 %v6886_v27, %v6885_v59  ;;  %v9182_v49 = vpop.f32.mrf.mxu1  ;;  %v7087_v2 = vsel %vm23_vm0, %v7023_v43, 0.0 }
 0x2d3   :  { %v7086_v55 = vsel %vm23_vm0, %v7022_v42, 0.0  ;;  %7224 = vst.msk [vmem:[%s12711_s2 + $0x18] sm:$0xff] %vm23_vm0, %v6823_v28  ;;  %v6086_v32 = vadd.f32 %v9182_v49, %v11974_v54  ;;  %v6521_v62 = vpop.f32.mrf.mxu0  ;;  %v6822_v58 = vadd.f32 %v6511_v12, %v6083_v52  ;;  %v7025_v14 = vmul.f32 %v6823_v28, %v6823_v28 }
 0x2d4   :  { %v7088_v34 = vadd.f32 %v7087_v2, %v7086_v55  ;;  %v5782_v4 = vpop.f32.mrf.mxu1 }
 0x2d5   :  { %v6825_v41 = vadd.f32 %v9280_v17, %v6086_v32  ;;  %v6085_v38 = vadd.f32 %v5782_v4, %v11982_v9  ;;  %v9283_v10 = vpop.f32.mrf.mxu0  ;;  %v6888_v43 = vsel %vm23_vm0, %v6822_v58, 0.0  ;;  %v7024_v27 = vmul.f32 %v6822_v58, %v6822_v58  ;;  %7223 = vst.msk [vmem:[%s12711_s2 + $0x10] sm:$0xff] %vm23_vm0, %v6822_v58 }
 0x2d6   :  { %v9185_v59 = vpop.f32.mrf.mxu1  ;;  %v6889_v54 = vadd.f32 %v6888_v43, %v6887_v24  ;;  %v13018_v9 = vmov 0.0   ;;  %v6890_v17 = vsel %vm23_vm0, %v6823_v28, 0.0  ;;  %v7091_v2 = vsel %vm23_vm0, %v7025_v14, 0.0 }
 0x2d7   :  { %7226 = vst.msk [vmem:[%s12711_s2 + $0x28] sm:$0xff] %vm23_vm0, %v6825_v41  ;;  %v6824_v12 = vadd.f32 %v6521_v62, %v6085_v38  ;;  %v6531_v42 = vpop.f32.mrf.mxu0  ;;  %v7089_v52 = vsel %vm23_vm0, %v7024_v27, 0.0  ;;  %v6088_v49 = vadd.f32 %v9185_v59, %v11988_v16  ;;  %v7027_v4 = vmul.f32 %v6825_v41, %v6825_v41 }
 0x2d8   :  { %21 = vst.msk [vmem:[#allocation3] sm:$0x1] %vm20_vm4, %v13018_v9  ;;  %22 = vst.msk [vmem:[#allocation5] sm:$0x1] %vm20_vm4, %v13018_v9  ;;  %v5792_v24 = vpop.f32.mrf.mxu1  ;;  %v6891_v55 = vadd.f32 %v6890_v17, %v6889_v54  ;;  %v7090_v32 = vadd.f32 %v7089_v52, %v7088_v34  ;;  %v6894_v34 = vsel %vm23_vm0, %v6825_v41, 0.0 }
 0x2d9   :  { %v6892_v62 = vsel %vm23_vm0, %v6824_v12, 0.0  ;;  %7225 = vst.msk [vmem:[%s12711_s2 + $0x20] sm:$0xff] %vm23_vm0, %v6824_v12  ;;  %v9286_v58 = vpop.f32.mrf.mxu0  ;;  %v7026_v38 = vmul.f32 %v6824_v12, %v6824_v12  ;;  %v6827_v28 = vadd.f32 %v9283_v10, %v6088_v49  ;;  %v6087_v43 = vadd.f32 %v5792_v24, %v11996_v13 }
 0x2da   :  { %v9188_v27 = vpop.f32.mrf.mxu1  ;;  %v7092_v16 = vadd.f32 %v7091_v2, %v7090_v32  ;;  %v6893_v59 = vadd.f32 %v6892_v62, %v6891_v55 }
 0x2db   :  { %v6090_v14 = vadd.f32 %v9188_v27, %v12002_v19  ;;  %v6541_v54 = vpop.f32.mrf.mxu0  ;;  %v7093_v9 = vsel %vm23_vm0, %v7026_v38, 0.0  ;;  %v7029_v17 = vmul.f32 %v6827_v28, %v6827_v28  ;;  %7228 = vst.msk [vmem:[%s12711_s2 + $0x38] sm:$0xff] %vm23_vm0, %v6827_v28  ;;  %v6826_v12 = vadd.f32 %v6531_v42, %v6087_v43 }
 0x2dc   :  { %v5802_v10 = vpop.f32.mrf.mxu1  ;;  %v6895_v52 = vadd.f32 %v6894_v34, %v6893_v59  ;;  %v7094_v13 = vadd.f32 %v7093_v9, %v7092_v16  ;;  %v7095_v19 = vsel %vm23_vm0, %v7027_v4, 0.0 }
 0x2dd   :  { %v6829_v49 = vadd.f32 %v9286_v58, %v6090_v14  ;;  %v6089_v24 = vadd.f32 %v5802_v10, %v12010_v40  ;;  %v9289_v2 = vpop.f32.mrf.mxu0  ;;  %v6896_v41 = vsel %vm23_vm0, %v6826_v12, 0.0  ;;  %v7028_v55 = vmul.f32 %v6826_v12, %v6826_v12  ;;  %7227 = vst.msk [vmem:[%s12711_s2 + $0x30] sm:$0xff] %vm23_vm0, %v6826_v12 }
 0x2de   :  { %v9191_v32 = vpop.f32.mrf.mxu1  ;;  %v7096_v62 = vadd.f32 %v7095_v19, %v7094_v13  ;;  %v6897_v42 = vadd.f32 %v6896_v41, %v6895_v52  ;;  %v6898_v58 = vsel %vm23_vm0, %v6827_v28, 0.0  ;;  %v7099_v16 = vsel %vm23_vm0, %v7029_v17, 0.0 }
 0x2df   :  { %7230 = vst.msk [vmem:[%s12711_s2 + $0x48] sm:$0xff] %vm23_vm0, %v6829_v49  ;;  %v6551_v40 = vpop.f32.mrf.mxu0  ;;  %v7097_v4 = vsel %vm23_vm0, %v7028_v55, 0.0  ;;  %v6828_v38 = vadd.f32 %v6541_v54, %v6089_v24  ;;  %v6092_v43 = vadd.f32 %v9191_v32, %v12016_v18  ;;  %v7031_v12 = vmul.f32 %v6829_v49, %v6829_v49 }
 0x2e0   :  { %v5812_v27 = vpop.f32.mrf.mxu1  ;;  %v7098_v59 = vadd.f32 %v7097_v4, %v7096_v62  ;;  %v6899_v14 = vadd.f32 %v6898_v58, %v6897_v42 }
 0x2e1   :  { %v6091_v34 = vadd.f32 %v5812_v27, %v12024_v23  ;;  %v9292_v9 = vpop.f32.mrf.mxu0  ;;  %v6900_v10 = vsel %vm23_vm0, %v6828_v38, 0.0  ;;  %v7030_v52 = vmul.f32 %v6828_v38, %v6828_v38  ;;  %7229 = vst.msk [vmem:[%s12711_s2 + $0x40] sm:$0xff] %vm23_vm0, %v6828_v38  ;;  %v6831_v28 = vadd.f32 %v9289_v2, %v6092_v43 }
 0x2e2   :  { %v9194_v54 = vpop.f32.mrf.mxu1  ;;  %v6901_v18 = vadd.f32 %v6900_v10, %v6899_v14  ;;  %v7100_v13 = vadd.f32 %v7099_v16, %v7098_v59  ;;  %v6902_v23 = vsel %vm23_vm0, %v6829_v49, 0.0  ;;  %v7103_v49 = vsel %vm23_vm0, %v7031_v12, 0.0 }
 0x2e3   :  { %v6830_v24 = vadd.f32 %v6551_v40, %v6091_v34  ;;  %v6094_v17 = vadd.f32 %v9194_v54, %v12030_v25  ;;  %v6561_v19 = vpop.f32.mrf.mxu0  ;;  %v7101_v41 = vsel %vm23_vm0, %v7030_v52, 0.0  ;;  %7232 = vst.msk [vmem:[%s12711_s2 + $0x58] sm:$0xff] %vm23_vm0, %v6831_v28  ;;  %v7033_v40 = vmul.f32 %v6831_v28, %v6831_v28 }
 0x2e4   :  { %v5822_v55 = vpop.f32.mrf.mxu1  ;;  %v7102_v32 = vadd.f32 %v7101_v41, %v7100_v13  ;;  %v6903_v62 = vadd.f32 %v6902_v23, %v6901_v18  ;;  %v6906_v34 = vsel %vm23_vm0, %v6831_v28, 0.0 }
 0x2e5   :  { %v6904_v2 = vsel %vm23_vm0, %v6830_v24, 0.0  ;;  %v7032_v42 = vmul.f32 %v6830_v24, %v6830_v24  ;;  %7231 = vst.msk [vmem:[%s12711_s2 + $0x50] sm:$0xff] %vm23_vm0, %v6830_v24  ;;  %v9295_v25 = vpop.f32.mrf.mxu0  ;;  %v6833_v58 = vadd.f32 %v9292_v9, %v6094_v17  ;;  %v6093_v4 = vadd.f32 %v5822_v55, %v12038_v48 }
 0x2e6   :  { %v9197_v38 = vpop.f32.mrf.mxu1  ;;  %v6905_v43 = vadd.f32 %v6904_v2, %v6903_v62  ;;  %v7104_v27 = vadd.f32 %v7103_v49, %v7102_v32  ;;  %v7107_v24 = vsel %vm23_vm0, %v7033_v40, 0.0 }
 0x2e7   :  { %v7105_v16 = vsel %vm23_vm0, %v7032_v42, 0.0  ;;  %v6096_v59 = vadd.f32 %v9197_v38, %v12044_v36  ;;  %v6571_v14 = vpop.f32.mrf.mxu0  ;;  %v7035_v10 = vmul.f32 %v6833_v58, %v6833_v58  ;;  %7234 = vst.msk [vmem:[%s12711_s2 + $0x68] sm:$0xff] %vm23_vm0, %v6833_v58  ;;  %v6832_v12 = vadd.f32 %v6561_v19, %v6093_v4 }
 0x2e8   :  { %v5832_v9 = vpop.f32.mrf.mxu1  ;;  %v7106_v52 = vadd.f32 %v7105_v16, %v7104_v27  ;;  %v6907_v48 = vadd.f32 %v6906_v34, %v6905_v43  ;;  %v6910_v41 = vsel %vm23_vm0, %v6833_v58, 0.0 }
 0x2e9   :  { %v6835_v54 = vadd.f32 %v9295_v25, %v6096_v59  ;;  %v6095_v18 = vadd.f32 %v5832_v9, %v12052_v45  ;;  %v9298_v13 = vpop.f32.mrf.mxu0  ;;  %v6908_v36 = vsel %vm23_vm0, %v6832_v12, 0.0  ;;  %v7034_v17 = vmul.f32 %v6832_v12, %v6832_v12  ;;  %7233 = vst.msk [vmem:[%s12711_s2 + $0x60] sm:$0xff] %vm23_vm0, %v6832_v12 }
 0x2ea   :  { %v9200_v28 = vpop.f32.mrf.mxu1  ;;  %v6909_v23 = vadd.f32 %v6908_v36, %v6907_v48  ;;  %v7108_v19 = vadd.f32 %v7107_v24, %v7106_v52  ;;  %v7111_v42 = vsel %vm23_vm0, %v7035_v10, 0.0 }
 0x2eb   :  { %7236 = vst.msk [vmem:[%s12711_s2 + $0x78] sm:$0xff] %vm23_vm0, %v6835_v54  ;;  %v6581_v45 = vpop.f32.mrf.mxu0  ;;  %v7109_v55 = vsel %vm23_vm0, %v7034_v17, 0.0  ;;  %v6834_v32 = vadd.f32 %v6571_v14, %v6095_v18  ;;  %v6098_v62 = vadd.f32 %v9200_v28, %v12058_v61  ;;  %v7037_v38 = vmul.f32 %v6835_v54, %v6835_v54 }
 0x2ec   :  { %v5842_v2 = vpop.f32.mrf.mxu1  ;;  %v7110_v25 = vadd.f32 %v7109_v55, %v7108_v19  ;;  %v6911_v49 = vadd.f32 %v6910_v41, %v6909_v23  ;;  %v13019_v41 = vld [vmem:[#allocation10_spill] sm:$0xff] }
 0x2ed   :  { %v6097_v40 = vadd.f32 %v5842_v2, %v12066_v37  ;;  %v9301_v4 = vpop.f32.mrf.mxu0  ;;  %v6912_v43 = vsel %vm23_vm0, %v6834_v32, 0.0  ;;  %v7036_v27 = vmul.f32 %v6834_v32, %v6834_v32  ;;  %7235 = vst.msk [vmem:[%s12711_s2 + $0x70] sm:$0xff] %vm23_vm0, %v6834_v32  ;;  %v6837_v58 = vadd.f32 %v9298_v13, %v6098_v62 }
 0x2ee   :  { %v9203_v16 = vpop.f32.mrf.mxu1  ;;  %v6913_v61 = vadd.f32 %v6912_v43, %v6911_v49  ;;  %v7112_v59 = vadd.f32 %v7111_v42, %v7110_v25  ;;  %v6914_v37 = vsel %vm23_vm0, %v6835_v54, 0.0  ;;  %v7115_v54 = vsel %vm23_vm0, %v7037_v38, 0.0 }
 0x2ef   :  { %v6836_v14 = vadd.f32 %v6581_v45, %v6097_v40  ;;  %v6100_v34 = vadd.f32 %v9203_v16, %v12072_v63  ;;  %v6591_v10 = vpop.f32.mrf.mxu0  ;;  %v7113_v12 = vsel %vm23_vm0, %v7036_v27, 0.0  ;;  %7238 = vst.msk [vmem:[%s12711_s2 + $0x88] sm:$0xff] %vm23_vm0, %v6837_v58  ;;  %v7039_v24 = vmul.f32 %v6837_v58, %v6837_v58 }
 0x2f0   :  { %v5852_v9 = vpop.f32.mrf.mxu1  ;;  %v7114_v52 = vadd.f32 %v7113_v12, %v7112_v59  ;;  %v6915_v48 = vadd.f32 %v6914_v37, %v6913_v61  ;;  %v6918_v62 = vsel %vm23_vm0, %v6837_v58, 0.0 }
 0x2f1   :  { %v6916_v18 = vsel %vm23_vm0, %v6836_v14, 0.0  ;;  %v7038_v13 = vmul.f32 %v6836_v14, %v6836_v14  ;;  %7237 = vst.msk [vmem:[%s12711_s2 + $0x80] sm:$0xff] %vm23_vm0, %v6836_v14  ;;  %v9304_v63 = vpop.f32.mrf.mxu0  ;;  %v6839_v36 = vadd.f32 %v9301_v4, %v6100_v34  ;;  %v6099_v17 = vadd.f32 %v5852_v9, %v12080_v44  ;;  %v13020_v4 = vld [vmem:[#allocation11_spill] sm:$0xff]  ;;  %v13021_v9 = vld [vmem:[#allocation12_spill] sm:$0xff] }
 0x2f2   :  { %v9206_v28 = vpop.f32.mrf.mxu1  ;;  %v6917_v23 = vadd.f32 %v6916_v18, %v6915_v48  ;;  %v7116_v19 = vadd.f32 %v7115_v54, %v7114_v52  ;;  %v7119_v27 = vsel %vm23_vm0, %v7039_v24, 0.0 }
 0x2f3   :  { %v7117_v45 = vsel %vm23_vm0, %v7038_v13, 0.0  ;;  %v6102_v55 = vadd.f32 %v9206_v28, %v13019_v41  ;;  %v6601_v32 = vpop.f32.mrf.mxu0  ;;  %v7041_v2 = vmul.f32 %v6839_v36, %v6839_v36  ;;  %7240 = vst.msk [vmem:[%s12711_s2 + $0x98] sm:$0xff] %vm23_vm0, %v6839_v36  ;;  %v6838_v42 = vadd.f32 %v6591_v10, %v6099_v17 }
 0x2f4   :  { %v5862_v25 = vpop.f32.mrf.mxu1  ;;  %v7118_v49 = vadd.f32 %v7117_v45, %v7116_v19  ;;  %v6919_v44 = vadd.f32 %v6918_v62, %v6917_v23  ;;  %v6922_v10 = vsel %vm23_vm0, %v6839_v36, 0.0 }
 0x2f5   :  { %v6841_v40 = vadd.f32 %v9304_v63, %v6102_v55  ;;  %v6101_v38 = vadd.f32 %v5862_v25, %v13020_v4  ;;  %v9307_v43 = vpop.f32.mrf.mxu0  ;;  %v6920_v16 = vsel %vm23_vm0, %v6838_v42, 0.0  ;;  %v7040_v61 = vmul.f32 %v6838_v42, %v6838_v42  ;;  %7239 = vst.msk [vmem:[%s12711_s2 + $0x90] sm:$0xff] %vm23_vm0, %v6838_v42 }
 0x2f6   :  { %v9209_v58 = vpop.f32.mrf.mxu1  ;;  %v6921_v59 = vadd.f32 %v6920_v16, %v6919_v44  ;;  %v7120_v14 = vadd.f32 %v7119_v27, %v7118_v49  ;;  %v7123_v18 = vsel %vm23_vm0, %v7041_v2, 0.0 }
 0x2f7   :  { %7242 = vst.msk [vmem:[%s12711_s2 + $0xa8] sm:$0xff] %vm23_vm0, %v6841_v40  ;;  %v6611_v34 = vpop.f32.mrf.mxu0  ;;  %v7121_v37 = vsel %vm23_vm0, %v7040_v61, 0.0  ;;  %v6840_v12 = vadd.f32 %v6601_v32, %v6101_v38  ;;  %v6104_v52 = vadd.f32 %v9209_v58, %v13021_v9  ;;  %v7043_v17 = vmul.f32 %v6841_v40, %v6841_v40 }
 0x2f8   :  { %v5872_v48 = vpop.f32.mrf.mxu1  ;;  %v7122_v13 = vadd.f32 %v7121_v37, %v7120_v14  ;;  %v6923_v63 = vadd.f32 %v6922_v10, %v6921_v59 }
 0x2f9   :  { %v6103_v54 = vadd.f32 %v5872_v48, %v12108_v5  ;;  %v9310_v24 = vpop.f32.mrf.mxu0  ;;  %v6924_v28 = vsel %vm23_vm0, %v6840_v12, 0.0  ;;  %v7042_v23 = vmul.f32 %v6840_v12, %v6840_v12  ;;  %7241 = vst.msk [vmem:[%s12711_s2 + $0xa0] sm:$0xff] %vm23_vm0, %v6840_v12  ;;  %v6843_v36 = vadd.f32 %v9307_v43, %v6104_v52 }
 0x2fa   :  { %v9212_v19 = vpop.f32.mrf.mxu1  ;;  %v6925_v45 = vadd.f32 %v6924_v28, %v6923_v63  ;;  %v7124_v41 = vadd.f32 %v7123_v18, %v7122_v13  ;;  %v6926_v5 = vsel %vm23_vm0, %v6841_v40, 0.0  ;;  %v7127_v40 = vsel %vm23_vm0, %v7043_v17, 0.0 }
 0x2fb   :  { %v6842_v55 = vadd.f32 %v6611_v34, %v6103_v54  ;;  %v6106_v32 = vadd.f32 %v9212_v19, %v12114_v60  ;;  %v6621_v62 = vpop.f32.mrf.mxu0  ;;  %v7125_v2 = vsel %vm23_vm0, %v7042_v23, 0.0  ;;  %7244 = vst.msk [vmem:[%s12711_s2 + $0xb8] sm:$0xff] %vm23_vm0, %v6843_v36  ;;  %v7045_v38 = vmul.f32 %v6843_v36, %v6843_v36 }
 0x2fc   :  { %v5882_v42 = vpop.f32.mrf.mxu1  ;;  %v7126_v25 = vadd.f32 %v7125_v2, %v7124_v41  ;;  %v6927_v49 = vadd.f32 %v6926_v5, %v6925_v45  ;;  %v6930_v10 = vsel %vm23_vm0, %v6843_v36, 0.0 }
 0x2fd   :  { %v6928_v44 = vsel %vm23_vm0, %v6842_v55, 0.0  ;;  %v7044_v4 = vmul.f32 %v6842_v55, %v6842_v55  ;;  %7243 = vst.msk [vmem:[%s12711_s2 + $0xb0] sm:$0xff] %vm23_vm0, %v6842_v55  ;;  %v9313_v60 = vpop.f32.mrf.mxu0  ;;  %v6845_v43 = vadd.f32 %v9310_v24, %v6106_v32  ;;  %v6105_v27 = vadd.f32 %v5882_v42, %v12122_v26 }
 0x2fe   :  { %v9215_v16 = vpop.f32.mrf.mxu1  ;;  %v6929_v61 = vadd.f32 %v6928_v44, %v6927_v49  ;;  %v7128_v58 = vadd.f32 %v7127_v40, %v7126_v25  ;;  %v7131_v63 = vsel %vm23_vm0, %v7045_v38, 0.0 }
 0x2ff   :  { %v7129_v59 = vsel %vm23_vm0, %v7044_v4, 0.0  ;;  %v6108_v14 = vadd.f32 %v9215_v16, %v12128_v15  ;;  %v6631_v34 = vpop.f32.mrf.mxu0  ;;  %v7047_v37 = vmul.f32 %v6845_v43, %v6845_v43  ;;  %7246 = vst.msk [vmem:[%s12711_s2 + $0xc8] sm:$0xff] %vm23_vm0, %v6845_v43  ;;  %v6844_v12 = vadd.f32 %v6621_v62, %v6105_v27 }
 0x300   :  { %v5892_v9 = vpop.f32.mrf.mxu1  ;;  %v7130_v52 = vadd.f32 %v7129_v59, %v7128_v58  ;;  %v6931_v26 = vadd.f32 %v6930_v10, %v6929_v61  ;;  %v6934_v23 = vsel %vm23_vm0, %v6845_v43, 0.0 }
 0x301   :  { %v6847_v48 = vadd.f32 %v9313_v60, %v6108_v14  ;;  %v6107_v18 = vadd.f32 %v5892_v9, %v12135_v46  ;;  %v9316_v13 = vpop.f32.mrf.mxu0  ;;  %v6932_v15 = vsel %vm23_vm0, %v6844_v12, 0.0  ;;  %v7046_v54 = vmul.f32 %v6844_v12, %v6844_v12  ;;  %7245 = vst.msk [vmem:[%s12711_s2 + $0xc0] sm:$0xff] %vm23_vm0, %v6844_v12 }
 0x302   :  { %v9218_v24 = vpop.f32.mrf.mxu1  ;;  %v6933_v17 = vadd.f32 %v6932_v15, %v6931_v26  ;;  %v7132_v28 = vadd.f32 %v7131_v63, %v7130_v52  ;;  %v7135_v55 = vsel %vm23_vm0, %v7047_v37, 0.0 }
 0x303   :  { %7248 = vst.msk [vmem:[%s12711_s2 + $0xd8] sm:$0xff] %vm23_vm0, %v6847_v48  ;;  %v6641_v46 = vpop.f32.mrf.mxu0  ;;  %v7133_v36 = vsel %vm23_vm0, %v7046_v54, 0.0  ;;  %v6846_v19 = vadd.f32 %v6631_v34, %v6107_v18  ;;  %v6110_v45 = vadd.f32 %v9218_v24, %v12140_v33  ;;  %v7049_v42 = vmul.f32 %v6847_v48, %v6847_v48 }
 0x304   :  { %v5902_v41 = vpop.f32.mrf.mxu1  ;;  %v7134_v32 = vadd.f32 %v7133_v36, %v7132_v28  ;;  %v6935_v62 = vadd.f32 %v6934_v23, %v6933_v17 }
 0x305   :  { %v6109_v5 = vadd.f32 %v5902_v41, %v12145_v21  ;;  %v9319_v2 = vpop.f32.mrf.mxu0  ;;  %v6936_v25 = vsel %vm23_vm0, %v6846_v19, 0.0  ;;  %v7048_v49 = vmul.f32 %v6846_v19, %v6846_v19  ;;  %7247 = vst.msk [vmem:[%s12711_s2 + $0xd0] sm:$0xff] %vm23_vm0, %v6846_v19  ;;  %v6849_v44 = vadd.f32 %v9316_v13, %v6110_v45 }
 0x306   :  { %v9221_v4 = vpop.f32.mrf.mxu1  ;;  %v6937_v33 = vadd.f32 %v6936_v25, %v6935_v62  ;;  %v7136_v60 = vadd.f32 %v7135_v55, %v7134_v32  ;;  %v6938_v21 = vsel %vm23_vm0, %v6847_v48, 0.0  ;;  %v7139_v34 = vsel %vm23_vm0, %v7049_v42, 0.0 }
 0x307   :  { %v6848_v40 = vadd.f32 %v6641_v46, %v6109_v5  ;;  %v6112_v38 = vadd.f32 %v9221_v4, %v12148_v1  ;;  %v6651_v43 = vpop.f32.mrf.mxu0  ;;  %v7137_v27 = vsel %vm23_vm0, %v7048_v49, 0.0  ;;  %7250 = vst.msk [vmem:[%s12711_s2 + $0xe8] sm:$0xff] %vm23_vm0, %v6849_v44  ;;  %v7051_v10 = vmul.f32 %v6849_v44, %v6849_v44 }
 0x308   :  { %v5912_v16 = vpop.f32.mrf.mxu1  ;;  %v7138_v61 = vadd.f32 %v7137_v27, %v7136_v60  ;;  %v6939_v58 = vadd.f32 %v6938_v21, %v6937_v33  ;;  %v6942_v63 = vsel %vm23_vm0, %v6849_v44, 0.0 }
 0x309   :  { %v6940_v59 = vsel %vm23_vm0, %v6848_v40, 0.0  ;;  %v7050_v14 = vmul.f32 %v6848_v40, %v6848_v40  ;;  %7249 = vst.msk [vmem:[%s12711_s2 + $0xe0] sm:$0xff] %vm23_vm0, %v6848_v40  ;;  %v9322_v1 = vpop.f32.mrf.mxu0  ;;  %v6851_v37 = vadd.f32 %v9319_v2, %v6112_v38  ;;  %v6111_v12 = vadd.f32 %v5912_v16, %v12151_v22 }
 0x30a   :  { %v9224_v9 = vpop.f32.mrf.mxu1  ;;  %v6941_v52 = vadd.f32 %v6940_v59, %v6939_v58  ;;  %v7140_v26 = vadd.f32 %v7139_v34, %v7138_v61  ;;  %v7143_v36 = vsel %vm23_vm0, %v7051_v10, 0.0 }
 0x30b   :  { %v7141_v48 = vsel %vm23_vm0, %v7050_v14, 0.0  ;;  %v6114_v18 = vadd.f32 %v9224_v9, %v12154_v8  ;;  %v6661_v13 = vpop.f32.mrf.mxu0  ;;  %v7053_v15 = vmul.f32 %v6851_v37, %v6851_v37  ;;  %7252 = vst.msk [vmem:[%s12711_s2 + $0xf8] sm:$0xff] %vm23_vm0, %v6851_v37  ;;  %v6850_v54 = vadd.f32 %v6651_v43, %v6111_v12 }
 0x30c   :  { %v5922_v24 = vpop.f32.mrf.mxu1  ;;  %v7142_v17 = vadd.f32 %v7141_v48, %v7140_v26  ;;  %v6943_v22 = vadd.f32 %v6942_v63, %v6941_v52  ;;  %v6946_v32 = vsel %vm23_vm0, %v6851_v37, 0.0 }
 0x30d   :  { %v6853_v28 = vadd.f32 %v9322_v1, %v6114_v18  ;;  %v6113_v46 = vadd.f32 %v5922_v24, %v12157_v11  ;;  %v9325_v23 = vpop.f32.mrf.mxu0  ;;  %v6944_v8 = vsel %vm23_vm0, %v6850_v54, 0.0  ;;  %v7052_v19 = vmul.f32 %v6850_v54, %v6850_v54  ;;  %7251 = vst.msk [vmem:[%s12711_s2 + $0xf0] sm:$0xff] %vm23_vm0, %v6850_v54 }
 0x30e   :  { %v9227_v45 = vpop.f32.mrf.mxu1  ;;  %v6945_v41 = vadd.f32 %v6944_v8, %v6943_v22  ;;  %v7144_v55 = vadd.f32 %v7143_v36, %v7142_v17  ;;  %v7147_v25 = vsel %vm23_vm0, %v7053_v15, 0.0 }
 0x30f   :  { %7254 = vst.msk [vmem:[%s12711_s2 + $0x108] sm:$0xff] %vm23_vm0, %v6853_v28  ;;  %v6671_v11 = vpop.f32.mrf.mxu0  ;;  %v7145_v62 = vsel %vm23_vm0, %v7052_v19, 0.0  ;;  %v6852_v5 = vadd.f32 %v6661_v13, %v6113_v46  ;;  %v6116_v2 = vadd.f32 %v9227_v45, %v12160_v7  ;;  %v7055_v60 = vmul.f32 %v6853_v28, %v6853_v28 }
 0x310   :  { %v5932_v42 = vpop.f32.mrf.mxu1  ;;  %v7146_v49 = vadd.f32 %v7145_v62, %v7144_v55  ;;  %v6947_v44 = vadd.f32 %v6946_v32, %v6945_v41 }
 0x311   :  { %v6115_v4 = vadd.f32 %v5932_v42, %v12163_v31  ;;  %v9328_v33 = vpop.f32.mrf.mxu0  ;;  %v6948_v40 = vsel %vm23_vm0, %v6852_v5, 0.0  ;;  %v7054_v38 = vmul.f32 %v6852_v5, %v6852_v5  ;;  %7253 = vst.msk [vmem:[%s12711_s2 + $0x100] sm:$0xff] %vm23_vm0, %v6852_v5  ;;  %v6855_v43 = vadd.f32 %v9325_v23, %v6116_v2 }
 0x312   :  { %v9230_v21 = vpop.f32.mrf.mxu1  ;;  %v6949_v7 = vadd.f32 %v6948_v40, %v6947_v44  ;;  %v7148_v27 = vadd.f32 %v7147_v25, %v7146_v49  ;;  %v6950_v31 = vsel %vm23_vm0, %v6853_v28, 0.0  ;;  %v7151_v12 = vsel %vm23_vm0, %v7055_v60, 0.0 }
 0x313   :  { %v6854_v16 = vadd.f32 %v6671_v11, %v6115_v4  ;;  %v6118_v61 = vadd.f32 %v9230_v21, %v12166_v3  ;;  %v6681_v58 = vpop.f32.mrf.mxu0  ;;  %v7149_v59 = vsel %vm23_vm0, %v7054_v38, 0.0  ;;  %7256 = vst.msk [vmem:[%s12711_s2 + $0x118] sm:$0xff] %vm23_vm0, %v6855_v43  ;;  %v7057_v9 = vmul.f32 %v6855_v43, %v6855_v43 }
 0x314   :  { %v5942_v14 = vpop.f32.mrf.mxu1  ;;  %v7150_v1 = vadd.f32 %v7149_v59, %v7148_v27  ;;  %v6951_v34 = vadd.f32 %v6950_v31, %v6949_v7  ;;  %v6954_v24 = vsel %vm23_vm0, %v6855_v43, 0.0 }
 0x315   :  { %v6952_v10 = vsel %vm23_vm0, %v6854_v16, 0.0  ;;  %v7056_v37 = vmul.f32 %v6854_v16, %v6854_v16  ;;  %7255 = vst.msk [vmem:[%s12711_s2 + $0x110] sm:$0xff] %vm23_vm0, %v6854_v16  ;;  %v9331_v3 = vpop.f32.mrf.mxu0  ;;  %v6857_v52 = vadd.f32 %v9328_v33, %v6118_v61  ;;  %v6117_v26 = vadd.f32 %v5942_v14, %v12169_v47 }
 0x316   :  { %v9233_v48 = vpop.f32.mrf.mxu1  ;;  %v6953_v18 = vadd.f32 %v6952_v10, %v6951_v34  ;;  %v7152_v13 = vadd.f32 %v7151_v12, %v7150_v1  ;;  %v7155_v19 = vsel %vm23_vm0, %v7057_v9, 0.0 }
 0x317   :  { %v7153_v63 = vsel %vm23_vm0, %v7056_v37, 0.0  ;;  %v6120_v15 = vadd.f32 %v9233_v48, %v12172_v0  ;;  %v6691_v54 = vpop.f32.mrf.mxu0  ;;  %v7059_v17 = vmul.f32 %v6857_v52, %v6857_v52  ;;  %7258 = vst.msk [vmem:[%s12711_s2 + $0x128] sm:$0xff] %vm23_vm0, %v6857_v52  ;;  %v6856_v22 = vadd.f32 %v6681_v58, %v6117_v26 }
 0x318   :  { %v5952_v28 = vpop.f32.mrf.mxu1  ;;  %v7154_v46 = vadd.f32 %v7153_v63, %v7152_v13  ;;  %v6955_v47 = vadd.f32 %v6954_v24, %v6953_v18  ;;  %v6958_v32 = vsel %vm23_vm0, %v6857_v52, 0.0  ;;  %v13022_v18 = vld [vmem:[#allocation13_spill] sm:$0xff] }
 0x319   :  { %v6859_v23 = vadd.f32 %v9331_v3, %v6120_v15  ;;  %v6119_v36 = vadd.f32 %v5952_v28, %v12175_v30  ;;  %v9334_v8 = vpop.f32.mrf.mxu0  ;;  %v6956_v0 = vsel %vm23_vm0, %v6856_v22, 0.0  ;;  %v7058_v45 = vmul.f32 %v6856_v22, %v6856_v22  ;;  %7257 = vst.msk [vmem:[%s12711_s2 + $0x120] sm:$0xff] %vm23_vm0, %v6856_v22 }
 0x31a   :  { %v9236_v41 = vpop.f32.mrf.mxu1  ;;  %v6957_v55 = vadd.f32 %v6956_v0, %v6955_v47  ;;  %v7156_v11 = vadd.f32 %v7155_v19, %v7154_v46  ;;  %v7159_v25 = vsel %vm23_vm0, %v7059_v17, 0.0  ;;  %v13023_v46 = vld [vmem:[#allocation14_spill] sm:$0xff] }
 0x31b   :  { %7260 = vst.msk [vmem:[%s12711_s2 + $0x138] sm:$0xff] %vm23_vm0, %v6859_v23  ;;  %v6701_v30 = vpop.f32.mrf.mxu0  ;;  %v7157_v62 = vsel %vm23_vm0, %v7058_v45, 0.0  ;;  %v6858_v5 = vadd.f32 %v6691_v54, %v6119_v36  ;;  %v6122_v2 = vadd.f32 %v9236_v41, %v12178_v39  ;;  %v7061_v60 = vmul.f32 %v6859_v23, %v6859_v23 }
 0x31c   :  { %v5962_v42 = vpop.f32.mrf.mxu1  ;;  %v7158_v49 = vadd.f32 %v7157_v62, %v7156_v11  ;;  %v6959_v44 = vadd.f32 %v6958_v32, %v6957_v55  ;;  %v13024_v62 = vld [vmem:[#allocation15_spill] sm:$0xff] }
 0x31d   :  { %v6121_v4 = vadd.f32 %v5962_v42, %v12181_v57  ;;  %v9337_v33 = vpop.f32.mrf.mxu0  ;;  %v6960_v40 = vsel %vm23_vm0, %v6858_v5, 0.0  ;;  %v7060_v38 = vmul.f32 %v6858_v5, %v6858_v5  ;;  %7259 = vst.msk [vmem:[%s12711_s2 + $0x130] sm:$0xff] %vm23_vm0, %v6858_v5  ;;  %v6861_v43 = vadd.f32 %v9334_v8, %v6122_v2 }
 0x31e   :  { %v9239_v21 = vpop.f32.mrf.mxu1  ;;  %v6961_v39 = vadd.f32 %v6960_v40, %v6959_v44  ;;  %v7160_v7 = vadd.f32 %v7159_v25, %v7158_v49  ;;  %v6962_v57 = vsel %vm23_vm0, %v6859_v23, 0.0  ;;  %v7163_v10 = vsel %vm23_vm0, %v7061_v60, 0.0  ;;  %v13025_v44 = vld [vmem:[#allocation16_spill] sm:$0xff] }
 0x31f   :  { %v6860_v27 = vadd.f32 %v6701_v30, %v6121_v4  ;;  %v6124_v16 = vadd.f32 %v9239_v21, %v12184_v20  ;;  %v6711_v61 = vpop.f32.mrf.mxu0  ;;  %v7161_v58 = vsel %vm23_vm0, %v7060_v38, 0.0  ;;  %7262 = vst.msk [vmem:[%s12711_s2 + $0x148] sm:$0xff] %vm23_vm0, %v6861_v43  ;;  %v7063_v37 = vmul.f32 %v6861_v43, %v6861_v43 }
 0x320   :  { %v5972_v31 = vpop.f32.mrf.mxu1  ;;  %v7162_v59 = vadd.f32 %v7161_v58, %v7160_v7  ;;  %v6963_v14 = vadd.f32 %v6962_v57, %v6961_v39  ;;  %v6966_v15 = vsel %vm23_vm0, %v6861_v43, 0.0 }
 0x321   :  { %v6964_v1 = vsel %vm23_vm0, %v6860_v27, 0.0  ;;  %v7062_v34 = vmul.f32 %v6860_v27, %v6860_v27  ;;  %7261 = vst.msk [vmem:[%s12711_s2 + $0x140] sm:$0xff] %vm23_vm0, %v6860_v27  ;;  %v9340_v20 = vpop.f32.mrf.mxu0  ;;  %v6863_v3 = vadd.f32 %v9337_v33, %v6124_v16  ;;  %v6123_v12 = vadd.f32 %v5972_v31, %v12187_v51  ;;  %v13026_v16 = vld [vmem:[#allocation17_spill] sm:$0xff] }
 0x322   :  { %v9242_v9 = vpop.f32.mrf.mxu1  ;;  %v6965_v52 = vadd.f32 %v6964_v1, %v6963_v14  ;;  %v7164_v26 = vadd.f32 %v7163_v10, %v7162_v59  ;;  %v7167_v36 = vsel %vm23_vm0, %v7063_v37, 0.0 }
 0x323   :  { %v7165_v48 = vsel %vm23_vm0, %v7062_v34, 0.0  ;;  %v6126_v13 = vadd.f32 %v9242_v9, %v13022_v18  ;;  %v6721_v63 = vpop.f32.mrf.mxu0  ;;  %v7065_v54 = vmul.f32 %v6863_v3, %v6863_v3  ;;  %7264 = vst.msk [vmem:[%s12711_s2 + $0x158] sm:$0xff] %vm23_vm0, %v6863_v3  ;;  %v6862_v24 = vadd.f32 %v6711_v61, %v6123_v12  ;;  %v13027_v9 = vld [vmem:[#allocation18_spill] sm:$0xff] }
 0x324   :  { %v5982_v17 = vpop.f32.mrf.mxu1  ;;  %v7166_v22 = vadd.f32 %v7165_v48, %v7164_v26  ;;  %v6967_v51 = vadd.f32 %v6966_v15, %v6965_v52  ;;  %v6970_v11 = vsel %vm23_vm0, %v6863_v3, 0.0 }
 0x325   :  { %v6865_v28 = vadd.f32 %v9340_v20, %v6126_v13  ;;  %v6125_v47 = vadd.f32 %v5982_v17, %v13023_v46  ;;  %v9343_v23 = vpop.f32.mrf.mxu0  ;;  %v6968_v8 = vsel %vm23_vm0, %v6862_v24, 0.0  ;;  %v7064_v19 = vmul.f32 %v6862_v24, %v6862_v24  ;;  %7263 = vst.msk [vmem:[%s12711_s2 + $0x150] sm:$0xff] %vm23_vm0, %v6862_v24 }
 0x326   :  { %v9245_v0 = vpop.f32.mrf.mxu1  ;;  %v6969_v45 = vadd.f32 %v6968_v8, %v6967_v51  ;;  %v7168_v41 = vadd.f32 %v7167_v36, %v7166_v22  ;;  %v7171_v42 = vsel %vm23_vm0, %v7065_v54, 0.0 }
 0x327   :  { %7266 = vst.msk [vmem:[%s12711_s2 + $0x168] sm:$0xff] %vm23_vm0, %v6865_v28  ;;  %v6731_v55 = vpop.f32.mrf.mxu0  ;;  %v7169_v30 = vsel %vm23_vm0, %v7064_v19, 0.0  ;;  %v6864_v32 = vadd.f32 %v6721_v63, %v6125_v47  ;;  %v6128_v5 = vadd.f32 %v9245_v0, %v13024_v62  ;;  %v7067_v60 = vmul.f32 %v6865_v28, %v6865_v28  ;;  %v13028_v63 = vld [vmem:[#allocation19_spill] sm:$0xff] }
 0x328   :  { %v5992_v2 = vpop.f32.mrf.mxu1  ;;  %v7170_v25 = vadd.f32 %v7169_v30, %v7168_v41  ;;  %v6971_v49 = vadd.f32 %v6970_v11, %v6969_v45  ;;  %v6974_v58 = vsel %vm23_vm0, %v6865_v28, 0.0 }
 0x329   :  { %v6127_v4 = vadd.f32 %v5992_v2, %v13025_v44  ;;  %v9346_v33 = vpop.f32.mrf.mxu0  ;;  %v6972_v40 = vsel %vm23_vm0, %v6864_v32, 0.0  ;;  %v7066_v38 = vmul.f32 %v6864_v32, %v6864_v32  ;;  %7265 = vst.msk [vmem:[%s12711_s2 + $0x160] sm:$0xff] %vm23_vm0, %v6864_v32  ;;  %v6867_v43 = vadd.f32 %v9343_v23, %v6128_v5  ;;  %v13029_v23 = vld [vmem:[#allocation20_spill] sm:$0xff]  ;;  %v13030_v2 = vld [vmem:[#allocation21_spill] sm:$0xff] }
 0x32a   :  { %v9248_v21 = vpop.f32.mrf.mxu1  ;;  %v6973_v39 = vadd.f32 %v6972_v40, %v6971_v49  ;;  %v7172_v7 = vadd.f32 %v7171_v42, %v7170_v25  ;;  %v7175_v37 = vsel %vm23_vm0, %v7067_v60, 0.0 }
 0x32b   :  { %v6866_v27 = vadd.f32 %v6731_v55, %v6127_v4  ;;  %v6130_v61 = vadd.f32 %v9248_v21, %v13026_v16  ;;  %v6741_v57 = vpop.f32.mrf.mxu0  ;;  %v7173_v31 = vsel %vm23_vm0, %v7066_v38, 0.0  ;;  %7268 = vst.msk [vmem:[%s12711_s2 + $0x178] sm:$0xff] %vm23_vm0, %v6867_v43  ;;  %v7069_v3 = vmul.f32 %v6867_v43, %v6867_v43 }
 0x32c   :  { %v6002_v59 = vpop.f32.mrf.mxu1  ;;  %v7174_v14 = vadd.f32 %v7173_v31, %v7172_v7  ;;  %v6975_v1 = vadd.f32 %v6974_v58, %v6973_v39  ;;  %v6978_v24 = vsel %vm23_vm0, %v6867_v43, 0.0 }
 0x32d   :  { %v6976_v34 = vsel %vm23_vm0, %v6866_v27, 0.0  ;;  %v7068_v20 = vmul.f32 %v6866_v27, %v6866_v27  ;;  %7267 = vst.msk [vmem:[%s12711_s2 + $0x170] sm:$0xff] %vm23_vm0, %v6866_v27  ;;  %v9349_v10 = vpop.f32.mrf.mxu0  ;;  %v6869_v12 = vadd.f32 %v9346_v33, %v6130_v61  ;;  %v6129_v52 = vadd.f32 %v6002_v59, %v13027_v9  ;;  %v13031_v33 = vld [vmem:[#allocation22_spill] sm:$0xff] }
 0x32e   :  { %v9251_v26 = vpop.f32.mrf.mxu1  ;;  %v6977_v48 = vadd.f32 %v6976_v34, %v6975_v1  ;;  %v7176_v18 = vadd.f32 %v7175_v37, %v7174_v14  ;;  %v7179_v19 = vsel %vm23_vm0, %v7069_v3, 0.0 }
 0x32f   :  { %v7177_v13 = vsel %vm23_vm0, %v7068_v20, 0.0  ;;  %v6132_v15 = vadd.f32 %v9251_v26, %v13028_v63  ;;  %v6751_v54 = vpop.f32.mrf.mxu0  ;;  %v7071_v17 = vmul.f32 %v6869_v12, %v6869_v12  ;;  %7270 = vst.msk [vmem:[%s12711_s2 + $0x188] sm:$0xff] %vm23_vm0, %v6869_v12  ;;  %v6868_v22 = vadd.f32 %v6741_v57, %v6129_v52  ;;  %v13032_v57 = vld [vmem:[#allocation23_spill] sm:$0xff]  ;;  %v13033_v26 = vld [vmem:[#allocation24_spill] sm:$0xff] }
 0x330   :  { %v6012_v51 = vpop.f32.mrf.mxu1  ;;  %v7178_v28 = vadd.f32 %v7177_v13, %v7176_v18  ;;  %v6979_v46 = vadd.f32 %v6978_v24, %v6977_v48  ;;  %v6982_v32 = vsel %vm23_vm0, %v6869_v12, 0.0 }
 0x331   :  { %v6871_v47 = vadd.f32 %v9349_v10, %v6132_v15  ;;  %v6131_v36 = vadd.f32 %v6012_v51, %v13029_v23  ;;  %v9352_v8 = vpop.f32.mrf.mxu0  ;;  %v6980_v0 = vsel %vm23_vm0, %v6868_v22, 0.0  ;;  %v7070_v45 = vmul.f32 %v6868_v22, %v6868_v22  ;;  %7269 = vst.msk [vmem:[%s12711_s2 + $0x180] sm:$0xff] %vm23_vm0, %v6868_v22 }
 0x332   :  { %v9254_v41 = vpop.f32.mrf.mxu1  ;;  %v6981_v55 = vadd.f32 %v6980_v0, %v6979_v46  ;;  %v7180_v11 = vadd.f32 %v7179_v19, %v7178_v28  ;;  %v7183_v49 = vsel %vm23_vm0, %v7071_v17, 0.0 }
 0x333   :  { %7272 = vst.msk [vmem:[%s12711_s2 + $0x198] sm:$0xff] %vm23_vm0, %v6871_v47  ;;  %v6761_v30 = vpop.f32.mrf.mxu0  ;;  %v7181_v62 = vsel %vm23_vm0, %v7070_v45, 0.0  ;;  %v6870_v5 = vadd.f32 %v6751_v54, %v6131_v36  ;;  %v6134_v42 = vadd.f32 %v9254_v41, %v13030_v2  ;;  %v7073_v38 = vmul.f32 %v6871_v47, %v6871_v47  ;;  %v13034_v54 = vld [vmem:[#allocation25_spill] sm:$0xff] }
 0x334   :  { %v6022_v25 = vpop.f32.mrf.mxu1  ;;  %v7182_v44 = vadd.f32 %v7181_v62, %v7180_v11  ;;  %v6983_v4 = vadd.f32 %v6982_v32, %v6981_v55  ;;  %v6986_v59 = vsel %vm23_vm0, %v6871_v47, 0.0 }
 0x335   :  { %v6133_v60 = vadd.f32 %v6022_v25, %v13031_v33  ;;  %v9355_v40 = vpop.f32.mrf.mxu0  ;;  %v6984_v43 = vsel %vm23_vm0, %v6870_v5, 0.0  ;;  %v7072_v21 = vmul.f32 %v6870_v5, %v6870_v5  ;;  %7271 = vst.msk [vmem:[%s12711_s2 + $0x190] sm:$0xff] %vm23_vm0, %v6870_v5  ;;  %v6873_v39 = vadd.f32 %v9352_v8, %v6134_v42 }
 0x336   :  { %v9257_v7 = vpop.f32.mrf.mxu1  ;;  %v6985_v27 = vadd.f32 %v6984_v43, %v6983_v4  ;;  %v7184_v16 = vadd.f32 %v7183_v49, %v7182_v44  ;;  %v7187_v12 = vsel %vm23_vm0, %v7073_v38, 0.0 }
 0x337   :  { %v6872_v61 = vadd.f32 %v6761_v30, %v6133_v60  ;;  %v6136_v58 = vadd.f32 %v9257_v7, %v13032_v57  ;;  %v6771_v31 = vpop.f32.mrf.mxu0  ;;  %v7185_v14 = vsel %vm23_vm0, %v7072_v21, 0.0  ;;  %7274 = vst.msk [vmem:[%s12711_s2 + $0x1a8] sm:$0xff] %vm23_vm0, %v6873_v39  ;;  %v7075_v9 = vmul.f32 %v6873_v39, %v6873_v39 }
 0x338   :  { %v6032_v1 = vpop.f32.mrf.mxu1  ;;  %v7186_v34 = vadd.f32 %v7185_v14, %v7184_v16  ;;  %v6987_v20 = vadd.f32 %v6986_v59, %v6985_v27  ;;  %v6990_v22 = vsel %vm23_vm0, %v6873_v39, 0.0 }
 0x339   :  { %v6988_v10 = vsel %vm23_vm0, %v6872_v61, 0.0  ;;  %v7074_v37 = vmul.f32 %v6872_v61, %v6872_v61  ;;  %7273 = vst.msk [vmem:[%s12711_s2 + $0x1a0] sm:$0xff] %vm23_vm0, %v6872_v61  ;;  %v9358_v3 = vpop.f32.mrf.mxu0  ;;  %v6875_v52 = vadd.f32 %v9355_v40, %v6136_v58  ;;  %v6135_v48 = vadd.f32 %v6032_v1, %v13033_v26 }
 0x33a   :  { %v9260_v18 = vpop.f32.mrf.mxu1  ;;  %v6989_v13 = vadd.f32 %v6988_v10, %v6987_v20  ;;  %v7188_v63 = vadd.f32 %v7187_v12, %v7186_v34  ;;  %v7191_v0 = vsel %vm23_vm0, %v7075_v9, 0.0  ;;  %v13035_v20 = vld [vmem:[#allocation26_spill] sm:$0xff] }
 0x33b   :  { %v7189_v15 = vsel %vm23_vm0, %v7074_v37, 0.0  ;;  %v6138_v24 = vadd.f32 %v9260_v18, %v13034_v54  ;;  %v6781_v17 = vpop.f32.mrf.mxu0  ;;  %v7077_v51 = vmul.f32 %v6875_v52, %v6875_v52  ;;  %7276 = vst.msk [vmem:[%s12711_s2 + $0x1b8] sm:$0xff] %vm23_vm0, %v6875_v52  ;;  %v6874_v28 = vadd.f32 %v6771_v31, %v6135_v48 }
 0x33c   :  { %v6042_v46 = vpop.f32.mrf.mxu1  ;;  %v7190_v47 = vadd.f32 %v7189_v15, %v7188_v63  ;;  %v6991_v23 = vadd.f32 %v6990_v22, %v6989_v13  ;;  %v6994_v32 = vsel %vm23_vm0, %v6875_v52, 0.0 }
 0x33d   :  { %v6877_v36 = vadd.f32 %v9358_v3, %v6138_v24  ;;  %v6137_v8 = vadd.f32 %v6042_v46, %v12229_v6  ;;  %v9361_v19 = vpop.f32.mrf.mxu0  ;;  %v6992_v45 = vsel %vm23_vm0, %v6874_v28, 0.0  ;;  %v7076_v41 = vmul.f32 %v6874_v28, %v6874_v28  ;;  %7275 = vst.msk [vmem:[%s12711_s2 + $0x1b0] sm:$0xff] %vm23_vm0, %v6874_v28 }
 0x33e   :  { %v9263_v55 = vpop.f32.mrf.mxu1  ;;  %v6993_v11 = vadd.f32 %v6992_v45, %v6991_v23  ;;  %v7192_v30 = vadd.f32 %v7191_v0, %v7190_v47  ;;  %v7195_v25 = vsel %vm23_vm0, %v7077_v51, 0.0 }
 0x33f   :  { %7278 = vst.msk [vmem:[%s12711_s2 + $0x1c8] sm:$0xff] %vm23_vm0, %v6877_v36  ;;  %v6791_v6 = vpop.f32.mrf.mxu0  ;;  %v7193_v62 = vsel %vm23_vm0, %v7076_v41, 0.0  ;;  %v6876_v5 = vadd.f32 %v6781_v17, %v6137_v8  ;;  %v6140_v2 = vadd.f32 %v9263_v55, %v12232_v53  ;;  %v7079_v60 = vmul.f32 %v6877_v36, %v6877_v36 }
 0x340   :  { %v6052_v42 = vpop.f32.mrf.mxu1  ;;  %v7194_v49 = vadd.f32 %v7193_v62, %v7192_v30  ;;  %v6995_v44 = vadd.f32 %v6994_v32, %v6993_v11 }
 0x341   :  { %v6139_v4 = vadd.f32 %v6052_v42, %v12235_v29  ;;  %v9364_v33 = vpop.f32.mrf.mxu0  ;;  %v6996_v40 = vsel %vm23_vm0, %v6876_v5, 0.0  ;;  %v7078_v38 = vmul.f32 %v6876_v5, %v6876_v5  ;;  %7277 = vst.msk [vmem:[%s12711_s2 + $0x1c0] sm:$0xff] %vm23_vm0, %v6876_v5  ;;  %v6879_v43 = vadd.f32 %v9361_v19, %v6140_v2 }
 0x342   :  { %v9266_v21 = vpop.f32.mrf.mxu1  ;;  %v6997_v53 = vadd.f32 %v6996_v40, %v6995_v44  ;;  %v7196_v39 = vadd.f32 %v7195_v25, %v7194_v49  ;;  %v6998_v29 = vsel %vm23_vm0, %v6877_v36, 0.0 }
 0x343   :  { %v6878_v7 = vadd.f32 %v6791_v6, %v6139_v4  ;;  %v6142_v27 = vadd.f32 %v9266_v21, %v12238_v35  ;;  %v6801_v16 = vpop.f32.mrf.mxu0  ;;  %v7197_v61 = vsel %vm23_vm0, %v7078_v38, 0.0  ;;  %7280 = vst.msk [vmem:[%s12711_s2 + $0x1d8] sm:$0xff] %vm23_vm0, %v6879_v43  ;;  %v7199_v35 = vsel %vm23_vm0, %v7079_v60, 0.0  ;;  %v6884_v21 = vld [vmem:[#allocation3] sm:$0x1] }
 0x344   :  { %v6062_v57 = vpop.f32.mrf.mxu1  ;;  %v7198_v58 = vadd.f32 %v7197_v61, %v7196_v39  ;;  %v6999_v31 = vadd.f32 %v6998_v29, %v6997_v53  ;;  %v7081_v1 = vmul.f32 %v6879_v43, %v6879_v43  ;;  %v7002_v48 = vsel %vm23_vm0, %v6879_v43, 0.0 }
 0x345   :  { %v7000_v59 = vsel %vm23_vm0, %v6878_v7, 0.0  ;;  %v7080_v14 = vmul.f32 %v6878_v7, %v6878_v7  ;;  %7279 = vst.msk [vmem:[%s12711_s2 + $0x1d0] sm:$0xff] %vm23_vm0, %v6878_v7  ;;  %v6881_v34 = vadd.f32 %v9364_v33, %v6142_v27  ;;  %v6141_v10 = vadd.f32 %v6062_v57, %v13035_v20  ;;  %v9367_v26 = vpop.f32.mrf.mxu0  ;;  %v7021_v7 = vld [vmem:[#allocation5] sm:$0x1] }
 0x346   :  { %v9269_v37 = vpop.f32.mrf.mxu1  ;;  %v7001_v3 = vadd.f32 %v7000_v59, %v6999_v31  ;;  %v7200_v12 = vadd.f32 %v7199_v35, %v7198_v58  ;;  %v7203_v17 = vsel %vm23_vm0, %v7081_v1, 0.0 }
 0x347   :  { %v7201_v9 = vsel %vm23_vm0, %v7080_v14, 0.0  ;;  %v6144_v52 = vadd.f32 %v9269_v37, %v12244_v56  ;;  %7282 = vst.msk [vmem:[%s12711_s2 + $0x1e8] sm:$0xff] %vm23_vm0, %v6881_v34  ;;  %v6880_v18 = vadd.f32 %v6801_v16, %v6141_v10  ;;  %v7083_v22 = vmul.f32 %v6881_v34, %v6881_v34  ;;  %v6811_v47 = vpop.f32.mrf.mxu0 }
 0x348   :  { %v6072_v13 = vpop.f32.mrf.mxu1  ;;  %v7202_v63 = vadd.f32 %v7201_v9, %v7200_v12  ;;  %v7003_v15 = vadd.f32 %v7002_v48, %v7001_v3 }
 0x349   :  { %v6883_v54 = vadd.f32 %v9367_v26, %v6144_v52  ;;  %v6143_v24 = vadd.f32 %v6072_v13, %v12247_v50  ;;  %v7004_v56 = vsel %vm23_vm0, %v6880_v18, 0.0  ;;  %v7082_v51 = vmul.f32 %v6880_v18, %v6880_v18  ;;  %7281 = vst.msk [vmem:[%s12711_s2 + $0x1e0] sm:$0xff] %vm23_vm0, %v6880_v18 }
 0x34a   :  { %v7005_v28 = vadd.f32 %v7004_v56, %v7003_v15  ;;  %v7204_v46 = vadd.f32 %v7203_v17, %v7202_v63  ;;  %v7006_v50 = vsel %vm23_vm0, %v6881_v34, 0.0  ;;  %v7207_v0 = vsel %vm23_vm0, %v7083_v22, 0.0 }
 0x34b   :  { %7284 = vst.msk [vmem:[%s12711_s2 + $0x1f8] sm:$0xff] %vm23_vm0, %v6883_v54  ;;  %v7205_v23 = vsel %vm23_vm0, %v7082_v51, 0.0  ;;  %v6882_v36 = vadd.f32 %v6811_v47, %v6143_v24  ;;  %v7085_v45 = vmul.f32 %v6883_v54, %v6883_v54  ;;  %v7010_v6 = vsel %vm23_vm0, %v6883_v54, 0.0 }
 0x34c   :  { %v7206_v8 = vadd.f32 %v7205_v23, %v7204_v46  ;;  %v7007_v19 = vadd.f32 %v7006_v50, %v7005_v28 }
 0x34d   :  { %v7008_v41 = vsel %vm23_vm0, %v6882_v36, 0.0  ;;  %v7084_v55 = vmul.f32 %v6882_v36, %v6882_v36  ;;  %7283 = vst.msk [vmem:[%s12711_s2 + $0x1f0] sm:$0xff] %vm23_vm0, %v6882_v36  ;;  %v7211_v2 = vsel %vm23_vm0, %v7085_v45, 0.0  ;;  %s9597_s2 = smov [#allocation3]  }
 0x34e   :  { %v7009_v11 = vadd.f32 %v7008_v41, %v7007_v19  ;;  %v7208_v30 = vadd.f32 %v7207_v0, %v7206_v8  ;;  %s7293_s23 = sshll.u32 %s9597_s2, 4  ;;  %s7294_s23 = int_to_ptr.vmem [resolvable:$true] %s7293_s23 }
 0x34f   :  { %v7209_v32 = vsel %vm23_vm0, %v7084_v55, 0.0  ;;  %s9552_s26 = scalar_lea.vmem %s7294_s23, 16  ;;  %s9556_s0 = scalar_lea.vmem %s7294_s23, 32 }
 0x350   :  { %v7011_v62 = vadd.f32 %v7010_v6, %v7009_v11  ;;  %v7210_v5 = vadd.f32 %v7209_v32, %v7208_v30  ;;  %p9553_p0 = scmp.ne.s32.totalorder %s7294_s23, %s9552_s26  ;;  %p9557_p1 = scmp.lt.s32.totalorder %s7294_s23, %s7294_s23 }
 0x351   :  { %p9558_p2 = scmp.lt.s32.totalorder %s9556_s0, %s9552_s26 }
 0x352   :  { %v7012_v42 = vrot.slane %v7011_v62, 4  ;;  %v7212_v25 = vadd.f32 %v7211_v2, %v7210_v5 }
 0x353   :  { %p9559_p3 = por %p9558_p2, %p9557_p1 }
 0x354   :  { %v7013_v49 = vadd.f32 %v7012_v42, %v7011_v62  ;;  %v7213_v44 = vrot.slane %v7212_v25, 4 }
 0x355   :  { %p9560_p4 = pnand %p9559_p3, %p9553_p0 }
 0x356   :  { %v7214_v4 = vadd.f32 %v7213_v44, %v7212_v25  ;;  %v7014_v33 = vrot.slane %v7013_v49, 2 }
 0x358   :  { %v7015_v60 = vadd.f32 %v7014_v33, %v7013_v49  ;;  %v7215_v40 = vrot.slane %v7214_v4, 2 }
 0x35a   :  { %v7016_v38 = vrot.slane %v7015_v60, 1  ;;  %v7216_v43 = vadd.f32 %v7215_v40, %v7214_v4 }
 0x35c   :  { %v7017_v53 = vadd.f32 %v7016_v38, %v7015_v60  ;;  %v7217_v39 = vrot.slane %v7216_v43, 1 }
 0x35e   :  { %v7018_v27 = vadd.f32 %v7017_v53, %v6884_v21  ;;  %v7218_v16 = vadd.f32 %v7217_v39, %v7216_v43 }
 0x360   :  { %7020 = vst.msk [vmem:[#allocation3] sm:$0x1] %vm20_vm4, %v7018_v27  ;;  %v7219_v29 = vadd.f32 %v7218_v16, %v7021_v7 }
 0x361   :  { %9563 = shalt.err (!%p9560_p4)
}
 0x362   :  { %7296 = dma.vmem_to_hbm [thread:$0]  %s7294_s23, 16, %s12712_s3, [#allocation4]   ;;  %7220 = vst.msk [vmem:[#allocation5] sm:$0x1] %vm20_vm4, %v7219_v29 }
 0x363   :  { %s9572_s29 = scalar_lea.vmem %s7304_s25, 16  ;;  %s9576_s30 = scalar_lea.vmem %s7304_s25, 32 }
 0x364   :  { %p9573_p5 = scmp.ne.s32.totalorder %s7304_s25, %s9572_s29  ;;  %p9577_p6 = scmp.lt.s32.totalorder %s7304_s25, %s7304_s25 }
 0x365   :  { %p9578_p7 = scmp.lt.s32.totalorder %s9576_s30, %s9572_s29 }
 0x367   :  { %p9579_p8 = por %p9578_p7, %p9577_p6 }
 0x369   :  { %p9580_p9 = pnand %p9579_p8, %p9573_p5 }
 0x36b   :  { %9583 = shalt.err (!%p9580_p9)
}
 0x36c   :  { %7306 = dma.vmem_to_hbm [thread:$0]  %s7304_s25, 16, %s12713_s4, [#allocation6]  }
 0x36d   :  { %9592 = dma.done.wait [#allocation4], 16  }
 0x36e   :  { %9593 = vsyncadd [#allocation4], 4294967280 }
 0x36f   :  { %9594 = dma.done.wait [#allocation6], 16  }
 0x370   :  { %9595 = vsyncadd [#allocation6], 4294967280 }
 0x371   :  { %7315 = vsyncpa [#allocation4], 1 }
 0x372   :  { %7316 = vsyncpa [#allocation6], 1 }

</bundles_post_ra>
